<compile_context>
chip_gen: v5e
topology: v5e:2x2
jax: 0.10.0
libtpu: 0.0.40
codegen_flags: <defaults>
</compile_context>

<pallas_src>
import functools

import jax
import jax.numpy as jnp
from jax.experimental import pallas as pl
from jax.experimental.pallas import tpu as pltpu

_LANE = 128                       # minimum lane-dense channel count for conv outputs
_IMAGE_KERNEL_VMEM_LIMIT = 24 * 1024 * 1024   # bytes; else fall back to per-row


# ---------------------------------------------------------------------------
# Fused 3x3 conv + bias + ReLU kernels
# ---------------------------------------------------------------------------
def _conv3x3_image_kernel(x0_ref, x1_ref, x2_ref, w_ref, b_ref, o_ref, *, hh, ww):
    """Whole-image fused conv.

    x{dx}_ref : ((H+2)*W, Cin) bf16   dx-shifted, zero rows at top/bottom
    w_ref     : (9, Cin, Cout) bf16
    b_ref     : (1, Cout) f32
    o_ref     : (H*W, Cout) bf16
    """
    hw = hh * ww
    xs = (x0_ref, x1_ref, x2_ref)
    acc = None
    for dy in range(3):
        off = dy * ww                                # static, contiguous rows
        for dx in range(3):
            lhs = xs[dx][off:off + hw, :]            # (H*W, Cin) bf16
            d = jnp.dot(lhs, w_ref[dy * 3 + dx],
                        preferred_element_type=jnp.float32)
            acc = d if acc is None else acc + d
    acc = acc + b_ref[...]                           # bias in f32
    o_ref[...] = jnp.maximum(acc, 0.0).astype(o_ref.dtype)


def _conv3x3_row_kernel(x0_ref, x1_ref, x2_ref, w_ref, b_ref, o_ref):
    """Per-output-row fused conv (VMEM-light fallback for large images).

    x{dy}_ref : (W+2, Cin) bf16   padded input rows h, h+1, h+2
    o_ref     : (W, Cout) bf16
    """
    out_w = o_ref.shape[0]
    rows = (x0_ref, x1_ref, x2_ref)
    acc = None
    for dy in range(3):
        row = rows[dy][...]
        for dx in range(3):
            lhs = row[dx:dx + out_w, :]
            d = jnp.dot(lhs, w_ref[dy * 3 + dx],
                        preferred_element_type=jnp.float32)
            acc = d if acc is None else acc + d
    acc = acc + b_ref[...]
    o_ref[...] = jnp.maximum(acc, 0.0).astype(o_ref.dtype)


def _conv3x3_relu_image(x, wr, br, N, H, W, Cin, Cout):
    # dx-shifted copies (zero fill in W), pad H, flatten rows: ((H+2)*W, Cin).
    xw = jnp.pad(x, ((0, 0), (0, 0), (1, 1), (0, 0)))             # (N,H,W+2,Cin)
    shifted = []
    for dx in range(3):
        s = xw[:, :, dx:dx + W, :]                                 # (N,H,W,Cin)
        s = jnp.pad(s, ((0, 0), (1, 1), (0, 0), (0, 0)))           # (N,H+2,W,Cin)
        shifted.append(s.reshape(N, (H + 2) * W, Cin))

    kernel = functools.partial(_conv3x3_image_kernel, hh=H, ww=W)
    in_row_spec = pl.BlockSpec((None, (H + 2) * W, Cin), lambda n: (n, 0, 0))
    out = pl.pallas_call(
        kernel,
        out_shape=jax.ShapeDtypeStruct((N, H * W, Cout), jnp.bfloat16),
        grid_spec=pltpu.PrefetchScalarGridSpec(
            num_scalar_prefetch=0,
            grid=(N,),
            in_specs=[
                in_row_spec, in_row_spec, in_row_spec,
                pl.BlockSpec((9, Cin, Cout), lambda n: (0, 0, 0)),   # resident
                pl.BlockSpec((1, Cout), lambda n: (0, 0)),           # resident
            ],
            out_specs=pl.BlockSpec((None, H * W, Cout), lambda n: (n, 0, 0)),
        ),
        compiler_params=pltpu.CompilerParams(dimension_semantics=("parallel",)),
    )(shifted[0], shifted[1], shifted[2], wr, br)
    return out.reshape(N, H, W, Cout)


def _conv3x3_relu_rows(x, wr, br, N, H, W, Cin, Cout):
    xp = jnp.pad(x, ((0, 0), (1, 1), (1, 1), (0, 0)))              # (N,H+2,W+2,Cin)

    def row_spec(dy):
        # one padded input row per grid step; dy selects the vertical tap
        return pl.BlockSpec((None, None, W + 2, Cin),
                            lambda n, h, dy=dy: (n, h + dy, 0, 0))

    return pl.pallas_call(
        _conv3x3_row_kernel,
        out_shape=jax.ShapeDtypeStruct((N, H, W, Cout), jnp.bfloat16),
        grid_spec=pltpu.PrefetchScalarGridSpec(
            num_scalar_prefetch=0,
            grid=(N, H),
            in_specs=[
                row_spec(0), row_spec(1), row_spec(2),
                pl.BlockSpec((9, Cin, Cout), lambda n, h: (0, 0, 0)),  # resident
                pl.BlockSpec((1, Cout), lambda n, h: (0, 0)),          # resident
            ],
            out_specs=pl.BlockSpec((None, None, W, Cout),
                                   lambda n, h: (n, h, 0, 0)),
        ),
        compiler_params=pltpu.CompilerParams(
            dimension_semantics=("parallel", "arbitrary")),
    )(xp, xp, xp, wr, br)


def _conv3x3_relu(x_nhwc, w_hwio, b):
    """x: (N,H,W,Cin) bf16 ; w: (3,3,Cin,Cout) ; b: (Cout,) -> (N,H,W,Cout) bf16."""
    N, H, W, Cin = x_nhwc.shape
    Cout = w_hwio.shape[-1]
    wr = w_hwio.reshape(9, Cin, Cout).astype(jnp.bfloat16)
    br = b.reshape(1, Cout).astype(jnp.float32)

    # Static VMEM estimate for the whole-image variant (double-buffered).
    bytes_est = (3 * (H + 2) * W * Cin * 2        # dx-shifted inputs (bf16)
                 + 9 * Cin * Cout * 2 + Cout * 4  # weights + bias
                 + H * W * Cout * 2               # bf16 output tile
                 + H * W * Cout * 4) * 2          # f32 accumulator (+ margin)
    if bytes_est <= _IMAGE_KERNEL_VMEM_LIMIT:
        return _conv3x3_relu_image(x_nhwc, wr, br, N, H, W, Cin, Cout)
    return _conv3x3_relu_rows(x_nhwc, wr, br, N, H, W, Cin, Cout)


# ---------------------------------------------------------------------------
# Tiled L1-mean reduction
# ---------------------------------------------------------------------------
def _l1_mean_kernel(x_ref, y_ref, o_ref, acc_ref, *, inv_count):
    """Tiled sum(|x - y|); mean written on the last grid step."""
    @pl.when(pl.program_id(0) == 0)
    def _():
        acc_ref[...] = jnp.zeros_like(acc_ref)

    d = jnp.abs(x_ref[...].astype(jnp.float32) - y_ref[...].astype(jnp.float32))
    s = jnp.sum(jnp.sum(d, axis=1, keepdims=True), axis=0, keepdims=True)
    acc_ref[...] += s

    @pl.when(pl.program_id(0) == pl.num_programs(0) - 1)
    def _():
        o_ref[...] = acc_ref[...] * inv_count


def _l1_mean(x, y):
    C = x.shape[-1]
    x2 = x.reshape(-1, C)
    y2 = y.reshape(-1, C)
    M = x2.shape[0]
    # Tile adapts to the problem size: no giant padding for tiny feature maps.
    tb = min(512, max(8, ((M + 7) // 8) * 8))
    nb = pl.cdiv(M, tb)
    m_pad = nb * tb
    if m_pad != M:  # zero padding: |0 - 0| contributes nothing to the sum
        x2 = jnp.pad(x2, ((0, m_pad - M), (0, 0)))
        y2 = jnp.pad(y2, ((0, m_pad - M), (0, 0)))

    out = pl.pallas_call(
        functools.partial(_l1_mean_kernel, inv_count=1.0 / float(M * C)),
        out_shape=jax.ShapeDtypeStruct((1, 1), jnp.float32),
        grid_spec=pltpu.PrefetchScalarGridSpec(
            num_scalar_prefetch=0,
            grid=(nb,),
            in_specs=[
                pl.BlockSpec((tb, C), lambda i: (i, 0)),
                pl.BlockSpec((tb, C), lambda i: (i, 0)),
            ],
            out_specs=pl.BlockSpec((1, 1), lambda i: (0, 0)),
            scratch_shapes=[pltpu.VMEM((1, 1), jnp.float32)],
        ),
        compiler_params=pltpu.CompilerParams(dimension_semantics=("arbitrary",)),
    )(x2, y2)
    return out[0, 0]


# ---------------------------------------------------------------------------
# VGG16 features[:16] (conv1_1 .. relu3_3) built on the kernels
# ---------------------------------------------------------------------------
# torchvision vgg16.features[:16]: conv(+ReLU) x2, pool, conv(+ReLU) x2, pool,
# conv(+ReLU) x3  -> relu3_3 features.
_VGG_SLICE_CFG = [
    ("conv", 3, 64), ("conv", 64, 64), ("pool",),
    ("conv", 64, 128), ("conv", 128, 128), ("pool",),
    ("conv", 128, 256), ("conv", 256, 256), ("conv", 256, 256),
]


def init_vgg_params(key):
    """He-initialized stand-ins with exact VGG16 shapes (see TODO above)."""
    params = []
    for layer in _VGG_SLICE_CFG:
        if layer[0] == "conv":
            _, cin, cout = layer
            key, wk = jax.random.split(key)
            std = (2.0 / (9 * cin)) ** 0.5
            w = jax.random.normal(wk, (3, 3, cin, cout), jnp.float32) * std
            b = jnp.zeros((cout,), jnp.float32)
            params.append((w, b))
        else:
            params.append(None)
    return params


def _pad_params_for_lanes(params):
    """Zero-pad conv channels so every conv output is lane-dense (>=128).

    Padded output channels carry exact zeros (zero weights + zero bias, ReLU),
    and consumers' padded Cin weights are zero, so the math is unchanged.
    """
    padded = []
    cur_c = 3  # runtime input channels (images are not padded)
    for layer, p in zip(_VGG_SLICE_CFG, params):
        if layer[0] != "conv":
            padded.append(None)
            continue
        _, cin, cout = layer
        w, b = p
        cout_p = max(cout, _LANE)
        wp = jnp.zeros((3, 3, cur_c, cout_p), w.dtype).at[:, :, :cin, :cout].set(w)
        bp = jnp.zeros((cout_p,), b.dtype).at[:cout].set(b)
        padded.append((wp, bp))
        cur_c = cout_p
    return padded


def _maxpool2x2(x_nhwc):
    # Cheap, memory-bound reshuffle; left to XLA on purpose.
    N, H, W, C = x_nhwc.shape
    return jnp.max(x_nhwc.reshape(N, H // 2, 2, W // 2, 2, C), axis=(2, 4))


def vgg_features(x_nchw, run_params):
    # NCHW in, NHWC internally (channels on the lane dim), bf16 activations.
    h = jnp.transpose(x_nchw, (0, 2, 3, 1)).astype(jnp.bfloat16)
    for layer, p in zip(_VGG_SLICE_CFG, run_params):
        if layer[0] == "conv":
            h = _conv3x3_relu(h, p[0], p[1])
        else:
            h = _maxpool2x2(h)
    return h  # (N, H/4, W/4, 256) bf16 (relu3_3)


def perceptual_loss(x_nchw, y_nchw, params):
    """Equivalent of PerceptualLoss.forward: L1Loss(VGG(x), VGG(y)) -> scalar."""
    run_params = _pad_params_for_lanes(params)
    n = x_nchw.shape[0]
    # Run x and y through the VGG slice in one pass (half the kernel launches).
    both = jnp.concatenate([x_nchw, y_nchw], axis=0)
    feats = vgg_features(both, run_params)
    return _l1_mean(feats[:n], feats[n:])


if __name__ == "__main__":
    key = jax.random.PRNGKey(0)
    kx, ky, kp = jax.random.split(key, 3)
    # Small RGB images, NCHW like the PyTorch module expects.
    x = jax.random.uniform(kx, (2, 3, 16, 16), dtype=jnp.float32)
    y = jax.random.uniform(ky, (2, 3, 16, 16), dtype=jnp.float32)
    params = init_vgg_params(kp)

    loss = jax.jit(perceptual_loss)(x, y, params)
    jax.block_until_ready(loss)
    assert loss.shape == () and loss.dtype == jnp.float32
    assert bool(jnp.isfinite(loss))
    print("KERNEL_OK")
</pallas_src>

<mosaic_0001>
module attributes {stable_mosaic.version = 11 : i64} {
  func.func @_conv3x3_image_kernel(%arg0: i32, %arg1: memref<1x288x3xbf16, #tpu.memory_space<vmem>>, %arg2: memref<1x288x3xbf16, #tpu.memory_space<vmem>>, %arg3: memref<1x288x3xbf16, #tpu.memory_space<vmem>>, %arg4: memref<9x3x128xbf16, #tpu.memory_space<vmem>>, %arg5: memref<1x128xf32, #tpu.memory_space<vmem>>, %arg6: memref<1x256x128xbf16, #tpu.memory_space<vmem>>) attributes {dimension_semantics = [#tpu.dimension_semantics<parallel>], iteration_bounds = array<i64: 4>, scalar_prefetch = 0 : i64, scratch_operands = 0 : i64, tpu.core_type = #tpu.core_type<tc>, window_params = [{transform_indices = @transform_0, window_bounds = array<i64: 1, 288, 3>}, {transform_indices = @transform_1, window_bounds = array<i64: 1, 288, 3>}, {transform_indices = @transform_2, window_bounds = array<i64: 1, 288, 3>}, {pipeline_mode = #tpu.pipeline_mode<synchronous>, transform_indices = @transform_3, window_bounds = array<i64: 9, 3, 128>}, {pipeline_mode = #tpu.pipeline_mode<synchronous>, transform_indices = @transform_4, window_bounds = array<i64: 1, 128>}, {transform_indices = @transform_5, window_bounds = array<i64: 1, 256, 128>}]} {
    %c0 = arith.constant 0 : index
    %c0_0 = arith.constant 0 : index
    %c0_1 = arith.constant 0 : index
    %0 = vector.load %arg1[%c0, %c0_0, %c0_1] : memref<1x288x3xbf16, #tpu.memory_space<vmem>>, vector<1x256x3xbf16>
    %1 = vector.shape_cast %0 : vector<1x256x3xbf16> to vector<256x3xbf16>
    %c0_2 = arith.constant 0 : index
    %c0_3 = arith.constant 0 : index
    %c0_4 = arith.constant 0 : index
    %2 = vector.load %arg4[%c0_2, %c0_3, %c0_4] : memref<9x3x128xbf16, #tpu.memory_space<vmem>>, vector<1x3x128xbf16>
    %3 = vector.shape_cast %2 : vector<1x3x128xbf16> to vector<3x128xbf16>
    %cst = arith.constant dense<0.000000e+00> : vector<256x128xf32>
    %4 = tpu.matmul %1, %3, %cst {dimension_numbers = #tpu.dot_dimension_numbers<[1], [0], [0], [1], [0, 0, 1, 1], [], []>} : vector<256x3xbf16>, vector<3x128xbf16>, vector<256x128xf32> -> vector<256x128xf32>
    %c0_5 = arith.constant 0 : index
    %c0_6 = arith.constant 0 : index
    %c0_7 = arith.constant 0 : index
    %5 = vector.load %arg2[%c0_5, %c0_6, %c0_7] : memref<1x288x3xbf16, #tpu.memory_space<vmem>>, vector<1x256x3xbf16>
    %6 = vector.shape_cast %5 : vector<1x256x3xbf16> to vector<256x3xbf16>
    %c1 = arith.constant 1 : index
    %c0_8 = arith.constant 0 : index
    %c0_9 = arith.constant 0 : index
    %7 = vector.load %arg4[%c1, %c0_8, %c0_9] : memref<9x3x128xbf16, #tpu.memory_space<vmem>>, vector<1x3x128xbf16>
    %8 = vector.shape_cast %7 : vector<1x3x128xbf16> to vector<3x128xbf16>
    %cst_10 = arith.constant dense<0.000000e+00> : vector<256x128xf32>
    %9 = tpu.matmul %6, %8, %cst_10 {dimension_numbers = #tpu.dot_dimension_numbers<[1], [0], [0], [1], [0, 0, 1, 1], [], []>} : vector<256x3xbf16>, vector<3x128xbf16>, vector<256x128xf32> -> vector<256x128xf32>
    %10 = arith.addf %4, %9 : vector<256x128xf32>
    %c0_11 = arith.constant 0 : index
    %c0_12 = arith.constant 0 : index
    %c0_13 = arith.constant 0 : index
    %11 = vector.load %arg3[%c0_11, %c0_12, %c0_13] : memref<1x288x3xbf16, #tpu.memory_space<vmem>>, vector<1x256x3xbf16>
    %12 = vector.shape_cast %11 : vector<1x256x3xbf16> to vector<256x3xbf16>
    %c2 = arith.constant 2 : index
    %c0_14 = arith.constant 0 : index
    %c0_15 = arith.constant 0 : index
    %13 = vector.load %arg4[%c2, %c0_14, %c0_15] : memref<9x3x128xbf16, #tpu.memory_space<vmem>>, vector<1x3x128xbf16>
    %14 = vector.shape_cast %13 : vector<1x3x128xbf16> to vector<3x128xbf16>
    %cst_16 = arith.constant dense<0.000000e+00> : vector<256x128xf32>
    %15 = tpu.matmul %12, %14, %cst_16 {dimension_numbers = #tpu.dot_dimension_numbers<[1], [0], [0], [1], [0, 0, 1, 1], [], []>} : vector<256x3xbf16>, vector<3x128xbf16>, vector<256x128xf32> -> vector<256x128xf32>
    %16 = arith.addf %10, %15 : vector<256x128xf32>
    %c0_17 = arith.constant 0 : index
    %c16 = arith.constant 16 : index
    %c0_18 = arith.constant 0 : index
    %17 = vector.load %arg1[%c0_17, %c16, %c0_18] : memref<1x288x3xbf16, #tpu.memory_space<vmem>>, vector<1x256x3xbf16>
    %18 = vector.shape_cast %17 : vector<1x256x3xbf16> to vector<256x3xbf16>
    %c3 = arith.constant 3 : index
    %c0_19 = arith.constant 0 : index
    %c0_20 = arith.constant 0 : index
    %19 = vector.load %arg4[%c3, %c0_19, %c0_20] : memref<9x3x128xbf16, #tpu.memory_space<vmem>>, vector<1x3x128xbf16>
    %20 = vector.shape_cast %19 : vector<1x3x128xbf16> to vector<3x128xbf16>
    %cst_21 = arith.constant dense<0.000000e+00> : vector<256x128xf32>
    %21 = tpu.matmul %18, %20, %cst_21 {dimension_numbers = #tpu.dot_dimension_numbers<[1], [0], [0], [1], [0, 0, 1, 1], [], []>} : vector<256x3xbf16>, vector<3x128xbf16>, vector<256x128xf32> -> vector<256x128xf32>
    %22 = arith.addf %16, %21 : vector<256x128xf32>
    %c0_22 = arith.constant 0 : index
    %c16_23 = arith.constant 16 : index
    %c0_24 = arith.constant 0 : index
    %23 = vector.load %arg2[%c0_22, %c16_23, %c0_24] : memref<1x288x3xbf16, #tpu.memory_space<vmem>>, vector<1x256x3xbf16>
    %24 = vector.shape_cast %23 : vector<1x256x3xbf16> to vector<256x3xbf16>
    %c4 = arith.constant 4 : index
    %c0_25 = arith.constant 0 : index
    %c0_26 = arith.constant 0 : index
    %25 = vector.load %arg4[%c4, %c0_25, %c0_26] : memref<9x3x128xbf16, #tpu.memory_space<vmem>>, vector<1x3x128xbf16>
    %26 = vector.shape_cast %25 : vector<1x3x128xbf16> to vector<3x128xbf16>
    %cst_27 = arith.constant dense<0.000000e+00> : vector<256x128xf32>
    %27 = tpu.matmul %24, %26, %cst_27 {dimension_numbers = #tpu.dot_dimension_numbers<[1], [0], [0], [1], [0, 0, 1, 1], [], []>} : vector<256x3xbf16>, vector<3x128xbf16>, vector<256x128xf32> -> vector<256x128xf32>
    %28 = arith.addf %22, %27 : vector<256x128xf32>
    %c0_28 = arith.constant 0 : index
    %c16_29 = arith.constant 16 : index
    %c0_30 = arith.constant 0 : index
    %29 = vector.load %arg3[%c0_28, %c16_29, %c0_30] : memref<1x288x3xbf16, #tpu.memory_space<vmem>>, vector<1x256x3xbf16>
    %30 = vector.shape_cast %29 : vector<1x256x3xbf16> to vector<256x3xbf16>
    %c5 = arith.constant 5 : index
    %c0_31 = arith.constant 0 : index
    %c0_32 = arith.constant 0 : index
    %31 = vector.load %arg4[%c5, %c0_31, %c0_32] : memref<9x3x128xbf16, #tpu.memory_space<vmem>>, vector<1x3x128xbf16>
    %32 = vector.shape_cast %31 : vector<1x3x128xbf16> to vector<3x128xbf16>
    %cst_33 = arith.constant dense<0.000000e+00> : vector<256x128xf32>
    %33 = tpu.matmul %30, %32, %cst_33 {dimension_numbers = #tpu.dot_dimension_numbers<[1], [0], [0], [1], [0, 0, 1, 1], [], []>} : vector<256x3xbf16>, vector<3x128xbf16>, vector<256x128xf32> -> vector<256x128xf32>
    %34 = arith.addf %28, %33 : vector<256x128xf32>
    %c0_34 = arith.constant 0 : index
    %c32 = arith.constant 32 : index
    %c0_35 = arith.constant 0 : index
    %35 = vector.load %arg1[%c0_34, %c32, %c0_35] : memref<1x288x3xbf16, #tpu.memory_space<vmem>>, vector<1x256x3xbf16>
    %36 = vector.shape_cast %35 : vector<1x256x3xbf16> to vector<256x3xbf16>
    %c6 = arith.constant 6 : index
    %c0_36 = arith.constant 0 : index
    %c0_37 = arith.constant 0 : index
    %37 = vector.load %arg4[%c6, %c0_36, %c0_37] : memref<9x3x128xbf16, #tpu.memory_space<vmem>>, vector<1x3x128xbf16>
    %38 = vector.shape_cast %37 : vector<1x3x128xbf16> to vector<3x128xbf16>
    %cst_38 = arith.constant dense<0.000000e+00> : vector<256x128xf32>
    %39 = tpu.matmul %36, %38, %cst_38 {dimension_numbers = #tpu.dot_dimension_numbers<[1], [0], [0], [1], [0, 0, 1, 1], [], []>} : vector<256x3xbf16>, vector<3x128xbf16>, vector<256x128xf32> -> vector<256x128xf32>
    %40 = arith.addf %34, %39 : vector<256x128xf32>
    %c0_39 = arith.constant 0 : index
    %c32_40 = arith.constant 32 : index
    %c0_41 = arith.constant 0 : index
    %41 = vector.load %arg2[%c0_39, %c32_40, %c0_41] : memref<1x288x3xbf16, #tpu.memory_space<vmem>>, vector<1x256x3xbf16>
    %42 = vector.shape_cast %41 : vector<1x256x3xbf16> to vector<256x3xbf16>
    %c7 = arith.constant 7 : index
    %c0_42 = arith.constant 0 : index
    %c0_43 = arith.constant 0 : index
    %43 = vector.load %arg4[%c7, %c0_42, %c0_43] : memref<9x3x128xbf16, #tpu.memory_space<vmem>>, vector<1x3x128xbf16>
    %44 = vector.shape_cast %43 : vector<1x3x128xbf16> to vector<3x128xbf16>
    %cst_44 = arith.constant dense<0.000000e+00> : vector<256x128xf32>
    %45 = tpu.matmul %42, %44, %cst_44 {dimension_numbers = #tpu.dot_dimension_numbers<[1], [0], [0], [1], [0, 0, 1, 1], [], []>} : vector<256x3xbf16>, vector<3x128xbf16>, vector<256x128xf32> -> vector<256x128xf32>
    %46 = arith.addf %40, %45 : vector<256x128xf32>
    %c0_45 = arith.constant 0 : index
    %c32_46 = arith.constant 32 : index
    %c0_47 = arith.constant 0 : index
    %47 = vector.load %arg3[%c0_45, %c32_46, %c0_47] : memref<1x288x3xbf16, #tpu.memory_space<vmem>>, vector<1x256x3xbf16>
    %48 = vector.shape_cast %47 : vector<1x256x3xbf16> to vector<256x3xbf16>
    %c8 = arith.constant 8 : index
    %c0_48 = arith.constant 0 : index
    %c0_49 = arith.constant 0 : index
    %49 = vector.load %arg4[%c8, %c0_48, %c0_49] : memref<9x3x128xbf16, #tpu.memory_space<vmem>>, vector<1x3x128xbf16>
    %50 = vector.shape_cast %49 : vector<1x3x128xbf16> to vector<3x128xbf16>
    %cst_50 = arith.constant dense<0.000000e+00> : vector<256x128xf32>
    %51 = tpu.matmul %48, %50, %cst_50 {dimension_numbers = #tpu.dot_dimension_numbers<[1], [0], [0], [1], [0, 0, 1, 1], [], []>} : vector<256x3xbf16>, vector<3x128xbf16>, vector<256x128xf32> -> vector<256x128xf32>
    %52 = arith.addf %46, %51 : vector<256x128xf32>
    %c0_51 = arith.constant 0 : index
    %c0_52 = arith.constant 0 : index
    %53 = vector.load %arg5[%c0_51, %c0_52] : memref<1x128xf32, #tpu.memory_space<vmem>>, vector<1x128xf32>
    %54 = vector.broadcast %53 : vector<1x128xf32> to vector<256x128xf32>
    %55 = arith.addf %52, %54 : vector<256x128xf32>
    %cst_53 = arith.constant 0.000000e+00 : f32
    %56 = vector.broadcast %cst_53 : f32 to vector<256x128xf32>
    %57 = arith.maximumf %55, %56 : vector<256x128xf32>
    %58 = arith.truncf %57 : vector<256x128xf32> to vector<256x128xbf16>
    %c0_54 = arith.constant 0 : index
    %c0_55 = arith.constant 0 : index
    %c0_56 = arith.constant 0 : index
    %59 = vector.load %arg6[%c0_54, %c0_55, %c0_56] : memref<1x256x128xbf16, #tpu.memory_space<vmem>>, vector<1x256x128xbf16>
    %60 = vector.shape_cast %59 : vector<1x256x128xbf16> to vector<256x128xbf16>
    %61 = vector.shape_cast %58 : vector<256x128xbf16> to vector<1x256x128xbf16>
    tpu.vector_store %arg6[%c0_54, %c0_55, %c0_56], %61 {strides = array<i32>} : memref<1x256x128xbf16, #tpu.memory_space<vmem>>, vector<1x256x128xbf16>,
    return
  }
  func.func @transform_0(%arg0: i32) -> (i32, i32, i32) {
    %c0_i32 = arith.constant 0 : i32
    %c0_i32_0 = arith.constant 0 : i32
    %c0_i32_1 = arith.constant 0 : i32
    return %arg0, %c0_i32, %c0_i32_0 : i32, i32, i32
  }
  func.func @transform_1(%arg0: i32) -> (i32, i32, i32) {
    %c0_i32 = arith.constant 0 : i32
    %c0_i32_0 = arith.constant 0 : i32
    %c0_i32_1 = arith.constant 0 : i32
    return %arg0, %c0_i32, %c0_i32_0 : i32, i32, i32
  }
  func.func @transform_2(%arg0: i32) -> (i32, i32, i32) {
    %c0_i32 = arith.constant 0 : i32
    %c0_i32_0 = arith.constant 0 : i32
    %c0_i32_1 = arith.constant 0 : i32
    return %arg0, %c0_i32, %c0_i32_0 : i32, i32, i32
  }
  func.func @transform_3(%arg0: i32) -> (i32, i32, i32) {
    %c0_i32 = arith.constant 0 : i32
    %c0_i32_0 = arith.constant 0 : i32
    %c0_i32_1 = arith.constant 0 : i32
    %c0_i32_2 = arith.constant 0 : i32
    return %c0_i32, %c0_i32_0, %c0_i32_1 : i32, i32, i32
  }
  func.func @transform_4(%arg0: i32) -> (i32, i32) {
    %c0_i32 = arith.constant 0 : i32
    %c0_i32_0 = arith.constant 0 : i32
    %c0_i32_1 = arith.constant 0 : i32
    return %c0_i32, %c0_i32_0 : i32, i32
  }
  func.func @transform_5(%arg0: i32) -> (i32, i32, i32) {
    %c0_i32 = arith.constant 0 : i32
    %c0_i32_0 = arith.constant 0 : i32
    %c0_i32_1 = arith.constant 0 : i32
    return %arg0, %c0_i32, %c0_i32_0 : i32, i32, i32
  }
}

module attributes {stable_mosaic.version = 11 : i64} {
  func.func @_conv3x3_image_kernel(%arg0: i32, %arg1: memref<1x288x128xbf16, #tpu.memory_space<vmem>>, %arg2: memref<1x288x128xbf16, #tpu.memory_space<vmem>>, %arg3: memref<1x288x128xbf16, #tpu.memory_space<vmem>>, %arg4: memref<9x128x128xbf16, #tpu.memory_space<vmem>>, %arg5: memref<1x128xf32, #tpu.memory_space<vmem>>, %arg6: memref<1x256x128xbf16, #tpu.memory_space<vmem>>) attributes {dimension_semantics = [#tpu.dimension_semantics<parallel>], iteration_bounds = array<i64: 4>, scalar_prefetch = 0 : i64, scratch_operands = 0 : i64, tpu.core_type = #tpu.core_type<tc>, window_params = [{transform_indices = @transform_0, window_bounds = array<i64: 1, 288, 128>}, {transform_indices = @transform_1, window_bounds = array<i64: 1, 288, 128>}, {transform_indices = @transform_2, window_bounds = array<i64: 1, 288, 128>}, {pipeline_mode = #tpu.pipeline_mode<synchronous>, transform_indices = @transform_3, window_bounds = array<i64: 9, 128, 128>}, {pipeline_mode = #tpu.pipeline_mode<synchronous>, transform_indices = @transform_4, window_bounds = array<i64: 1, 128>}, {transform_indices = @transform_5, window_bounds = array<i64: 1, 256, 128>}]} {
    %c0 = arith.constant 0 : index
    %c0_0 = arith.constant 0 : index
    %c0_1 = arith.constant 0 : index
    %0 = vector.load %arg1[%c0, %c0_0, %c0_1] : memref<1x288x128xbf16, #tpu.memory_space<vmem>>, vector<1x256x128xbf16>
    %1 = vector.shape_cast %0 : vector<1x256x128xbf16> to vector<256x128xbf16>
    %c0_2 = arith.constant 0 : index
    %c0_3 = arith.constant 0 : index
    %c0_4 = arith.constant 0 : index
    %2 = vector.load %arg4[%c0_2, %c0_3, %c0_4] : memref<9x128x128xbf16, #tpu.memory_space<vmem>>, vector<1x128x128xbf16>
    %3 = vector.shape_cast %2 : vector<1x128x128xbf16> to vector<128x128xbf16>
    %cst = arith.constant dense<0.000000e+00> : vector<256x128xf32>
    %4 = tpu.matmul %1, %3, %cst {dimension_numbers = #tpu.dot_dimension_numbers<[1], [0], [0], [1], [0, 0, 1, 1], [], []>} : vector<256x128xbf16>, vector<128x128xbf16>, vector<256x128xf32> -> vector<256x128xf32>
    %c0_5 = arith.constant 0 : index
    %c0_6 = arith.constant 0 : index
    %c0_7 = arith.constant 0 : index
    %5 = vector.load %arg2[%c0_5, %c0_6, %c0_7] : memref<1x288x128xbf16, #tpu.memory_space<vmem>>, vector<1x256x128xbf16>
    %6 = vector.shape_cast %5 : vector<1x256x128xbf16> to vector<256x128xbf16>
    %c1 = arith.constant 1 : index
    %c0_8 = arith.constant 0 : index
    %c0_9 = arith.constant 0 : index
    %7 = vector.load %arg4[%c1, %c0_8, %c0_9] : memref<9x128x128xbf16, #tpu.memory_space<vmem>>, vector<1x128x128xbf16>
    %8 = vector.shape_cast %7 : vector<1x128x128xbf16> to vector<128x128xbf16>
    %cst_10 = arith.constant dense<0.000000e+00> : vector<256x128xf32>
    %9 = tpu.matmul %6, %8, %cst_10 {dimension_numbers = #tpu.dot_dimension_numbers<[1], [0], [0], [1], [0, 0, 1, 1], [], []>} : vector<256x128xbf16>, vector<128x128xbf16>, vector<256x128xf32> -> vector<256x128xf32>
    %10 = arith.addf %4, %9 : vector<256x128xf32>
    %c0_11 = arith.constant 0 : index
    %c0_12 = arith.constant 0 : index
    %c0_13 = arith.constant 0 : index
    %11 = vector.load %arg3[%c0_11, %c0_12, %c0_13] : memref<1x288x128xbf16, #tpu.memory_space<vmem>>, vector<1x256x128xbf16>
    %12 = vector.shape_cast %11 : vector<1x256x128xbf16> to vector<256x128xbf16>
    %c2 = arith.constant 2 : index
    %c0_14 = arith.constant 0 : index
    %c0_15 = arith.constant 0 : index
    %13 = vector.load %arg4[%c2, %c0_14, %c0_15] : memref<9x128x128xbf16, #tpu.memory_space<vmem>>, vector<1x128x128xbf16>
    %14 = vector.shape_cast %13 : vector<1x128x128xbf16> to vector<128x128xbf16>
    %cst_16 = arith.constant dense<0.000000e+00> : vector<256x128xf32>
    %15 = tpu.matmul %12, %14, %cst_16 {dimension_numbers = #tpu.dot_dimension_numbers<[1], [0], [0], [1], [0, 0, 1, 1], [], []>} : vector<256x128xbf16>, vector<128x128xbf16>, vector<256x128xf32> -> vector<256x128xf32>
    %16 = arith.addf %10, %15 : vector<256x128xf32>
    %c0_17 = arith.constant 0 : index
    %c16 = arith.constant 16 : index
    %c0_18 = arith.constant 0 : index
    %17 = vector.load %arg1[%c0_17, %c16, %c0_18] : memref<1x288x128xbf16, #tpu.memory_space<vmem>>, vector<1x256x128xbf16>
    %18 = vector.shape_cast %17 : vector<1x256x128xbf16> to vector<256x128xbf16>
    %c3 = arith.constant 3 : index
    %c0_19 = arith.constant 0 : index
    %c0_20 = arith.constant 0 : index
    %19 = vector.load %arg4[%c3, %c0_19, %c0_20] : memref<9x128x128xbf16, #tpu.memory_space<vmem>>, vector<1x128x128xbf16>
    %20 = vector.shape_cast %19 : vector<1x128x128xbf16> to vector<128x128xbf16>
    %cst_21 = arith.constant dense<0.000000e+00> : vector<256x128xf32>
    %21 = tpu.matmul %18, %20, %cst_21 {dimension_numbers = #tpu.dot_dimension_numbers<[1], [0], [0], [1], [0, 0, 1, 1], [], []>} : vector<256x128xbf16>, vector<128x128xbf16>, vector<256x128xf32> -> vector<256x128xf32>
    %22 = arith.addf %16, %21 : vector<256x128xf32>
    %c0_22 = arith.constant 0 : index
    %c16_23 = arith.constant 16 : index
    %c0_24 = arith.constant 0 : index
    %23 = vector.load %arg2[%c0_22, %c16_23, %c0_24] : memref<1x288x128xbf16, #tpu.memory_space<vmem>>, vector<1x256x128xbf16>
    %24 = vector.shape_cast %23 : vector<1x256x128xbf16> to vector<256x128xbf16>
    %c4 = arith.constant 4 : index
    %c0_25 = arith.constant 0 : index
    %c0_26 = arith.constant 0 : index
    %25 = vector.load %arg4[%c4, %c0_25, %c0_26] : memref<9x128x128xbf16, #tpu.memory_space<vmem>>, vector<1x128x128xbf16>
    %26 = vector.shape_cast %25 : vector<1x128x128xbf16> to vector<128x128xbf16>
    %cst_27 = arith.constant dense<0.000000e+00> : vector<256x128xf32>
    %27 = tpu.matmul %24, %26, %cst_27 {dimension_numbers = #tpu.dot_dimension_numbers<[1], [0], [0], [1], [0, 0, 1, 1], [], []>} : vector<256x128xbf16>, vector<128x128xbf16>, vector<256x128xf32> -> vector<256x128xf32>
    %28 = arith.addf %22, %27 : vector<256x128xf32>
    %c0_28 = arith.constant 0 : index
    %c16_29 = arith.constant 16 : index
    %c0_30 = arith.constant 0 : index
    %29 = vector.load %arg3[%c0_28, %c16_29, %c0_30] : memref<1x288x128xbf16, #tpu.memory_space<vmem>>, vector<1x256x128xbf16>
    %30 = vector.shape_cast %29 : vector<1x256x128xbf16> to vector<256x128xbf16>
    %c5 = arith.constant 5 : index
    %c0_31 = arith.constant 0 : index
    %c0_32 = arith.constant 0 : index
    %31 = vector.load %arg4[%c5, %c0_31, %c0_32] : memref<9x128x128xbf16, #tpu.memory_space<vmem>>, vector<1x128x128xbf16>
    %32 = vector.shape_cast %31 : vector<1x128x128xbf16> to vector<128x128xbf16>
    %cst_33 = arith.constant dense<0.000000e+00> : vector<256x128xf32>
    %33 = tpu.matmul %30, %32, %cst_33 {dimension_numbers = #tpu.dot_dimension_numbers<[1], [0], [0], [1], [0, 0, 1, 1], [], []>} : vector<256x128xbf16>, vector<128x128xbf16>, vector<256x128xf32> -> vector<256x128xf32>
    %34 = arith.addf %28, %33 : vector<256x128xf32>
    %c0_34 = arith.constant 0 : index
    %c32 = arith.constant 32 : index
    %c0_35 = arith.constant 0 : index
    %35 = vector.load %arg1[%c0_34, %c32, %c0_35] : memref<1x288x128xbf16, #tpu.memory_space<vmem>>, vector<1x256x128xbf16>
    %36 = vector.shape_cast %35 : vector<1x256x128xbf16> to vector<256x128xbf16>
    %c6 = arith.constant 6 : index
    %c0_36 = arith.constant 0 : index
    %c0_37 = arith.constant 0 : index
    %37 = vector.load %arg4[%c6, %c0_36, %c0_37] : memref<9x128x128xbf16, #tpu.memory_space<vmem>>, vector<1x128x128xbf16>
    %38 = vector.shape_cast %37 : vector<1x128x128xbf16> to vector<128x128xbf16>
    %cst_38 = arith.constant dense<0.000000e+00> : vector<256x128xf32>
    %39 = tpu.matmul %36, %38, %cst_38 {dimension_numbers = #tpu.dot_dimension_numbers<[1], [0], [0], [1], [0, 0, 1, 1], [], []>} : vector<256x128xbf16>, vector<128x128xbf16>, vector<256x128xf32> -> vector<256x128xf32>
    %40 = arith.addf %34, %39 : vector<256x128xf32>
    %c0_39 = arith.constant 0 : index
    %c32_40 = arith.constant 32 : index
    %c0_41 = arith.constant 0 : index
    %41 = vector.load %arg2[%c0_39, %c32_40, %c0_41] : memref<1x288x128xbf16, #tpu.memory_space<vmem>>, vector<1x256x128xbf16>
    %42 = vector.shape_cast %41 : vector<1x256x128xbf16> to vector<256x128xbf16>
    %c7 = arith.constant 7 : index
    %c0_42 = arith.constant 0 : index
    %c0_43 = arith.constant 0 : index
    %43 = vector.load %arg4[%c7, %c0_42, %c0_43] : memref<9x128x128xbf16, #tpu.memory_space<vmem>>, vector<1x128x128xbf16>
    %44 = vector.shape_cast %43 : vector<1x128x128xbf16> to vector<128x128xbf16>
    %cst_44 = arith.constant dense<0.000000e+00> : vector<256x128xf32>
    %45 = tpu.matmul %42, %44, %cst_44 {dimension_numbers = #tpu.dot_dimension_numbers<[1], [0], [0], [1], [0, 0, 1, 1], [], []>} : vector<256x128xbf16>, vector<128x128xbf16>, vector<256x128xf32> -> vector<256x128xf32>
    %46 = arith.addf %40, %45 : vector<256x128xf32>
    %c0_45 = arith.constant 0 : index
    %c32_46 = arith.constant 32 : index
    %c0_47 = arith.constant 0 : index
    %47 = vector.load %arg3[%c0_45, %c32_46, %c0_47] : memref<1x288x128xbf16, #tpu.memory_space<vmem>>, vector<1x256x128xbf16>
    %48 = vector.shape_cast %47 : vector<1x256x128xbf16> to vector<256x128xbf16>
    %c8 = arith.constant 8 : index
    %c0_48 = arith.constant 0 : index
    %c0_49 = arith.constant 0 : index
    %49 = vector.load %arg4[%c8, %c0_48, %c0_49] : memref<9x128x128xbf16, #tpu.memory_space<vmem>>, vector<1x128x128xbf16>
    %50 = vector.shape_cast %49 : vector<1x128x128xbf16> to vector<128x128xbf16>
    %cst_50 = arith.constant dense<0.000000e+00> : vector<256x128xf32>
    %51 = tpu.matmul %48, %50, %cst_50 {dimension_numbers = #tpu.dot_dimension_numbers<[1], [0], [0], [1], [0, 0, 1, 1], [], []>} : vector<256x128xbf16>, vector<128x128xbf16>, vector<256x128xf32> -> vector<256x128xf32>
    %52 = arith.addf %46, %51 : vector<256x128xf32>
    %c0_51 = arith.constant 0 : index
    %c0_52 = arith.constant 0 : index
    %53 = vector.load %arg5[%c0_51, %c0_52] : memref<1x128xf32, #tpu.memory_space<vmem>>, vector<1x128xf32>
    %54 = vector.broadcast %53 : vector<1x128xf32> to vector<256x128xf32>
    %55 = arith.addf %52, %54 : vector<256x128xf32>
    %cst_53 = arith.constant 0.000000e+00 : f32
    %56 = vector.broadcast %cst_53 : f32 to vector<256x128xf32>
    %57 = arith.maximumf %55, %56 : vector<256x128xf32>
    %58 = arith.truncf %57 : vector<256x128xf32> to vector<256x128xbf16>
    %c0_54 = arith.constant 0 : index
    %c0_55 = arith.constant 0 : index
    %c0_56 = arith.constant 0 : index
    %59 = vector.load %arg6[%c0_54, %c0_55, %c0_56] : memref<1x256x128xbf16, #tpu.memory_space<vmem>>, vector<1x256x128xbf16>
    %60 = vector.shape_cast %59 : vector<1x256x128xbf16> to vector<256x128xbf16>
    %61 = vector.shape_cast %58 : vector<256x128xbf16> to vector<1x256x128xbf16>
    tpu.vector_store %arg6[%c0_54, %c0_55, %c0_56], %61 {strides = array<i32>} : memref<1x256x128xbf16, #tpu.memory_space<vmem>>, vector<1x256x128xbf16>,
    return
  }
  func.func @transform_0(%arg0: i32) -> (i32, i32, i32) {
    %c0_i32 = arith.constant 0 : i32
    %c0_i32_0 = arith.constant 0 : i32
    %c0_i32_1 = arith.constant 0 : i32
    return %arg0, %c0_i32, %c0_i32_0 : i32, i32, i32
  }
  func.func @transform_1(%arg0: i32) -> (i32, i32, i32) {
    %c0_i32 = arith.constant 0 : i32
    %c0_i32_0 = arith.constant 0 : i32
    %c0_i32_1 = arith.constant 0 : i32
    return %arg0, %c0_i32, %c0_i32_0 : i32, i32, i32
  }
  func.func @transform_2(%arg0: i32) -> (i32, i32, i32) {
    %c0_i32 = arith.constant 0 : i32
    %c0_i32_0 = arith.constant 0 : i32
    %c0_i32_1 = arith.constant 0 : i32
    return %arg0, %c0_i32, %c0_i32_0 : i32, i32, i32
  }
  func.func @transform_3(%arg0: i32) -> (i32, i32, i32) {
    %c0_i32 = arith.constant 0 : i32
    %c0_i32_0 = arith.constant 0 : i32
    %c0_i32_1 = arith.constant 0 : i32
    %c0_i32_2 = arith.constant 0 : i32
    return %c0_i32, %c0_i32_0, %c0_i32_1 : i32, i32, i32
  }
  func.func @transform_4(%arg0: i32) -> (i32, i32) {
    %c0_i32 = arith.constant 0 : i32
    %c0_i32_0 = arith.constant 0 : i32
    %c0_i32_1 = arith.constant 0 : i32
    return %c0_i32, %c0_i32_0 : i32, i32
  }
  func.func @transform_5(%arg0: i32) -> (i32, i32, i32) {
    %c0_i32 = arith.constant 0 : i32
    %c0_i32_0 = arith.constant 0 : i32
    %c0_i32_1 = arith.constant 0 : i32
    return %arg0, %c0_i32, %c0_i32_0 : i32, i32, i32
  }
}

module attributes {stable_mosaic.version = 11 : i64} {
  func.func @_conv3x3_image_kernel(%arg0: i32, %arg1: memref<1x80x128xbf16, #tpu.memory_space<vmem>>, %arg2: memref<1x80x128xbf16, #tpu.memory_space<vmem>>, %arg3: memref<1x80x128xbf16, #tpu.memory_space<vmem>>, %arg4: memref<9x128x128xbf16, #tpu.memory_space<vmem>>, %arg5: memref<1x128xf32, #tpu.memory_space<vmem>>, %arg6: memref<1x64x128xbf16, #tpu.memory_space<vmem>>) attributes {dimension_semantics = [#tpu.dimension_semantics<parallel>], iteration_bounds = array<i64: 4>, scalar_prefetch = 0 : i64, scratch_operands = 0 : i64, tpu.core_type = #tpu.core_type<tc>, window_params = [{transform_indices = @transform_0, window_bounds = array<i64: 1, 80, 128>}, {transform_indices = @transform_1, window_bounds = array<i64: 1, 80, 128>}, {transform_indices = @transform_2, window_bounds = array<i64: 1, 80, 128>}, {pipeline_mode = #tpu.pipeline_mode<synchronous>, transform_indices = @transform_3, window_bounds = array<i64: 9, 128, 128>}, {pipeline_mode = #tpu.pipeline_mode<synchronous>, transform_indices = @transform_4, window_bounds = array<i64: 1, 128>}, {transform_indices = @transform_5, window_bounds = array<i64: 1, 64, 128>}]} {
    %c0 = arith.constant 0 : index
    %c0_0 = arith.constant 0 : index
    %c0_1 = arith.constant 0 : index
    %0 = vector.load %arg1[%c0, %c0_0, %c0_1] : memref<1x80x128xbf16, #tpu.memory_space<vmem>>, vector<1x64x128xbf16>
    %1 = vector.shape_cast %0 : vector<1x64x128xbf16> to vector<64x128xbf16>
    %c0_2 = arith.constant 0 : index
    %c0_3 = arith.constant 0 : index
    %c0_4 = arith.constant 0 : index
    %2 = vector.load %arg4[%c0_2, %c0_3, %c0_4] : memref<9x128x128xbf16, #tpu.memory_space<vmem>>, vector<1x128x128xbf16>
    %3 = vector.shape_cast %2 : vector<1x128x128xbf16> to vector<128x128xbf16>
    %cst = arith.constant dense<0.000000e+00> : vector<64x128xf32>
    %4 = tpu.matmul %1, %3, %cst {dimension_numbers = #tpu.dot_dimension_numbers<[1], [0], [0], [1], [0, 0, 1, 1], [], []>} : vector<64x128xbf16>, vector<128x128xbf16>, vector<64x128xf32> -> vector<64x128xf32>
    %c0_5 = arith.constant 0 : index
    %c0_6 = arith.constant 0 : index
    %c0_7 = arith.constant 0 : index
    %5 = vector.load %arg2[%c0_5, %c0_6, %c0_7] : memref<1x80x128xbf16, #tpu.memory_space<vmem>>, vector<1x64x128xbf16>
    %6 = vector.shape_cast %5 : vector<1x64x128xbf16> to vector<64x128xbf16>
    %c1 = arith.constant 1 : index
    %c0_8 = arith.constant 0 : index
    %c0_9 = arith.constant 0 : index
    %7 = vector.load %arg4[%c1, %c0_8, %c0_9] : memref<9x128x128xbf16, #tpu.memory_space<vmem>>, vector<1x128x128xbf16>
    %8 = vector.shape_cast %7 : vector<1x128x128xbf16> to vector<128x128xbf16>
    %cst_10 = arith.constant dense<0.000000e+00> : vector<64x128xf32>
    %9 = tpu.matmul %6, %8, %cst_10 {dimension_numbers = #tpu.dot_dimension_numbers<[1], [0], [0], [1], [0, 0, 1, 1], [], []>} : vector<64x128xbf16>, vector<128x128xbf16>, vector<64x128xf32> -> vector<64x128xf32>
    %10 = arith.addf %4, %9 : vector<64x128xf32>
    %c0_11 = arith.constant 0 : index
    %c0_12 = arith.constant 0 : index
    %c0_13 = arith.constant 0 : index
    %11 = vector.load %arg3[%c0_11, %c0_12, %c0_13] : memref<1x80x128xbf16, #tpu.memory_space<vmem>>, vector<1x64x128xbf16>
    %12 = vector.shape_cast %11 : vector<1x64x128xbf16> to vector<64x128xbf16>
    %c2 = arith.constant 2 : index
    %c0_14 = arith.constant 0 : index
    %c0_15 = arith.constant 0 : index
    %13 = vector.load %arg4[%c2, %c0_14, %c0_15] : memref<9x128x128xbf16, #tpu.memory_space<vmem>>, vector<1x128x128xbf16>
    %14 = vector.shape_cast %13 : vector<1x128x128xbf16> to vector<128x128xbf16>
    %cst_16 = arith.constant dense<0.000000e+00> : vector<64x128xf32>
    %15 = tpu.matmul %12, %14, %cst_16 {dimension_numbers = #tpu.dot_dimension_numbers<[1], [0], [0], [1], [0, 0, 1, 1], [], []>} : vector<64x128xbf16>, vector<128x128xbf16>, vector<64x128xf32> -> vector<64x128xf32>
    %16 = arith.addf %10, %15 : vector<64x128xf32>
    %c0_17 = arith.constant 0 : index
    %c8 = arith.constant 8 : index
    %c0_18 = arith.constant 0 : index
    %17 = vector.load %arg1[%c0_17, %c8, %c0_18] : memref<1x80x128xbf16, #tpu.memory_space<vmem>>, vector<1x64x128xbf16>
    %18 = vector.shape_cast %17 : vector<1x64x128xbf16> to vector<64x128xbf16>
    %c3 = arith.constant 3 : index
    %c0_19 = arith.constant 0 : index
    %c0_20 = arith.constant 0 : index
    %19 = vector.load %arg4[%c3, %c0_19, %c0_20] : memref<9x128x128xbf16, #tpu.memory_space<vmem>>, vector<1x128x128xbf16>
    %20 = vector.shape_cast %19 : vector<1x128x128xbf16> to vector<128x128xbf16>
    %cst_21 = arith.constant dense<0.000000e+00> : vector<64x128xf32>
    %21 = tpu.matmul %18, %20, %cst_21 {dimension_numbers = #tpu.dot_dimension_numbers<[1], [0], [0], [1], [0, 0, 1, 1], [], []>} : vector<64x128xbf16>, vector<128x128xbf16>, vector<64x128xf32> -> vector<64x128xf32>
    %22 = arith.addf %16, %21 : vector<64x128xf32>
    %c0_22 = arith.constant 0 : index
    %c8_23 = arith.constant 8 : index
    %c0_24 = arith.constant 0 : index
    %23 = vector.load %arg2[%c0_22, %c8_23, %c0_24] : memref<1x80x128xbf16, #tpu.memory_space<vmem>>, vector<1x64x128xbf16>
    %24 = vector.shape_cast %23 : vector<1x64x128xbf16> to vector<64x128xbf16>
    %c4 = arith.constant 4 : index
    %c0_25 = arith.constant 0 : index
    %c0_26 = arith.constant 0 : index
    %25 = vector.load %arg4[%c4, %c0_25, %c0_26] : memref<9x128x128xbf16, #tpu.memory_space<vmem>>, vector<1x128x128xbf16>
    %26 = vector.shape_cast %25 : vector<1x128x128xbf16> to vector<128x128xbf16>
    %cst_27 = arith.constant dense<0.000000e+00> : vector<64x128xf32>
    %27 = tpu.matmul %24, %26, %cst_27 {dimension_numbers = #tpu.dot_dimension_numbers<[1], [0], [0], [1], [0, 0, 1, 1], [], []>} : vector<64x128xbf16>, vector<128x128xbf16>, vector<64x128xf32> -> vector<64x128xf32>
    %28 = arith.addf %22, %27 : vector<64x128xf32>
    %c0_28 = arith.constant 0 : index
    %c8_29 = arith.constant 8 : index
    %c0_30 = arith.constant 0 : index
    %29 = vector.load %arg3[%c0_28, %c8_29, %c0_30] : memref<1x80x128xbf16, #tpu.memory_space<vmem>>, vector<1x64x128xbf16>
    %30 = vector.shape_cast %29 : vector<1x64x128xbf16> to vector<64x128xbf16>
    %c5 = arith.constant 5 : index
    %c0_31 = arith.constant 0 : index
    %c0_32 = arith.constant 0 : index
    %31 = vector.load %arg4[%c5, %c0_31, %c0_32] : memref<9x128x128xbf16, #tpu.memory_space<vmem>>, vector<1x128x128xbf16>
    %32 = vector.shape_cast %31 : vector<1x128x128xbf16> to vector<128x128xbf16>
    %cst_33 = arith.constant dense<0.000000e+00> : vector<64x128xf32>
    %33 = tpu.matmul %30, %32, %cst_33 {dimension_numbers = #tpu.dot_dimension_numbers<[1], [0], [0], [1], [0, 0, 1, 1], [], []>} : vector<64x128xbf16>, vector<128x128xbf16>, vector<64x128xf32> -> vector<64x128xf32>
    %34 = arith.addf %28, %33 : vector<64x128xf32>
    %c0_34 = arith.constant 0 : index
    %c16 = arith.constant 16 : index
    %c0_35 = arith.constant 0 : index
    %35 = vector.load %arg1[%c0_34, %c16, %c0_35] : memref<1x80x128xbf16, #tpu.memory_space<vmem>>, vector<1x64x128xbf16>
    %36 = vector.shape_cast %35 : vector<1x64x128xbf16> to vector<64x128xbf16>
    %c6 = arith.constant 6 : index
    %c0_36 = arith.constant 0 : index
    %c0_37 = arith.constant 0 : index
    %37 = vector.load %arg4[%c6, %c0_36, %c0_37] : memref<9x128x128xbf16, #tpu.memory_space<vmem>>, vector<1x128x128xbf16>
    %38 = vector.shape_cast %37 : vector<1x128x128xbf16> to vector<128x128xbf16>
    %cst_38 = arith.constant dense<0.000000e+00> : vector<64x128xf32>
    %39 = tpu.matmul %36, %38, %cst_38 {dimension_numbers = #tpu.dot_dimension_numbers<[1], [0], [0], [1], [0, 0, 1, 1], [], []>} : vector<64x128xbf16>, vector<128x128xbf16>, vector<64x128xf32> -> vector<64x128xf32>
    %40 = arith.addf %34, %39 : vector<64x128xf32>
    %c0_39 = arith.constant 0 : index
    %c16_40 = arith.constant 16 : index
    %c0_41 = arith.constant 0 : index
    %41 = vector.load %arg2[%c0_39, %c16_40, %c0_41] : memref<1x80x128xbf16, #tpu.memory_space<vmem>>, vector<1x64x128xbf16>
    %42 = vector.shape_cast %41 : vector<1x64x128xbf16> to vector<64x128xbf16>
    %c7 = arith.constant 7 : index
    %c0_42 = arith.constant 0 : index
    %c0_43 = arith.constant 0 : index
    %43 = vector.load %arg4[%c7, %c0_42, %c0_43] : memref<9x128x128xbf16, #tpu.memory_space<vmem>>, vector<1x128x128xbf16>
    %44 = vector.shape_cast %43 : vector<1x128x128xbf16> to vector<128x128xbf16>
    %cst_44 = arith.constant dense<0.000000e+00> : vector<64x128xf32>
    %45 = tpu.matmul %42, %44, %cst_44 {dimension_numbers = #tpu.dot_dimension_numbers<[1], [0], [0], [1], [0, 0, 1, 1], [], []>} : vector<64x128xbf16>, vector<128x128xbf16>, vector<64x128xf32> -> vector<64x128xf32>
    %46 = arith.addf %40, %45 : vector<64x128xf32>
    %c0_45 = arith.constant 0 : index
    %c16_46 = arith.constant 16 : index
    %c0_47 = arith.constant 0 : index
    %47 = vector.load %arg3[%c0_45, %c16_46, %c0_47] : memref<1x80x128xbf16, #tpu.memory_space<vmem>>, vector<1x64x128xbf16>
    %48 = vector.shape_cast %47 : vector<1x64x128xbf16> to vector<64x128xbf16>
    %c8_48 = arith.constant 8 : index
    %c0_49 = arith.constant 0 : index
    %c0_50 = arith.constant 0 : index
    %49 = vector.load %arg4[%c8_48, %c0_49, %c0_50] : memref<9x128x128xbf16, #tpu.memory_space<vmem>>, vector<1x128x128xbf16>
    %50 = vector.shape_cast %49 : vector<1x128x128xbf16> to vector<128x128xbf16>
    %cst_51 = arith.constant dense<0.000000e+00> : vector<64x128xf32>
    %51 = tpu.matmul %48, %50, %cst_51 {dimension_numbers = #tpu.dot_dimension_numbers<[1], [0], [0], [1], [0, 0, 1, 1], [], []>} : vector<64x128xbf16>, vector<128x128xbf16>, vector<64x128xf32> -> vector<64x128xf32>
    %52 = arith.addf %46, %51 : vector<64x128xf32>
    %c0_52 = arith.constant 0 : index
    %c0_53 = arith.constant 0 : index
    %53 = vector.load %arg5[%c0_52, %c0_53] : memref<1x128xf32, #tpu.memory_space<vmem>>, vector<1x128xf32>
    %54 = vector.broadcast %53 : vector<1x128xf32> to vector<64x128xf32>
    %55 = arith.addf %52, %54 : vector<64x128xf32>
    %cst_54 = arith.constant 0.000000e+00 : f32
    %56 = vector.broadcast %cst_54 : f32 to vector<64x128xf32>
    %57 = arith.maximumf %55, %56 : vector<64x128xf32>
    %58 = arith.truncf %57 : vector<64x128xf32> to vector<64x128xbf16>
    %c0_55 = arith.constant 0 : index
    %c0_56 = arith.constant 0 : index
    %c0_57 = arith.constant 0 : index
    %59 = vector.load %arg6[%c0_55, %c0_56, %c0_57] : memref<1x64x128xbf16, #tpu.memory_space<vmem>>, vector<1x64x128xbf16>
    %60 = vector.shape_cast %59 : vector<1x64x128xbf16> to vector<64x128xbf16>
    %61 = vector.shape_cast %58 : vector<64x128xbf16> to vector<1x64x128xbf16>
    tpu.vector_store %arg6[%c0_55, %c0_56, %c0_57], %61 {strides = array<i32>} : memref<1x64x128xbf16, #tpu.memory_space<vmem>>, vector<1x64x128xbf16>,
    return
  }
  func.func @transform_0(%arg0: i32) -> (i32, i32, i32) {
    %c0_i32 = arith.constant 0 : i32
    %c0_i32_0 = arith.constant 0 : i32
    %c0_i32_1 = arith.constant 0 : i32
    return %arg0, %c0_i32, %c0_i32_0 : i32, i32, i32
  }
  func.func @transform_1(%arg0: i32) -> (i32, i32, i32) {
    %c0_i32 = arith.constant 0 : i32
    %c0_i32_0 = arith.constant 0 : i32
    %c0_i32_1 = arith.constant 0 : i32
    return %arg0, %c0_i32, %c0_i32_0 : i32, i32, i32
  }
  func.func @transform_2(%arg0: i32) -> (i32, i32, i32) {
    %c0_i32 = arith.constant 0 : i32
    %c0_i32_0 = arith.constant 0 : i32
    %c0_i32_1 = arith.constant 0 : i32
    return %arg0, %c0_i32, %c0_i32_0 : i32, i32, i32
  }
  func.func @transform_3(%arg0: i32) -> (i32, i32, i32) {
    %c0_i32 = arith.constant 0 : i32
    %c0_i32_0 = arith.constant 0 : i32
    %c0_i32_1 = arith.constant 0 : i32
    %c0_i32_2 = arith.constant 0 : i32
    return %c0_i32, %c0_i32_0, %c0_i32_1 : i32, i32, i32
  }
  func.func @transform_4(%arg0: i32) -> (i32, i32) {
    %c0_i32 = arith.constant 0 : i32
    %c0_i32_0 = arith.constant 0 : i32
    %c0_i32_1 = arith.constant 0 : i32
    return %c0_i32, %c0_i32_0 : i32, i32
  }
  func.func @transform_5(%arg0: i32) -> (i32, i32, i32) {
    %c0_i32 = arith.constant 0 : i32
    %c0_i32_0 = arith.constant 0 : i32
    %c0_i32_1 = arith.constant 0 : i32
    return %arg0, %c0_i32, %c0_i32_0 : i32, i32, i32
  }
}

module attributes {stable_mosaic.version = 11 : i64} {
  func.func @_conv3x3_image_kernel(%arg0: i32, %arg1: memref<1x24x128xbf16, #tpu.memory_space<vmem>>, %arg2: memref<1x24x128xbf16, #tpu.memory_space<vmem>>, %arg3: memref<1x24x128xbf16, #tpu.memory_space<vmem>>, %arg4: memref<9x128x256xbf16, #tpu.memory_space<vmem>>, %arg5: memref<1x256xf32, #tpu.memory_space<vmem>>, %arg6: memref<1x16x256xbf16, #tpu.memory_space<vmem>>) attributes {dimension_semantics = [#tpu.dimension_semantics<parallel>], iteration_bounds = array<i64: 4>, scalar_prefetch = 0 : i64, scratch_operands = 0 : i64, tpu.core_type = #tpu.core_type<tc>, window_params = [{transform_indices = @transform_0, window_bounds = array<i64: 1, 24, 128>}, {transform_indices = @transform_1, window_bounds = array<i64: 1, 24, 128>}, {transform_indices = @transform_2, window_bounds = array<i64: 1, 24, 128>}, {pipeline_mode = #tpu.pipeline_mode<synchronous>, transform_indices = @transform_3, window_bounds = array<i64: 9, 128, 256>}, {pipeline_mode = #tpu.pipeline_mode<synchronous>, transform_indices = @transform_4, window_bounds = array<i64: 1, 256>}, {transform_indices = @transform_5, window_bounds = array<i64: 1, 16, 256>}]} {
    %c0 = arith.constant 0 : index
    %c0_0 = arith.constant 0 : index
    %c0_1 = arith.constant 0 : index
    %0 = vector.load %arg1[%c0, %c0_0, %c0_1] : memref<1x24x128xbf16, #tpu.memory_space<vmem>>, vector<1x16x128xbf16>
    %1 = vector.shape_cast %0 : vector<1x16x128xbf16> to vector<16x128xbf16>
    %c0_2 = arith.constant 0 : index
    %c0_3 = arith.constant 0 : index
    %c0_4 = arith.constant 0 : index
    %2 = vector.load %arg4[%c0_2, %c0_3, %c0_4] : memref<9x128x256xbf16, #tpu.memory_space<vmem>>, vector<1x128x256xbf16>
    %3 = vector.shape_cast %2 : vector<1x128x256xbf16> to vector<128x256xbf16>
    %cst = arith.constant dense<0.000000e+00> : vector<16x256xf32>
    %4 = tpu.matmul %1, %3, %cst {dimension_numbers = #tpu.dot_dimension_numbers<[1], [0], [0], [1], [0, 0, 1, 1], [], []>} : vector<16x128xbf16>, vector<128x256xbf16>, vector<16x256xf32> -> vector<16x256xf32>
    %c0_5 = arith.constant 0 : index
    %c0_6 = arith.constant 0 : index
    %c0_7 = arith.constant 0 : index
    %5 = vector.load %arg2[%c0_5, %c0_6, %c0_7] : memref<1x24x128xbf16, #tpu.memory_space<vmem>>, vector<1x16x128xbf16>
    %6 = vector.shape_cast %5 : vector<1x16x128xbf16> to vector<16x128xbf16>
    %c1 = arith.constant 1 : index
    %c0_8 = arith.constant 0 : index
    %c0_9 = arith.constant 0 : index
    %7 = vector.load %arg4[%c1, %c0_8, %c0_9] : memref<9x128x256xbf16, #tpu.memory_space<vmem>>, vector<1x128x256xbf16>
    %8 = vector.shape_cast %7 : vector<1x128x256xbf16> to vector<128x256xbf16>
    %cst_10 = arith.constant dense<0.000000e+00> : vector<16x256xf32>
    %9 = tpu.matmul %6, %8, %cst_10 {dimension_numbers = #tpu.dot_dimension_numbers<[1], [0], [0], [1], [0, 0, 1, 1], [], []>} : vector<16x128xbf16>, vector<128x256xbf16>, vector<16x256xf32> -> vector<16x256xf32>
    %10 = arith.addf %4, %9 : vector<16x256xf32>
    %c0_11 = arith.constant 0 : index
    %c0_12 = arith.constant 0 : index
    %c0_13 = arith.constant 0 : index
    %11 = vector.load %arg3[%c0_11, %c0_12, %c0_13] : memref<1x24x128xbf16, #tpu.memory_space<vmem>>, vector<1x16x128xbf16>
    %12 = vector.shape_cast %11 : vector<1x16x128xbf16> to vector<16x128xbf16>
    %c2 = arith.constant 2 : index
    %c0_14 = arith.constant 0 : index
    %c0_15 = arith.constant 0 : index
    %13 = vector.load %arg4[%c2, %c0_14, %c0_15] : memref<9x128x256xbf16, #tpu.memory_space<vmem>>, vector<1x128x256xbf16>
    %14 = vector.shape_cast %13 : vector<1x128x256xbf16> to vector<128x256xbf16>
    %cst_16 = arith.constant dense<0.000000e+00> : vector<16x256xf32>
    %15 = tpu.matmul %12, %14, %cst_16 {dimension_numbers = #tpu.dot_dimension_numbers<[1], [0], [0], [1], [0, 0, 1, 1], [], []>} : vector<16x128xbf16>, vector<128x256xbf16>, vector<16x256xf32> -> vector<16x256xf32>
    %16 = arith.addf %10, %15 : vector<16x256xf32>
    %c0_17 = arith.constant 0 : index
    %c4 = arith.constant 4 : index
    %c0_18 = arith.constant 0 : index
    %17 = vector.load %arg1[%c0_17, %c4, %c0_18] : memref<1x24x128xbf16, #tpu.memory_space<vmem>>, vector<1x16x128xbf16>
    %18 = vector.shape_cast %17 : vector<1x16x128xbf16> to vector<16x128xbf16>
    %c3 = arith.constant 3 : index
    %c0_19 = arith.constant 0 : index
    %c0_20 = arith.constant 0 : index
    %19 = vector.load %arg4[%c3, %c0_19, %c0_20] : memref<9x128x256xbf16, #tpu.memory_space<vmem>>, vector<1x128x256xbf16>
    %20 = vector.shape_cast %19 : vector<1x128x256xbf16> to vector<128x256xbf16>
    %cst_21 = arith.constant dense<0.000000e+00> : vector<16x256xf32>
    %21 = tpu.matmul %18, %20, %cst_21 {dimension_numbers = #tpu.dot_dimension_numbers<[1], [0], [0], [1], [0, 0, 1, 1], [], []>} : vector<16x128xbf16>, vector<128x256xbf16>, vector<16x256xf32> -> vector<16x256xf32>
    %22 = arith.addf %16, %21 : vector<16x256xf32>
    %c0_22 = arith.constant 0 : index
    %c4_23 = arith.constant 4 : index
    %c0_24 = arith.constant 0 : index
    %23 = vector.load %arg2[%c0_22, %c4_23, %c0_24] : memref<1x24x128xbf16, #tpu.memory_space<vmem>>, vector<1x16x128xbf16>
    %24 = vector.shape_cast %23 : vector<1x16x128xbf16> to vector<16x128xbf16>
    %c4_25 = arith.constant 4 : index
    %c0_26 = arith.constant 0 : index
    %c0_27 = arith.constant 0 : index
    %25 = vector.load %arg4[%c4_25, %c0_26, %c0_27] : memref<9x128x256xbf16, #tpu.memory_space<vmem>>, vector<1x128x256xbf16>
    %26 = vector.shape_cast %25 : vector<1x128x256xbf16> to vector<128x256xbf16>
    %cst_28 = arith.constant dense<0.000000e+00> : vector<16x256xf32>
    %27 = tpu.matmul %24, %26, %cst_28 {dimension_numbers = #tpu.dot_dimension_numbers<[1], [0], [0], [1], [0, 0, 1, 1], [], []>} : vector<16x128xbf16>, vector<128x256xbf16>, vector<16x256xf32> -> vector<16x256xf32>
    %28 = arith.addf %22, %27 : vector<16x256xf32>
    %c0_29 = arith.constant 0 : index
    %c4_30 = arith.constant 4 : index
    %c0_31 = arith.constant 0 : index
    %29 = vector.load %arg3[%c0_29, %c4_30, %c0_31] : memref<1x24x128xbf16, #tpu.memory_space<vmem>>, vector<1x16x128xbf16>
    %30 = vector.shape_cast %29 : vector<1x16x128xbf16> to vector<16x128xbf16>
    %c5 = arith.constant 5 : index
    %c0_32 = arith.constant 0 : index
    %c0_33 = arith.constant 0 : index
    %31 = vector.load %arg4[%c5, %c0_32, %c0_33] : memref<9x128x256xbf16, #tpu.memory_space<vmem>>, vector<1x128x256xbf16>
    %32 = vector.shape_cast %31 : vector<1x128x256xbf16> to vector<128x256xbf16>
    %cst_34 = arith.constant dense<0.000000e+00> : vector<16x256xf32>
    %33 = tpu.matmul %30, %32, %cst_34 {dimension_numbers = #tpu.dot_dimension_numbers<[1], [0], [0], [1], [0, 0, 1, 1], [], []>} : vector<16x128xbf16>, vector<128x256xbf16>, vector<16x256xf32> -> vector<16x256xf32>
    %34 = arith.addf %28, %33 : vector<16x256xf32>
    %c0_35 = arith.constant 0 : index
    %c8 = arith.constant 8 : index
    %c0_36 = arith.constant 0 : index
    %35 = vector.load %arg1[%c0_35, %c8, %c0_36] : memref<1x24x128xbf16, #tpu.memory_space<vmem>>, vector<1x16x128xbf16>
    %36 = vector.shape_cast %35 : vector<1x16x128xbf16> to vector<16x128xbf16>
    %c6 = arith.constant 6 : index
    %c0_37 = arith.constant 0 : index
    %c0_38 = arith.constant 0 : index
    %37 = vector.load %arg4[%c6, %c0_37, %c0_38] : memref<9x128x256xbf16, #tpu.memory_space<vmem>>, vector<1x128x256xbf16>
    %38 = vector.shape_cast %37 : vector<1x128x256xbf16> to vector<128x256xbf16>
    %cst_39 = arith.constant dense<0.000000e+00> : vector<16x256xf32>
    %39 = tpu.matmul %36, %38, %cst_39 {dimension_numbers = #tpu.dot_dimension_numbers<[1], [0], [0], [1], [0, 0, 1, 1], [], []>} : vector<16x128xbf16>, vector<128x256xbf16>, vector<16x256xf32> -> vector<16x256xf32>
    %40 = arith.addf %34, %39 : vector<16x256xf32>
    %c0_40 = arith.constant 0 : index
    %c8_41 = arith.constant 8 : index
    %c0_42 = arith.constant 0 : index
    %41 = vector.load %arg2[%c0_40, %c8_41, %c0_42] : memref<1x24x128xbf16, #tpu.memory_space<vmem>>, vector<1x16x128xbf16>
    %42 = vector.shape_cast %41 : vector<1x16x128xbf16> to vector<16x128xbf16>
    %c7 = arith.constant 7 : index
    %c0_43 = arith.constant 0 : index
    %c0_44 = arith.constant 0 : index
    %43 = vector.load %arg4[%c7, %c0_43, %c0_44] : memref<9x128x256xbf16, #tpu.memory_space<vmem>>, vector<1x128x256xbf16>
    %44 = vector.shape_cast %43 : vector<1x128x256xbf16> to vector<128x256xbf16>
    %cst_45 = arith.constant dense<0.000000e+00> : vector<16x256xf32>
    %45 = tpu.matmul %42, %44, %cst_45 {dimension_numbers = #tpu.dot_dimension_numbers<[1], [0], [0], [1], [0, 0, 1, 1], [], []>} : vector<16x128xbf16>, vector<128x256xbf16>, vector<16x256xf32> -> vector<16x256xf32>
    %46 = arith.addf %40, %45 : vector<16x256xf32>
    %c0_46 = arith.constant 0 : index
    %c8_47 = arith.constant 8 : index
    %c0_48 = arith.constant 0 : index
    %47 = vector.load %arg3[%c0_46, %c8_47, %c0_48] : memref<1x24x128xbf16, #tpu.memory_space<vmem>>, vector<1x16x128xbf16>
    %48 = vector.shape_cast %47 : vector<1x16x128xbf16> to vector<16x128xbf16>
    %c8_49 = arith.constant 8 : index
    %c0_50 = arith.constant 0 : index
    %c0_51 = arith.constant 0 : index
    %49 = vector.load %arg4[%c8_49, %c0_50, %c0_51] : memref<9x128x256xbf16, #tpu.memory_space<vmem>>, vector<1x128x256xbf16>
    %50 = vector.shape_cast %49 : vector<1x128x256xbf16> to vector<128x256xbf16>
    %cst_52 = arith.constant dense<0.000000e+00> : vector<16x256xf32>
    %51 = tpu.matmul %48, %50, %cst_52 {dimension_numbers = #tpu.dot_dimension_numbers<[1], [0], [0], [1], [0, 0, 1, 1], [], []>} : vector<16x128xbf16>, vector<128x256xbf16>, vector<16x256xf32> -> vector<16x256xf32>
    %52 = arith.addf %46, %51 : vector<16x256xf32>
    %c0_53 = arith.constant 0 : index
    %c0_54 = arith.constant 0 : index
    %53 = vector.load %arg5[%c0_53, %c0_54] : memref<1x256xf32, #tpu.memory_space<vmem>>, vector<1x256xf32>
    %54 = vector.broadcast %53 : vector<1x256xf32> to vector<16x256xf32>
    %55 = arith.addf %52, %54 : vector<16x256xf32>
    %cst_55 = arith.constant 0.000000e+00 : f32
    %56 = vector.broadcast %cst_55 : f32 to vector<16x256xf32>
    %57 = arith.maximumf %55, %56 : vector<16x256xf32>
    %58 = arith.truncf %57 : vector<16x256xf32> to vector<16x256xbf16>
    %c0_56 = arith.constant 0 : index
    %c0_57 = arith.constant 0 : index
    %c0_58 = arith.constant 0 : index
    %59 = vector.load %arg6[%c0_56, %c0_57, %c0_58] : memref<1x16x256xbf16, #tpu.memory_space<vmem>>, vector<1x16x256xbf16>
    %60 = vector.shape_cast %59 : vector<1x16x256xbf16> to vector<16x256xbf16>
    %61 = vector.shape_cast %58 : vector<16x256xbf16> to vector<1x16x256xbf16>
    tpu.vector_store %arg6[%c0_56, %c0_57, %c0_58], %61 {strides = array<i32>} : memref<1x16x256xbf16, #tpu.memory_space<vmem>>, vector<1x16x256xbf16>,
    return
  }
  func.func @transform_0(%arg0: i32) -> (i32, i32, i32) {
    %c0_i32 = arith.constant 0 : i32
    %c0_i32_0 = arith.constant 0 : i32
    %c0_i32_1 = arith.constant 0 : i32
    return %arg0, %c0_i32, %c0_i32_0 : i32, i32, i32
  }
  func.func @transform_1(%arg0: i32) -> (i32, i32, i32) {
    %c0_i32 = arith.constant 0 : i32
    %c0_i32_0 = arith.constant 0 : i32
    %c0_i32_1 = arith.constant 0 : i32
    return %arg0, %c0_i32, %c0_i32_0 : i32, i32, i32
  }
  func.func @transform_2(%arg0: i32) -> (i32, i32, i32) {
    %c0_i32 = arith.constant 0 : i32
    %c0_i32_0 = arith.constant 0 : i32
    %c0_i32_1 = arith.constant 0 : i32
    return %arg0, %c0_i32, %c0_i32_0 : i32, i32, i32
  }
  func.func @transform_3(%arg0: i32) -> (i32, i32, i32) {
    %c0_i32 = arith.constant 0 : i32
    %c0_i32_0 = arith.constant 0 : i32
    %c0_i32_1 = arith.constant 0 : i32
    %c0_i32_2 = arith.constant 0 : i32
    return %c0_i32, %c0_i32_0, %c0_i32_1 : i32, i32, i32
  }
  func.func @transform_4(%arg0: i32) -> (i32, i32) {
    %c0_i32 = arith.constant 0 : i32
    %c0_i32_0 = arith.constant 0 : i32
    %c0_i32_1 = arith.constant 0 : i32
    return %c0_i32, %c0_i32_0 : i32, i32
  }
  func.func @transform_5(%arg0: i32) -> (i32, i32, i32) {
    %c0_i32 = arith.constant 0 : i32
    %c0_i32_0 = arith.constant 0 : i32
    %c0_i32_1 = arith.constant 0 : i32
    return %arg0, %c0_i32, %c0_i32_0 : i32, i32, i32
  }
}

module attributes {stable_mosaic.version = 11 : i64} {
  func.func @_conv3x3_image_kernel(%arg0: i32, %arg1: memref<1x24x256xbf16, #tpu.memory_space<vmem>>, %arg2: memref<1x24x256xbf16, #tpu.memory_space<vmem>>, %arg3: memref<1x24x256xbf16, #tpu.memory_space<vmem>>, %arg4: memref<9x256x256xbf16, #tpu.memory_space<vmem>>, %arg5: memref<1x256xf32, #tpu.memory_space<vmem>>, %arg6: memref<1x16x256xbf16, #tpu.memory_space<vmem>>) attributes {dimension_semantics = [#tpu.dimension_semantics<parallel>], iteration_bounds = array<i64: 4>, scalar_prefetch = 0 : i64, scratch_operands = 0 : i64, tpu.core_type = #tpu.core_type<tc>, window_params = [{transform_indices = @transform_0, window_bounds = array<i64: 1, 24, 256>}, {transform_indices = @transform_1, window_bounds = array<i64: 1, 24, 256>}, {transform_indices = @transform_2, window_bounds = array<i64: 1, 24, 256>}, {pipeline_mode = #tpu.pipeline_mode<synchronous>, transform_indices = @transform_3, window_bounds = array<i64: 9, 256, 256>}, {pipeline_mode = #tpu.pipeline_mode<synchronous>, transform_indices = @transform_4, window_bounds = array<i64: 1, 256>}, {transform_indices = @transform_5, window_bounds = array<i64: 1, 16, 256>}]} {
    %c0 = arith.constant 0 : index
    %c0_0 = arith.constant 0 : index
    %c0_1 = arith.constant 0 : index
    %0 = vector.load %arg1[%c0, %c0_0, %c0_1] : memref<1x24x256xbf16, #tpu.memory_space<vmem>>, vector<1x16x256xbf16>
    %1 = vector.shape_cast %0 : vector<1x16x256xbf16> to vector<16x256xbf16>
    %c0_2 = arith.constant 0 : index
    %c0_3 = arith.constant 0 : index
    %c0_4 = arith.constant 0 : index
    %2 = vector.load %arg4[%c0_2, %c0_3, %c0_4] : memref<9x256x256xbf16, #tpu.memory_space<vmem>>, vector<1x256x256xbf16>
    %3 = vector.shape_cast %2 : vector<1x256x256xbf16> to vector<256x256xbf16>
    %cst = arith.constant dense<0.000000e+00> : vector<16x256xf32>
    %4 = tpu.matmul %1, %3, %cst {dimension_numbers = #tpu.dot_dimension_numbers<[1], [0], [0], [1], [0, 0, 1, 1], [], []>} : vector<16x256xbf16>, vector<256x256xbf16>, vector<16x256xf32> -> vector<16x256xf32>
    %c0_5 = arith.constant 0 : index
    %c0_6 = arith.constant 0 : index
    %c0_7 = arith.constant 0 : index
    %5 = vector.load %arg2[%c0_5, %c0_6, %c0_7] : memref<1x24x256xbf16, #tpu.memory_space<vmem>>, vector<1x16x256xbf16>
    %6 = vector.shape_cast %5 : vector<1x16x256xbf16> to vector<16x256xbf16>
    %c1 = arith.constant 1 : index
    %c0_8 = arith.constant 0 : index
    %c0_9 = arith.constant 0 : index
    %7 = vector.load %arg4[%c1, %c0_8, %c0_9] : memref<9x256x256xbf16, #tpu.memory_space<vmem>>, vector<1x256x256xbf16>
    %8 = vector.shape_cast %7 : vector<1x256x256xbf16> to vector<256x256xbf16>
    %cst_10 = arith.constant dense<0.000000e+00> : vector<16x256xf32>
    %9 = tpu.matmul %6, %8, %cst_10 {dimension_numbers = #tpu.dot_dimension_numbers<[1], [0], [0], [1], [0, 0, 1, 1], [], []>} : vector<16x256xbf16>, vector<256x256xbf16>, vector<16x256xf32> -> vector<16x256xf32>
    %10 = arith.addf %4, %9 : vector<16x256xf32>
    %c0_11 = arith.constant 0 : index
    %c0_12 = arith.constant 0 : index
    %c0_13 = arith.constant 0 : index
    %11 = vector.load %arg3[%c0_11, %c0_12, %c0_13] : memref<1x24x256xbf16, #tpu.memory_space<vmem>>, vector<1x16x256xbf16>
    %12 = vector.shape_cast %11 : vector<1x16x256xbf16> to vector<16x256xbf16>
    %c2 = arith.constant 2 : index
    %c0_14 = arith.constant 0 : index
    %c0_15 = arith.constant 0 : index
    %13 = vector.load %arg4[%c2, %c0_14, %c0_15] : memref<9x256x256xbf16, #tpu.memory_space<vmem>>, vector<1x256x256xbf16>
    %14 = vector.shape_cast %13 : vector<1x256x256xbf16> to vector<256x256xbf16>
    %cst_16 = arith.constant dense<0.000000e+00> : vector<16x256xf32>
    %15 = tpu.matmul %12, %14, %cst_16 {dimension_numbers = #tpu.dot_dimension_numbers<[1], [0], [0], [1], [0, 0, 1, 1], [], []>} : vector<16x256xbf16>, vector<256x256xbf16>, vector<16x256xf32> -> vector<16x256xf32>
    %16 = arith.addf %10, %15 : vector<16x256xf32>
    %c0_17 = arith.constant 0 : index
    %c4 = arith.constant 4 : index
    %c0_18 = arith.constant 0 : index
    %17 = vector.load %arg1[%c0_17, %c4, %c0_18] : memref<1x24x256xbf16, #tpu.memory_space<vmem>>, vector<1x16x256xbf16>
    %18 = vector.shape_cast %17 : vector<1x16x256xbf16> to vector<16x256xbf16>
    %c3 = arith.constant 3 : index
    %c0_19 = arith.constant 0 : index
    %c0_20 = arith.constant 0 : index
    %19 = vector.load %arg4[%c3, %c0_19, %c0_20] : memref<9x256x256xbf16, #tpu.memory_space<vmem>>, vector<1x256x256xbf16>
    %20 = vector.shape_cast %19 : vector<1x256x256xbf16> to vector<256x256xbf16>
    %cst_21 = arith.constant dense<0.000000e+00> : vector<16x256xf32>
    %21 = tpu.matmul %18, %20, %cst_21 {dimension_numbers = #tpu.dot_dimension_numbers<[1], [0], [0], [1], [0, 0, 1, 1], [], []>} : vector<16x256xbf16>, vector<256x256xbf16>, vector<16x256xf32> -> vector<16x256xf32>
    %22 = arith.addf %16, %21 : vector<16x256xf32>
    %c0_22 = arith.constant 0 : index
    %c4_23 = arith.constant 4 : index
    %c0_24 = arith.constant 0 : index
    %23 = vector.load %arg2[%c0_22, %c4_23, %c0_24] : memref<1x24x256xbf16, #tpu.memory_space<vmem>>, vector<1x16x256xbf16>
    %24 = vector.shape_cast %23 : vector<1x16x256xbf16> to vector<16x256xbf16>
    %c4_25 = arith.constant 4 : index
    %c0_26 = arith.constant 0 : index
    %c0_27 = arith.constant 0 : index
    %25 = vector.load %arg4[%c4_25, %c0_26, %c0_27] : memref<9x256x256xbf16, #tpu.memory_space<vmem>>, vector<1x256x256xbf16>
    %26 = vector.shape_cast %25 : vector<1x256x256xbf16> to vector<256x256xbf16>
    %cst_28 = arith.constant dense<0.000000e+00> : vector<16x256xf32>
    %27 = tpu.matmul %24, %26, %cst_28 {dimension_numbers = #tpu.dot_dimension_numbers<[1], [0], [0], [1], [0, 0, 1, 1], [], []>} : vector<16x256xbf16>, vector<256x256xbf16>, vector<16x256xf32> -> vector<16x256xf32>
    %28 = arith.addf %22, %27 : vector<16x256xf32>
    %c0_29 = arith.constant 0 : index
    %c4_30 = arith.constant 4 : index
    %c0_31 = arith.constant 0 : index
    %29 = vector.load %arg3[%c0_29, %c4_30, %c0_31] : memref<1x24x256xbf16, #tpu.memory_space<vmem>>, vector<1x16x256xbf16>
    %30 = vector.shape_cast %29 : vector<1x16x256xbf16> to vector<16x256xbf16>
    %c5 = arith.constant 5 : index
    %c0_32 = arith.constant 0 : index
    %c0_33 = arith.constant 0 : index
    %31 = vector.load %arg4[%c5, %c0_32, %c0_33] : memref<9x256x256xbf16, #tpu.memory_space<vmem>>, vector<1x256x256xbf16>
    %32 = vector.shape_cast %31 : vector<1x256x256xbf16> to vector<256x256xbf16>
    %cst_34 = arith.constant dense<0.000000e+00> : vector<16x256xf32>
    %33 = tpu.matmul %30, %32, %cst_34 {dimension_numbers = #tpu.dot_dimension_numbers<[1], [0], [0], [1], [0, 0, 1, 1], [], []>} : vector<16x256xbf16>, vector<256x256xbf16>, vector<16x256xf32> -> vector<16x256xf32>
    %34 = arith.addf %28, %33 : vector<16x256xf32>
    %c0_35 = arith.constant 0 : index
    %c8 = arith.constant 8 : index
    %c0_36 = arith.constant 0 : index
    %35 = vector.load %arg1[%c0_35, %c8, %c0_36] : memref<1x24x256xbf16, #tpu.memory_space<vmem>>, vector<1x16x256xbf16>
    %36 = vector.shape_cast %35 : vector<1x16x256xbf16> to vector<16x256xbf16>
    %c6 = arith.constant 6 : index
    %c0_37 = arith.constant 0 : index
    %c0_38 = arith.constant 0 : index
    %37 = vector.load %arg4[%c6, %c0_37, %c0_38] : memref<9x256x256xbf16, #tpu.memory_space<vmem>>, vector<1x256x256xbf16>
    %38 = vector.shape_cast %37 : vector<1x256x256xbf16> to vector<256x256xbf16>
    %cst_39 = arith.constant dense<0.000000e+00> : vector<16x256xf32>
    %39 = tpu.matmul %36, %38, %cst_39 {dimension_numbers = #tpu.dot_dimension_numbers<[1], [0], [0], [1], [0, 0, 1, 1], [], []>} : vector<16x256xbf16>, vector<256x256xbf16>, vector<16x256xf32> -> vector<16x256xf32>
    %40 = arith.addf %34, %39 : vector<16x256xf32>
    %c0_40 = arith.constant 0 : index
    %c8_41 = arith.constant 8 : index
    %c0_42 = arith.constant 0 : index
    %41 = vector.load %arg2[%c0_40, %c8_41, %c0_42] : memref<1x24x256xbf16, #tpu.memory_space<vmem>>, vector<1x16x256xbf16>
    %42 = vector.shape_cast %41 : vector<1x16x256xbf16> to vector<16x256xbf16>
    %c7 = arith.constant 7 : index
    %c0_43 = arith.constant 0 : index
    %c0_44 = arith.constant 0 : index
    %43 = vector.load %arg4[%c7, %c0_43, %c0_44] : memref<9x256x256xbf16, #tpu.memory_space<vmem>>, vector<1x256x256xbf16>
    %44 = vector.shape_cast %43 : vector<1x256x256xbf16> to vector<256x256xbf16>
    %cst_45 = arith.constant dense<0.000000e+00> : vector<16x256xf32>
    %45 = tpu.matmul %42, %44, %cst_45 {dimension_numbers = #tpu.dot_dimension_numbers<[1], [0], [0], [1], [0, 0, 1, 1], [], []>} : vector<16x256xbf16>, vector<256x256xbf16>, vector<16x256xf32> -> vector<16x256xf32>
    %46 = arith.addf %40, %45 : vector<16x256xf32>
    %c0_46 = arith.constant 0 : index
    %c8_47 = arith.constant 8 : index
    %c0_48 = arith.constant 0 : index
    %47 = vector.load %arg3[%c0_46, %c8_47, %c0_48] : memref<1x24x256xbf16, #tpu.memory_space<vmem>>, vector<1x16x256xbf16>
    %48 = vector.shape_cast %47 : vector<1x16x256xbf16> to vector<16x256xbf16>
    %c8_49 = arith.constant 8 : index
    %c0_50 = arith.constant 0 : index
    %c0_51 = arith.constant 0 : index
    %49 = vector.load %arg4[%c8_49, %c0_50, %c0_51] : memref<9x256x256xbf16, #tpu.memory_space<vmem>>, vector<1x256x256xbf16>
    %50 = vector.shape_cast %49 : vector<1x256x256xbf16> to vector<256x256xbf16>
    %cst_52 = arith.constant dense<0.000000e+00> : vector<16x256xf32>
    %51 = tpu.matmul %48, %50, %cst_52 {dimension_numbers = #tpu.dot_dimension_numbers<[1], [0], [0], [1], [0, 0, 1, 1], [], []>} : vector<16x256xbf16>, vector<256x256xbf16>, vector<16x256xf32> -> vector<16x256xf32>
    %52 = arith.addf %46, %51 : vector<16x256xf32>
    %c0_53 = arith.constant 0 : index
    %c0_54 = arith.constant 0 : index
    %53 = vector.load %arg5[%c0_53, %c0_54] : memref<1x256xf32, #tpu.memory_space<vmem>>, vector<1x256xf32>
    %54 = vector.broadcast %53 : vector<1x256xf32> to vector<16x256xf32>
    %55 = arith.addf %52, %54 : vector<16x256xf32>
    %cst_55 = arith.constant 0.000000e+00 : f32
    %56 = vector.broadcast %cst_55 : f32 to vector<16x256xf32>
    %57 = arith.maximumf %55, %56 : vector<16x256xf32>
    %58 = arith.truncf %57 : vector<16x256xf32> to vector<16x256xbf16>
    %c0_56 = arith.constant 0 : index
    %c0_57 = arith.constant 0 : index
    %c0_58 = arith.constant 0 : index
    %59 = vector.load %arg6[%c0_56, %c0_57, %c0_58] : memref<1x16x256xbf16, #tpu.memory_space<vmem>>, vector<1x16x256xbf16>
    %60 = vector.shape_cast %59 : vector<1x16x256xbf16> to vector<16x256xbf16>
    %61 = vector.shape_cast %58 : vector<16x256xbf16> to vector<1x16x256xbf16>
    tpu.vector_store %arg6[%c0_56, %c0_57, %c0_58], %61 {strides = array<i32>} : memref<1x16x256xbf16, #tpu.memory_space<vmem>>, vector<1x16x256xbf16>,
    return
  }
  func.func @transform_0(%arg0: i32) -> (i32, i32, i32) {
    %c0_i32 = arith.constant 0 : i32
    %c0_i32_0 = arith.constant 0 : i32
    %c0_i32_1 = arith.constant 0 : i32
    return %arg0, %c0_i32, %c0_i32_0 : i32, i32, i32
  }
  func.func @transform_1(%arg0: i32) -> (i32, i32, i32) {
    %c0_i32 = arith.constant 0 : i32
    %c0_i32_0 = arith.constant 0 : i32
    %c0_i32_1 = arith.constant 0 : i32
    return %arg0, %c0_i32, %c0_i32_0 : i32, i32, i32
  }
  func.func @transform_2(%arg0: i32) -> (i32, i32, i32) {
    %c0_i32 = arith.constant 0 : i32
    %c0_i32_0 = arith.constant 0 : i32
    %c0_i32_1 = arith.constant 0 : i32
    return %arg0, %c0_i32, %c0_i32_0 : i32, i32, i32
  }
  func.func @transform_3(%arg0: i32) -> (i32, i32, i32) {
    %c0_i32 = arith.constant 0 : i32
    %c0_i32_0 = arith.constant 0 : i32
    %c0_i32_1 = arith.constant 0 : i32
    %c0_i32_2 = arith.constant 0 : i32
    return %c0_i32, %c0_i32_0, %c0_i32_1 : i32, i32, i32
  }
  func.func @transform_4(%arg0: i32) -> (i32, i32) {
    %c0_i32 = arith.constant 0 : i32
    %c0_i32_0 = arith.constant 0 : i32
    %c0_i32_1 = arith.constant 0 : i32
    return %c0_i32, %c0_i32_0 : i32, i32
  }
  func.func @transform_5(%arg0: i32) -> (i32, i32, i32) {
    %c0_i32 = arith.constant 0 : i32
    %c0_i32_0 = arith.constant 0 : i32
    %c0_i32_1 = arith.constant 0 : i32
    return %arg0, %c0_i32, %c0_i32_0 : i32, i32, i32
  }
}

module attributes {stable_mosaic.version = 11 : i64} {
  func.func @_l1_mean_kernel(%arg0: i32, %arg1: memref<32x256xbf16, #tpu.memory_space<vmem>>, %arg2: memref<32x256xbf16, #tpu.memory_space<vmem>>, %arg3: memref<1x1xf32, #tpu.memory_space<vmem>>, %arg4: memref<1x1xf32, #tpu.memory_space<vmem>>) attributes {dimension_semantics = [#tpu.dimension_semantics<arbitrary>], iteration_bounds = array<i64: 1>, scalar_prefetch = 0 : i64, scratch_operands = 1 : i64, tpu.core_type = #tpu.core_type<tc>, window_params = [{transform_indices = @transform_0, window_bounds = array<i64: 32, 256>}, {transform_indices = @transform_1, window_bounds = array<i64: 32, 256>}, {pipeline_mode = #tpu.pipeline_mode<synchronous>, transform_indices = @transform_2, window_bounds = array<i64: 1, 1>}]} {
    %c0_i32 = arith.constant 0 : i32
    %0 = arith.cmpi eq, %arg0, %c0_i32 : i32
    %1 = arith.extui %0 : i1 to i32
    %c0_i32_0 = arith.constant 0 : i32
    %2 = arith.cmpi ne, %1, %c0_i32_0 : i32
    scf.if %2 {
      %cst_11 = arith.constant 0.000000e+00 : f32
      %19 = vector.broadcast %cst_11 : f32 to vector<1x1xf32>
      %c0_12 = arith.constant 0 : index
      %c0_13 = arith.constant 0 : index
      %20 = vector.load %arg4[%c0_12, %c0_13] : memref<1x1xf32, #tpu.memory_space<vmem>>, vector<1x1xf32>
      tpu.vector_store %arg4[%c0_12, %c0_13], %19 {strides = array<i32>} : memref<1x1xf32, #tpu.memory_space<vmem>>, vector<1x1xf32>,
    } else {
    }
    %c0 = arith.constant 0 : index
    %c0_1 = arith.constant 0 : index
    %3 = vector.load %arg1[%c0, %c0_1] : memref<32x256xbf16, #tpu.memory_space<vmem>>, vector<32x256xbf16>
    %4 = arith.extf %3 : vector<32x256xbf16> to vector<32x256xf32>
    %c0_2 = arith.constant 0 : index
    %c0_3 = arith.constant 0 : index
    %5 = vector.load %arg2[%c0_2, %c0_3] : memref<32x256xbf16, #tpu.memory_space<vmem>>, vector<32x256xbf16>
    %6 = arith.extf %5 : vector<32x256xbf16> to vector<32x256xf32>
    %7 = arith.subf %4, %6 : vector<32x256xf32>
    %8 = math.absf %7 : vector<32x256xf32>
    %cst = arith.constant dense<0.000000e+00> : vector<32xf32>
    %9 = vector.multi_reduction <add>, %8, %cst [1] : vector<32x256xf32> to vector<32xf32>
    %10 = vector.shape_cast %9 : vector<32xf32> to vector<32x1xf32>
    %cst_4 = arith.constant dense<0.000000e+00> : vector<1xf32>
    %11 = vector.multi_reduction <add>, %10, %cst_4 [0] : vector<32x1xf32> to vector<1xf32>
    %12 = vector.shape_cast %11 : vector<1xf32> to vector<1x1xf32>
    %c0_5 = arith.constant 0 : index
    %c0_6 = arith.constant 0 : index
    %13 = vector.load %arg4[%c0_5, %c0_6] : memref<1x1xf32, #tpu.memory_space<vmem>>, vector<1x1xf32>
    %14 = arith.addf %13, %12 : vector<1x1xf32>
    %c0_7 = arith.constant 0 : index
    %c0_8 = arith.constant 0 : index
    %15 = vector.load %arg4[%c0_7, %c0_8] : memref<1x1xf32, #tpu.memory_space<vmem>>, vector<1x1xf32>
    tpu.vector_store %arg4[%c0_7, %c0_8], %14 {strides = array<i32>} : memref<1x1xf32, #tpu.memory_space<vmem>>, vector<1x1xf32>,
    %c0_i32_9 = arith.constant 0 : i32
    %16 = arith.cmpi eq, %arg0, %c0_i32_9 : i32
    %17 = arith.extui %16 : i1 to i32
    %c0_i32_10 = arith.constant 0 : i32
    %18 = arith.cmpi ne, %17, %c0_i32_10 : i32
    scf.if %18 {
      %c0_11 = arith.constant 0 : index
      %c0_12 = arith.constant 0 : index
      %19 = vector.load %arg4[%c0_11, %c0_12] : memref<1x1xf32, #tpu.memory_space<vmem>>, vector<1x1xf32>
      %cst_13 = arith.constant 1.22070313E-4 : f32
      %20 = vector.broadcast %cst_13 : f32 to vector<1x1xf32>
      %21 = arith.mulf %19, %20 : vector<1x1xf32>
      %c0_14 = arith.constant 0 : index
      %c0_15 = arith.constant 0 : index
      %22 = vector.load %arg3[%c0_14, %c0_15] : memref<1x1xf32, #tpu.memory_space<vmem>>, vector<1x1xf32>
      tpu.vector_store %arg3[%c0_14, %c0_15], %21 {strides = array<i32>} : memref<1x1xf32, #tpu.memory_space<vmem>>, vector<1x1xf32>,
    } else {
    }
    return
  }
  func.func @transform_0(%arg0: i32) -> (i32, i32) {
    %c0_i32 = arith.constant 0 : i32
    %c0_i32_0 = arith.constant 0 : i32
    return %arg0, %c0_i32 : i32, i32
  }
  func.func @transform_1(%arg0: i32) -> (i32, i32) {
    %c0_i32 = arith.constant 0 : i32
    %c0_i32_0 = arith.constant 0 : i32
    return %arg0, %c0_i32 : i32, i32
  }
  func.func @transform_2(%arg0: i32) -> (i32, i32) {
    %c0_i32 = arith.constant 0 : i32
    %c0_i32_0 = arith.constant 0 : i32
    %c0_i32_1 = arith.constant 0 : i32
    return %c0_i32, %c0_i32_0 : i32, i32
  }
}

</mosaic_0001>

<bundles_post_ra>
// kernel: perceptual_loss.8
= control target key start
LH: loop header
LB: loop body
LE: loop exit
PB: predicated region body
PF: predicated region fallthrough
CT: control target
= control target key end

     0   :  { %s4024_s18 = smov 0   ;;  %s4624_s0 = inlined_call_operand.vmem [shape: bf16[4,288,3], index: 0, kind: input, shape index: {}]   ;;  %s4625_s1 = inlined_call_operand.vmem [shape: bf16[4,288,3], index: 1, kind: input, shape index: {}]   ;;  %s4626_s2 = inlined_call_operand.vmem [shape: bf16[4,288,3], index: 2, kind: input, shape index: {}]   ;;  %s4627_s3 = inlined_call_operand.vmem [shape: bf16[9,3,128], index: 3, kind: input, shape index: {}]   ;;  %s4628_s4 = inlined_call_operand.vmem [shape: f32[1,128], index: 4, kind: input, shape index: {}]   ;;  %s4629_s5 = inlined_call_operand.vmem [shape: bf16[4,256,128], index: 5, kind: output, shape index: {}]  }
   0x1 LB: > { %s2991_s19 = sadd.s32 4294967295, %s3991_s18   ;;  %p2995_p0 = scmp.ge.s32.totalorder %s3991_s18, 1  ;;  %s3991_s18 = sphi %s4024_s18, %s15_s18  }
   0x2   : > { %p207_p1 = scmp.lt.s32.totalorder %s3991_s18, 5 }
   0x4   : > { %p208_p2 = pnand %p2995_p0, %p207_p1 }
   0x5   : > { %p245_p3 = scmp.lt.s32.totalorder (!%p208_p2), %s2991_s19, 3 }
   0x6   : > { %211 = sbr.rel (%p208_p2) target bundleno = 733 (0x2dd), region = 40 }
   0xb   : > { %v3001_v0 = vld [vmem:[%s4627_s3 + $0x2] sm:$0x3]  ;;  %vm462_vm0 = vcmask 1040384   ;;  %vm463_vm1 = vcmask 1041408   ;;  %v3993_v1 = vmov 65535   ;;  %s4631_s19 = smov (!%p245_p3, %s2991_s19), 3 }
   0xc   : > { %v464_v2 = vsel %vm462_vm0, 4294967295, %v3993_v1  ;;  %v3162_v3 = vld [vmem:[%s4627_s3 + $0x4] sm:$0x3]  ;;  %v3243_v4 = vld [vmem:[%s4627_s3 + $0x6] sm:$0x3]  ;;  %s4050_s30 = smul.u32 144, %s4631_s19 }
   0xd   : > { %v465_v5 = vsel %vm463_vm1, %v464_v2, 0  ;;  %v298_v6 = vld [vmem:[%s4627_s3] sm:$0x3]  ;;  %v3324_v7 = vld [vmem:[%s4627_s3 + $0x8] sm:$0x3]  ;;  %vm413_vm2 = vcmask 23552  }
   0xe   : > { %v467_v8 = vand.u32 %v3001_v0, %v465_v5  ;;  %v941_v9 = vand.u32 %v3162_v3, %v465_v5  ;;  %v1227_v10 = vand.u32 %v3243_v4, %v465_v5  ;;  %v687_v11 = vand.u32 %v465_v5, %v298_v6  ;;  %s4056_s8 = scalar_lea.vmem %s4625_s1, %s4050_s30  ;;  %v3486_v25 = vld [vmem:[%s4627_s3 + $0xc] sm:$0x3]  ;;  %v3567_v26 = vld [vmem:[%s4627_s3 + $0xe] sm:$0x3]  ;;  %v3405_v29 = vld [vmem:[%s4627_s3 + $0xa] sm:$0x3]  ;;  %s4106_s21 = scalar_lea.vmem %s4624_s0, %s4050_s30 }
   0xf   : > { %v1513_v12 = vand.u32 %v3324_v7, %v465_v5  ;;  %v3752_v13 = vld [vmem:[%s4056_s8 + $0x20] sm:$0xff]  ;;  %v3753_v17 = vld [vmem:[%s4056_s8 + $0x28] sm:$0xff]  ;;  %v3754_v21 = vld [vmem:[%s4056_s8 + $0x30] sm:$0xff]  ;;  %v2085_v27 = vand.u32 %v3486_v25, %v465_v5  ;;  %v2371_v28 = vand.u32 %v3567_v26, %v465_v5  ;;  %v1799_v31 = vand.u32 %v3405_v29, %v465_v5  ;;  %s4112_s24 = scalar_lea.vmem %s4626_s2, %s4050_s30  ;;  %s3731_s27 = sshll.u32 %s4631_s19, 7 }
  0x10   : > { %3971 = vmatpush.bf16.msra.mxu1 %v467_v8  ;;  %3972 = vmatpush.bf16.msra.mxu2 %v467_v8  ;;  %v3756_v14 = vld [vmem:[%s4056_s8 + $0x40] sm:$0xff]  ;;  %v3757_v18 = vld [vmem:[%s4056_s8 + $0x48] sm:$0xff]  ;;  %v3758_v22 = vld [vmem:[%s4056_s8 + $0x50] sm:$0xff]  ;;  %s4496_s30 = scalar_lea.vmem %s4629_s5, %s3731_s27 }
  0x11   : > { %3973 = vmatpush.bf16.msra.mxu3 %v467_v8  ;;  %476 = vmatpush.bf16.msra.mxu0 %v467_v8  ;;  %v3760_v15 = vld [vmem:[%s4056_s8 + $0x60] sm:$0xff]  ;;  %v3761_v19 = vld [vmem:[%s4056_s8 + $0x68] sm:$0xff]  ;;  %v3762_v23 = vld [vmem:[%s4056_s8 + $0x70] sm:$0xff] }
  0x12   : > { %v3748_v16 = vld [vmem:[%s4056_s8] sm:$0xff]  ;;  %v3749_v20 = vld [vmem:[%s4056_s8 + $0x8] sm:$0xff]  ;;  %v3750_v24 = vld [vmem:[%s4056_s8 + $0x10] sm:$0xff] }
  0x13   : > { %3070 = vmatmul.msk.bf16.vlgmr.msra.gmra.mxu1 %vm413_vm2, %v3752_v13  ;;  %3074 = vmatmul.msk.bf16.vlgmr.msra.gmra.mxu2 %vm413_vm2, %v3756_v14  ;;  %v3648_v30 = vld [vmem:[%s4627_s3 + $0x10] sm:$0x3]  ;;  %v3755_v33 = vld [vmem:[%s4056_s8 + $0x38] sm:$0xff]  ;;  %v3732_v37 = vld [vmem:[%s4106_s21] sm:$0xff] }
  0x14   : > { %950 = vmatpush.bf16.msrb.mxu2 %v941_v9  ;;  %696 = vmatpush.bf16.msrb.mxu1 %v687_v11  ;;  %v2657_v32 = vand.u32 %v3648_v30, %v465_v5  ;;  %v3759_v34 = vld [vmem:[%s4056_s8 + $0x58] sm:$0xff]  ;;  %v3764_v38 = vld [vmem:[%s4112_s24] sm:$0xff]  ;;  %v3780_v39 = vld [vmem:[%s4106_s21 + $0x8] sm:$0xff] }
  0x15   : > { %1236 = vmatpush.bf16.msrb.mxu3 %v1227_v10  ;;  %1522 = vmatpush.bf16.msrb.mxu0 %v1513_v12  ;;  %v3763_v35 = vld [vmem:[%s4056_s8 + $0x78] sm:$0xff]  ;;  %v3796_v40 = vld [vmem:[%s4056_s8 + $0x8] sm:$0xff]  ;;  %v3781_v43 = vld [vmem:[%s4106_s21 + $0x10] sm:$0xff] }
  0x16   : > { %3078 = vmatmul.msk.bf16.vlgmr.msra.gmra.mxu3 %vm413_vm2, %v3760_v15  ;;  %3066 = vmatmul.msk.bf16.vlgmr.msra.gmra.mxu0 %vm413_vm2, %v3748_v16  ;;  %v3751_v36 = vld [vmem:[%s4056_s8 + $0x18] sm:$0xff]  ;;  %v3733_v41 = vld [vmem:[%s4106_s21 + $0x8] sm:$0xff]  ;;  %v3797_v44 = vld [vmem:[%s4056_s8 + $0x10] sm:$0xff] }
  0x17   : > { %v3765_v42 = vld [vmem:[%s4112_s24 + $0x8] sm:$0xff]  ;;  %v3734_v45 = vld [vmem:[%s4106_s21 + $0x10] sm:$0xff]  ;;  %v3782_v47 = vld [vmem:[%s4106_s21 + $0x18] sm:$0xff] }
  0x18   : > { %2094 = vmatpush.bf16.msra.mxu2 %v2085_v27  ;;  %1808 = vmatpush.bf16.msra.mxu1 %v1799_v31  ;;  %v3766_v46 = vld [vmem:[%s4112_s24 + $0x10] sm:$0xff]  ;;  %v3798_v48 = vld [vmem:[%s4056_s8 + $0x18] sm:$0xff]  ;;  %v3783_v51 = vld [vmem:[%s4106_s21 + $0x20] sm:$0xff] }
  0x19   : > { %2380 = vmatpush.bf16.msra.mxu3 %v2371_v28  ;;  %2666 = vmatpush.bf16.msra.mxu0 %v2657_v32  ;;  %v3735_v49 = vld [vmem:[%s4106_s21 + $0x18] sm:$0xff]  ;;  %v3799_v52 = vld [vmem:[%s4056_s8 + $0x20] sm:$0xff]  ;;  %v3784_v56 = vld [vmem:[%s4106_s21 + $0x28] sm:$0xff] }
  0x1a   : > { %v3767_v50 = vld [vmem:[%s4112_s24 + $0x18] sm:$0xff]  ;;  %v3736_v53 = vld [vmem:[%s4106_s21 + $0x20] sm:$0xff]  ;;  %v3800_v57 = vld [vmem:[%s4056_s8 + $0x28] sm:$0xff] }
  0x1b   : > { %v3768_v54 = vld [vmem:[%s4112_s24 + $0x20] sm:$0xff]  ;;  %v3737_v1 = vld [vmem:[%s4106_s21 + $0x28] sm:$0xff]  ;;  %v3785_v4 = vld [vmem:[%s4106_s21 + $0x30] sm:$0xff] }
  0x1c   : > { %v3769_v2 = vld [vmem:[%s4112_s24 + $0x28] sm:$0xff]  ;;  %v3801_v5 = vld [vmem:[%s4056_s8 + $0x30] sm:$0xff]  ;;  %v3786_v16 = vld [vmem:[%s4106_s21 + $0x38] sm:$0xff] }
  0x1d   : > { %v3738_v13 = vld [vmem:[%s4106_s21 + $0x30] sm:$0xff]  ;;  %v3739_v25 = vld [vmem:[%s4106_s21 + $0x38] sm:$0xff]  ;;  %v3787_v28 = vld [vmem:[%s4106_s21 + $0x40] sm:$0xff] }
  0x1e   : > { %v3770_v14 = vld [vmem:[%s4112_s24 + $0x30] sm:$0xff]  ;;  %v3771_v26 = vld [vmem:[%s4112_s24 + $0x38] sm:$0xff]  ;;  %v3803_v29 = vld [vmem:[%s4056_s8 + $0x40] sm:$0xff] }
  0x23   : > { %3071 = vmatmul.msk.bf16.gmra.mxu1 %vm413_vm2, %v3753_v17  ;;  %3075 = vmatmul.msk.bf16.gmra.mxu2 %vm413_vm2, %v3757_v18  ;;  %v3802_v17 = vld [vmem:[%s4056_s8 + $0x38] sm:$0xff] }
  0x26   : > { %3079 = vmatmul.msk.bf16.gmra.mxu3 %vm413_vm2, %v3761_v19  ;;  %3067 = vmatmul.msk.bf16.gmra.mxu0 %vm413_vm2, %v3749_v20 }
  0x33   : > { %3072 = vmatmul.msk.bf16.gmra.mxu1 %vm413_vm2, %v3754_v21  ;;  %3076 = vmatmul.msk.bf16.gmra.mxu2 %vm413_vm2, %v3758_v22 }
  0x36   : > { %3080 = vmatmul.msk.bf16.gmra.mxu3 %vm413_vm2, %v3762_v23  ;;  %3068 = vmatmul.msk.bf16.gmra.mxu0 %vm413_vm2, %v3750_v24 }
  0x43   : > { %3073 = vmatmul.msk.bf16.gmra.mxu1 %vm413_vm2, %v3755_v33  ;;  %3077 = vmatmul.msk.bf16.gmra.mxu2 %vm413_vm2, %v3759_v34 }
  0x46   : > { %3081 = vmatmul.msk.bf16.gmra.mxu3 %vm413_vm2, %v3763_v35  ;;  %3069 = vmatmul.msk.bf16.gmra.mxu0 %vm413_vm2, %v3751_v36 }
  0x53   : > { %3146 = vmatmul.msk.bf16.vlgmr.msrb.gmra.mxu1 %vm413_vm2, %v3732_v37  ;;  %3227 = vmatmul.msk.bf16.vlgmr.msrb.gmra.mxu2 %vm413_vm2, %v3764_v38  ;;  %v3740_v37 = vld [vmem:[%s4106_s21 + $0x40] sm:$0xff] }
  0x54   : > { %v3772_v38 = vld [vmem:[%s4112_s24 + $0x40] sm:$0xff] }
  0x56   : > { %3308 = vmatmul.msk.bf16.vlgmr.msrb.gmra.mxu3 %vm413_vm2, %v3780_v39  ;;  %3389 = vmatmul.msk.bf16.vlgmr.msrb.gmra.mxu0 %vm413_vm2, %v3796_v40  ;;  %v3788_v40 = vld [vmem:[%s4106_s21 + $0x48] sm:$0xff] }
  0x63   : > { %3147 = vmatmul.msk.bf16.gmra.mxu1 %vm413_vm2, %v3733_v41  ;;  %3228 = vmatmul.msk.bf16.gmra.mxu2 %vm413_vm2, %v3765_v42  ;;  %v3804_v41 = vld [vmem:[%s4056_s8 + $0x48] sm:$0xff] }
  0x66   : > { %3309 = vmatmul.msk.bf16.gmra.mxu3 %vm413_vm2, %v3781_v43  ;;  %3390 = vmatmul.msk.bf16.gmra.mxu0 %vm413_vm2, %v3797_v44 }
  0x73   : > { %3148 = vmatmul.msk.bf16.gmra.mxu1 %vm413_vm2, %v3734_v45  ;;  %3229 = vmatmul.msk.bf16.gmra.mxu2 %vm413_vm2, %v3766_v46 }
  0x76   : > { %3310 = vmatmul.msk.bf16.gmra.mxu3 %vm413_vm2, %v3782_v47  ;;  %3391 = vmatmul.msk.bf16.gmra.mxu0 %vm413_vm2, %v3798_v48 }
  0x83   : > { %3149 = vmatmul.msk.bf16.gmra.mxu1 %vm413_vm2, %v3735_v49  ;;  %3230 = vmatmul.msk.bf16.gmra.mxu2 %vm413_vm2, %v3767_v50 }
  0x86   : > { %3311 = vmatmul.msk.bf16.gmra.mxu3 %vm413_vm2, %v3783_v51  ;;  %3392 = vmatmul.msk.bf16.gmra.mxu0 %vm413_vm2, %v3799_v52 }
  0x90   : > { %v4148_v55 = vpop.f32.mrf.mxu1 }
  0x93   : > { %v4152_v58 = vpop.f32.mrf.mxu0  ;;  %3150 = vmatmul.msk.bf16.gmra.mxu1 %vm413_vm2, %v3736_v53  ;;  %3231 = vmatmul.msk.bf16.gmra.mxu2 %vm413_vm2, %v3768_v54 }
  0x96   : > { %3312 = vmatmul.msk.bf16.gmra.mxu3 %vm413_vm2, %v3784_v56  ;;  %3393 = vmatmul.msk.bf16.gmra.mxu0 %vm413_vm2, %v3800_v57  ;;  %v4158_v59 = vpop.f32.mrf.mxu2  ;;  %v3741_v56 = vld [vmem:[%s4106_s21 + $0x48] sm:$0xff] }
  0x97   : > { %v3773_v57 = vld [vmem:[%s4112_s24 + $0x48] sm:$0xff] }
  0x98   : > { %v4162_v61 = vpop.f32.mrf.mxu1 }
  0x99   : > { %v4160_v60 = vpop.f32.mrf.mxu3 }
  0x9b   : > { %v4164_v62 = vpop.f32.mrf.mxu0 }
  0x9e   : > { %v4166_v63 = vpop.f32.mrf.mxu2 }
  0xa0   : > { %v4172_v3 = vpop.f32.mrf.mxu1 }
  0xa1   : > { %v4168_v0 = vpop.f32.mrf.mxu3 }
  0xa3   : > { %v4176_v6 = vpop.f32.mrf.mxu0  ;;  %3151 = vmatmul.msk.bf16.gmra.mxu1 %vm413_vm2, %v3737_v1  ;;  %3232 = vmatmul.msk.bf16.gmra.mxu2 %vm413_vm2, %v3769_v2  ;;  %v3789_v1 = vld [vmem:[%s4106_s21 + $0x50] sm:$0xff] }
  0xa4   : > { %v3805_v2 = vld [vmem:[%s4056_s8 + $0x50] sm:$0xff] }
  0xa6   : > { %3313 = vmatmul.msk.bf16.gmra.mxu3 %vm413_vm2, %v3785_v4  ;;  %3394 = vmatmul.msk.bf16.gmra.mxu0 %vm413_vm2, %v3801_v5  ;;  %v4182_v7 = vpop.f32.mrf.mxu2 }
  0xa8   : > { %v4186_v9 = vpop.f32.mrf.mxu1 }
  0xa9   : > { %v4184_v8 = vpop.f32.mrf.mxu3 }
  0xab   : > { %v4188_v10 = vpop.f32.mrf.mxu0 }
  0xae   : > { %v4190_v11 = vpop.f32.mrf.mxu2 }
  0xb0   : > { %v4196_v15 = vpop.f32.mrf.mxu1 }
  0xb1   : > { %v4192_v12 = vpop.f32.mrf.mxu3 }
  0xb3   : > { %v4200_v18 = vpop.f32.mrf.mxu0  ;;  %3152 = vmatmul.msk.bf16.gmra.mxu1 %vm413_vm2, %v3738_v13  ;;  %3233 = vmatmul.msk.bf16.gmra.mxu2 %vm413_vm2, %v3770_v14 }
  0xb6   : > { %3314 = vmatmul.msk.bf16.gmra.mxu3 %vm413_vm2, %v3786_v16  ;;  %3395 = vmatmul.msk.bf16.gmra.mxu0 %vm413_vm2, %v3802_v17  ;;  %v4206_v19 = vpop.f32.mrf.mxu2 }
  0xb8   : > { %v4210_v21 = vpop.f32.mrf.mxu1 }
  0xb9   : > { %v4208_v20 = vpop.f32.mrf.mxu3 }
  0xbb   : > { %v4212_v22 = vpop.f32.mrf.mxu0 }
  0xbe   : > { %v4214_v23 = vpop.f32.mrf.mxu2 }
  0xc0   : > { %v4220_v27 = vpop.f32.mrf.mxu1 }
  0xc1   : > { %v4216_v24 = vpop.f32.mrf.mxu3 }
  0xc3   : > { %v4224_v30 = vpop.f32.mrf.mxu0  ;;  %3153 = vmatmul.msk.bf16.gmra.mxu1 %vm413_vm2, %v3739_v25  ;;  %3234 = vmatmul.msk.bf16.gmra.mxu2 %vm413_vm2, %v3771_v26 }
  0xc6   : > { %3315 = vmatmul.msk.bf16.gmra.mxu3 %vm413_vm2, %v3787_v28  ;;  %3396 = vmatmul.msk.bf16.gmra.mxu0 %vm413_vm2, %v3803_v29  ;;  %v4230_v31 = vpop.f32.mrf.mxu2 }
  0xc8   : > { %v4234_v33 = vpop.f32.mrf.mxu1 }
  0xc9   : > { %v4232_v32 = vpop.f32.mrf.mxu3 }
  0xcb   : > { %v4236_v34 = vpop.f32.mrf.mxu0 }
  0xce   : > { %v4238_v35 = vpop.f32.mrf.mxu2 }
  0xd0   : > { %v698_v39 = vpop.f32.mrf.mxu1 }
  0xd1   : > { %v4240_v36 = vpop.f32.mrf.mxu3  ;;  %v699_v42 = vadd.f32 %v698_v39, %v4152_v58 }
  0xd3   : > { %v1524_v43 = vpop.f32.mrf.mxu0  ;;  %3154 = vmatmul.msk.bf16.gmra.mxu1 %vm413_vm2, %v3740_v37  ;;  %3235 = vmatmul.msk.bf16.gmra.mxu2 %vm413_vm2, %v3772_v38 }
  0xd6   : > { %3316 = vmatmul.msk.bf16.gmra.mxu3 %vm413_vm2, %v3788_v40  ;;  %3397 = vmatmul.msk.bf16.gmra.mxu0 %vm413_vm2, %v3804_v41  ;;  %v952_v44 = vpop.f32.mrf.mxu2  ;;  %v3742_v40 = vld [vmem:[%s4106_s21 + $0x50] sm:$0xff] }
  0xd7   : > { %v1032_v45 = vadd.f32 %v952_v44, %v699_v42  ;;  %v3774_v41 = vld [vmem:[%s4112_s24 + $0x50] sm:$0xff]  ;;  %v3806_v44 = vld [vmem:[%s4056_s8 + $0x58] sm:$0xff] }
  0xd8   : > { %v700_v47 = vpop.f32.mrf.mxu1 }
  0xd9   : > { %v1238_v46 = vpop.f32.mrf.mxu3  ;;  %v701_v49 = vadd.f32 %v700_v47, %v4164_v62 }
  0xda   : > { %v1318_v48 = vadd.f32 %v1238_v46, %v1032_v45 }
  0xdb   : > { %v1526_v50 = vpop.f32.mrf.mxu0 }
  0xdc   : > { %v4252_v51 = vadd.f32 %v1524_v43, %v1318_v48  ;;  %v3790_v43 = vld [vmem:[%s4106_s21 + $0x58] sm:$0xff] }
  0xde   : > { %v954_v52 = vpop.f32.mrf.mxu2 }
  0xdf   : > { %v1033_v53 = vadd.f32 %v954_v52, %v701_v49 }
  0xe0   : > { %v703_v58 = vpop.f32.mrf.mxu1 }
  0xe1   : > { %v1240_v54 = vpop.f32.mrf.mxu3  ;;  %v704_v5 = vadd.f32 %v703_v58, %v4176_v6 }
  0xe2   : > { %v1319_v4 = vadd.f32 %v1240_v54, %v1033_v53 }
  0xe3   : > { %v1529_v13 = vpop.f32.mrf.mxu0  ;;  %3155 = vmatmul.msk.bf16.gmra.mxu1 %vm413_vm2, %v3741_v56  ;;  %3236 = vmatmul.msk.bf16.gmra.mxu2 %vm413_vm2, %v3773_v57 }
  0xe4   : > { %v4261_v62 = vadd.f32 %v1526_v50, %v1319_v4  ;;  %v3775_v4 = vld [vmem:[%s4112_s24 + $0x58] sm:$0xff] }
  0xe6   : > { %3317 = vmatmul.msk.bf16.gmra.mxu3 %vm413_vm2, %v3789_v1  ;;  %3398 = vmatmul.msk.bf16.gmra.mxu0 %vm413_vm2, %v3805_v2  ;;  %v957_v14 = vpop.f32.mrf.mxu2  ;;  %v3743_v2 = vld [vmem:[%s4106_s21 + $0x58] sm:$0xff] }
  0xe7   : > { %v1034_v16 = vadd.f32 %v957_v14, %v704_v5  ;;  %v3807_v14 = vld [vmem:[%s4056_s8 + $0x60] sm:$0xff] }
  0xe8   : > { %v705_v25 = vpop.f32.mrf.mxu1 }
  0xe9   : > { %v1243_v17 = vpop.f32.mrf.mxu3  ;;  %v706_v26 = vadd.f32 %v705_v25, %v4188_v10 }
  0xea   : > { %v1320_v6 = vadd.f32 %v1243_v17, %v1034_v16 }
  0xeb   : > { %v1531_v28 = vpop.f32.mrf.mxu0 }
  0xec   : > { %v4266_v29 = vadd.f32 %v1529_v13, %v1320_v6  ;;  %v3791_v13 = vld [vmem:[%s4106_s21 + $0x60] sm:$0xff] }
  0xee   : > { %v959_v37 = vpop.f32.mrf.mxu2 }
  0xef   : > { %v1035_v38 = vadd.f32 %v959_v37, %v706_v26 }
  0xf0   : > { %v708_v42 = vpop.f32.mrf.mxu1 }
  0xf1   : > { %v1245_v39 = vpop.f32.mrf.mxu3  ;;  %v709_v46 = vadd.f32 %v708_v42, %v4200_v18 }
  0xf2   : > { %v1321_v45 = vadd.f32 %v1245_v39, %v1035_v38 }
  0xf3   : > { %v1534_v47 = vpop.f32.mrf.mxu0  ;;  %3156 = vmatmul.msk.bf16.gmra.mxu1 %vm413_vm2, %v3742_v40  ;;  %3237 = vmatmul.msk.bf16.gmra.mxu2 %vm413_vm2, %v3774_v41 }
  0xf4   : > { %v4275_v10 = vadd.f32 %v1531_v28, %v1321_v45  ;;  %v3776_v45 = vld [vmem:[%s4112_s24 + $0x60] sm:$0xff] }
  0xf6   : > { %3318 = vmatmul.msk.bf16.gmra.mxu3 %vm413_vm2, %v3790_v43  ;;  %3399 = vmatmul.msk.bf16.gmra.mxu0 %vm413_vm2, %v3806_v44  ;;  %v962_v48 = vpop.f32.mrf.mxu2  ;;  %v3744_v44 = vld [vmem:[%s4106_s21 + $0x60] sm:$0xff] }
  0xf7   : > { %v1036_v49 = vadd.f32 %v962_v48, %v709_v46  ;;  %v3808_v48 = vld [vmem:[%s4056_s8 + $0x68] sm:$0xff] }
  0xf8   : > { %v710_v52 = vpop.f32.mrf.mxu1 }
  0xf9   : > { %v1248_v50 = vpop.f32.mrf.mxu3  ;;  %v711_v53 = vadd.f32 %v710_v52, %v4212_v22 }
  0xfa   : > { %v1322_v18 = vadd.f32 %v1248_v50, %v1036_v49 }
  0xfb   : > { %v1536_v54 = vpop.f32.mrf.mxu0 }
  0xfc   : > { %v4280_v56 = vadd.f32 %v1534_v47, %v1322_v18  ;;  %v3792_v47 = vld [vmem:[%s4106_s21 + $0x68] sm:$0xff] }
  0xfe   : > { %v964_v57 = vpop.f32.mrf.mxu2 }
  0xff   : > { %v1037_v58 = vadd.f32 %v964_v57, %v711_v53 }
 0x100   : > { %v713_v5 = vpop.f32.mrf.mxu1 }
 0x101   : > { %v1250_v1 = vpop.f32.mrf.mxu3  ;;  %v714_v17 = vadd.f32 %v713_v5, %v4224_v30 }
 0x102   : > { %v1323_v16 = vadd.f32 %v1250_v1, %v1037_v58 }
 0x103   : > { %v1539_v25 = vpop.f32.mrf.mxu0  ;;  %3157 = vmatmul.msk.bf16.gmra.mxu1 %vm413_vm2, %v3743_v2  ;;  %3238 = vmatmul.msk.bf16.gmra.mxu2 %vm413_vm2, %v3775_v4 }
 0x104   : > { %v4289_v22 = vadd.f32 %v1536_v54, %v1323_v16  ;;  %v3745_v16 = vld [vmem:[%s4106_s21 + $0x68] sm:$0xff] }
 0x106   : > { %3319 = vmatmul.msk.bf16.gmra.mxu3 %vm413_vm2, %v3791_v13  ;;  %3400 = vmatmul.msk.bf16.gmra.mxu0 %vm413_vm2, %v3807_v14  ;;  %v967_v6 = vpop.f32.mrf.mxu2 }
 0x107   : > { %v1038_v26 = vadd.f32 %v967_v6, %v714_v17  ;;  %v3777_v17 = vld [vmem:[%s4112_s24 + $0x68] sm:$0xff]  ;;  %v3793_v6 = vld [vmem:[%s4106_s21 + $0x70] sm:$0xff] }
 0x108   : > { %v715_v37 = vpop.f32.mrf.mxu1 }
 0x109   : > { %v1253_v28 = vpop.f32.mrf.mxu3  ;;  %v716_v38 = vadd.f32 %v715_v37, %v4236_v34 }
 0x10a   : > { %v1324_v30 = vadd.f32 %v1253_v28, %v1038_v26  ;;  %v3809_v26 = vld [vmem:[%s4056_s8 + $0x70] sm:$0xff] }
 0x10b   : > { %v1541_v39 = vpop.f32.mrf.mxu0 }
 0x10c   : > { %v4294_v40 = vadd.f32 %v1539_v25, %v1324_v30 }
 0x10e   : > { %v969_v41 = vpop.f32.mrf.mxu2 }
 0x10f   : > { %v1039_v42 = vadd.f32 %v969_v41, %v716_v38 }
 0x110   : > { %v718_v46 = vpop.f32.mrf.mxu1 }
 0x111   : > { %v1255_v43 = vpop.f32.mrf.mxu3  ;;  %v719_v34 = vadd.f32 %v718_v46, %v4148_v55 }
 0x112   : > { %v1325_v49 = vadd.f32 %v1255_v43, %v1039_v42 }
 0x113   : > { %v1544_v50 = vpop.f32.mrf.mxu0  ;;  %3158 = vmatmul.msk.bf16.gmra.mxu1 %vm413_vm2, %v3744_v44  ;;  %3239 = vmatmul.msk.bf16.gmra.mxu2 %vm413_vm2, %v3776_v45 }
 0x114   : > { %v4302_v52 = vadd.f32 %v1541_v39, %v1325_v49  ;;  %v3746_v49 = vld [vmem:[%s4106_s21 + $0x70] sm:$0xff] }
 0x116   : > { %3320 = vmatmul.msk.bf16.gmra.mxu3 %vm413_vm2, %v3792_v47  ;;  %3401 = vmatmul.msk.bf16.gmra.mxu0 %vm413_vm2, %v3808_v48  ;;  %v972_v18 = vpop.f32.mrf.mxu2 }
 0x117   : > { %v1040_v53 = vadd.f32 %v972_v18, %v719_v34  ;;  %v3794_v18 = vld [vmem:[%s4106_s21 + $0x78] sm:$0xff] }
 0x118   : > { %v720_v57 = vpop.f32.mrf.mxu1 }
 0x119   : > { %v1258_v54 = vpop.f32.mrf.mxu3  ;;  %v721_v4 = vadd.f32 %v720_v57, %v4162_v61 }
 0x11a   : > { %v1326_v58 = vadd.f32 %v1258_v54, %v1040_v53  ;;  %v3810_v53 = vld [vmem:[%s4056_s8 + $0x78] sm:$0xff] }
 0x11b   : > { %v1546_v1 = vpop.f32.mrf.mxu0 }
 0x11c   : > { %v4307_v2 = vadd.f32 %v1544_v50, %v1326_v58  ;;  %v3778_v50 = vld [vmem:[%s4112_s24 + $0x70] sm:$0xff] }
 0x11e   : > { %v974_v5 = vpop.f32.mrf.mxu2 }
 0x11f   : > { %v1041_v13 = vadd.f32 %v974_v5, %v721_v4 }
 0x120   : > { %v723_v25 = vpop.f32.mrf.mxu1 }
 0x121   : > { %v1260_v14 = vpop.f32.mrf.mxu3  ;;  %v724_v61 = vadd.f32 %v723_v25, %v4172_v3 }
 0x122   : > { %v1327_v55 = vadd.f32 %v1260_v14, %v1041_v13 }
 0x123   : > { %v1549_v28 = vpop.f32.mrf.mxu0  ;;  %3159 = vmatmul.msk.bf16.gmra.mxu1 %vm413_vm2, %v3745_v16  ;;  %3240 = vmatmul.msk.bf16.gmra.mxu2 %vm413_vm2, %v3777_v17 }
 0x124   : > { %v4316_v37 = vadd.f32 %v1546_v1, %v1327_v55  ;;  %v3747_v55 = vld [vmem:[%s4106_s21 + $0x78] sm:$0xff] }
 0x126   : > { %3321 = vmatmul.msk.bf16.gmra.mxu3 %vm413_vm2, %v3793_v6  ;;  %3402 = vmatmul.msk.bf16.gmra.mxu0 %vm413_vm2, %v3809_v26  ;;  %v977_v30 = vpop.f32.mrf.mxu2 }
 0x127   : > { %v1042_v38 = vadd.f32 %v977_v30, %v724_v61  ;;  %v3795_v30 = vld [vmem:[%s4106_s21 + $0x80] sm:$0xff] }
 0x128   : > { %v725_v41 = vpop.f32.mrf.mxu1 }
 0x129   : > { %v1263_v39 = vpop.f32.mrf.mxu3  ;;  %v726_v45 = vadd.f32 %v725_v41, %v4186_v9 }
 0x12a   : > { %v1328_v42 = vadd.f32 %v1263_v39, %v1042_v38  ;;  %v3811_v38 = vld [vmem:[%s4056_s8 + $0x80] sm:$0xff] }
 0x12b   : > { %v1551_v43 = vpop.f32.mrf.mxu0 }
 0x12c   : > { %v4321_v44 = vadd.f32 %v1549_v28, %v1328_v42  ;;  %v3779_v28 = vld [vmem:[%s4112_s24 + $0x78] sm:$0xff] }
 0x12e   : > { %v979_v46 = vpop.f32.mrf.mxu2 }
 0x12f   : > { %v1043_v47 = vadd.f32 %v979_v46, %v726_v45 }
 0x130   : > { %v728_v34 = vpop.f32.mrf.mxu1 }
 0x131   : > { %v1265_v48 = vpop.f32.mrf.mxu3  ;;  %v729_v9 = vadd.f32 %v728_v34, %v4196_v15 }
 0x132   : > { %v1329_v3 = vadd.f32 %v1265_v48, %v1043_v47 }
 0x133   : > { %v1554_v54 = vpop.f32.mrf.mxu0  ;;  %3160 = vmatmul.msk.bf16.gmra.mxu1 %vm413_vm2, %v3746_v49  ;;  %3241 = vmatmul.msk.bf16.gmra.mxu2 %vm413_vm2, %v3778_v50 }
 0x134   : > { %v4330_v57 = vadd.f32 %v1551_v43, %v1329_v3  ;;  %v3812_v3 = vld [vmem:[%s4112_s24 + $0x8] sm:$0xff] }
 0x136   : > { %3322 = vmatmul.msk.bf16.gmra.mxu3 %vm413_vm2, %v3794_v18  ;;  %3403 = vmatmul.msk.bf16.gmra.mxu0 %vm413_vm2, %v3810_v53  ;;  %v982_v58 = vpop.f32.mrf.mxu2 }
 0x137   : > { %v1044_v1 = vadd.f32 %v982_v58, %v729_v9  ;;  %v3844_v58 = vld [vmem:[%s4056_s8 + $0x10] sm:$0xff] }
 0x138   : > { %v730_v5 = vpop.f32.mrf.mxu1 }
 0x139   : > { %v1268_v4 = vpop.f32.mrf.mxu3  ;;  %v731_v17 = vadd.f32 %v730_v5, %v4210_v21 }
 0x13a   : > { %v1330_v13 = vadd.f32 %v1268_v4, %v1044_v1  ;;  %v3860_v1 = vld [vmem:[%s4112_s24 + $0x10] sm:$0xff] }
 0x13b   : > { %v1556_v14 = vpop.f32.mrf.mxu0 }
 0x13c   : > { %v4335_v16 = vadd.f32 %v1554_v54, %v1330_v13  ;;  %v3828_v54 = vld [vmem:[%s4106_s21 + $0x10] sm:$0xff] }
 0x13e   : > { %v984_v25 = vpop.f32.mrf.mxu2 }
 0x13f   : > { %v1045_v6 = vadd.f32 %v984_v25, %v731_v17 }
 0x140   : > { %v733_v61 = vpop.f32.mrf.mxu1 }
 0x141   : > { %v1270_v26 = vpop.f32.mrf.mxu3  ;;  %v734_v21 = vadd.f32 %v733_v61, %v4220_v27 }
 0x142   : > { %v1331_v15 = vadd.f32 %v1270_v26, %v1045_v6 }
 0x143   : > { %v1559_v39 = vpop.f32.mrf.mxu0  ;;  %3161 = vmatmul.msk.bf16.gmra.mxu1 %vm413_vm2, %v3747_v55  ;;  %3242 = vmatmul.msk.bf16.gmra.mxu2 %vm413_vm2, %v3779_v28 }
 0x144   : > { %v4344_v41 = vadd.f32 %v1556_v14, %v1331_v15  ;;  %v3813_v15 = vld [vmem:[%s4112_s24 + $0x10] sm:$0xff] }
 0x146   : > { %3323 = vmatmul.msk.bf16.gmra.mxu3 %vm413_vm2, %v3795_v30  ;;  %3404 = vmatmul.msk.bf16.gmra.mxu0 %vm413_vm2, %v3811_v38  ;;  %v987_v42 = vpop.f32.mrf.mxu2 }
 0x147   : > { %v1046_v43 = vadd.f32 %v987_v42, %v734_v21  ;;  %v3845_v42 = vld [vmem:[%s4056_s8 + $0x18] sm:$0xff] }
 0x148   : > { %v735_v46 = vpop.f32.mrf.mxu1 }
 0x149   : > { %v1273_v45 = vpop.f32.mrf.mxu3  ;;  %v736_v50 = vadd.f32 %v735_v46, %v4234_v33 }
 0x14a   : > { %v1332_v47 = vadd.f32 %v1273_v45, %v1046_v43  ;;  %v3861_v43 = vld [vmem:[%s4112_s24 + $0x18] sm:$0xff] }
 0x14b   : > { %v1561_v48 = vpop.f32.mrf.mxu0 }
 0x14c   : > { %v4349_v49 = vadd.f32 %v1559_v39, %v1332_v47  ;;  %v3829_v39 = vld [vmem:[%s4106_s21 + $0x18] sm:$0xff] }
 0x14e   : > { %v989_v34 = vpop.f32.mrf.mxu2 }
 0x14f   : > { %v1047_v18 = vadd.f32 %v989_v34, %v736_v50 }
 0x150   : > { %v738_v9 = vpop.f32.mrf.mxu1 }
 0x151   : > { %v1275_v53 = vpop.f32.mrf.mxu3  ;;  %v739_v33 = vadd.f32 %v738_v9, %v4158_v59 }
 0x152   : > { %v1333_v27 = vadd.f32 %v1275_v53, %v1047_v18 }
 0x153   : > { %v1564_v4 = vpop.f32.mrf.mxu0  ;;  %3470 = vmatmul.msk.bf16.vlgmr.msra.gmra.mxu1 %vm413_vm2, %v3812_v3  ;;  %3551 = vmatmul.msk.bf16.vlgmr.msra.gmra.mxu2 %vm413_vm2, %v3828_v54 }
 0x154   : > { %v4358_v5 = vadd.f32 %v1561_v48, %v1333_v27  ;;  %v3814_v27 = vld [vmem:[%s4112_s24 + $0x18] sm:$0xff] }
 0x156   : > { %3632 = vmatmul.msk.bf16.vlgmr.msra.gmra.mxu3 %vm413_vm2, %v3844_v58  ;;  %3713 = vmatmul.msk.bf16.vlgmr.msra.gmra.mxu0 %vm413_vm2, %v3860_v1  ;;  %v992_v13 = vpop.f32.mrf.mxu2 }
 0x157   : > { %v1048_v14 = vadd.f32 %v992_v13, %v739_v33  ;;  %v3846_v13 = vld [vmem:[%s4056_s8 + $0x20] sm:$0xff] }
 0x158   : > { %v740_v25 = vpop.f32.mrf.mxu1 }
 0x159   : > { %v1278_v17 = vpop.f32.mrf.mxu3  ;;  %v741_v28 = vadd.f32 %v740_v25, %v4166_v63 }
 0x15a   : > { %v1334_v6 = vadd.f32 %v1278_v17, %v1048_v14  ;;  %v3862_v14 = vld [vmem:[%s4112_s24 + $0x20] sm:$0xff] }
 0x15b   : > { %v1566_v26 = vpop.f32.mrf.mxu0 }
 0x15c   : > { %v4363_v55 = vadd.f32 %v1564_v4, %v1334_v6  ;;  %v3830_v4 = vld [vmem:[%s4106_s21 + $0x20] sm:$0xff] }
 0x15e   : > { %v994_v61 = vpop.f32.mrf.mxu2 }
 0x15f   : > { %v1049_v30 = vadd.f32 %v994_v61, %v741_v28 }
 0x160   : > { %v743_v21 = vpop.f32.mrf.mxu1 }
 0x161   : > { %v1280_v38 = vpop.f32.mrf.mxu3  ;;  %v744_v63 = vadd.f32 %v743_v21, %v4182_v7 }
 0x162   : > { %v1335_v59 = vadd.f32 %v1280_v38, %v1049_v30 }
 0x163   : > { %v1569_v45 = vpop.f32.mrf.mxu0  ;;  %3471 = vmatmul.msk.bf16.gmra.mxu1 %vm413_vm2, %v3813_v15  ;;  %3552 = vmatmul.msk.bf16.gmra.mxu2 %vm413_vm2, %v3829_v39 }
 0x164   : > { %v4372_v46 = vadd.f32 %v1566_v26, %v1335_v59  ;;  %v3815_v59 = vld [vmem:[%s4112_s24 + $0x20] sm:$0xff] }
 0x166   : > { %3633 = vmatmul.msk.bf16.gmra.mxu3 %vm413_vm2, %v3845_v42  ;;  %3714 = vmatmul.msk.bf16.gmra.mxu0 %vm413_vm2, %v3861_v43  ;;  %v997_v47 = vpop.f32.mrf.mxu2 }
 0x167   : > { %v1050_v48 = vadd.f32 %v997_v47, %v744_v63  ;;  %v3847_v47 = vld [vmem:[%s4056_s8 + $0x28] sm:$0xff] }
 0x168   : > { %v745_v34 = vpop.f32.mrf.mxu1 }
 0x169   : > { %v1283_v50 = vpop.f32.mrf.mxu3  ;;  %v746_v54 = vadd.f32 %v745_v34, %v4190_v11 }
 0x16a   : > { %v1336_v18 = vadd.f32 %v1283_v50, %v1050_v48  ;;  %v3863_v48 = vld [vmem:[%s4112_s24 + $0x28] sm:$0xff] }
 0x16b   : > { %v1571_v53 = vpop.f32.mrf.mxu0 }
 0x16c   : > { %v4377_v3 = vadd.f32 %v1569_v45, %v1336_v18  ;;  %v3831_v45 = vld [vmem:[%s4106_s21 + $0x28] sm:$0xff] }
 0x16e   : > { %v999_v9 = vpop.f32.mrf.mxu2 }
 0x16f   : > { %v1051_v58 = vadd.f32 %v999_v9, %v746_v54 }
 0x170   : > { %v748_v33 = vpop.f32.mrf.mxu1 }
 0x171   : > { %v1285_v1 = vpop.f32.mrf.mxu3  ;;  %v749_v11 = vadd.f32 %v748_v33, %v4206_v19 }
 0x172   : > { %v1337_v7 = vadd.f32 %v1285_v1, %v1051_v58 }
 0x173   : > { %v1574_v17 = vpop.f32.mrf.mxu0  ;;  %3472 = vmatmul.msk.bf16.gmra.mxu1 %vm413_vm2, %v3814_v27  ;;  %3553 = vmatmul.msk.bf16.gmra.mxu2 %vm413_vm2, %v3830_v4 }
 0x174   : > { %v4386_v25 = vadd.f32 %v1571_v53, %v1337_v7  ;;  %v3816_v7 = vld [vmem:[%s4112_s24 + $0x28] sm:$0xff] }
 0x176   : > { %3634 = vmatmul.msk.bf16.gmra.mxu3 %vm413_vm2, %v3846_v13  ;;  %3715 = vmatmul.msk.bf16.gmra.mxu0 %vm413_vm2, %v3862_v14  ;;  %v1002_v6 = vpop.f32.mrf.mxu2 }
 0x177   : > { %v1052_v26 = vadd.f32 %v1002_v6, %v749_v11  ;;  %v3848_v6 = vld [vmem:[%s4056_s8 + $0x30] sm:$0xff] }
 0x178   : > { %v750_v61 = vpop.f32.mrf.mxu1 }
 0x179   : > { %v1288_v28 = vpop.f32.mrf.mxu3  ;;  %v751_v39 = vadd.f32 %v750_v61, %v4214_v23 }
 0x17a   : > { %v1338_v30 = vadd.f32 %v1288_v28, %v1052_v26  ;;  %v3864_v26 = vld [vmem:[%s4112_s24 + $0x30] sm:$0xff] }
 0x17b   : > { %v1576_v38 = vpop.f32.mrf.mxu0 }
 0x17c   : > { %v4391_v15 = vadd.f32 %v1574_v17, %v1338_v30  ;;  %v3832_v17 = vld [vmem:[%s4106_s21 + $0x30] sm:$0xff] }
 0x17e   : > { %v1004_v21 = vpop.f32.mrf.mxu2 }
 0x17f   : > { %v1053_v42 = vadd.f32 %v1004_v21, %v751_v39 }
 0x180   : > { %v753_v63 = vpop.f32.mrf.mxu1 }
 0x181   : > { %v1290_v43 = vpop.f32.mrf.mxu3  ;;  %v754_v23 = vadd.f32 %v753_v63, %v4230_v31 }
 0x182   : > { %v1339_v19 = vadd.f32 %v1290_v43, %v1053_v42 }
 0x183   : > { %v1579_v50 = vpop.f32.mrf.mxu0  ;;  %3473 = vmatmul.msk.bf16.gmra.mxu1 %vm413_vm2, %v3815_v59  ;;  %3554 = vmatmul.msk.bf16.gmra.mxu2 %vm413_vm2, %v3831_v45 }
 0x184   : > { %v4400_v34 = vadd.f32 %v1576_v38, %v1339_v19  ;;  %v3817_v19 = vld [vmem:[%s4112_s24 + $0x30] sm:$0xff] }
 0x186   : > { %3635 = vmatmul.msk.bf16.gmra.mxu3 %vm413_vm2, %v3847_v47  ;;  %3716 = vmatmul.msk.bf16.gmra.mxu0 %vm413_vm2, %v3863_v48  ;;  %v1007_v18 = vpop.f32.mrf.mxu2 }
 0x187   : > { %v1054_v53 = vadd.f32 %v1007_v18, %v754_v23  ;;  %v3849_v18 = vld [vmem:[%s4056_s8 + $0x38] sm:$0xff] }
 0x188   : > { %v755_v9 = vpop.f32.mrf.mxu1 }
 0x189   : > { %v1293_v54 = vpop.f32.mrf.mxu3  ;;  %v756_v4 = vadd.f32 %v755_v9, %v4238_v35 }
 0x18a   : > { %v1340_v58 = vadd.f32 %v1293_v54, %v1054_v53  ;;  %v3865_v53 = vld [vmem:[%s4112_s24 + $0x38] sm:$0xff] }
 0x18b   : > { %v1581_v1 = vpop.f32.mrf.mxu0 }
 0x18c   : > { %v4405_v27 = vadd.f32 %v1579_v50, %v1340_v58  ;;  %v3833_v50 = vld [vmem:[%s4106_s21 + $0x38] sm:$0xff] }
 0x18e   : > { %v1009_v33 = vpop.f32.mrf.mxu2 }
 0x18f   : > { %v1055_v13 = vadd.f32 %v1009_v33, %v756_v4 }
 0x190   : > { %v758_v11 = vpop.f32.mrf.mxu1 }
 0x191   : > { %v1295_v14 = vpop.f32.mrf.mxu3  ;;  %v759_v35 = vadd.f32 %v758_v11, %v4160_v60 }
 0x192   : > { %v1341_v31 = vadd.f32 %v1295_v14, %v1055_v13 }
 0x193   : > { %v1584_v28 = vpop.f32.mrf.mxu0  ;;  %3474 = vmatmul.msk.bf16.gmra.mxu1 %vm413_vm2, %v3816_v7  ;;  %3555 = vmatmul.msk.bf16.gmra.mxu2 %vm413_vm2, %v3832_v17 }
 0x194   : > { %v4414_v61 = vadd.f32 %v1581_v1, %v1341_v31  ;;  %v3818_v31 = vld [vmem:[%s4112_s24 + $0x38] sm:$0xff] }
 0x196   : > { %3636 = vmatmul.msk.bf16.gmra.mxu3 %vm413_vm2, %v3848_v6  ;;  %3717 = vmatmul.msk.bf16.gmra.mxu0 %vm413_vm2, %v3864_v26  ;;  %v1012_v30 = vpop.f32.mrf.mxu2 }
 0x197   : > { %v1056_v38 = vadd.f32 %v1012_v30, %v759_v35  ;;  %v3850_v30 = vld [vmem:[%s4056_s8 + $0x40] sm:$0xff] }
 0x198   : > { %v760_v21 = vpop.f32.mrf.mxu1 }
 0x199   : > { %v1298_v39 = vpop.f32.mrf.mxu3  ;;  %v761_v45 = vadd.f32 %v760_v21, %v4168_v0 }
 0x19a   : > { %v1342_v42 = vadd.f32 %v1298_v39, %v1056_v38  ;;  %v3866_v38 = vld [vmem:[%s4112_s24 + $0x40] sm:$0xff] }
 0x19b   : > { %v1586_v43 = vpop.f32.mrf.mxu0 }
 0x19c   : > { %v4419_v59 = vadd.f32 %v1584_v28, %v1342_v42  ;;  %v3834_v28 = vld [vmem:[%s4106_s21 + $0x40] sm:$0xff] }
 0x19e   : > { %v1014_v63 = vpop.f32.mrf.mxu2 }
 0x19f   : > { %v1057_v47 = vadd.f32 %v1014_v63, %v761_v45 }
 0x1a0   : > { %v763_v23 = vpop.f32.mrf.mxu1 }
 0x1a1   : > { %v1300_v48 = vpop.f32.mrf.mxu3  ;;  %v764_v0 = vadd.f32 %v763_v23, %v4184_v8 }
 0x1a2   : > { %v1343_v60 = vadd.f32 %v1300_v48, %v1057_v47 }
 0x1a3   : > { %v1589_v54 = vpop.f32.mrf.mxu0  ;;  %3475 = vmatmul.msk.bf16.gmra.mxu1 %vm413_vm2, %v3817_v19  ;;  %3556 = vmatmul.msk.bf16.gmra.mxu2 %vm413_vm2, %v3833_v50 }
 0x1a4   : > { %v4428_v9 = vadd.f32 %v1586_v43, %v1343_v60  ;;  %v3819_v60 = vld [vmem:[%s4112_s24 + $0x40] sm:$0xff] }
 0x1a6   : > { %3637 = vmatmul.msk.bf16.gmra.mxu3 %vm413_vm2, %v3849_v18  ;;  %3718 = vmatmul.msk.bf16.gmra.mxu0 %vm413_vm2, %v3865_v53  ;;  %v1017_v58 = vpop.f32.mrf.mxu2 }
 0x1a7   : > { %v1058_v1 = vadd.f32 %v1017_v58, %v764_v0  ;;  %v3851_v58 = vld [vmem:[%s4056_s8 + $0x48] sm:$0xff] }
 0x1a8   : > { %v765_v33 = vpop.f32.mrf.mxu1 }
 0x1a9   : > { %v1303_v4 = vpop.f32.mrf.mxu3  ;;  %v766_v17 = vadd.f32 %v765_v33, %v4192_v12 }
 0x1aa   : > { %v1344_v13 = vadd.f32 %v1303_v4, %v1058_v1  ;;  %v3867_v1 = vld [vmem:[%s4112_s24 + $0x48] sm:$0xff] }
 0x1ab   : > { %v1591_v14 = vpop.f32.mrf.mxu0 }
 0x1ac   : > { %v4433_v7 = vadd.f32 %v1589_v54, %v1344_v13  ;;  %v3835_v54 = vld [vmem:[%s4106_s21 + $0x48] sm:$0xff] }
 0x1ae   : > { %v1019_v11 = vpop.f32.mrf.mxu2 }
 0x1af   : > { %v1059_v6 = vadd.f32 %v1019_v11, %v766_v17 }
 0x1b0   : > { %v768_v35 = vpop.f32.mrf.mxu1 }
 0x1b1   : > { %v1305_v26 = vpop.f32.mrf.mxu3  ;;  %v769_v12 = vadd.f32 %v768_v35, %v4208_v20 }
 0x1b2   : > { %v1345_v8 = vadd.f32 %v1305_v26, %v1059_v6 }
 0x1b3   : > { %v1594_v39 = vpop.f32.mrf.mxu0  ;;  %3476 = vmatmul.msk.bf16.gmra.mxu1 %vm413_vm2, %v3818_v31  ;;  %3557 = vmatmul.msk.bf16.gmra.mxu2 %vm413_vm2, %v3834_v28 }
 0x1b4   : > { %v4442_v21 = vadd.f32 %v1591_v14, %v1345_v8  ;;  %v3820_v8 = vld [vmem:[%s4112_s24 + $0x48] sm:$0xff] }
 0x1b6   : > { %3638 = vmatmul.msk.bf16.gmra.mxu3 %vm413_vm2, %v3850_v30  ;;  %3719 = vmatmul.msk.bf16.gmra.mxu0 %vm413_vm2, %v3866_v38  ;;  %v1022_v42 = vpop.f32.mrf.mxu2 }
 0x1b7   : > { %v1060_v43 = vadd.f32 %v1022_v42, %v769_v12  ;;  %v3852_v42 = vld [vmem:[%s4056_s8 + $0x50] sm:$0xff] }
 0x1b8   : > { %v770_v63 = vpop.f32.mrf.mxu1 }
 0x1b9   : > { %v1308_v45 = vpop.f32.mrf.mxu3  ;;  %v771_v50 = vadd.f32 %v770_v63, %v4216_v24 }
 0x1ba   : > { %v1346_v47 = vadd.f32 %v1308_v45, %v1060_v43  ;;  %v3868_v43 = vld [vmem:[%s4112_s24 + $0x50] sm:$0xff] }
 0x1bb   : > { %v1596_v48 = vpop.f32.mrf.mxu0 }
 0x1bc   : > { %v4447_v19 = vadd.f32 %v1594_v39, %v1346_v47  ;;  %v3836_v39 = vld [vmem:[%s4106_s21 + $0x50] sm:$0xff] }
 0x1be   : > { %v1024_v23 = vpop.f32.mrf.mxu2 }
 0x1bf   : > { %v1061_v18 = vadd.f32 %v1024_v23, %v771_v50 }
 0x1c0   : > { %v773_v0 = vpop.f32.mrf.mxu1 }
 0x1c1   : > { %v1310_v53 = vpop.f32.mrf.mxu3  ;;  %v774_v24 = vadd.f32 %v773_v0, %v4232_v32 }
 0x1c2   : > { %v1347_v20 = vadd.f32 %v1310_v53, %v1061_v18 }
 0x1c3   : > { %v1599_v4 = vpop.f32.mrf.mxu0  ;;  %3477 = vmatmul.msk.bf16.gmra.mxu1 %vm413_vm2, %v3819_v60  ;;  %3558 = vmatmul.msk.bf16.gmra.mxu2 %vm413_vm2, %v3835_v54 }
 0x1c4   : > { %v4456_v33 = vadd.f32 %v1596_v48, %v1347_v20  ;;  %v3821_v20 = vld [vmem:[%s4112_s24 + $0x50] sm:$0xff] }
 0x1c6   : > { %3639 = vmatmul.msk.bf16.gmra.mxu3 %vm413_vm2, %v3851_v58  ;;  %3720 = vmatmul.msk.bf16.gmra.mxu0 %vm413_vm2, %v3867_v1  ;;  %v1027_v13 = vpop.f32.mrf.mxu2  ;;  %v4479_v58 = vld [vmem:[%s4628_s4] ss:$0 sm:$0xff] }
 0x1c7   : > { %v1062_v14 = vadd.f32 %v1027_v13, %v774_v24  ;;  %v3853_v13 = vld [vmem:[%s4056_s8 + $0x58] sm:$0xff] }
 0x1c8   : > { %v775_v11 = vpop.f32.mrf.mxu1 }
 0x1c9   : > { %v1313_v17 = vpop.f32.mrf.mxu3  ;;  %v776_v28 = vadd.f32 %v775_v11, %v4240_v36 }
 0x1ca   : > { %v1348_v6 = vadd.f32 %v1313_v17, %v1062_v14  ;;  %v3869_v14 = vld [vmem:[%s4112_s24 + $0x58] sm:$0xff] }
 0x1cb   : > { %v1601_v26 = vpop.f32.mrf.mxu0 }
 0x1cc   : > { %v4461_v31 = vadd.f32 %v1599_v4, %v1348_v6  ;;  %v3837_v4 = vld [vmem:[%s4106_s21 + $0x58] sm:$0xff] }
 0x1ce   : > { %v1029_v35 = vpop.f32.mrf.mxu2 }
 0x1cf   : > { %v1063_v30 = vadd.f32 %v1029_v35, %v776_v28 }
 0x1d0   : > { %v1810_v12 = vpop.f32.mrf.mxu1 }
 0x1d1   : > { %v1315_v38 = vpop.f32.mrf.mxu3  ;;  %v1890_v36 = vadd.f32 %v1810_v12, %v4252_v51 }
 0x1d2   : > { %v1349_v32 = vadd.f32 %v1315_v38, %v1063_v30 }
 0x1d3   : > { %v2668_v45 = vpop.f32.mrf.mxu0  ;;  %3478 = vmatmul.msk.bf16.gmra.mxu1 %vm413_vm2, %v3820_v8  ;;  %3559 = vmatmul.msk.bf16.gmra.mxu2 %vm413_vm2, %v3836_v39 }
 0x1d4   : > { %v4470_v63 = vadd.f32 %v1601_v26, %v1349_v32 }
 0x1d6   : > { %3640 = vmatmul.msk.bf16.gmra.mxu3 %vm413_vm2, %v3852_v42  ;;  %3721 = vmatmul.msk.bf16.gmra.mxu0 %vm413_vm2, %v3868_v43  ;;  %v2096_v47 = vpop.f32.mrf.mxu2 }
 0x1d7   : > { %v2176_v48 = vadd.f32 %v2096_v47, %v1890_v36 }
 0x1d8   : > { %v1812_v23 = vpop.f32.mrf.mxu1 }
 0x1d9   : > { %v2382_v50 = vpop.f32.mrf.mxu3  ;;  %v1891_v60 = vadd.f32 %v1812_v23, %v4261_v62  ;;  %v3838_v23 = vld [vmem:[%s4106_s21 + $0x60] sm:$0xff] }
 0x1da   : > { %v2462_v53 = vadd.f32 %v2382_v50, %v2176_v48  ;;  %v3822_v50 = vld [vmem:[%s4112_s24 + $0x58] sm:$0xff] }
 0x1db   : > { %v2670_v18 = vpop.f32.mrf.mxu0 }
 0x1dc   : > { %v2748_v0 = vadd.f32 %v2668_v45, %v2462_v53  ;;  %v3854_v53 = vld [vmem:[%s4056_s8 + $0x60] sm:$0xff] }
 0x1de   : > { %v2098_v54 = vpop.f32.mrf.mxu2  ;;  %v2784_v6 = vadd.f32 %v4479_v58, %v2748_v0 }
 0x1df   : > { %v2177_v1 = vadd.f32 %v2098_v54, %v1891_v60  ;;  %v3870_v60 = vld [vmem:[%s4112_s24 + $0x60] sm:$0xff] }
 0x1e0   : > { %v1815_v24 = vpop.f32.mrf.mxu1  ;;  %v2816_v30 = vmax.f32 %v2784_v6, 0.0 }
 0x1e1   : > { %v2384_v51 = vpop.f32.mrf.mxu3  ;;  %v1892_v28 = vadd.f32 %v1815_v24, %v4266_v29 }
 0x1e2   : > { %v2463_v17 = vadd.f32 %v2384_v51, %v2177_v1 }
 0x1e3   : > { %v2673_v11 = vpop.f32.mrf.mxu0  ;;  %3479 = vmatmul.msk.bf16.gmra.mxu1 %vm413_vm2, %v3821_v20  ;;  %3560 = vmatmul.msk.bf16.gmra.mxu2 %vm413_vm2, %v3837_v4 }
 0x1e4   : > { %v2749_v62 = vadd.f32 %v2670_v18, %v2463_v17 }
 0x1e6   : > { %3641 = vmatmul.msk.bf16.gmra.mxu3 %vm413_vm2, %v3853_v13  ;;  %3722 = vmatmul.msk.bf16.gmra.mxu0 %vm413_vm2, %v3869_v14  ;;  %v2785_v26 = vadd.f32 %v4479_v58, %v2749_v62  ;;  %v2101_v35 = vpop.f32.mrf.mxu2 }
 0x1e7   : > { %v2178_v8 = vadd.f32 %v2101_v35, %v1892_v28 }
 0x1e8   : > { %v2817_v38 = vmax.f32 %v2785_v26, 0.0  ;;  %v1817_v12 = vpop.f32.mrf.mxu1 }
 0x1e9   : > { %v2387_v39 = vpop.f32.mrf.mxu3  ;;  %v1893_v32 = vadd.f32 %v1817_v12, %v4275_v10 }
 0x1ea   : > { %v3879_v42 = vpack.c.bf16 %v2817_v38, %v2816_v30  ;;  %v2464_v29 = vadd.f32 %v2387_v39, %v2178_v8  ;;  %v3823_v8 = vld [vmem:[%s4112_s24 + $0x60] sm:$0xff]  ;;  %v3839_v39 = vld [vmem:[%s4106_s21 + $0x68] sm:$0xff] }
 0x1eb   : > { %v2675_v43 = vpop.f32.mrf.mxu0 }
 0x1ec   : > { %3880 = vst [vmem:[%s4496_s30] sm:$0xff] %v3879_v42   ;;  %v2750_v36 = vadd.f32 %v2673_v11, %v2464_v29  ;;  %v3855_v42 = vld [vmem:[%s4056_s8 + $0x68] sm:$0xff] }
 0x1ee   : > { %v2103_v45 = vpop.f32.mrf.mxu2  ;;  %v2786_v1 = vadd.f32 %v4479_v58, %v2750_v36 }
 0x1ef   : > { %v2179_v47 = vadd.f32 %v2103_v45, %v1893_v32 }
 0x1f0   : > { %v1820_v18 = vpop.f32.mrf.mxu1  ;;  %v2818_v24 = vmax.f32 %v2786_v1, 0.0 }
 0x1f1   : > { %v2389_v48 = vpop.f32.mrf.mxu3  ;;  %v1894_v20 = vadd.f32 %v1820_v18, %v4280_v56 }
 0x1f2   : > { %v2465_v54 = vadd.f32 %v2389_v48, %v2179_v47 }
 0x1f3   : > { %v2678_v0 = vpop.f32.mrf.mxu0  ;;  %3480 = vmatmul.msk.bf16.gmra.mxu1 %vm413_vm2, %v3822_v50  ;;  %3561 = vmatmul.msk.bf16.gmra.mxu2 %vm413_vm2, %v3838_v23 }
 0x1f4   : > { %v2751_v51 = vadd.f32 %v2675_v43, %v2465_v54  ;;  %v3871_v43 = vld [vmem:[%s4112_s24 + $0x68] sm:$0xff] }
 0x1f6   : > { %3642 = vmatmul.msk.bf16.gmra.mxu3 %vm413_vm2, %v3854_v53  ;;  %3723 = vmatmul.msk.bf16.gmra.mxu0 %vm413_vm2, %v3870_v60  ;;  %v2787_v10 = vadd.f32 %v4479_v58, %v2751_v51  ;;  %v2106_v4 = vpop.f32.mrf.mxu2 }
 0x1f7   : > { %v2180_v14 = vadd.f32 %v2106_v4, %v1894_v20 }
 0x1f8   : > { %v2819_v13 = vmax.f32 %v2787_v10, 0.0  ;;  %v1822_v11 = vpop.f32.mrf.mxu1 }
 0x1f9   : > { %v2392_v17 = vpop.f32.mrf.mxu3  ;;  %v1895_v28 = vadd.f32 %v1822_v11, %v4289_v22  ;;  %v3872_v11 = vld [vmem:[%s4112_s24 + $0x70] sm:$0xff] }
 0x1fa   : > { %v3884_v6 = vpack.c.bf16 %v2819_v13, %v2818_v24  ;;  %v2466_v26 = vadd.f32 %v2392_v17, %v2180_v14  ;;  %v3824_v24 = vld [vmem:[%s4112_s24 + $0x68] sm:$0xff]  ;;  %v3840_v13 = vld [vmem:[%s4106_s21 + $0x70] sm:$0xff] }
 0x1fb   : > { %v2680_v62 = vpop.f32.mrf.mxu0  ;;  %v3856_v17 = vld [vmem:[%s4056_s8 + $0x70] sm:$0xff] }
 0x1fc   : > { %3956 = vst [vmem:[%s4496_s30 + $0x8] sm:$0xff] %v3884_v6   ;;  %v2752_v30 = vadd.f32 %v2678_v0, %v2466_v26 }
 0x1fe   : > { %v2108_v35 = vpop.f32.mrf.mxu2  ;;  %v2788_v45 = vadd.f32 %v4479_v58, %v2752_v30 }
 0x1ff   : > { %v2181_v38 = vadd.f32 %v2108_v35, %v1895_v28 }
 0x200   : > { %v1825_v12 = vpop.f32.mrf.mxu1  ;;  %v2820_v50 = vmax.f32 %v2788_v45, 0.0 }
 0x201   : > { %v2394_v56 = vpop.f32.mrf.mxu3  ;;  %v1896_v47 = vadd.f32 %v1825_v12, %v4294_v40 }
 0x202   : > { %v2467_v29 = vadd.f32 %v2394_v56, %v2181_v38 }
 0x203   : > { %v2683_v32 = vpop.f32.mrf.mxu0  ;;  %3481 = vmatmul.msk.bf16.gmra.mxu1 %vm413_vm2, %v3823_v8  ;;  %3562 = vmatmul.msk.bf16.gmra.mxu2 %vm413_vm2, %v3839_v39 }
 0x204   : > { %v2753_v36 = vadd.f32 %v2680_v62, %v2467_v29 }
 0x206   : > { %3643 = vmatmul.msk.bf16.gmra.mxu3 %vm413_vm2, %v3855_v42  ;;  %3724 = vmatmul.msk.bf16.gmra.mxu0 %vm413_vm2, %v3871_v43  ;;  %v2789_v22 = vadd.f32 %v4479_v58, %v2753_v36  ;;  %v2111_v48 = vpop.f32.mrf.mxu2 }
 0x207   : > { %v2182_v18 = vadd.f32 %v2111_v48, %v1896_v47  ;;  %v3825_v47 = vld [vmem:[%s4112_s24 + $0x70] sm:$0xff]  ;;  %v3841_v48 = vld [vmem:[%s4106_s21 + $0x78] sm:$0xff] }
 0x208   : > { %v2821_v23 = vmax.f32 %v2789_v22, 0.0  ;;  %v1827_v60 = vpop.f32.mrf.mxu1 }
 0x209   : > { %v2397_v53 = vpop.f32.mrf.mxu3  ;;  %v1897_v51 = vadd.f32 %v1827_v60, %v4302_v52 }
 0x20a   : > { %v3889_v54 = vpack.c.bf16 %v2821_v23, %v2820_v50  ;;  %v2468_v1 = vadd.f32 %v2397_v53, %v2182_v18  ;;  %v3857_v23 = vld [vmem:[%s4056_s8 + $0x78] sm:$0xff] }
 0x20b   : > { %v2685_v0 = vpop.f32.mrf.mxu0  ;;  %v3873_v18 = vld [vmem:[%s4112_s24 + $0x78] sm:$0xff] }
 0x20c   : > { %3957 = vst [vmem:[%s4496_s30 + $0x10] sm:$0xff] %v3889_v54   ;;  %v2754_v20 = vadd.f32 %v2683_v32, %v2468_v1 }
 0x20e   : > { %v2113_v10 = vpop.f32.mrf.mxu2  ;;  %v2790_v26 = vadd.f32 %v4479_v58, %v2754_v20 }
 0x20f   : > { %v2183_v4 = vadd.f32 %v2113_v10, %v1897_v51 }
 0x210   : > { %v1830_v14 = vpop.f32.mrf.mxu1  ;;  %v2822_v38 = vmax.f32 %v2790_v26, 0.0 }
 0x211   : > { %v2399_v40 = vpop.f32.mrf.mxu3  ;;  %v1898_v35 = vadd.f32 %v1830_v14, %v4307_v2 }
 0x212   : > { %v2469_v6 = vadd.f32 %v2399_v40, %v2183_v4 }
 0x213   : > { %v2688_v62 = vpop.f32.mrf.mxu0  ;;  %3482 = vmatmul.msk.bf16.gmra.mxu1 %vm413_vm2, %v3824_v24  ;;  %3563 = vmatmul.msk.bf16.gmra.mxu2 %vm413_vm2, %v3840_v13 }
 0x214   : > { %v2755_v28 = vadd.f32 %v2685_v0, %v2469_v6 }
 0x216   : > { %3644 = vmatmul.msk.bf16.gmra.mxu3 %vm413_vm2, %v3856_v17  ;;  %3725 = vmatmul.msk.bf16.gmra.mxu0 %vm413_vm2, %v3872_v11  ;;  %v2791_v52 = vadd.f32 %v4479_v58, %v2755_v28  ;;  %v2116_v30 = vpop.f32.mrf.mxu2  ;;  %v3826_v28 = vld [vmem:[%s4112_s24 + $0x78] sm:$0xff] }
 0x217   : > { %v2184_v8 = vadd.f32 %v2116_v30, %v1898_v35  ;;  %v3858_v30 = vld [vmem:[%s4056_s8 + $0x80] sm:$0xff] }
 0x218   : > { %v2823_v56 = vmax.f32 %v2791_v52, 0.0  ;;  %v1832_v12 = vpop.f32.mrf.mxu1  ;;  %v3842_v52 = vld [vmem:[%s4106_s21 + $0x80] sm:$0xff] }
 0x219   : > { %v2402_v39 = vpop.f32.mrf.mxu3  ;;  %v1899_v32 = vadd.f32 %v1832_v12, %v4316_v37 }
 0x21a   : > { %v3894_v42 = vpack.c.bf16 %v2823_v56, %v2822_v38  ;;  %v2470_v29 = vadd.f32 %v2402_v39, %v2184_v8  ;;  %v3874_v38 = vld [vmem:[%s4112_s24 + $0x80] sm:$0xff] }
 0x21b   : > { %v2690_v43 = vpop.f32.mrf.mxu0 }
 0x21c   : > { %3958 = vst [vmem:[%s4496_s30 + $0x18] sm:$0xff] %v3894_v42   ;;  %v2756_v36 = vadd.f32 %v2688_v62, %v2470_v29 }
 0x21e   : > { %v2118_v45 = vpop.f32.mrf.mxu2  ;;  %v2792_v54 = vadd.f32 %v4479_v58, %v2756_v36 }
 0x21f   : > { %v2185_v22 = vadd.f32 %v2118_v45, %v1899_v32 }
 0x220   : > { %v1835_v50 = vpop.f32.mrf.mxu1  ;;  %v2824_v10 = vmax.f32 %v2792_v54, 0.0  ;;  %v3843_v54 = vld [vmem:[%s4106_s21 + $0x88] sm:$0xff] }
 0x221   : > { %v2404_v2 = vpop.f32.mrf.mxu3  ;;  %v1900_v1 = vadd.f32 %v1835_v50, %v4321_v44 }
 0x222   : > { %v2471_v53 = vadd.f32 %v2404_v2, %v2185_v22 }
 0x223   : > { %v2693_v60 = vpop.f32.mrf.mxu0  ;;  %3483 = vmatmul.msk.bf16.gmra.mxu1 %vm413_vm2, %v3825_v47  ;;  %3564 = vmatmul.msk.bf16.gmra.mxu2 %vm413_vm2, %v3841_v48 }
 0x224   : > { %v2757_v0 = vadd.f32 %v2690_v43, %v2471_v53 }
 0x226   : > { %3645 = vmatmul.msk.bf16.gmra.mxu3 %vm413_vm2, %v3857_v23  ;;  %3726 = vmatmul.msk.bf16.gmra.mxu0 %vm413_vm2, %v3873_v18  ;;  %v2793_v37 = vadd.f32 %v4479_v58, %v2757_v0  ;;  %v2121_v51 = vpop.f32.mrf.mxu2 }
 0x227   : > { %v2186_v4 = vadd.f32 %v2121_v51, %v1900_v1  ;;  %v3875_v1 = vld [vmem:[%s4112_s24 + $0x88] sm:$0xff] }
 0x228   : > { %v2825_v20 = vmax.f32 %v2793_v37, 0.0  ;;  %v1837_v24 = vpop.f32.mrf.mxu1  ;;  %v3859_v37 = vld [vmem:[%s4056_s8 + $0x88] sm:$0xff] }
 0x229   : > { %v2407_v40 = vpop.f32.mrf.mxu3  ;;  %v1901_v11 = vadd.f32 %v1837_v24, %v4330_v57 }
 0x22a   : > { %v3899_v13 = vpack.c.bf16 %v2825_v20, %v2824_v10  ;;  %v2472_v17 = vadd.f32 %v2407_v40, %v2186_v4 }
 0x22b   : > { %v2695_v14 = vpop.f32.mrf.mxu0 }
 0x22c   : > { %3959 = vst [vmem:[%s4496_s30 + $0x20] sm:$0xff] %v3899_v13   ;;  %v2758_v62 = vadd.f32 %v2693_v60, %v2472_v17  ;;  %v3827_v60 = vld [vmem:[%s4112_s24 + $0x80] sm:$0xff] }
 0x22e   : > { %v2123_v6 = vpop.f32.mrf.mxu2  ;;  %v2794_v39 = vadd.f32 %v4479_v58, %v2758_v62 }
 0x22f   : > { %v2187_v26 = vadd.f32 %v2123_v6, %v1901_v11 }
 0x230   : > { %v1840_v35 = vpop.f32.mrf.mxu1  ;;  %v2826_v29 = vmax.f32 %v2794_v39, 0.0 }
 0x231   : > { %v2409_v44 = vpop.f32.mrf.mxu3  ;;  %v1902_v42 = vadd.f32 %v1840_v35, %v4335_v16 }
 0x232   : > { %v2473_v56 = vadd.f32 %v2409_v44, %v2187_v26 }
 0x233   : > { %v2698_v8 = vpop.f32.mrf.mxu0  ;;  %3484 = vmatmul.msk.bf16.gmra.mxu1 %vm413_vm2, %v3826_v28  ;;  %3565 = vmatmul.msk.bf16.gmra.mxu2 %vm413_vm2, %v3842_v52 }
 0x234   : > { %v2759_v12 = vadd.f32 %v2695_v14, %v2473_v56 }
 0x236   : > { %3646 = vmatmul.msk.bf16.gmra.mxu3 %vm413_vm2, %v3858_v30  ;;  %3727 = vmatmul.msk.bf16.gmra.mxu0 %vm413_vm2, %v3874_v38  ;;  %v2795_v57 = vadd.f32 %v4479_v58, %v2759_v12  ;;  %v2126_v43 = vpop.f32.mrf.mxu2 }
 0x237   : > { %v2188_v45 = vadd.f32 %v2126_v43, %v1902_v42 }
 0x238   : > { %v2827_v32 = vmax.f32 %v2795_v57, 0.0  ;;  %v1842_v22 = vpop.f32.mrf.mxu1 }
 0x239   : > { %v2412_v36 = vpop.f32.mrf.mxu3  ;;  %v1903_v50 = vadd.f32 %v1842_v22, %v4344_v41 }
 0x23a   : > { %v3904_v2 = vpack.c.bf16 %v2827_v32, %v2826_v29  ;;  %v2474_v48 = vadd.f32 %v2412_v36, %v2188_v45 }
 0x23b   : > { %v2700_v47 = vpop.f32.mrf.mxu0 }
 0x23c   : > { %3960 = vst [vmem:[%s4496_s30 + $0x28] sm:$0xff] %v3904_v2   ;;  %v2760_v18 = vadd.f32 %v2698_v8, %v2474_v48 }
 0x23e   : > { %v2128_v23 = vpop.f32.mrf.mxu2  ;;  %v2796_v20 = vadd.f32 %v4479_v58, %v2760_v18 }
 0x23f   : > { %v2189_v53 = vadd.f32 %v2128_v23, %v1903_v50 }
 0x240   : > { %v1845_v0 = vpop.f32.mrf.mxu1  ;;  %v2828_v13 = vmax.f32 %v2796_v20, 0.0 }
 0x241   : > { %v2414_v16 = vpop.f32.mrf.mxu3  ;;  %v1904_v40 = vadd.f32 %v1845_v0, %v4349_v49 }
 0x242   : > { %v2475_v51 = vadd.f32 %v2414_v16, %v2189_v53 }
 0x243   : > { %v2703_v10 = vpop.f32.mrf.mxu0  ;;  %3485 = vmatmul.msk.bf16.gmra.mxu1 %vm413_vm2, %v3827_v60  ;;  %3566 = vmatmul.msk.bf16.gmra.mxu2 %vm413_vm2, %v3843_v54 }
 0x244   : > { %v2761_v4 = vadd.f32 %v2700_v47, %v2475_v51 }
 0x246   : > { %3647 = vmatmul.msk.bf16.gmra.mxu3 %vm413_vm2, %v3859_v37  ;;  %3728 = vmatmul.msk.bf16.gmra.mxu0 %vm413_vm2, %v3875_v1  ;;  %v2797_v41 = vadd.f32 %v4479_v58, %v2761_v4  ;;  %v2131_v24 = vpop.f32.mrf.mxu2 }
 0x247   : > { %v2190_v17 = vadd.f32 %v2131_v24, %v1904_v40 }
 0x248   : > { %v2829_v14 = vmax.f32 %v2797_v41, 0.0  ;;  %v1847_v6 = vpop.f32.mrf.mxu1 }
 0x249   : > { %v2417_v11 = vpop.f32.mrf.mxu3  ;;  %v1905_v28 = vadd.f32 %v1847_v6, %v4358_v5 }
 0x24a   : > { %v3909_v62 = vpack.c.bf16 %v2829_v14, %v2828_v13  ;;  %v2476_v44 = vadd.f32 %v2417_v11, %v2190_v17 }
 0x24b   : > { %v2705_v26 = vpop.f32.mrf.mxu0 }
 0x24c   : > { %3961 = vst [vmem:[%s4496_s30 + $0x30] sm:$0xff] %v3909_v62   ;;  %v2762_v35 = vadd.f32 %v2703_v10, %v2476_v44 }
 0x24e   : > { %v2133_v52 = vpop.f32.mrf.mxu2  ;;  %v2798_v39 = vadd.f32 %v4479_v58, %v2762_v35 }
 0x24f   : > { %v2191_v30 = vadd.f32 %v2133_v52, %v1905_v28 }
 0x250   : > { %v1850_v56 = vpop.f32.mrf.mxu1  ;;  %v2830_v29 = vmax.f32 %v2798_v39, 0.0 }
 0x251   : > { %v2419_v38 = vpop.f32.mrf.mxu3  ;;  %v1906_v42 = vadd.f32 %v1850_v56, %v4363_v55 }
 0x252   : > { %v2477_v8 = vadd.f32 %v2419_v38, %v2191_v30 }
 0x253   : > { %v2708_v49 = vpop.f32.mrf.mxu0 }
 0x254   : > { %v2763_v12 = vadd.f32 %v2705_v26, %v2477_v8 }
 0x256   : > { %v2799_v57 = vadd.f32 %v4479_v58, %v2763_v12  ;;  %v2136_v43 = vpop.f32.mrf.mxu2 }
 0x257   : > { %v2192_v45 = vadd.f32 %v2136_v43, %v1906_v42 }
 0x258   : > { %v2831_v32 = vmax.f32 %v2799_v57, 0.0  ;;  %v1852_v36 = vpop.f32.mrf.mxu1 }
 0x259   : > { %v2422_v5 = vpop.f32.mrf.mxu3  ;;  %v1907_v48 = vadd.f32 %v1852_v36, %v4372_v46 }
 0x25a   : > { %v3914_v22 = vpack.c.bf16 %v2831_v32, %v2830_v29  ;;  %v2478_v47 = vadd.f32 %v2422_v5, %v2192_v45 }
 0x25b   : > { %v2710_v2 = vpop.f32.mrf.mxu0 }
 0x25c   : > { %3962 = vst [vmem:[%s4496_s30 + $0x38] sm:$0xff] %v3914_v22   ;;  %v2764_v23 = vadd.f32 %v2708_v49, %v2478_v47 }
 0x25e   : > { %v2138_v50 = vpop.f32.mrf.mxu2  ;;  %v2800_v54 = vadd.f32 %v4479_v58, %v2764_v23 }
 0x25f   : > { %v2193_v18 = vadd.f32 %v2138_v50, %v1907_v48 }
 0x260   : > { %v1855_v16 = vpop.f32.mrf.mxu1  ;;  %v2832_v10 = vmax.f32 %v2800_v54, 0.0 }
 0x261   : > { %v2424_v53 = vpop.f32.mrf.mxu3  ;;  %v1908_v1 = vadd.f32 %v1855_v16, %v4377_v3 }
 0x262   : > { %v2479_v60 = vadd.f32 %v2424_v53, %v2193_v18 }
 0x263   : > { %v2713_v55 = vpop.f32.mrf.mxu0 }
 0x264   : > { %v2765_v0 = vadd.f32 %v2710_v2, %v2479_v60 }
 0x266   : > { %v2801_v37 = vadd.f32 %v4479_v58, %v2765_v0  ;;  %v2141_v51 = vpop.f32.mrf.mxu2 }
 0x267   : > { %v2194_v4 = vadd.f32 %v2141_v51, %v1908_v1 }
 0x268   : > { %v2833_v20 = vmax.f32 %v2801_v37, 0.0  ;;  %v1857_v41 = vpop.f32.mrf.mxu1 }
 0x269   : > { %v2427_v46 = vpop.f32.mrf.mxu3  ;;  %v1909_v14 = vadd.f32 %v1857_v41, %v4386_v25 }
 0x26a   : > { %v3919_v40 = vpack.c.bf16 %v2833_v20, %v2832_v10  ;;  %v2480_v13 = vadd.f32 %v2427_v46, %v2194_v4 }
 0x26b   : > { %v2715_v24 = vpop.f32.mrf.mxu0 }
 0x26c   : > { %3963 = vst [vmem:[%s4496_s30 + $0x40] sm:$0xff] %v3919_v40   ;;  %v2766_v11 = vadd.f32 %v2713_v55, %v2480_v13 }
 0x26e   : > { %v2143_v17 = vpop.f32.mrf.mxu2  ;;  %v2802_v28 = vadd.f32 %v4479_v58, %v2766_v11 }
 0x26f   : > { %v2195_v6 = vadd.f32 %v2143_v17, %v1909_v14 }
 0x270   : > { %v1860_v26 = vpop.f32.mrf.mxu1  ;;  %v2834_v56 = vmax.f32 %v2802_v28, 0.0 }
 0x271   : > { %v2429_v62 = vpop.f32.mrf.mxu3  ;;  %v1910_v30 = vadd.f32 %v1860_v26, %v4391_v15 }
 0x272   : > { %v2481_v44 = vadd.f32 %v2429_v62, %v2195_v6 }
 0x273   : > { %v2718_v3 = vpop.f32.mrf.mxu0 }
 0x274   : > { %v2767_v52 = vadd.f32 %v2715_v24, %v2481_v44 }
 0x276   : > { %v2803_v35 = vadd.f32 %v4479_v58, %v2767_v52  ;;  %v2146_v38 = vpop.f32.mrf.mxu2 }
 0x277   : > { %v2196_v49 = vadd.f32 %v2146_v38, %v1910_v30 }
 0x278   : > { %v2835_v8 = vmax.f32 %v2803_v35, 0.0  ;;  %v1862_v39 = vpop.f32.mrf.mxu1 }
 0x279   : > { %v2432_v25 = vpop.f32.mrf.mxu3  ;;  %v1911_v43 = vadd.f32 %v1862_v39, %v4400_v34 }
 0x27a   : > { %v3924_v12 = vpack.c.bf16 %v2835_v8, %v2834_v56  ;;  %v2482_v42 = vadd.f32 %v2432_v25, %v2196_v49 }
 0x27b   : > { %v2720_v57 = vpop.f32.mrf.mxu0 }
 0x27c   : > { %3964 = vst [vmem:[%s4496_s30 + $0x48] sm:$0xff] %v3924_v12   ;;  %v2768_v32 = vadd.f32 %v2718_v3, %v2482_v42 }
 0x27e   : > { %v2148_v29 = vpop.f32.mrf.mxu2  ;;  %v2804_v2 = vadd.f32 %v4479_v58, %v2768_v32 }
 0x27f   : > { %v2197_v45 = vadd.f32 %v2148_v29, %v1911_v43 }
 0x280   : > { %v1865_v36 = vpop.f32.mrf.mxu1  ;;  %v2836_v18 = vmax.f32 %v2804_v2, 0.0 }
 0x281   : > { %v2434_v5 = vpop.f32.mrf.mxu3  ;;  %v1912_v50 = vadd.f32 %v1865_v36, %v4405_v27 }
 0x282   : > { %v2483_v22 = vadd.f32 %v2434_v5, %v2197_v45 }
 0x283   : > { %v2723_v15 = vpop.f32.mrf.mxu0 }
 0x284   : > { %v2769_v47 = vadd.f32 %v2720_v57, %v2483_v22 }
 0x286   : > { %v2805_v48 = vadd.f32 %v4479_v58, %v2769_v47  ;;  %v2151_v23 = vpop.f32.mrf.mxu2 }
 0x287   : > { %v2198_v16 = vadd.f32 %v2151_v23, %v1912_v50 }
 0x288   : > { %v2837_v53 = vmax.f32 %v2805_v48, 0.0  ;;  %v1867_v60 = vpop.f32.mrf.mxu1 }
 0x289   : > { %v2437_v34 = vpop.f32.mrf.mxu3  ;;  %v1913_v37 = vadd.f32 %v1867_v60, %v4414_v61 }
 0x28a   : > { %v3929_v55 = vpack.c.bf16 %v2837_v53, %v2836_v18  ;;  %v2484_v0 = vadd.f32 %v2437_v34, %v2198_v16 }
 0x28b   : > { %v2725_v54 = vpop.f32.mrf.mxu0 }
 0x28c   : > { %3965 = vst [vmem:[%s4496_s30 + $0x50] sm:$0xff] %v3929_v55   ;;  %v2770_v51 = vadd.f32 %v2723_v15, %v2484_v0 }
 0x28e   : > { %v2153_v1 = vpop.f32.mrf.mxu2  ;;  %v2806_v41 = vadd.f32 %v4479_v58, %v2770_v51 }
 0x28f   : > { %v2199_v10 = vadd.f32 %v2153_v1, %v1913_v37 }
 0x290   : > { %v1870_v4 = vpop.f32.mrf.mxu1  ;;  %v2838_v17 = vmax.f32 %v2806_v41, 0.0 }
 0x291   : > { %v2439_v20 = vpop.f32.mrf.mxu3  ;;  %v1914_v13 = vadd.f32 %v1870_v4, %v4419_v59 }
 0x292   : > { %v2485_v46 = vadd.f32 %v2439_v20, %v2199_v10 }
 0x293   : > { %v2728_v27 = vpop.f32.mrf.mxu0 }
 0x294   : > { %v2771_v40 = vadd.f32 %v2725_v54, %v2485_v46 }
 0x296   : > { %v2807_v24 = vadd.f32 %v4479_v58, %v2771_v40  ;;  %v2156_v14 = vpop.f32.mrf.mxu2 }
 0x297   : > { %v2200_v6 = vadd.f32 %v2156_v14, %v1914_v13 }
 0x298   : > { %v2839_v11 = vmax.f32 %v2807_v24, 0.0  ;;  %v1872_v62 = vpop.f32.mrf.mxu1 }
 0x299   : > { %v2442_v61 = vpop.f32.mrf.mxu3  ;;  %v1915_v28 = vadd.f32 %v1872_v62, %v4428_v9 }
 0x29a   : > { %v3934_v26 = vpack.c.bf16 %v2839_v11, %v2838_v17  ;;  %v2486_v3 = vadd.f32 %v2442_v61, %v2200_v6 }
 0x29b   : > { %v2730_v44 = vpop.f32.mrf.mxu0 }
 0x29c   : > { %3966 = vst [vmem:[%s4496_s30 + $0x58] sm:$0xff] %v3934_v26   ;;  %v2772_v35 = vadd.f32 %v2728_v27, %v2486_v3 }
 0x29e   : > { %v2158_v52 = vpop.f32.mrf.mxu2  ;;  %v2808_v49 = vadd.f32 %v4479_v58, %v2772_v35 }
 0x29f   : > { %v2201_v30 = vadd.f32 %v2158_v52, %v1915_v28 }
 0x2a0   : > { %v1875_v56 = vpop.f32.mrf.mxu1  ;;  %v2840_v42 = vmax.f32 %v2808_v49, 0.0 }
 0x2a1   : > { %v2444_v38 = vpop.f32.mrf.mxu3  ;;  %v1916_v12 = vadd.f32 %v1875_v56, %v4433_v7 }
 0x2a2   : > { %v2487_v8 = vadd.f32 %v2444_v38, %v2201_v30 }
 0x2a3   : > { %v2733_v59 = vpop.f32.mrf.mxu0 }
 0x2a4   : > { %v2773_v25 = vadd.f32 %v2730_v44, %v2487_v8 }
 0x2a6   : > { %v2809_v39 = vadd.f32 %v4479_v58, %v2773_v25  ;;  %v2161_v57 = vpop.f32.mrf.mxu2 }
 0x2a7   : > { %v2202_v29 = vadd.f32 %v2161_v57, %v1916_v12 }
 0x2a8   : > { %v2841_v43 = vmax.f32 %v2809_v39, 0.0  ;;  %v1877_v32 = vpop.f32.mrf.mxu1 }
 0x2a9   : > { %v2447_v9 = vpop.f32.mrf.mxu3  ;;  %v1917_v22 = vadd.f32 %v1877_v32, %v4442_v21 }
 0x2aa   : > { %v3939_v45 = vpack.c.bf16 %v2841_v43, %v2840_v42  ;;  %v2488_v36 = vadd.f32 %v2447_v9, %v2202_v29 }
 0x2ab   : > { %v2735_v5 = vpop.f32.mrf.mxu0 }
 0x2ac   : > { %3967 = vst [vmem:[%s4496_s30 + $0x60] sm:$0xff] %v3939_v45   ;;  %v2774_v2 = vadd.f32 %v2733_v59, %v2488_v36 }
 0x2ae   : > { %v2163_v15 = vpop.f32.mrf.mxu2  ;;  %v2810_v7 = vadd.f32 %v4479_v58, %v2774_v2 }
 0x2af   : > { %v2203_v47 = vadd.f32 %v2163_v15, %v1917_v22 }
 0x2b0   : > { %v1880_v50 = vpop.f32.mrf.mxu1  ;;  %v2842_v55 = vmax.f32 %v2810_v7, 0.0 }
 0x2b1   : > { %v2449_v48 = vpop.f32.mrf.mxu3  ;;  %v1918_v34 = vadd.f32 %v1880_v50, %v4447_v19 }
 0x2b2   : > { %v2489_v23 = vadd.f32 %v2449_v48, %v2203_v47 }
 0x2b3   : > { %v2738_v53 = vpop.f32.mrf.mxu0 }
 0x2b4   : > { %v2775_v18 = vadd.f32 %v2735_v5, %v2489_v23 }
 0x2b6   : > { %v2811_v16 = vadd.f32 %v4479_v58, %v2775_v18  ;;  %v2166_v60 = vpop.f32.mrf.mxu2 }
 0x2b7   : > { %v2204_v0 = vadd.f32 %v2166_v60, %v1918_v34 }
 0x2b8   : > { %v2843_v54 = vmax.f32 %v2811_v16, 0.0  ;;  %v1882_v37 = vpop.f32.mrf.mxu1 }
 0x2b9   : > { %v2452_v21 = vpop.f32.mrf.mxu3  ;;  %v1919_v10 = vadd.f32 %v1882_v37, %v4456_v33 }
 0x2ba   : > { %v3944_v1 = vpack.c.bf16 %v2843_v54, %v2842_v55  ;;  %v2490_v51 = vadd.f32 %v2452_v21, %v2204_v0 }
 0x2bb   : > { %v2740_v20 = vpop.f32.mrf.mxu0 }
 0x2bc   : > { %3968 = vst [vmem:[%s4496_s30 + $0x68] sm:$0xff] %v3944_v1   ;;  %v2776_v46 = vadd.f32 %v2738_v53, %v2490_v51 }
 0x2be   : > { %v2168_v4 = vpop.f32.mrf.mxu2  ;;  %v2812_v19 = vadd.f32 %v4479_v58, %v2776_v46 }
 0x2bf   : > { %v2205_v27 = vadd.f32 %v2168_v4, %v1919_v10 }
 0x2c0   : > { %v1885_v40 = vpop.f32.mrf.mxu1  ;;  %v2844_v6 = vmax.f32 %v2812_v19, 0.0 }
 0x2c1   : > { %v2454_v41 = vpop.f32.mrf.mxu3  ;;  %v1920_v17 = vadd.f32 %v1885_v40, %v4461_v31 }
 0x2c2   : > { %v2491_v24 = vadd.f32 %v2454_v41, %v2205_v27 }
 0x2c3   : > { %v2743_v26 = vpop.f32.mrf.mxu0 }
 0x2c4   : > { %v2777_v13 = vadd.f32 %v2740_v20, %v2491_v24 }
 0x2c6   : > { %v2813_v14 = vadd.f32 %v4479_v58, %v2777_v13  ;;  %v2171_v11 = vpop.f32.mrf.mxu2 }
 0x2c7   : > { %v2206_v62 = vadd.f32 %v2171_v11, %v1920_v17 }
 0x2c8   : > { %v2845_v61 = vmax.f32 %v2813_v14, 0.0  ;;  %v1887_v3 = vpop.f32.mrf.mxu1 }
 0x2c9   : > { %v2457_v33 = vpop.f32.mrf.mxu3  ;;  %v1921_v52 = vadd.f32 %v1887_v3, %v4470_v63 }
 0x2ca   : > { %v3949_v44 = vpack.c.bf16 %v2845_v61, %v2844_v6  ;;  %v2492_v28 = vadd.f32 %v2457_v33, %v2206_v62 }
 0x2cb   : > { %v2745_v59 = vpop.f32.mrf.mxu0 }
 0x2cc   : > { %3969 = vst [vmem:[%s4496_s30 + $0x70] sm:$0xff] %v3949_v44   ;;  %v2778_v30 = vadd.f32 %v2743_v26, %v2492_v28 }
 0x2ce   : > { %v2173_v35 = vpop.f32.mrf.mxu2  ;;  %v2814_v31 = vadd.f32 %v4479_v58, %v2778_v30 }
 0x2cf   : > { %v2207_v38 = vadd.f32 %v2173_v35, %v1921_v52 }
 0x2d0   : > { %v2846_v39 = vmax.f32 %v2814_v31, 0.0 }
 0x2d1   : > { %v2459_v56 = vpop.f32.mrf.mxu3 }
 0x2d2   : > { %v2493_v8 = vadd.f32 %v2459_v56, %v2207_v38 }
 0x2d4   : > { %v2779_v49 = vadd.f32 %v2745_v59, %v2493_v8 }
 0x2d6   : > { %v2815_v25 = vadd.f32 %v4479_v58, %v2779_v49 }
 0x2d8   : > { %v2847_v12 = vmax.f32 %v2815_v25, 0.0 }
 0x2da   : > { %v3954_v57 = vpack.c.bf16 %v2847_v12, %v2846_v39 }
 0x2dc   : > { %3970 = vst [vmem:[%s4496_s30 + $0x78] sm:$0xff] %v3954_v57  }
 0x2dd PF: > { %s15_s18 = sadd.s32 1, %s3991_s18  }
 0x2de   : > { %p12_p4 = scmp.ge.s32.totalorder %s15_s18, 6  }
 0x2e0   :  { %14 = sbr.rel (!%p12_p4) target bundleno = 1 (0x1), region = 84 }

// kernel: perceptual_loss.9
= control target key start
LH: loop header
LB: loop body
LE: loop exit
PB: predicated region body
PF: predicated region fallthrough
CT: control target
= control target key end

     0   :  { %s4625_s18 = smov 0   ;;  %s5274_s0 = inlined_call_operand.vmem [shape: bf16[4,288,128], index: 0, kind: input, shape index: {}]   ;;  %s5275_s1 = inlined_call_operand.vmem [shape: bf16[4,288,128], index: 1, kind: input, shape index: {}]   ;;  %s5276_s2 = inlined_call_operand.vmem [shape: bf16[4,288,128], index: 2, kind: input, shape index: {}]   ;;  %s5277_s3 = inlined_call_operand.vmem [shape: bf16[9,128,128], index: 3, kind: input, shape index: {}]   ;;  %s5278_s4 = inlined_call_operand.vmem [shape: f32[1,128], index: 4, kind: input, shape index: {}]   ;;  %s5279_s5 = inlined_call_operand.vmem [shape: bf16[4,256,128], index: 5, kind: output, shape index: {}]  }
   0x1 LB: > { %s3237_s19 = sadd.s32 4294967295, %s4593_s18   ;;  %p3241_p0 = scmp.ge.s32.totalorder %s4593_s18, 1  ;;  %s4593_s18 = sphi %s4625_s18, %s15_s18  }
   0x2   : > { %p207_p1 = scmp.lt.s32.totalorder %s4593_s18, 5 }
   0x4   : > { %p208_p2 = pnand %p3241_p0, %p207_p1 }
   0x5   : > { %p245_p3 = scmp.lt.s32.totalorder (!%p208_p2), %s3237_s19, 3 }
   0x6   : > { %211 = sbr.rel (%p208_p2) target bundleno = 756 (0x2f4), region = 40 }
   0xb   : > { %v4289_v0 = vld [vmem:[%s5277_s3 + $0x78] sm:$0xff]  ;;  %v4288_v1 = vld [vmem:[%s5277_s3 + $0x70] sm:$0xff]  ;;  %v4287_v2 = vld [vmem:[%s5277_s3 + $0x68] sm:$0xff]  ;;  %s5281_s19 = smov (!%p245_p3, %s3237_s19), 3 }
   0xc   : > { %4553 = vmatpush.bf16.msra.mxu1 %v4289_v0  ;;  %4554 = vmatpush.bf16.msra.mxu2 %v4289_v0  ;;  %v4286_v3 = vld [vmem:[%s5277_s3 + $0x60] sm:$0xff]  ;;  %v4285_v4 = vld [vmem:[%s5277_s3 + $0x58] sm:$0xff]  ;;  %v4284_v5 = vld [vmem:[%s5277_s3 + $0x50] sm:$0xff]  ;;  %s4661_s9 = smul.u32 144, %s5281_s19  ;;  %s4241_s29 = sshll.u32 %s5281_s19, 7 }
   0xd   : > { %4555 = vmatpush.bf16.msra.mxu3 %v4289_v0  ;;  %506 = vmatpush.bf16.msra.mxu0 %v4289_v0  ;;  %v4283_v6 = vld [vmem:[%s5277_s3 + $0x48] sm:$0xff]  ;;  %v4282_v7 = vld [vmem:[%s5277_s3 + $0x40] sm:$0xff]  ;;  %v4313_v8 = vld [vmem:[%s5277_s3 + $0xb8] sm:$0xff]  ;;  %s5170_s8 = scalar_lea.vmem %s5279_s5, %s4241_s29 }
   0xe   : > { %s4670_s14 = scalar_lea.vmem %s5275_s1, %s4661_s9  ;;  %v4337_v9 = vld [vmem:[%s5277_s3 + $0xf8] sm:$0xff]  ;;  %v4312_v16 = vld [vmem:[%s5277_s3 + $0xb0] sm:$0xff]  ;;  %v4311_v20 = vld [vmem:[%s5277_s3 + $0xa8] sm:$0xff]  ;;  %s4800_s28 = scalar_lea.vmem %s5274_s0, %s4661_s9 }
   0xf   : > { %v4270_v10 = vld [vmem:[%s4670_s14 + $0x20] sm:$0xff]  ;;  %v4265_v14 = vld [vmem:[%s5277_s3 + $0x38] sm:$0xff]  ;;  %v4336_v17 = vld [vmem:[%s5277_s3 + $0xf0] sm:$0xff]  ;;  %s4806_s6 = scalar_lea.vmem %s5276_s2, %s4661_s9 }
  0x10   : > { %4556 = vmatpush.bf16.msra.mxu1 %v4288_v1  ;;  %4557 = vmatpush.bf16.msra.mxu2 %v4288_v1  ;;  %v4274_v11 = vld [vmem:[%s4670_s14 + $0x40] sm:$0xff]  ;;  %v4361_v15 = vld [vmem:[%s5277_s3 + $0x138] sm:$0xff]  ;;  %v4264_v18 = vld [vmem:[%s5277_s3 + $0x30] sm:$0xff] }
  0x11   : > { %4558 = vmatpush.bf16.msra.mxu3 %v4288_v1  ;;  %507 = vmatpush.bf16.msra.mxu0 %v4288_v1  ;;  %v4278_v12 = vld [vmem:[%s4670_s14 + $0x60] sm:$0xff]  ;;  %v4360_v19 = vld [vmem:[%s5277_s3 + $0x130] sm:$0xff]  ;;  %v4335_v21 = vld [vmem:[%s5277_s3 + $0xe8] sm:$0xff] }
  0x12   : > { %v4266_v13 = vld [vmem:[%s4670_s14] sm:$0xff]  ;;  %v4263_v22 = vld [vmem:[%s5277_s3 + $0x28] sm:$0xff]  ;;  %v4309_v28 = vld [vmem:[%s5277_s3 + $0x98] sm:$0xff] }
  0x13   : > { %v4359_v23 = vld [vmem:[%s5277_s3 + $0x128] sm:$0xff]  ;;  %v4310_v24 = vld [vmem:[%s5277_s3 + $0xa0] sm:$0xff]  ;;  %v4333_v29 = vld [vmem:[%s5277_s3 + $0xd8] sm:$0xff] }
  0x14   : > { %4559 = vmatpush.bf16.msra.mxu1 %v4287_v2  ;;  %4560 = vmatpush.bf16.msra.mxu2 %v4287_v2  ;;  %v4334_v25 = vld [vmem:[%s5277_s3 + $0xe0] sm:$0xff]  ;;  %v4271_v30 = vld [vmem:[%s4670_s14 + $0x28] sm:$0xff]  ;;  %v4261_v34 = vld [vmem:[%s5277_s3 + $0x18] sm:$0xff] }
  0x15   : > { %4561 = vmatpush.bf16.msra.mxu3 %v4287_v2  ;;  %508 = vmatpush.bf16.msra.mxu0 %v4287_v2  ;;  %v4262_v26 = vld [vmem:[%s5277_s3 + $0x20] sm:$0xff]  ;;  %v4275_v31 = vld [vmem:[%s4670_s14 + $0x48] sm:$0xff]  ;;  %v4357_v35 = vld [vmem:[%s5277_s3 + $0x118] sm:$0xff] }
  0x16   : > { %v4358_v27 = vld [vmem:[%s5277_s3 + $0x120] sm:$0xff]  ;;  %v4279_v32 = vld [vmem:[%s4670_s14 + $0x68] sm:$0xff]  ;;  %v4308_v36 = vld [vmem:[%s5277_s3 + $0x90] sm:$0xff] }
  0x17   : > { %v4267_v33 = vld [vmem:[%s4670_s14 + $0x8] sm:$0xff]  ;;  %v4332_v37 = vld [vmem:[%s5277_s3 + $0xd0] sm:$0xff]  ;;  %v4306_v44 = vld [vmem:[%s5277_s3 + $0x80] sm:$0xff] }
  0x18   : > { %4562 = vmatpush.bf16.msra.mxu1 %v4286_v3  ;;  %4563 = vmatpush.bf16.msra.mxu2 %v4286_v3  ;;  %v4260_v38 = vld [vmem:[%s5277_s3 + $0x10] sm:$0xff]  ;;  %v4307_v40 = vld [vmem:[%s5277_s3 + $0x88] sm:$0xff]  ;;  %v4330_v45 = vld [vmem:[%s5277_s3 + $0xc0] sm:$0xff] }
  0x19   : > { %4564 = vmatpush.bf16.msra.mxu3 %v4286_v3  ;;  %509 = vmatpush.bf16.msra.mxu0 %v4286_v3  ;;  %v4356_v39 = vld [vmem:[%s5277_s3 + $0x110] sm:$0xff]  ;;  %v4331_v41 = vld [vmem:[%s5277_s3 + $0xc8] sm:$0xff]  ;;  %v4258_v46 = vld [vmem:[%s5277_s3] sm:$0xff] }
  0x1a   : > { %v4259_v42 = vld [vmem:[%s5277_s3 + $0x8] sm:$0xff]  ;;  %v4354_v47 = vld [vmem:[%s5277_s3 + $0x100] sm:$0xff]  ;;  %v4272_v48 = vld [vmem:[%s4670_s14 + $0x30] sm:$0xff] }
  0x1b   : > { %v4355_v43 = vld [vmem:[%s5277_s3 + $0x108] sm:$0xff]  ;;  %v4276_v49 = vld [vmem:[%s4670_s14 + $0x50] sm:$0xff]  ;;  %v4409_v52 = vld [vmem:[%s5277_s3 + $0x1b8] sm:$0xff] }
  0x1c   : > { %4565 = vmatpush.bf16.msra.mxu1 %v4285_v4  ;;  %4566 = vmatpush.bf16.msra.mxu2 %v4285_v4  ;;  %v4280_v50 = vld [vmem:[%s4670_s14 + $0x70] sm:$0xff]  ;;  %v4433_v53 = vld [vmem:[%s5277_s3 + $0x1f8] sm:$0xff]  ;;  %v4242_v60 = vld [vmem:[%s4800_s28] sm:$0xff] }
  0x1d   : > { %4567 = vmatpush.bf16.msra.mxu3 %v4285_v4  ;;  %510 = vmatpush.bf16.msra.mxu0 %v4285_v4  ;;  %v4268_v51 = vld [vmem:[%s4670_s14 + $0x10] sm:$0xff]  ;;  %v4385_v54 = vld [vmem:[%s5277_s3 + $0x178] sm:$0xff]  ;;  %v4290_v61 = vld [vmem:[%s4806_s6] sm:$0xff] }
  0x1e   : > { %v4457_v55 = vld [vmem:[%s5277_s3 + $0x238] sm:$0xff]  ;;  %v4314_v62 = vld [vmem:[%s4800_s28 + $0x8] sm:$0xff]  ;;  %v4408_v0 = vld [vmem:[%s5277_s3 + $0x1b0] sm:$0xff] }
  0x1f   : > { %v4273_v56 = vld [vmem:[%s4670_s14 + $0x38] sm:$0xff]  ;;  %v4338_v63 = vld [vmem:[%s4670_s14 + $0x8] sm:$0xff]  ;;  %v4432_v1 = vld [vmem:[%s5277_s3 + $0x1f0] sm:$0xff] }
  0x20   : > { %4568 = vmatpush.bf16.msra.mxu1 %v4284_v5  ;;  %4569 = vmatpush.bf16.msra.mxu2 %v4284_v5  ;;  %v4277_v57 = vld [vmem:[%s4670_s14 + $0x58] sm:$0xff]  ;;  %v4384_v2 = vld [vmem:[%s5277_s3 + $0x170] sm:$0xff]  ;;  %v4243_v4 = vld [vmem:[%s4800_s28 + $0x8] sm:$0xff] }
  0x21   : > { %4570 = vmatpush.bf16.msra.mxu3 %v4284_v5  ;;  %511 = vmatpush.bf16.msra.mxu0 %v4284_v5  ;;  %v4281_v58 = vld [vmem:[%s4670_s14 + $0x78] sm:$0xff]  ;;  %v4456_v3 = vld [vmem:[%s5277_s3 + $0x230] sm:$0xff]  ;;  %v4291_v5 = vld [vmem:[%s4806_s6 + $0x8] sm:$0xff] }
  0x22   : > { %v4269_v59 = vld [vmem:[%s4670_s14 + $0x18] sm:$0xff] }
  0x24   : > { %4571 = vmatpush.bf16.msra.mxu1 %v4283_v6  ;;  %4572 = vmatpush.bf16.msra.mxu2 %v4283_v6 }
  0x25   : > { %4573 = vmatpush.bf16.msra.mxu3 %v4283_v6  ;;  %512 = vmatpush.bf16.msra.mxu0 %v4283_v6  ;;  %v4315_v6 = vld [vmem:[%s4800_s28 + $0x10] sm:$0xff] }
  0x28   : > { %4574 = vmatpush.bf16.msra.mxu1 %v4282_v7  ;;  %4575 = vmatpush.bf16.msra.mxu2 %v4282_v7 }
  0x29   : > { %4576 = vmatpush.bf16.msra.mxu3 %v4282_v7  ;;  %513 = vmatpush.bf16.msra.mxu0 %v4282_v7  ;;  %v4339_v7 = vld [vmem:[%s4670_s14 + $0x10] sm:$0xff] }
  0x2b   : > { %534 = vmatmul.bf16.vlgmr.msra.gmra.mxu1 %v4270_v10  ;;  %554 = vmatmul.bf16.vlgmr.msra.gmra.mxu2 %v4274_v11  ;;  %v4316_v10 = vld [vmem:[%s4800_s28 + $0x18] sm:$0xff] }
  0x2c   : > { %1021 = vmatpush.bf16.msrb.mxu2 %v4313_v8  ;;  %574 = vmatmul.bf16.vlgmr.msra.gmra.mxu3 %v4278_v12  ;;  %v4244_v8 = vld [vmem:[%s4800_s28 + $0x10] sm:$0xff]  ;;  %v4340_v11 = vld [vmem:[%s4670_s14 + $0x18] sm:$0xff]  ;;  %v4407_v12 = vld [vmem:[%s5277_s3 + $0x1a8] sm:$0xff] }
  0x2d   : > { %1335 = vmatpush.bf16.msrb.mxu3 %v4337_v9  ;;  %514 = vmatmul.bf16.vlgmr.msra.gmra.mxu0 %v4266_v13  ;;  %v4292_v9 = vld [vmem:[%s4806_s6 + $0x10] sm:$0xff]  ;;  %v4431_v13 = vld [vmem:[%s5277_s3 + $0x1e8] sm:$0xff] }
  0x2e   : > { %739 = vmatpush.bf16.msrb.mxu1 %v4265_v14  ;;  %1649 = vmatpush.bf16.msrb.mxu0 %v4361_v15  ;;  %v4383_v14 = vld [vmem:[%s5277_s3 + $0x168] sm:$0xff] }
  0x2f   : > { %v4455_v15 = vld [vmem:[%s5277_s3 + $0x228] sm:$0xff] }
  0x30   : > { %1022 = vmatpush.bf16.msrb.mxu2 %v4312_v16  ;;  %v4245_v16 = vld [vmem:[%s4800_s28 + $0x18] sm:$0xff] }
  0x31   : > { %1336 = vmatpush.bf16.msrb.mxu3 %v4336_v17  ;;  %v4293_v17 = vld [vmem:[%s4806_s6 + $0x18] sm:$0xff] }
  0x32   : > { %740 = vmatpush.bf16.msrb.mxu1 %v4264_v18  ;;  %1650 = vmatpush.bf16.msrb.mxu0 %v4360_v19  ;;  %v4317_v18 = vld [vmem:[%s4800_s28 + $0x20] sm:$0xff] }
  0x33   : > { %v4341_v19 = vld [vmem:[%s4670_s14 + $0x20] sm:$0xff] }
  0x34   : > { %1023 = vmatpush.bf16.msrb.mxu2 %v4311_v20  ;;  %v4246_v20 = vld [vmem:[%s4800_s28 + $0x20] sm:$0xff] }
  0x35   : > { %1337 = vmatpush.bf16.msrb.mxu3 %v4335_v21  ;;  %v4294_v21 = vld [vmem:[%s4806_s6 + $0x20] sm:$0xff] }
  0x36   : > { %741 = vmatpush.bf16.msrb.mxu1 %v4263_v22  ;;  %1651 = vmatpush.bf16.msrb.mxu0 %v4359_v23  ;;  %v4318_v23 = vld [vmem:[%s4800_s28 + $0x28] sm:$0xff] }
  0x38   : > { %1024 = vmatpush.bf16.msrb.mxu2 %v4310_v24  ;;  %v4342_v24 = vld [vmem:[%s4670_s14 + $0x28] sm:$0xff] }
  0x39   : > { %1338 = vmatpush.bf16.msrb.mxu3 %v4334_v25 }
  0x3a   : > { %742 = vmatpush.bf16.msrb.mxu1 %v4262_v26  ;;  %1652 = vmatpush.bf16.msrb.mxu0 %v4358_v27  ;;  %v4406_v26 = vld [vmem:[%s5277_s3 + $0x1a0] sm:$0xff] }
  0x3b   : > { %539 = vmatmul.bf16.gmra.mxu1 %v4271_v30  ;;  %559 = vmatmul.bf16.gmra.mxu2 %v4275_v31  ;;  %v4430_v27 = vld [vmem:[%s5277_s3 + $0x1e0] sm:$0xff] }
  0x3c   : > { %1025 = vmatpush.bf16.msrb.mxu2 %v4309_v28  ;;  %579 = vmatmul.bf16.gmra.mxu3 %v4279_v32  ;;  %v4382_v30 = vld [vmem:[%s5277_s3 + $0x160] sm:$0xff] }
  0x3d   : > { %1339 = vmatpush.bf16.msrb.mxu3 %v4333_v29  ;;  %519 = vmatmul.bf16.gmra.mxu0 %v4267_v33  ;;  %v4454_v33 = vld [vmem:[%s5277_s3 + $0x220] sm:$0xff] }
  0x3e   : > { %743 = vmatpush.bf16.msrb.mxu1 %v4261_v34  ;;  %1653 = vmatpush.bf16.msrb.mxu0 %v4357_v35 }
  0x40   : > { %1026 = vmatpush.bf16.msrb.mxu2 %v4308_v36  ;;  %v4247_v36 = vld [vmem:[%s4800_s28 + $0x28] sm:$0xff] }
  0x41   : > { %1340 = vmatpush.bf16.msrb.mxu3 %v4332_v37  ;;  %v4295_v37 = vld [vmem:[%s4806_s6 + $0x28] sm:$0xff] }
  0x42   : > { %744 = vmatpush.bf16.msrb.mxu1 %v4260_v38  ;;  %1654 = vmatpush.bf16.msrb.mxu0 %v4356_v39  ;;  %v4319_v39 = vld [vmem:[%s4800_s28 + $0x30] sm:$0xff] }
  0x44   : > { %1027 = vmatpush.bf16.msrb.mxu2 %v4307_v40  ;;  %v4343_v40 = vld [vmem:[%s4670_s14 + $0x30] sm:$0xff] }
  0x45   : > { %1341 = vmatpush.bf16.msrb.mxu3 %v4331_v41 }
  0x46   : > { %745 = vmatpush.bf16.msrb.mxu1 %v4259_v42  ;;  %1655 = vmatpush.bf16.msrb.mxu0 %v4355_v43 }
  0x48   : > { %1028 = vmatpush.bf16.msrb.mxu2 %v4306_v44 }
  0x49   : > { %1342 = vmatpush.bf16.msrb.mxu3 %v4330_v45 }
  0x4a   : > { %746 = vmatpush.bf16.msrb.mxu1 %v4258_v46  ;;  %1656 = vmatpush.bf16.msrb.mxu0 %v4354_v47 }
  0x4b   : > { %544 = vmatmul.bf16.gmra.mxu1 %v4272_v48  ;;  %564 = vmatmul.bf16.gmra.mxu2 %v4276_v49  ;;  %v4248_v48 = vld [vmem:[%s4800_s28 + $0x30] sm:$0xff] }
  0x4c   : > { %584 = vmatmul.bf16.gmra.mxu3 %v4280_v50  ;;  %2277 = vmatpush.bf16.msra.mxu2 %v4409_v52  ;;  %v4296_v49 = vld [vmem:[%s4806_s6 + $0x30] sm:$0xff]  ;;  %v4344_v52 = vld [vmem:[%s4670_s14 + $0x38] sm:$0xff] }
  0x4d   : > { %524 = vmatmul.bf16.gmra.mxu0 %v4268_v51  ;;  %2591 = vmatpush.bf16.msra.mxu3 %v4433_v53  ;;  %v4320_v51 = vld [vmem:[%s4800_s28 + $0x38] sm:$0xff] }
  0x4e   : > { %1963 = vmatpush.bf16.msra.mxu1 %v4385_v54  ;;  %2905 = vmatpush.bf16.msra.mxu0 %v4457_v55  ;;  %v4405_v54 = vld [vmem:[%s5277_s3 + $0x198] sm:$0xff] }
  0x4f   : > { %v4429_v55 = vld [vmem:[%s5277_s3 + $0x1d8] sm:$0xff] }
  0x50   : > { %2278 = vmatpush.bf16.msra.mxu2 %v4408_v0  ;;  %v4249_v0 = vld [vmem:[%s4800_s28 + $0x38] sm:$0xff] }
  0x51   : > { %2592 = vmatpush.bf16.msra.mxu3 %v4432_v1  ;;  %v4297_v1 = vld [vmem:[%s4806_s6 + $0x38] sm:$0xff] }
  0x52   : > { %1964 = vmatpush.bf16.msra.mxu1 %v4384_v2  ;;  %2906 = vmatpush.bf16.msra.mxu0 %v4456_v3  ;;  %v4321_v3 = vld [vmem:[%s4800_s28 + $0x40] sm:$0xff] }
  0x54   : > { %2279 = vmatpush.bf16.msra.mxu2 %v4407_v12  ;;  %v4250_v12 = vld [vmem:[%s4800_s28 + $0x40] sm:$0xff] }
  0x55   : > { %2593 = vmatpush.bf16.msra.mxu3 %v4431_v13  ;;  %v4298_v13 = vld [vmem:[%s4806_s6 + $0x40] sm:$0xff] }
  0x56   : > { %1965 = vmatpush.bf16.msra.mxu1 %v4383_v14  ;;  %2907 = vmatpush.bf16.msra.mxu0 %v4455_v15  ;;  %v4322_v15 = vld [vmem:[%s4800_s28 + $0x48] sm:$0xff] }
  0x58   : > { %2280 = vmatpush.bf16.msra.mxu2 %v4406_v26 }
  0x59   : > { %2594 = vmatpush.bf16.msra.mxu3 %v4430_v27 }
  0x5a   : > { %1966 = vmatpush.bf16.msra.mxu1 %v4382_v30  ;;  %2908 = vmatpush.bf16.msra.mxu0 %v4454_v33  ;;  %v4380_v33 = vld [vmem:[%s5277_s3 + $0x150] sm:$0xff] }
  0x5b   : > { %549 = vmatmul.bf16.gmra.mxu1 %v4273_v56  ;;  %569 = vmatmul.bf16.gmra.mxu2 %v4277_v57 }
  0x5c   : > { %589 = vmatmul.bf16.gmra.mxu3 %v4281_v58  ;;  %2281 = vmatpush.bf16.msra.mxu2 %v4405_v54  ;;  %v4347_v54 = vld [vmem:[%s4670_s14 + $0x50] sm:$0xff] }
  0x5d   : > { %529 = vmatmul.bf16.gmra.mxu0 %v4269_v59  ;;  %2595 = vmatpush.bf16.msra.mxu3 %v4429_v55 }
  0x6b   : > { %747 = vmatmul.bf16.vlgmr.msrb.gmra.mxu1 %v4242_v60  ;;  %1029 = vmatmul.bf16.vlgmr.msrb.gmra.mxu2 %v4290_v61  ;;  %v4381_v60 = vld [vmem:[%s5277_s3 + $0x158] sm:$0xff] }
  0x6c   : > { %1343 = vmatmul.bf16.vlgmr.msrb.gmra.mxu3 %v4314_v62  ;;  %v4453_v61 = vld [vmem:[%s5277_s3 + $0x218] sm:$0xff]  ;;  %1967 = vmatpush.bf16.msra.mxu1 %v4381_v60 }
  0x6d   : > { %1657 = vmatmul.bf16.vlgmr.msrb.gmra.mxu0 %v4338_v63 }
  0x6e   : > { %2909 = vmatpush.bf16.msra.mxu0 %v4453_v61 }
  0x70   : > { %1968 = vmatpush.bf16.msra.mxu1 %v4380_v33  ;;  %v4427_v33 = vld [vmem:[%s5277_s3 + $0x1c8] sm:$0xff] }
  0x7b   : > { %752 = vmatmul.bf16.gmra.mxu1 %v4243_v4  ;;  %1034 = vmatmul.bf16.gmra.mxu2 %v4291_v5  ;;  %v4345_v4 = vld [vmem:[%s4670_s14 + $0x40] sm:$0xff] }
  0x7c   : > { %1348 = vmatmul.bf16.gmra.mxu3 %v4315_v6 }
  0x7d   : > { %1662 = vmatmul.bf16.gmra.mxu0 %v4339_v7 }
  0x8b   : > { %757 = vmatmul.bf16.gmra.mxu1 %v4244_v8  ;;  %1039 = vmatmul.bf16.gmra.mxu2 %v4292_v9 }
  0x8c   : > { %1353 = vmatmul.bf16.gmra.mxu3 %v4316_v10 }
  0x8d   : > { %1667 = vmatmul.bf16.gmra.mxu0 %v4340_v11 }
  0x9b   : > { %762 = vmatmul.bf16.gmra.mxu1 %v4245_v16  ;;  %1044 = vmatmul.bf16.gmra.mxu2 %v4293_v17  ;;  %v4346_v16 = vld [vmem:[%s4670_s14 + $0x48] sm:$0xff] }
  0x9c   : > { %1358 = vmatmul.bf16.gmra.mxu3 %v4317_v18 }
  0x9d   : > { %1672 = vmatmul.bf16.gmra.mxu0 %v4341_v19  ;;  %v4404_v19 = vld [vmem:[%s5277_s3 + $0x190] sm:$0xff] }
  0x9e   : > { %2282 = vmatpush.bf16.msra.mxu2 %v4404_v19  ;;  %v4252_v19 = vld [vmem:[%s4800_s28 + $0x50] sm:$0xff] }
  0xa8   : > { %v4850_v22 = vpop.f32.mrf.mxu1 }
  0xaa   : > { %v4854_v25 = vpop.f32.mrf.mxu0 }
  0xab   : > { %767 = vmatmul.bf16.gmra.mxu1 %v4246_v20  ;;  %1049 = vmatmul.bf16.gmra.mxu2 %v4294_v21  ;;  %v4428_v20 = vld [vmem:[%s5277_s3 + $0x1d0] sm:$0xff] }
  0xac   : > { %1363 = vmatmul.bf16.gmra.mxu3 %v4318_v23 }
  0xad   : > { %1677 = vmatmul.bf16.gmra.mxu0 %v4342_v24  ;;  %2596 = vmatpush.bf16.msra.mxu3 %v4428_v20  ;;  %v4300_v20 = vld [vmem:[%s4806_s6 + $0x50] sm:$0xff] }
  0xae   : > { %v4862_v28 = vpop.f32.mrf.mxu2 }
  0xaf   : > { %v4864_v29 = vpop.f32.mrf.mxu3 }
  0xb0   : > { %v4869_v31 = vpop.f32.mrf.mxu1 }
  0xb1   : > { %2597 = vmatpush.bf16.msra.mxu3 %v4427_v33  ;;  %v4302_v33 = vld [vmem:[%s4806_s6 + $0x60] sm:$0xff] }
  0xb2   : > { %v4871_v32 = vpop.f32.mrf.mxu0 }
  0xb6   : > { %v4876_v34 = vpop.f32.mrf.mxu2 }
  0xb7   : > { %v4878_v35 = vpop.f32.mrf.mxu3 }
  0xb8   : > { %v4882_v38 = vpop.f32.mrf.mxu1 }
  0xba   : > { %v4886_v41 = vpop.f32.mrf.mxu0 }
  0xbb   : > { %772 = vmatmul.bf16.gmra.mxu1 %v4247_v36  ;;  %1054 = vmatmul.bf16.gmra.mxu2 %v4295_v37  ;;  %v4452_v36 = vld [vmem:[%s5277_s3 + $0x210] sm:$0xff] }
  0xbc   : > { %1368 = vmatmul.bf16.gmra.mxu3 %v4319_v39  ;;  %2910 = vmatpush.bf16.msra.mxu0 %v4452_v36 }
  0xbd   : > { %1682 = vmatmul.bf16.gmra.mxu0 %v4343_v40 }
  0xbe   : > { %v4888_v42 = vpop.f32.mrf.mxu2 }
  0xbf   : > { %v4890_v43 = vpop.f32.mrf.mxu3 }
  0xc0   : > { %v4892_v44 = vpop.f32.mrf.mxu1 }
  0xc2   : > { %v4894_v45 = vpop.f32.mrf.mxu0 }
  0xc6   : > { %v4896_v46 = vpop.f32.mrf.mxu2 }
  0xc7   : > { %v4898_v47 = vpop.f32.mrf.mxu3 }
  0xc8   : > { %v4902_v50 = vpop.f32.mrf.mxu1 }
  0xca   : > { %v4906_v53 = vpop.f32.mrf.mxu0 }
  0xcb   : > { %777 = vmatmul.bf16.gmra.mxu1 %v4248_v48  ;;  %1059 = vmatmul.bf16.gmra.mxu2 %v4296_v49  ;;  %v4251_v49 = vld [vmem:[%s4800_s28 + $0x48] sm:$0xff] }
  0xcc   : > { %1373 = vmatmul.bf16.gmra.mxu3 %v4320_v51  ;;  %v4299_v51 = vld [vmem:[%s4806_s6 + $0x48] sm:$0xff] }
  0xcd   : > { %1687 = vmatmul.bf16.gmra.mxu0 %v4344_v52 }
  0xce   : > { %v4914_v56 = vpop.f32.mrf.mxu2 }
  0xcf   : > { %v4916_v57 = vpop.f32.mrf.mxu3 }
  0xd0   : > { %v4918_v58 = vpop.f32.mrf.mxu1 }
  0xd2   : > { %v4920_v59 = vpop.f32.mrf.mxu0 }
  0xd6   : > { %v4928_v62 = vpop.f32.mrf.mxu2 }
  0xd7   : > { %v4930_v63 = vpop.f32.mrf.mxu3 }
  0xd8   : > { %v4934_v2 = vpop.f32.mrf.mxu1 }
  0xda   : > { %v4938_v5 = vpop.f32.mrf.mxu0 }
  0xdb   : > { %782 = vmatmul.bf16.gmra.mxu1 %v4249_v0  ;;  %1064 = vmatmul.bf16.gmra.mxu2 %v4297_v1 }
  0xdc   : > { %1378 = vmatmul.bf16.gmra.mxu3 %v4321_v3 }
  0xdd   : > { %1692 = vmatmul.bf16.gmra.mxu0 %v4345_v4 }
  0xde   : > { %v4940_v6 = vpop.f32.mrf.mxu2 }
  0xdf   : > { %v4942_v7 = vpop.f32.mrf.mxu3 }
  0xe0   : > { %v4944_v8 = vpop.f32.mrf.mxu1 }
  0xe2   : > { %v4946_v9 = vpop.f32.mrf.mxu0 }
  0xe6   : > { %v4948_v10 = vpop.f32.mrf.mxu2 }
  0xe7   : > { %v4950_v11 = vpop.f32.mrf.mxu3 }
  0xe8   : > { %v748_v14 = vpop.f32.mrf.mxu1 }
  0xe9   : > { %v749_v17 = vadd.f32 %v748_v14, %v4854_v25 }
  0xea   : > { %v1658_v18 = vpop.f32.mrf.mxu0 }
  0xeb   : > { %787 = vmatmul.bf16.gmra.mxu1 %v4250_v12  ;;  %1069 = vmatmul.bf16.gmra.mxu2 %v4298_v13 }
  0xec   : > { %1383 = vmatmul.bf16.gmra.mxu3 %v4322_v15 }
  0xed   : > { %1697 = vmatmul.bf16.gmra.mxu0 %v4346_v16 }
  0xee   : > { %v1030_v21 = vpop.f32.mrf.mxu2 }
  0xef   : > { %v1110_v23 = vadd.f32 %v1030_v21, %v749_v17  ;;  %v1344_v24 = vpop.f32.mrf.mxu3 }
  0xf0   : > { %v750_v25 = vpop.f32.mrf.mxu1 }
  0xf1   : > { %v1424_v26 = vadd.f32 %v1344_v24, %v1110_v23  ;;  %v751_v27 = vadd.f32 %v750_v25, %v4871_v32  ;;  %v4323_v32 = vld [vmem:[%s4800_s28 + $0x50] sm:$0xff]  ;;  %v4324_v23 = vld [vmem:[%s4800_s28 + $0x58] sm:$0xff] }
  0xf2   : > { %v1660_v30 = vpop.f32.mrf.mxu0  ;;  %v4348_v24 = vld [vmem:[%s4670_s14 + $0x58] sm:$0xff] }
  0xf3   : > { %v4970_v37 = vadd.f32 %v1658_v18, %v1424_v26 }
  0xf6   : > { %v1032_v39 = vpop.f32.mrf.mxu2 }
  0xf7   : > { %v1111_v40 = vadd.f32 %v1032_v39, %v751_v27  ;;  %v1346_v48 = vpop.f32.mrf.mxu3 }
  0xf8   : > { %v753_v52 = vpop.f32.mrf.mxu1 }
  0xf9   : > { %v1425_v55 = vadd.f32 %v1346_v48, %v1111_v40  ;;  %v754_v60 = vadd.f32 %v753_v52, %v4886_v41  ;;  %v4379_v52 = vld [vmem:[%s5277_s3 + $0x148] sm:$0xff] }
  0xfa   : > { %v1663_v61 = vpop.f32.mrf.mxu0  ;;  %1969 = vmatpush.bf16.msra.mxu1 %v4379_v52 }
  0xfb   : > { %792 = vmatmul.bf16.gmra.mxu1 %v4251_v49  ;;  %1074 = vmatmul.bf16.gmra.mxu2 %v4299_v51  ;;  %v4977_v0 = vadd.f32 %v1660_v30, %v1425_v55 }
  0xfc   : > { %1388 = vmatmul.bf16.gmra.mxu3 %v4323_v32  ;;  %v4451_v32 = vld [vmem:[%s5277_s3 + $0x208] sm:$0xff] }
  0xfd   : > { %1702 = vmatmul.bf16.gmra.mxu0 %v4347_v54 }
  0xfe   : > { %v1035_v1 = vpop.f32.mrf.mxu2  ;;  %2911 = vmatpush.bf16.msra.mxu0 %v4451_v32 }
  0xff   : > { %v1112_v3 = vadd.f32 %v1035_v1, %v754_v60  ;;  %v1349_v4 = vpop.f32.mrf.mxu3  ;;  %v4253_v1 = vld [vmem:[%s4800_s28 + $0x58] sm:$0xff] }
 0x100   : > { %v755_v12 = vpop.f32.mrf.mxu1 }
 0x101   : > { %v1426_v13 = vadd.f32 %v1349_v4, %v1112_v3  ;;  %v756_v14 = vadd.f32 %v755_v12, %v4894_v45  ;;  %v4403_v45 = vld [vmem:[%s5277_s3 + $0x188] sm:$0xff]  ;;  %v4301_v3 = vld [vmem:[%s4806_s6 + $0x58] sm:$0xff]  ;;  %v4349_v12 = vld [vmem:[%s4670_s14 + $0x60] sm:$0xff] }
 0x102   : > { %v1665_v15 = vpop.f32.mrf.mxu0  ;;  %2283 = vmatpush.bf16.msra.mxu2 %v4403_v45  ;;  %v4254_v45 = vld [vmem:[%s4800_s28 + $0x60] sm:$0xff] }
 0x103   : > { %v4980_v41 = vadd.f32 %v1663_v61, %v1426_v13 }
 0x106   : > { %v1037_v16 = vpop.f32.mrf.mxu2 }
 0x107   : > { %v1113_v17 = vadd.f32 %v1037_v16, %v756_v14  ;;  %v1351_v18 = vpop.f32.mrf.mxu3 }
 0x108   : > { %v758_v21 = vpop.f32.mrf.mxu1 }
 0x109   : > { %v1427_v25 = vadd.f32 %v1351_v18, %v1113_v17  ;;  %v759_v26 = vadd.f32 %v758_v21, %v4906_v53 }
 0x10a   : > { %v1668_v27 = vpop.f32.mrf.mxu0 }
 0x10b   : > { %797 = vmatmul.bf16.gmra.mxu1 %v4252_v19  ;;  %1079 = vmatmul.bf16.gmra.mxu2 %v4300_v20  ;;  %v4987_v30 = vadd.f32 %v1665_v15, %v1427_v25 }
 0x10c   : > { %1393 = vmatmul.bf16.gmra.mxu3 %v4324_v23 }
 0x10d   : > { %1707 = vmatmul.bf16.gmra.mxu0 %v4348_v24 }
 0x10e   : > { %v1040_v36 = vpop.f32.mrf.mxu2 }
 0x10f   : > { %v1114_v53 = vadd.f32 %v1040_v36, %v759_v26  ;;  %v1354_v39 = vpop.f32.mrf.mxu3 }
 0x110   : > { %v760_v40 = vpop.f32.mrf.mxu1 }
 0x111   : > { %v1428_v48 = vadd.f32 %v1354_v39, %v1114_v53  ;;  %v761_v49 = vadd.f32 %v760_v40, %v4920_v59  ;;  %v4325_v59 = vld [vmem:[%s4800_s28 + $0x60] sm:$0xff]  ;;  %v4326_v53 = vld [vmem:[%s4800_s28 + $0x68] sm:$0xff] }
 0x112   : > { %v1670_v51 = vpop.f32.mrf.mxu0  ;;  %v4350_v39 = vld [vmem:[%s4670_s14 + $0x68] sm:$0xff] }
 0x113   : > { %v5002_v54 = vadd.f32 %v1668_v27, %v1428_v48 }
 0x116   : > { %v1042_v55 = vpop.f32.mrf.mxu2 }
 0x117   : > { %v1115_v60 = vadd.f32 %v1042_v55, %v761_v49  ;;  %v1356_v61 = vpop.f32.mrf.mxu3 }
 0x118   : > { %v763_v4 = vpop.f32.mrf.mxu1 }
 0x119   : > { %v1429_v13 = vadd.f32 %v1356_v61, %v1115_v60  ;;  %v764_v14 = vadd.f32 %v763_v4, %v4938_v5  ;;  %v4378_v4 = vld [vmem:[%s5277_s3 + $0x140] sm:$0xff] }
 0x11a   : > { %v1673_v15 = vpop.f32.mrf.mxu0  ;;  %1970 = vmatpush.bf16.msra.mxu1 %v4378_v4 }
 0x11b   : > { %802 = vmatmul.bf16.gmra.mxu1 %v4253_v1  ;;  %1084 = vmatmul.bf16.gmra.mxu2 %v4301_v3  ;;  %v5009_v16 = vadd.f32 %v1670_v51, %v1429_v13  ;;  %v4426_v51 = vld [vmem:[%s5277_s3 + $0x1c0] sm:$0xff] }
 0x11c   : > { %1398 = vmatmul.bf16.gmra.mxu3 %v4325_v59 }
 0x11d   : > { %1712 = vmatmul.bf16.gmra.mxu0 %v4349_v12  ;;  %2598 = vmatpush.bf16.msra.mxu3 %v4426_v51 }
 0x11e   : > { %v1045_v17 = vpop.f32.mrf.mxu2 }
 0x11f   : > { %v1116_v18 = vadd.f32 %v1045_v17, %v764_v14  ;;  %v1359_v19 = vpop.f32.mrf.mxu3  ;;  %v4255_v17 = vld [vmem:[%s4800_s28 + $0x68] sm:$0xff] }
 0x120   : > { %v765_v20 = vpop.f32.mrf.mxu1 }
 0x121   : > { %v1430_v21 = vadd.f32 %v1359_v19, %v1116_v18  ;;  %v766_v23 = vadd.f32 %v765_v20, %v4946_v9  ;;  %v4402_v9 = vld [vmem:[%s5277_s3 + $0x180] sm:$0xff]  ;;  %v4303_v18 = vld [vmem:[%s4806_s6 + $0x68] sm:$0xff]  ;;  %v4327_v20 = vld [vmem:[%s4800_s28 + $0x70] sm:$0xff] }
 0x122   : > { %v1675_v24 = vpop.f32.mrf.mxu0  ;;  %2284 = vmatpush.bf16.msra.mxu2 %v4402_v9 }
 0x123   : > { %v5012_v5 = vadd.f32 %v1673_v15, %v1430_v21  ;;  %v4351_v21 = vld [vmem:[%s4670_s14 + $0x70] sm:$0xff] }
 0x126   : > { %v1047_v25 = vpop.f32.mrf.mxu2 }
 0x127   : > { %v1117_v26 = vadd.f32 %v1047_v25, %v766_v23  ;;  %v1361_v27 = vpop.f32.mrf.mxu3 }
 0x128   : > { %v768_v36 = vpop.f32.mrf.mxu1 }
 0x129   : > { %v1431_v40 = vadd.f32 %v1361_v27, %v1117_v26  ;;  %v769_v52 = vadd.f32 %v768_v36, %v4850_v22  ;;  %v4450_v22 = vld [vmem:[%s5277_s3 + $0x200] sm:$0xff] }
 0x12a   : > { %v1678_v48 = vpop.f32.mrf.mxu0  ;;  %2912 = vmatpush.bf16.msra.mxu0 %v4450_v22 }
 0x12b   : > { %807 = vmatmul.bf16.gmra.mxu1 %v4254_v45  ;;  %1089 = vmatmul.bf16.gmra.mxu2 %v4302_v33  ;;  %v5018_v49 = vadd.f32 %v1675_v24, %v1431_v40 }
 0x12c   : > { %1403 = vmatmul.bf16.gmra.mxu3 %v4326_v53 }
 0x12d   : > { %1717 = vmatmul.bf16.gmra.mxu0 %v4350_v39 }
 0x12e   : > { %v1050_v32 = vpop.f32.mrf.mxu2 }
 0x12f   : > { %v1118_v55 = vadd.f32 %v1050_v32, %v769_v52  ;;  %v1364_v60 = vpop.f32.mrf.mxu3  ;;  %v4256_v52 = vld [vmem:[%s4800_s28 + $0x70] sm:$0xff] }
 0x130   : > { %v770_v61 = vpop.f32.mrf.mxu1  ;;  %v4304_v32 = vld [vmem:[%s4806_s6 + $0x70] sm:$0xff] }
 0x131   : > { %v1432_v1 = vadd.f32 %v1364_v60, %v1118_v55  ;;  %v771_v12 = vadd.f32 %v770_v61, %v4869_v31  ;;  %v4328_v60 = vld [vmem:[%s4800_s28 + $0x78] sm:$0xff] }
 0x132   : > { %v1680_v3 = vpop.f32.mrf.mxu0  ;;  %v4352_v61 = vld [vmem:[%s4670_s14 + $0x78] sm:$0xff] }
 0x133   : > { %v5033_v59 = vadd.f32 %v1678_v48, %v1432_v1 }
 0x136   : > { %v1052_v13 = vpop.f32.mrf.mxu2 }
 0x137   : > { %v1119_v14 = vadd.f32 %v1052_v13, %v771_v12  ;;  %v1366_v15 = vpop.f32.mrf.mxu3 }
 0x138   : > { %v773_v19 = vpop.f32.mrf.mxu1 }
 0x139   : > { %v1433_v23 = vadd.f32 %v1366_v15, %v1119_v14  ;;  %v774_v31 = vadd.f32 %v773_v19, %v4882_v38 }
 0x13a   : > { %v1683_v24 = vpop.f32.mrf.mxu0 }
 0x13b   : > { %812 = vmatmul.bf16.gmra.mxu1 %v4255_v17  ;;  %1094 = vmatmul.bf16.gmra.mxu2 %v4303_v18  ;;  %v5040_v25 = vadd.f32 %v1680_v3, %v1433_v23  ;;  %v4257_v23 = vld [vmem:[%s4800_s28 + $0x78] sm:$0xff] }
 0x13c   : > { %1408 = vmatmul.bf16.gmra.mxu3 %v4327_v20 }
 0x13d   : > { %1722 = vmatmul.bf16.gmra.mxu0 %v4351_v21 }
 0x13e   : > { %v1055_v26 = vpop.f32.mrf.mxu2 }
 0x13f   : > { %v1120_v27 = vadd.f32 %v1055_v26, %v774_v31  ;;  %v1369_v45 = vpop.f32.mrf.mxu3  ;;  %v4329_v26 = vld [vmem:[%s4800_s28 + $0x80] sm:$0xff] }
 0x140   : > { %v775_v33 = vpop.f32.mrf.mxu1 }
 0x141   : > { %v1434_v36 = vadd.f32 %v1369_v45, %v1120_v27  ;;  %v776_v40 = vadd.f32 %v775_v33, %v4892_v44  ;;  %v4353_v27 = vld [vmem:[%s4670_s14 + $0x80] sm:$0xff] }
 0x142   : > { %v1685_v53 = vpop.f32.mrf.mxu0 }
 0x143   : > { %v5043_v39 = vadd.f32 %v1683_v24, %v1434_v36  ;;  %v4305_v24 = vld [vmem:[%s4806_s6 + $0x78] sm:$0xff] }
 0x146   : > { %v1057_v48 = vpop.f32.mrf.mxu2 }
 0x147   : > { %v1121_v9 = vadd.f32 %v1057_v48, %v776_v40  ;;  %v1371_v51 = vpop.f32.mrf.mxu3 }
 0x148   : > { %v778_v55 = vpop.f32.mrf.mxu1 }
 0x149   : > { %v1435_v38 = vadd.f32 %v1371_v51, %v1121_v9  ;;  %v779_v44 = vadd.f32 %v778_v55, %v4902_v50 }
 0x14a   : > { %v1688_v1 = vpop.f32.mrf.mxu0 }
 0x14b   : > { %817 = vmatmul.bf16.gmra.mxu1 %v4256_v52  ;;  %1099 = vmatmul.bf16.gmra.mxu2 %v4304_v32  ;;  %v5050_v3 = vadd.f32 %v1685_v53, %v1435_v38  ;;  %v4362_v38 = vld [vmem:[%s4806_s6 + $0x8] sm:$0xff] }
 0x14c   : > { %1413 = vmatmul.bf16.gmra.mxu3 %v4328_v60 }
 0x14d   : > { %1727 = vmatmul.bf16.gmra.mxu0 %v4352_v61 }
 0x14e   : > { %v1060_v4 = vpop.f32.mrf.mxu2 }
 0x14f   : > { %v1122_v22 = vadd.f32 %v1060_v4, %v779_v44  ;;  %v1374_v12 = vpop.f32.mrf.mxu3  ;;  %v4410_v4 = vld [vmem:[%s4670_s14 + $0x10] sm:$0xff] }
 0x150   : > { %v780_v13 = vpop.f32.mrf.mxu1 }
 0x151   : > { %v1436_v14 = vadd.f32 %v1374_v12, %v1122_v22  ;;  %v781_v18 = vadd.f32 %v780_v13, %v4918_v58  ;;  %v4434_v22 = vld [vmem:[%s4806_s6 + $0x10] sm:$0xff] }
 0x152   : > { %v1690_v15 = vpop.f32.mrf.mxu0 }
 0x153   : > { %v5053_v17 = vadd.f32 %v1688_v1, %v1436_v14  ;;  %v4386_v1 = vld [vmem:[%s4800_s28 + $0x10] sm:$0xff] }
 0x156   : > { %v1062_v19 = vpop.f32.mrf.mxu2 }
 0x157   : > { %v1123_v20 = vadd.f32 %v1062_v19, %v781_v18  ;;  %v1376_v21 = vpop.f32.mrf.mxu3 }
 0x158   : > { %v783_v31 = vpop.f32.mrf.mxu1 }
 0x159   : > { %v1437_v50 = vadd.f32 %v1376_v21, %v1123_v20  ;;  %v784_v58 = vadd.f32 %v783_v31, %v4934_v2 }
 0x15a   : > { %v1693_v45 = vpop.f32.mrf.mxu0 }
 0x15b   : > { %822 = vmatmul.bf16.gmra.mxu1 %v4257_v23  ;;  %1104 = vmatmul.bf16.gmra.mxu2 %v4305_v24  ;;  %v5060_v33 = vadd.f32 %v1690_v15, %v1437_v50  ;;  %v4363_v50 = vld [vmem:[%s4806_s6 + $0x10] sm:$0xff] }
 0x15c   : > { %1418 = vmatmul.bf16.gmra.mxu3 %v4329_v26 }
 0x15d   : > { %1732 = vmatmul.bf16.gmra.mxu0 %v4353_v27 }
 0x15e   : > { %v1065_v36 = vpop.f32.mrf.mxu2 }
 0x15f   : > { %v1124_v53 = vadd.f32 %v1065_v36, %v784_v58  ;;  %v1379_v40 = vpop.f32.mrf.mxu3  ;;  %v4411_v36 = vld [vmem:[%s4670_s14 + $0x18] sm:$0xff] }
 0x160   : > { %v785_v48 = vpop.f32.mrf.mxu1 }
 0x161   : > { %v1438_v9 = vadd.f32 %v1379_v40, %v1124_v53  ;;  %v786_v32 = vadd.f32 %v785_v48, %v4944_v8  ;;  %v4435_v53 = vld [vmem:[%s4806_s6 + $0x18] sm:$0xff] }
 0x162   : > { %v1695_v51 = vpop.f32.mrf.mxu0 }
 0x163   : > { %v5063_v52 = vadd.f32 %v1693_v45, %v1438_v9  ;;  %v4387_v45 = vld [vmem:[%s4800_s28 + $0x18] sm:$0xff] }
 0x166   : > { %v1067_v55 = vpop.f32.mrf.mxu2 }
 0x167   : > { %v1125_v60 = vadd.f32 %v1067_v55, %v786_v32  ;;  %v1381_v61 = vpop.f32.mrf.mxu3 }
 0x168   : > { %v788_v44 = vpop.f32.mrf.mxu1 }
 0x169   : > { %v1439_v2 = vadd.f32 %v1381_v61, %v1125_v60  ;;  %v789_v8 = vadd.f32 %v788_v44, %v4862_v28 }
 0x16a   : > { %v1698_v12 = vpop.f32.mrf.mxu0 }
 0x16b   : > { %1971 = vmatmul.bf16.vlgmr.msra.gmra.mxu1 %v4362_v38  ;;  %2285 = vmatmul.bf16.vlgmr.msra.gmra.mxu2 %v4386_v1  ;;  %v5070_v13 = vadd.f32 %v1695_v51, %v1439_v2  ;;  %v4364_v2 = vld [vmem:[%s4806_s6 + $0x18] sm:$0xff] }
 0x16c   : > { %2599 = vmatmul.bf16.vlgmr.msra.gmra.mxu3 %v4410_v4 }
 0x16d   : > { %2913 = vmatmul.bf16.vlgmr.msra.gmra.mxu0 %v4434_v22 }
 0x16e   : > { %v1070_v14 = vpop.f32.mrf.mxu2 }
 0x16f   : > { %v1126_v15 = vadd.f32 %v1070_v14, %v789_v8  ;;  %v1384_v18 = vpop.f32.mrf.mxu3  ;;  %v4412_v14 = vld [vmem:[%s4670_s14 + $0x20] sm:$0xff] }
 0x170   : > { %v790_v19 = vpop.f32.mrf.mxu1 }
 0x171   : > { %v1440_v20 = vadd.f32 %v1384_v18, %v1126_v15  ;;  %v791_v24 = vadd.f32 %v790_v19, %v4876_v34  ;;  %v4436_v15 = vld [vmem:[%s4806_s6 + $0x20] sm:$0xff] }
 0x172   : > { %v1700_v21 = vpop.f32.mrf.mxu0 }
 0x173   : > { %v5073_v23 = vadd.f32 %v1698_v12, %v1440_v20  ;;  %v4388_v12 = vld [vmem:[%s4800_s28 + $0x20] sm:$0xff] }
 0x176   : > { %v1072_v31 = vpop.f32.mrf.mxu2 }
 0x177   : > { %v1127_v26 = vadd.f32 %v1072_v31, %v791_v24  ;;  %v1386_v27 = vpop.f32.mrf.mxu3 }
 0x178   : > { %v793_v58 = vpop.f32.mrf.mxu1 }
 0x179   : > { %v1441_v28 = vadd.f32 %v1386_v27, %v1127_v26  ;;  %v794_v34 = vadd.f32 %v793_v58, %v4888_v42 }
 0x17a   : > { %v1703_v40 = vpop.f32.mrf.mxu0 }
 0x17b   : > { %1976 = vmatmul.bf16.gmra.mxu1 %v4363_v50  ;;  %2290 = vmatmul.bf16.gmra.mxu2 %v4387_v45  ;;  %v5080_v48 = vadd.f32 %v1700_v21, %v1441_v28  ;;  %v4365_v28 = vld [vmem:[%s4806_s6 + $0x20] sm:$0xff] }
 0x17c   : > { %2604 = vmatmul.bf16.gmra.mxu3 %v4411_v36 }
 0x17d   : > { %2918 = vmatmul.bf16.gmra.mxu0 %v4435_v53 }
 0x17e   : > { %v1075_v9 = vpop.f32.mrf.mxu2 }
 0x17f   : > { %v1128_v51 = vadd.f32 %v1075_v9, %v794_v34  ;;  %v1389_v32 = vpop.f32.mrf.mxu3  ;;  %v4413_v9 = vld [vmem:[%s4670_s14 + $0x28] sm:$0xff] }
 0x180   : > { %v795_v55 = vpop.f32.mrf.mxu1 }
 0x181   : > { %v1442_v60 = vadd.f32 %v1389_v32, %v1128_v51  ;;  %v796_v1 = vadd.f32 %v795_v55, %v4896_v46  ;;  %v4437_v51 = vld [vmem:[%s4806_s6 + $0x28] sm:$0xff] }
 0x182   : > { %v1705_v61 = vpop.f32.mrf.mxu0 }
 0x183   : > { %v5083_v38 = vadd.f32 %v1703_v40, %v1442_v60  ;;  %v4389_v40 = vld [vmem:[%s4800_s28 + $0x28] sm:$0xff] }
 0x186   : > { %v1077_v44 = vpop.f32.mrf.mxu2 }
 0x187   : > { %v1129_v4 = vadd.f32 %v1077_v44, %v796_v1  ;;  %v1391_v22 = vpop.f32.mrf.mxu3 }
 0x188   : > { %v798_v8 = vpop.f32.mrf.mxu1 }
 0x189   : > { %v1443_v42 = vadd.f32 %v1391_v22, %v1129_v4  ;;  %v799_v46 = vadd.f32 %v798_v8, %v4914_v56 }
 0x18a   : > { %v1708_v18 = vpop.f32.mrf.mxu0 }
 0x18b   : > { %1981 = vmatmul.bf16.gmra.mxu1 %v4364_v2  ;;  %2295 = vmatmul.bf16.gmra.mxu2 %v4388_v12  ;;  %v5090_v19 = vadd.f32 %v1705_v61, %v1443_v42  ;;  %v4366_v42 = vld [vmem:[%s4806_s6 + $0x28] sm:$0xff] }
 0x18c   : > { %2609 = vmatmul.bf16.gmra.mxu3 %v4412_v14 }
 0x18d   : > { %2923 = vmatmul.bf16.gmra.mxu0 %v4436_v15 }
 0x18e   : > { %v1080_v20 = vpop.f32.mrf.mxu2 }
 0x18f   : > { %v1130_v21 = vadd.f32 %v1080_v20, %v799_v46  ;;  %v1394_v24 = vpop.f32.mrf.mxu3  ;;  %v4414_v20 = vld [vmem:[%s4670_s14 + $0x30] sm:$0xff] }
 0x190   : > { %v800_v31 = vpop.f32.mrf.mxu1 }
 0x191   : > { %v1444_v26 = vadd.f32 %v1394_v24, %v1130_v21  ;;  %v801_v45 = vadd.f32 %v800_v31, %v4928_v62  ;;  %v4438_v21 = vld [vmem:[%s4806_s6 + $0x30] sm:$0xff] }
 0x192   : > { %v1710_v27 = vpop.f32.mrf.mxu0 }
 0x193   : > { %v5093_v50 = vadd.f32 %v1708_v18, %v1444_v26  ;;  %v4390_v18 = vld [vmem:[%s4800_s28 + $0x30] sm:$0xff] }
 0x196   : > { %v1082_v58 = vpop.f32.mrf.mxu2 }
 0x197   : > { %v1131_v36 = vadd.f32 %v1082_v58, %v801_v45  ;;  %v1396_v53 = vpop.f32.mrf.mxu3 }
 0x198   : > { %v803_v34 = vpop.f32.mrf.mxu1 }
 0x199   : > { %v1445_v56 = vadd.f32 %v1396_v53, %v1131_v36  ;;  %v804_v62 = vadd.f32 %v803_v34, %v4940_v6 }
 0x19a   : > { %v1713_v32 = vpop.f32.mrf.mxu0 }
 0x19b   : > { %1986 = vmatmul.bf16.gmra.mxu1 %v4365_v28  ;;  %2300 = vmatmul.bf16.gmra.mxu2 %v4389_v40  ;;  %v5100_v55 = vadd.f32 %v1710_v27, %v1445_v56  ;;  %v4367_v56 = vld [vmem:[%s4806_s6 + $0x30] sm:$0xff] }
 0x19c   : > { %2614 = vmatmul.bf16.gmra.mxu3 %v4413_v9 }
 0x19d   : > { %2928 = vmatmul.bf16.gmra.mxu0 %v4437_v51 }
 0x19e   : > { %v1085_v60 = vpop.f32.mrf.mxu2 }
 0x19f   : > { %v1132_v61 = vadd.f32 %v1085_v60, %v804_v62  ;;  %v1399_v1 = vpop.f32.mrf.mxu3  ;;  %v4415_v60 = vld [vmem:[%s4670_s14 + $0x38] sm:$0xff] }
 0x1a0   : > { %v805_v44 = vpop.f32.mrf.mxu1 }
 0x1a1   : > { %v1446_v4 = vadd.f32 %v1399_v1, %v1132_v61  ;;  %v806_v12 = vadd.f32 %v805_v44, %v4948_v10  ;;  %v4439_v61 = vld [vmem:[%s4806_s6 + $0x38] sm:$0xff] }
 0x1a2   : > { %v1715_v22 = vpop.f32.mrf.mxu0 }
 0x1a3   : > { %v5103_v2 = vadd.f32 %v1713_v32, %v1446_v4  ;;  %v4391_v32 = vld [vmem:[%s4800_s28 + $0x38] sm:$0xff] }
 0x1a6   : > { %v1087_v8 = vpop.f32.mrf.mxu2 }
 0x1a7   : > { %v1133_v14 = vadd.f32 %v1087_v8, %v806_v12  ;;  %v1401_v15 = vpop.f32.mrf.mxu3 }
 0x1a8   : > { %v808_v46 = vpop.f32.mrf.mxu1 }
 0x1a9   : > { %v1447_v6 = vadd.f32 %v1401_v15, %v1133_v14  ;;  %v809_v10 = vadd.f32 %v808_v46, %v4864_v29 }
 0x1aa   : > { %v1718_v24 = vpop.f32.mrf.mxu0 }
 0x1ab   : > { %1991 = vmatmul.bf16.gmra.mxu1 %v4366_v42  ;;  %2305 = vmatmul.bf16.gmra.mxu2 %v4390_v18  ;;  %v5110_v31 = vadd.f32 %v1715_v22, %v1447_v6  ;;  %v4368_v6 = vld [vmem:[%s4806_s6 + $0x38] sm:$0xff] }
 0x1ac   : > { %2619 = vmatmul.bf16.gmra.mxu3 %v4414_v20 }
 0x1ad   : > { %2933 = vmatmul.bf16.gmra.mxu0 %v4438_v21 }
 0x1ae   : > { %v1090_v26 = vpop.f32.mrf.mxu2 }
 0x1af   : > { %v1134_v27 = vadd.f32 %v1090_v26, %v809_v10  ;;  %v1404_v45 = vpop.f32.mrf.mxu3  ;;  %v4416_v26 = vld [vmem:[%s4670_s14 + $0x40] sm:$0xff] }
 0x1b0   : > { %v810_v58 = vpop.f32.mrf.mxu1 }
 0x1b1   : > { %v1448_v36 = vadd.f32 %v1404_v45, %v1134_v27  ;;  %v811_v40 = vadd.f32 %v810_v58, %v4878_v35  ;;  %v4440_v27 = vld [vmem:[%s4806_s6 + $0x40] sm:$0xff] }
 0x1b2   : > { %v1720_v53 = vpop.f32.mrf.mxu0 }
 0x1b3   : > { %v5113_v28 = vadd.f32 %v1718_v24, %v1448_v36  ;;  %v4392_v24 = vld [vmem:[%s4800_s28 + $0x40] sm:$0xff] }
 0x1b6   : > { %v1092_v34 = vpop.f32.mrf.mxu2 }
 0x1b7   : > { %v1135_v9 = vadd.f32 %v1092_v34, %v811_v40  ;;  %v1406_v51 = vpop.f32.mrf.mxu3 }
 0x1b8   : > { %v813_v62 = vpop.f32.mrf.mxu1 }
 0x1b9   : > { %v1449_v29 = vadd.f32 %v1406_v51, %v1135_v9  ;;  %v814_v35 = vadd.f32 %v813_v62, %v4890_v43 }
 0x1ba   : > { %v1723_v1 = vpop.f32.mrf.mxu0 }
 0x1bb   : > { %1996 = vmatmul.bf16.gmra.mxu1 %v4367_v56  ;;  %2310 = vmatmul.bf16.gmra.mxu2 %v4391_v32  ;;  %v5120_v44 = vadd.f32 %v1720_v53, %v1449_v29  ;;  %v4369_v29 = vld [vmem:[%s4806_s6 + $0x40] sm:$0xff] }
 0x1bc   : > { %2624 = vmatmul.bf16.gmra.mxu3 %v4415_v60 }
 0x1bd   : > { %2938 = vmatmul.bf16.gmra.mxu0 %v4439_v61 }
 0x1be   : > { %v1095_v4 = vpop.f32.mrf.mxu2 }
 0x1bf   : > { %v1136_v22 = vadd.f32 %v1095_v4, %v814_v35  ;;  %v1409_v12 = vpop.f32.mrf.mxu3  ;;  %v4417_v4 = vld [vmem:[%s4670_s14 + $0x48] sm:$0xff] }
 0x1c0   : > { %v815_v8 = vpop.f32.mrf.mxu1 }
 0x1c1   : > { %v1450_v14 = vadd.f32 %v1409_v12, %v1136_v22  ;;  %v816_v18 = vadd.f32 %v815_v8, %v4898_v47  ;;  %v4441_v22 = vld [vmem:[%s4806_s6 + $0x48] sm:$0xff] }
 0x1c2   : > { %v1725_v15 = vpop.f32.mrf.mxu0 }
 0x1c3   : > { %v5123_v42 = vadd.f32 %v1723_v1, %v1450_v14  ;;  %v4393_v1 = vld [vmem:[%s4800_s28 + $0x48] sm:$0xff] }
 0x1c6   : > { %v1097_v46 = vpop.f32.mrf.mxu2 }
 0x1c7   : > { %v1137_v20 = vadd.f32 %v1097_v46, %v816_v18  ;;  %v1411_v21 = vpop.f32.mrf.mxu3 }
 0x1c8   : > { %v818_v10 = vpop.f32.mrf.mxu1 }
 0x1c9   : > { %v1451_v43 = vadd.f32 %v1411_v21, %v1137_v20  ;;  %v819_v47 = vadd.f32 %v818_v10, %v4916_v57 }
 0x1ca   : > { %v1728_v45 = vpop.f32.mrf.mxu0 }
 0x1cb   : > { %2001 = vmatmul.bf16.gmra.mxu1 %v4368_v6  ;;  %2315 = vmatmul.bf16.gmra.mxu2 %v4392_v24  ;;  %v5130_v58 = vadd.f32 %v1725_v15, %v1451_v43  ;;  %v4370_v43 = vld [vmem:[%s4806_s6 + $0x48] sm:$0xff] }
 0x1cc   : > { %2629 = vmatmul.bf16.gmra.mxu3 %v4416_v26 }
 0x1cd   : > { %2943 = vmatmul.bf16.gmra.mxu0 %v4440_v27 }
 0x1ce   : > { %v1100_v36 = vpop.f32.mrf.mxu2 }
 0x1cf   : > { %v1138_v53 = vadd.f32 %v1100_v36, %v819_v47  ;;  %v1414_v40 = vpop.f32.mrf.mxu3  ;;  %v4418_v36 = vld [vmem:[%s4670_s14 + $0x50] sm:$0xff] }
 0x1d0   : > { %v820_v34 = vpop.f32.mrf.mxu1 }
 0x1d1   : > { %v1452_v9 = vadd.f32 %v1414_v40, %v1138_v53  ;;  %v821_v32 = vadd.f32 %v820_v34, %v4930_v63  ;;  %v4442_v53 = vld [vmem:[%s4806_s6 + $0x50] sm:$0xff] }
 0x1d2   : > { %v1730_v51 = vpop.f32.mrf.mxu0 }
 0x1d3   : > { %v5133_v56 = vadd.f32 %v1728_v45, %v1452_v9  ;;  %v4394_v45 = vld [vmem:[%s4800_s28 + $0x50] sm:$0xff] }
 0x1d6   : > { %v1102_v62 = vpop.f32.mrf.mxu2 }
 0x1d7   : > { %v1139_v60 = vadd.f32 %v1102_v62, %v821_v32  ;;  %v1416_v61 = vpop.f32.mrf.mxu3 }
 0x1d8   : > { %v823_v35 = vpop.f32.mrf.mxu1 }
 0x1d9   : > { %v1453_v57 = vadd.f32 %v1416_v61, %v1139_v60  ;;  %v824_v63 = vadd.f32 %v823_v35, %v4942_v7 }
 0x1da   : > { %v1733_v12 = vpop.f32.mrf.mxu0 }
 0x1db   : > { %2006 = vmatmul.bf16.gmra.mxu1 %v4369_v29  ;;  %2320 = vmatmul.bf16.gmra.mxu2 %v4393_v1  ;;  %v5140_v8 = vadd.f32 %v1730_v51, %v1453_v57  ;;  %v4371_v57 = vld [vmem:[%s4806_s6 + $0x50] sm:$0xff] }
 0x1dc   : > { %2634 = vmatmul.bf16.gmra.mxu3 %v4417_v4  ;;  %v5157_v4 = vld [vmem:[%s5278_s4] ss:$0 sm:$0xff] }
 0x1dd   : > { %2948 = vmatmul.bf16.gmra.mxu0 %v4441_v22 }
 0x1de   : > { %v1105_v14 = vpop.f32.mrf.mxu2 }
 0x1df   : > { %v1140_v15 = vadd.f32 %v1105_v14, %v824_v63  ;;  %v1419_v18 = vpop.f32.mrf.mxu3  ;;  %v4419_v14 = vld [vmem:[%s4670_s14 + $0x58] sm:$0xff] }
 0x1e0   : > { %v825_v46 = vpop.f32.mrf.mxu1 }
 0x1e1   : > { %v1454_v20 = vadd.f32 %v1419_v18, %v1140_v15  ;;  %v826_v24 = vadd.f32 %v825_v46, %v4950_v11  ;;  %v4443_v15 = vld [vmem:[%s4806_s6 + $0x58] sm:$0xff] }
 0x1e2   : > { %v1735_v21 = vpop.f32.mrf.mxu0 }
 0x1e3   : > { %v5143_v6 = vadd.f32 %v1733_v12, %v1454_v20  ;;  %v4395_v12 = vld [vmem:[%s4800_s28 + $0x58] sm:$0xff] }
 0x1e6   : > { %v1107_v10 = vpop.f32.mrf.mxu2 }
 0x1e7   : > { %v1141_v26 = vadd.f32 %v1107_v10, %v826_v24  ;;  %v1421_v27 = vpop.f32.mrf.mxu3 }
 0x1e8   : > { %v1972_v47 = vpop.f32.mrf.mxu1 }
 0x1e9   : > { %v1455_v7 = vadd.f32 %v1421_v27, %v1141_v26  ;;  %v2052_v11 = vadd.f32 %v1972_v47, %v4970_v37 }
 0x1ea   : > { %v2914_v40 = vpop.f32.mrf.mxu0 }
 0x1eb   : > { %2011 = vmatmul.bf16.gmra.mxu1 %v4370_v43  ;;  %2325 = vmatmul.bf16.gmra.mxu2 %v4394_v45  ;;  %v5150_v34 = vadd.f32 %v1735_v21, %v1455_v7 }
 0x1ec   : > { %2639 = vmatmul.bf16.gmra.mxu3 %v4418_v36 }
 0x1ed   : > { %2953 = vmatmul.bf16.gmra.mxu0 %v4442_v53 }
 0x1ee   : > { %v2286_v9 = vpop.f32.mrf.mxu2 }
 0x1ef   : > { %v2366_v51 = vadd.f32 %v2286_v9, %v2052_v11  ;;  %v2600_v32 = vpop.f32.mrf.mxu3 }
 0x1f0   : > { %v1974_v62 = vpop.f32.mrf.mxu1 }
 0x1f1   : > { %v2680_v61 = vadd.f32 %v2600_v32, %v2366_v51  ;;  %v2053_v29 = vadd.f32 %v1974_v62, %v4977_v0  ;;  %v4372_v32 = vld [vmem:[%s4806_s6 + $0x58] sm:$0xff]  ;;  %v4396_v62 = vld [vmem:[%s4800_s28 + $0x60] sm:$0xff] }
 0x1f2   : > { %v2916_v60 = vpop.f32.mrf.mxu0 }
 0x1f3   : > { %v2994_v35 = vadd.f32 %v2914_v40, %v2680_v61  ;;  %v4420_v61 = vld [vmem:[%s4670_s14 + $0x60] sm:$0xff] }
 0x1f5   : > { %v3030_v20 = vadd.f32 %v5157_v4, %v2994_v35 }
 0x1f6   : > { %v2288_v1 = vpop.f32.mrf.mxu2 }
 0x1f7   : > { %v2367_v22 = vadd.f32 %v2288_v1, %v2053_v29  ;;  %v2602_v37 = vpop.f32.mrf.mxu3  ;;  %v3062_v26 = vmax.f32 %v3030_v20, 0.0  ;;  %v4444_v29 = vld [vmem:[%s4806_s6 + $0x60] sm:$0xff] }
 0x1f8   : > { %v1977_v63 = vpop.f32.mrf.mxu1 }
 0x1f9   : > { %v2681_v18 = vadd.f32 %v2602_v37, %v2367_v22  ;;  %v2054_v24 = vadd.f32 %v1977_v63, %v4980_v41 }
 0x1fa   : > { %v2919_v46 = vpop.f32.mrf.mxu0 }
 0x1fb   : > { %v2995_v0 = vadd.f32 %v2916_v60, %v2681_v18  ;;  %2016 = vmatmul.bf16.gmra.mxu1 %v4371_v57  ;;  %2330 = vmatmul.bf16.gmra.mxu2 %v4395_v12 }
 0x1fc   : > { %2644 = vmatmul.bf16.gmra.mxu3 %v4419_v14 }
 0x1fd   : > { %2958 = vmatmul.bf16.gmra.mxu0 %v4443_v15  ;;  %v3031_v21 = vadd.f32 %v5157_v4, %v2995_v0 }
 0x1fe   : > { %v2291_v10 = vpop.f32.mrf.mxu2 }
 0x1ff   : > { %v3063_v27 = vmax.f32 %v3031_v21, 0.0  ;;  %v2368_v43 = vadd.f32 %v2291_v10, %v2054_v24  ;;  %v2605_v45 = vpop.f32.mrf.mxu3 }
 0x200   : > { %v1979_v47 = vpop.f32.mrf.mxu1 }
 0x201   : > { %v4461_v36 = vpack.c.bf16 %v3063_v27, %v3062_v26  ;;  %v2682_v41 = vadd.f32 %v2605_v45, %v2368_v43  ;;  %v2055_v7 = vadd.f32 %v1979_v47, %v4987_v30  ;;  %v4373_v43 = vld [vmem:[%s4806_s6 + $0x60] sm:$0xff]  ;;  %v4397_v45 = vld [vmem:[%s4800_s28 + $0x68] sm:$0xff] }
 0x202   : > { %v2921_v53 = vpop.f32.mrf.mxu0 }
 0x203   : > { %4462 = vst [vmem:[%s5170_s8] sm:$0xff] %v4461_v36   ;;  %v2996_v11 = vadd.f32 %v2919_v46, %v2682_v41  ;;  %v4421_v36 = vld [vmem:[%s4670_s14 + $0x68] sm:$0xff] }
 0x205   : > { %v3032_v22 = vadd.f32 %v5157_v4, %v2996_v11 }
 0x206   : > { %v2293_v40 = vpop.f32.mrf.mxu2 }
 0x207   : > { %v2369_v9 = vadd.f32 %v2293_v40, %v2055_v7  ;;  %v2607_v51 = vpop.f32.mrf.mxu3  ;;  %v3064_v63 = vmax.f32 %v3032_v22, 0.0 }
 0x208   : > { %v1982_v60 = vpop.f32.mrf.mxu1 }
 0x209   : > { %v2683_v1 = vadd.f32 %v2607_v51, %v2369_v9  ;;  %v2056_v57 = vadd.f32 %v1982_v60, %v5002_v54 }
 0x20a   : > { %v2924_v35 = vpop.f32.mrf.mxu0 }
 0x20b   : > { %v2997_v37 = vadd.f32 %v2921_v53, %v2683_v1  ;;  %2021 = vmatmul.bf16.gmra.mxu1 %v4372_v32  ;;  %2335 = vmatmul.bf16.gmra.mxu2 %v4396_v62  ;;  %v4445_v53 = vld [vmem:[%s4806_s6 + $0x68] sm:$0xff] }
 0x20c   : > { %2649 = vmatmul.bf16.gmra.mxu3 %v4420_v61 }
 0x20d   : > { %2963 = vmatmul.bf16.gmra.mxu0 %v4444_v29  ;;  %v3033_v30 = vadd.f32 %v5157_v4, %v2997_v37 }
 0x20e   : > { %v2296_v12 = vpop.f32.mrf.mxu2 }
 0x20f   : > { %v3065_v14 = vmax.f32 %v3033_v30, 0.0  ;;  %v2370_v15 = vadd.f32 %v2296_v12, %v2056_v57  ;;  %v2610_v18 = vpop.f32.mrf.mxu3 }
 0x210   : > { %v1984_v46 = vpop.f32.mrf.mxu1 }
 0x211   : > { %v4466_v20 = vpack.c.bf16 %v3065_v14, %v3064_v63  ;;  %v2684_v21 = vadd.f32 %v2610_v18, %v2370_v15  ;;  %v2057_v24 = vadd.f32 %v1984_v46, %v5009_v16  ;;  %v4374_v63 = vld [vmem:[%s4806_s6 + $0x68] sm:$0xff]  ;;  %v4398_v14 = vld [vmem:[%s4800_s28 + $0x70] sm:$0xff] }
 0x212   : > { %v2926_v0 = vpop.f32.mrf.mxu0  ;;  %v4422_v18 = vld [vmem:[%s4670_s14 + $0x70] sm:$0xff] }
 0x213   : > { %4538 = vst [vmem:[%s5170_s8 + $0x8] sm:$0xff] %v4466_v20   ;;  %v2998_v26 = vadd.f32 %v2924_v35, %v2684_v21  ;;  %v4446_v46 = vld [vmem:[%s4806_s6 + $0x70] sm:$0xff] }
 0x215   : > { %v3034_v40 = vadd.f32 %v5157_v4, %v2998_v26 }
 0x216   : > { %v2298_v10 = vpop.f32.mrf.mxu2 }
 0x217   : > { %v2371_v27 = vadd.f32 %v2298_v10, %v2057_v24  ;;  %v2612_v54 = vpop.f32.mrf.mxu3  ;;  %v3066_v32 = vmax.f32 %v3034_v40, 0.0 }
 0x218   : > { %v1987_v47 = vpop.f32.mrf.mxu1 }
 0x219   : > { %v2685_v41 = vadd.f32 %v2612_v54, %v2371_v27  ;;  %v2058_v9 = vadd.f32 %v1987_v47, %v5012_v5 }
 0x21a   : > { %v2929_v7 = vpop.f32.mrf.mxu0 }
 0x21b   : > { %v2999_v11 = vadd.f32 %v2926_v0, %v2685_v41  ;;  %2026 = vmatmul.bf16.gmra.mxu1 %v4373_v43  ;;  %2340 = vmatmul.bf16.gmra.mxu2 %v4397_v45 }
 0x21c   : > { %2654 = vmatmul.bf16.gmra.mxu3 %v4421_v36 }
 0x21d   : > { %2968 = vmatmul.bf16.gmra.mxu0 %v4445_v53  ;;  %v3035_v16 = vadd.f32 %v5157_v4, %v2999_v11 }
 0x21e   : > { %v2301_v51 = vpop.f32.mrf.mxu2 }
 0x21f   : > { %v3067_v62 = vmax.f32 %v3035_v16, 0.0  ;;  %v2372_v60 = vadd.f32 %v2301_v51, %v2058_v9  ;;  %v2615_v61 = vpop.f32.mrf.mxu3  ;;  %v4375_v9 = vld [vmem:[%s4806_s6 + $0x70] sm:$0xff]  ;;  %v4399_v51 = vld [vmem:[%s4800_s28 + $0x78] sm:$0xff] }
 0x220   : > { %v1989_v29 = vpop.f32.mrf.mxu1 }
 0x221   : > { %v4471_v1 = vpack.c.bf16 %v3067_v62, %v3066_v32  ;;  %v2686_v22 = vadd.f32 %v2615_v61, %v2372_v60  ;;  %v2059_v37 = vadd.f32 %v1989_v29, %v5018_v49  ;;  %v4423_v62 = vld [vmem:[%s4670_s14 + $0x78] sm:$0xff] }
 0x222   : > { %v2931_v35 = vpop.f32.mrf.mxu0  ;;  %v4447_v60 = vld [vmem:[%s4806_s6 + $0x78] sm:$0xff] }
 0x223   : > { %4539 = vst [vmem:[%s5170_s8 + $0x10] sm:$0xff] %v4471_v1   ;;  %v3000_v57 = vadd.f32 %v2929_v7, %v2686_v22 }
 0x225   : > { %v3036_v21 = vadd.f32 %v5157_v4, %v3000_v57 }
 0x226   : > { %v2303_v30 = vpop.f32.mrf.mxu2 }
 0x227   : > { %v2373_v12 = vadd.f32 %v2303_v30, %v2059_v37  ;;  %v2617_v5 = vpop.f32.mrf.mxu3  ;;  %v3068_v27 = vmax.f32 %v3036_v21, 0.0 }
 0x228   : > { %v1992_v15 = vpop.f32.mrf.mxu1 }
 0x229   : > { %v2687_v20 = vadd.f32 %v2617_v5, %v2373_v12  ;;  %v2060_v10 = vadd.f32 %v1992_v15, %v5033_v59 }
 0x22a   : > { %v2934_v0 = vpop.f32.mrf.mxu0 }
 0x22b   : > { %v3001_v24 = vadd.f32 %v2931_v35, %v2687_v20  ;;  %2031 = vmatmul.bf16.gmra.mxu1 %v4374_v63  ;;  %2345 = vmatmul.bf16.gmra.mxu2 %v4398_v14 }
 0x22c   : > { %2659 = vmatmul.bf16.gmra.mxu3 %v4422_v18 }
 0x22d   : > { %2973 = vmatmul.bf16.gmra.mxu0 %v4446_v46  ;;  %v3037_v49 = vadd.f32 %v5157_v4, %v3001_v24  ;;  %v4376_v24 = vld [vmem:[%s4806_s6 + $0x78] sm:$0xff] }
 0x22e   : > { %v2306_v26 = vpop.f32.mrf.mxu2 }
 0x22f   : > { %v3069_v54 = vmax.f32 %v3037_v49, 0.0  ;;  %v2374_v43 = vadd.f32 %v2306_v26, %v2060_v10  ;;  %v2620_v45 = vpop.f32.mrf.mxu3  ;;  %v4400_v49 = vld [vmem:[%s4800_s28 + $0x80] sm:$0xff] }
 0x230   : > { %v1994_v47 = vpop.f32.mrf.mxu1  ;;  %v4424_v26 = vld [vmem:[%s4670_s14 + $0x80] sm:$0xff] }
 0x231   : > { %v4476_v36 = vpack.c.bf16 %v3069_v54, %v3068_v27  ;;  %v2688_v41 = vadd.f32 %v2620_v45, %v2374_v43  ;;  %v2061_v7 = vadd.f32 %v1994_v47, %v5040_v25  ;;  %v4448_v27 = vld [vmem:[%s4806_s6 + $0x80] sm:$0xff] }
 0x232   : > { %v2936_v53 = vpop.f32.mrf.mxu0 }
 0x233   : > { %4540 = vst [vmem:[%s5170_s8 + $0x18] sm:$0xff] %v4476_v36   ;;  %v3002_v11 = vadd.f32 %v2934_v0, %v2688_v41 }
 0x235   : > { %v3038_v1 = vadd.f32 %v5157_v4, %v3002_v11 }
 0x236   : > { %v2308_v40 = vpop.f32.mrf.mxu2 }
 0x237   : > { %v2375_v16 = vadd.f32 %v2308_v40, %v2061_v7  ;;  %v2622_v59 = vpop.f32.mrf.mxu3  ;;  %v3070_v30 = vmax.f32 %v3038_v1, 0.0  ;;  %v4401_v1 = vld [vmem:[%s4800_s28 + $0x88] sm:$0xff] }
 0x238   : > { %v1997_v32 = vpop.f32.mrf.mxu1 }
 0x239   : > { %v2689_v61 = vadd.f32 %v2622_v59, %v2375_v16  ;;  %v2062_v22 = vadd.f32 %v1997_v32, %v5043_v39 }
 0x23a   : > { %v2939_v29 = vpop.f32.mrf.mxu0 }
 0x23b   : > { %v3003_v35 = vadd.f32 %v2936_v53, %v2689_v61  ;;  %2036 = vmatmul.bf16.gmra.mxu1 %v4375_v9  ;;  %2350 = vmatmul.bf16.gmra.mxu2 %v4399_v51 }
 0x23c   : > { %2664 = vmatmul.bf16.gmra.mxu3 %v4423_v62 }
 0x23d   : > { %2978 = vmatmul.bf16.gmra.mxu0 %v4447_v60  ;;  %v3039_v25 = vadd.f32 %v5157_v4, %v3003_v35 }
 0x23e   : > { %v2311_v37 = vpop.f32.mrf.mxu2 }
 0x23f   : > { %v3071_v57 = vmax.f32 %v3039_v25, 0.0  ;;  %v2376_v12 = vadd.f32 %v2311_v37, %v2062_v22  ;;  %v2625_v5 = vpop.f32.mrf.mxu3  ;;  %v4425_v25 = vld [vmem:[%s4670_s14 + $0x88] sm:$0xff] }
 0x240   : > { %v1999_v63 = vpop.f32.mrf.mxu1  ;;  %v4449_v22 = vld [vmem:[%s4806_s6 + $0x88] sm:$0xff] }
 0x241   : > { %v4481_v14 = vpack.c.bf16 %v3071_v57, %v3070_v30  ;;  %v2690_v18 = vadd.f32 %v2625_v5, %v2376_v12  ;;  %v2063_v46 = vadd.f32 %v1999_v63, %v5050_v3 }
 0x242   : > { %v2941_v15 = vpop.f32.mrf.mxu0 }
 0x243   : > { %4541 = vst [vmem:[%s5170_s8 + $0x20] sm:$0xff] %v4481_v14   ;;  %v3004_v0 = vadd.f32 %v2939_v29, %v2690_v18  ;;  %v4377_v29 = vld [vmem:[%s4806_s6 + $0x80] sm:$0xff] }
 0x245   : > { %v3040_v45 = vadd.f32 %v5157_v4, %v3004_v0 }
 0x246   : > { %v2313_v20 = vpop.f32.mrf.mxu2 }
 0x247   : > { %v2377_v21 = vadd.f32 %v2313_v20, %v2063_v46  ;;  %v2627_v39 = vpop.f32.mrf.mxu3  ;;  %v3072_v41 = vmax.f32 %v3040_v45, 0.0 }
 0x248   : > { %v2002_v10 = vpop.f32.mrf.mxu1 }
 0x249   : > { %v2691_v54 = vadd.f32 %v2627_v39, %v2377_v21  ;;  %v2064_v36 = vadd.f32 %v2002_v10, %v5053_v17 }
 0x24a   : > { %v2944_v43 = vpop.f32.mrf.mxu0 }
 0x24b   : > { %v3005_v47 = vadd.f32 %v2941_v15, %v2691_v54  ;;  %2041 = vmatmul.bf16.gmra.mxu1 %v4376_v24  ;;  %2355 = vmatmul.bf16.gmra.mxu2 %v4400_v49 }
 0x24c   : > { %2669 = vmatmul.bf16.gmra.mxu3 %v4424_v26 }
 0x24d   : > { %2983 = vmatmul.bf16.gmra.mxu0 %v4448_v27  ;;  %v3041_v3 = vadd.f32 %v5157_v4, %v3005_v47 }
 0x24e   : > { %v2316_v53 = vpop.f32.mrf.mxu2 }
 0x24f   : > { %v3073_v7 = vmax.f32 %v3041_v3, 0.0  ;;  %v2378_v40 = vadd.f32 %v2316_v53, %v2064_v36  ;;  %v2630_v11 = vpop.f32.mrf.mxu3 }
 0x250   : > { %v2004_v16 = vpop.f32.mrf.mxu1 }
 0x251   : > { %v4486_v59 = vpack.c.bf16 %v3073_v7, %v3072_v41  ;;  %v2692_v51 = vadd.f32 %v2630_v11, %v2378_v40  ;;  %v2065_v32 = vadd.f32 %v2004_v16, %v5060_v33 }
 0x252   : > { %v2946_v9 = vpop.f32.mrf.mxu0 }
 0x253   : > { %4542 = vst [vmem:[%s5170_s8 + $0x28] sm:$0xff] %v4486_v59   ;;  %v3006_v60 = vadd.f32 %v2944_v43, %v2692_v51 }
 0x255   : > { %v3042_v57 = vadd.f32 %v5157_v4, %v3006_v60 }
 0x256   : > { %v2318_v62 = vpop.f32.mrf.mxu2 }
 0x257   : > { %v2379_v61 = vadd.f32 %v2318_v62, %v2065_v32  ;;  %v2632_v17 = vpop.f32.mrf.mxu3  ;;  %v3074_v14 = vmax.f32 %v3042_v57, 0.0 }
 0x258   : > { %v2007_v35 = vpop.f32.mrf.mxu1 }
 0x259   : > { %v2693_v37 = vadd.f32 %v2632_v17, %v2379_v61  ;;  %v2066_v5 = vadd.f32 %v2007_v35, %v5063_v52 }
 0x25a   : > { %v2949_v30 = vpop.f32.mrf.mxu0 }
 0x25b   : > { %v3007_v12 = vadd.f32 %v2946_v9, %v2693_v37  ;;  %2046 = vmatmul.bf16.gmra.mxu1 %v4377_v29  ;;  %2360 = vmatmul.bf16.gmra.mxu2 %v4401_v1 }
 0x25c   : > { %2674 = vmatmul.bf16.gmra.mxu3 %v4425_v25 }
 0x25d   : > { %2988 = vmatmul.bf16.gmra.mxu0 %v4449_v22  ;;  %v3043_v33 = vadd.f32 %v5157_v4, %v3007_v12 }
 0x25e   : > { %v2321_v63 = vpop.f32.mrf.mxu2 }
 0x25f   : > { %v3075_v15 = vmax.f32 %v3043_v33, 0.0  ;;  %v2380_v18 = vadd.f32 %v2321_v63, %v2066_v5  ;;  %v2635_v46 = vpop.f32.mrf.mxu3 }
 0x260   : > { %v2009_v20 = vpop.f32.mrf.mxu1 }
 0x261   : > { %v4491_v0 = vpack.c.bf16 %v3075_v15, %v3074_v14  ;;  %v2694_v39 = vadd.f32 %v2635_v46, %v2380_v18  ;;  %v2067_v24 = vadd.f32 %v2009_v20, %v5070_v13 }
 0x262   : > { %v2951_v21 = vpop.f32.mrf.mxu0 }
 0x263   : > { %4543 = vst [vmem:[%s5170_s8 + $0x30] sm:$0xff] %v4491_v0   ;;  %v3008_v10 = vadd.f32 %v2949_v30, %v2694_v39 }
 0x265   : > { %v3044_v45 = vadd.f32 %v5157_v4, %v3008_v10 }
 0x266   : > { %v2323_v49 = vpop.f32.mrf.mxu2 }
 0x267   : > { %v2381_v26 = vadd.f32 %v2323_v49, %v2067_v24  ;;  %v2637_v27 = vpop.f32.mrf.mxu3  ;;  %v3076_v41 = vmax.f32 %v3044_v45, 0.0 }
 0x268   : > { %v2012_v54 = vpop.f32.mrf.mxu1 }
 0x269   : > { %v2695_v43 = vadd.f32 %v2637_v27, %v2381_v26  ;;  %v2068_v36 = vadd.f32 %v2012_v54, %v5073_v23 }
 0x26a   : > { %v2954_v52 = vpop.f32.mrf.mxu0 }
 0x26b   : > { %v3009_v47 = vadd.f32 %v2951_v21, %v2695_v43 }
 0x26d   : > { %v3045_v3 = vadd.f32 %v5157_v4, %v3009_v47 }
 0x26e   : > { %v2326_v53 = vpop.f32.mrf.mxu2 }
 0x26f   : > { %v3077_v7 = vmax.f32 %v3045_v3, 0.0  ;;  %v2382_v40 = vadd.f32 %v2326_v53, %v2068_v36  ;;  %v2640_v13 = vpop.f32.mrf.mxu3 }
 0x270   : > { %v2014_v11 = vpop.f32.mrf.mxu1 }
 0x271   : > { %v4496_v16 = vpack.c.bf16 %v3077_v7, %v3076_v41  ;;  %v2696_v9 = vadd.f32 %v2640_v13, %v2382_v40  ;;  %v2069_v51 = vadd.f32 %v2014_v11, %v5080_v48 }
 0x272   : > { %v2956_v59 = vpop.f32.mrf.mxu0 }
 0x273   : > { %4544 = vst [vmem:[%s5170_s8 + $0x38] sm:$0xff] %v4496_v16   ;;  %v3010_v62 = vadd.f32 %v2954_v52, %v2696_v9 }
 0x275   : > { %v3046_v1 = vadd.f32 %v5157_v4, %v3010_v62 }
 0x276   : > { %v2328_v32 = vpop.f32.mrf.mxu2 }
 0x277   : > { %v2383_v60 = vadd.f32 %v2328_v32, %v2069_v51  ;;  %v2642_v61 = vpop.f32.mrf.mxu3  ;;  %v3078_v30 = vmax.f32 %v3046_v1, 0.0 }
 0x278   : > { %v2017_v17 = vpop.f32.mrf.mxu1 }
 0x279   : > { %v2697_v29 = vadd.f32 %v2642_v61, %v2383_v60  ;;  %v2070_v22 = vadd.f32 %v2017_v17, %v5083_v38 }
 0x27a   : > { %v2959_v23 = vpop.f32.mrf.mxu0 }
 0x27b   : > { %v3011_v35 = vadd.f32 %v2956_v59, %v2697_v29 }
 0x27d   : > { %v3047_v25 = vadd.f32 %v5157_v4, %v3011_v35 }
 0x27e   : > { %v2331_v37 = vpop.f32.mrf.mxu2 }
 0x27f   : > { %v3079_v57 = vmax.f32 %v3047_v25, 0.0  ;;  %v2384_v12 = vadd.f32 %v2331_v37, %v2070_v22  ;;  %v2645_v48 = vpop.f32.mrf.mxu3 }
 0x280   : > { %v2019_v33 = vpop.f32.mrf.mxu1 }
 0x281   : > { %v4501_v5 = vpack.c.bf16 %v3079_v57, %v3078_v30  ;;  %v2698_v14 = vadd.f32 %v2645_v48, %v2384_v12  ;;  %v2071_v15 = vadd.f32 %v2019_v33, %v5090_v19 }
 0x282   : > { %v2961_v63 = vpop.f32.mrf.mxu0 }
 0x283   : > { %4545 = vst [vmem:[%s5170_s8 + $0x40] sm:$0xff] %v4501_v5   ;;  %v3012_v46 = vadd.f32 %v2959_v23, %v2698_v14 }
 0x285   : > { %v3048_v24 = vadd.f32 %v5157_v4, %v3012_v46 }
 0x286   : > { %v2333_v18 = vpop.f32.mrf.mxu2 }
 0x287   : > { %v2385_v20 = vadd.f32 %v2333_v18, %v2071_v15  ;;  %v2647_v0 = vpop.f32.mrf.mxu3  ;;  %v3080_v54 = vmax.f32 %v3048_v24, 0.0 }
 0x288   : > { %v2022_v21 = vpop.f32.mrf.mxu1 }
 0x289   : > { %v2699_v39 = vadd.f32 %v2647_v0, %v2385_v20  ;;  %v2072_v26 = vadd.f32 %v2022_v21, %v5093_v50 }
 0x28a   : > { %v2964_v38 = vpop.f32.mrf.mxu0 }
 0x28b   : > { %v3013_v49 = vadd.f32 %v2961_v63, %v2699_v39 }
 0x28d   : > { %v3049_v10 = vadd.f32 %v5157_v4, %v3013_v49 }
 0x28e   : > { %v2336_v27 = vpop.f32.mrf.mxu2 }
 0x28f   : > { %v3081_v43 = vmax.f32 %v3049_v10, 0.0  ;;  %v2386_v52 = vadd.f32 %v2336_v27, %v2072_v26  ;;  %v2650_v19 = vpop.f32.mrf.mxu3 }
 0x290   : > { %v2024_v45 = vpop.f32.mrf.mxu1 }
 0x291   : > { %v4506_v47 = vpack.c.bf16 %v3081_v43, %v3080_v54  ;;  %v2700_v36 = vadd.f32 %v2650_v19, %v2386_v52  ;;  %v2073_v53 = vadd.f32 %v2024_v45, %v5100_v55 }
 0x292   : > { %v2966_v3 = vpop.f32.mrf.mxu0 }
 0x293   : > { %4546 = vst [vmem:[%s5170_s8 + $0x48] sm:$0xff] %v4506_v47   ;;  %v3014_v7 = vadd.f32 %v2964_v38, %v2700_v36 }
 0x295   : > { %v3050_v59 = vadd.f32 %v5157_v4, %v3014_v7 }
 0x296   : > { %v2338_v41 = vpop.f32.mrf.mxu2 }
 0x297   : > { %v2387_v40 = vadd.f32 %v2338_v41, %v2073_v53  ;;  %v2652_v13 = vpop.f32.mrf.mxu3  ;;  %v3082_v60 = vmax.f32 %v3050_v59, 0.0 }
 0x298   : > { %v2027_v11 = vpop.f32.mrf.mxu1 }
 0x299   : > { %v2701_v16 = vadd.f32 %v2652_v13, %v2387_v40  ;;  %v2074_v32 = vadd.f32 %v2027_v11, %v5103_v2 }
 0x29a   : > { %v2969_v50 = vpop.f32.mrf.mxu0 }
 0x29b   : > { %v3015_v9 = vadd.f32 %v2966_v3, %v2701_v16 }
 0x29d   : > { %v3051_v51 = vadd.f32 %v5157_v4, %v3015_v9 }
 0x29e   : > { %v2341_v62 = vpop.f32.mrf.mxu2 }
 0x29f   : > { %v3083_v61 = vmax.f32 %v3051_v51, 0.0  ;;  %v2388_v17 = vadd.f32 %v2341_v62, %v2074_v32  ;;  %v2655_v55 = vpop.f32.mrf.mxu3 }
 0x2a0   : > { %v2029_v29 = vpop.f32.mrf.mxu1 }
 0x2a1   : > { %v4511_v23 = vpack.c.bf16 %v3083_v61, %v3082_v60  ;;  %v2702_v35 = vadd.f32 %v2655_v55, %v2388_v17  ;;  %v2075_v25 = vadd.f32 %v2029_v29, %v5110_v31 }
 0x2a2   : > { %v2971_v1 = vpop.f32.mrf.mxu0 }
 0x2a3   : > { %4547 = vst [vmem:[%s5170_s8 + $0x50] sm:$0xff] %v4511_v23   ;;  %v3016_v37 = vadd.f32 %v2969_v50, %v2702_v35 }
 0x2a5   : > { %v3052_v33 = vadd.f32 %v5157_v4, %v3016_v37 }
 0x2a6   : > { %v2343_v22 = vpop.f32.mrf.mxu2 }
 0x2a7   : > { %v2389_v30 = vadd.f32 %v2343_v22, %v2075_v25  ;;  %v2657_v57 = vpop.f32.mrf.mxu3  ;;  %v3084_v18 = vmax.f32 %v3052_v33, 0.0 }
 0x2a8   : > { %v2032_v12 = vpop.f32.mrf.mxu1 }
 0x2a9   : > { %v2703_v48 = vadd.f32 %v2657_v57, %v2389_v30  ;;  %v2076_v14 = vadd.f32 %v2032_v12, %v5113_v28 }
 0x2aa   : > { %v2974_v2 = vpop.f32.mrf.mxu0 }
 0x2ab   : > { %v3017_v5 = vadd.f32 %v2971_v1, %v2703_v48 }
 0x2ad   : > { %v3053_v63 = vadd.f32 %v5157_v4, %v3017_v5 }
 0x2ae   : > { %v2346_v15 = vpop.f32.mrf.mxu2 }
 0x2af   : > { %v3085_v46 = vmax.f32 %v3053_v63, 0.0  ;;  %v2390_v20 = vadd.f32 %v2346_v15, %v2076_v14  ;;  %v2660_v31 = vpop.f32.mrf.mxu3 }
 0x2b0   : > { %v2034_v0 = vpop.f32.mrf.mxu1 }
 0x2b1   : > { %v4516_v21 = vpack.c.bf16 %v3085_v46, %v3084_v18  ;;  %v2704_v38 = vadd.f32 %v2660_v31, %v2390_v20  ;;  %v2077_v24 = vadd.f32 %v2034_v0, %v5120_v44 }
 0x2b2   : > { %v2976_v39 = vpop.f32.mrf.mxu0 }
 0x2b3   : > { %4548 = vst [vmem:[%s5170_s8 + $0x58] sm:$0xff] %v4516_v21   ;;  %v3018_v10 = vadd.f32 %v2974_v2, %v2704_v38 }
 0x2b5   : > { %v3054_v52 = vadd.f32 %v5157_v4, %v3018_v10 }
 0x2b6   : > { %v2348_v49 = vpop.f32.mrf.mxu2 }
 0x2b7   : > { %v2391_v26 = vadd.f32 %v2348_v49, %v2077_v24  ;;  %v2662_v27 = vpop.f32.mrf.mxu3  ;;  %v3086_v36 = vmax.f32 %v3054_v52, 0.0 }
 0x2b8   : > { %v2037_v54 = vpop.f32.mrf.mxu1 }
 0x2b9   : > { %v2705_v43 = vadd.f32 %v2662_v27, %v2391_v26  ;;  %v2078_v47 = vadd.f32 %v2037_v54, %v5123_v42 }
 0x2ba   : > { %v2979_v28 = vpop.f32.mrf.mxu0 }
 0x2bb   : > { %v3019_v19 = vadd.f32 %v2976_v39, %v2705_v43 }
 0x2bd   : > { %v3055_v45 = vadd.f32 %v5157_v4, %v3019_v19 }
 0x2be   : > { %v2351_v3 = vpop.f32.mrf.mxu2 }
 0x2bf   : > { %v3087_v53 = vmax.f32 %v3055_v45, 0.0  ;;  %v2392_v41 = vadd.f32 %v2351_v3, %v2078_v47  ;;  %v2665_v44 = vpop.f32.mrf.mxu3 }
 0x2c0   : > { %v2039_v7 = vpop.f32.mrf.mxu1 }
 0x2c1   : > { %v4521_v40 = vpack.c.bf16 %v3087_v53, %v3086_v36  ;;  %v2706_v11 = vadd.f32 %v2665_v44, %v2392_v41  ;;  %v2079_v16 = vadd.f32 %v2039_v7, %v5130_v58 }
 0x2c2   : > { %v2981_v13 = vpop.f32.mrf.mxu0 }
 0x2c3   : > { %4549 = vst [vmem:[%s5170_s8 + $0x60] sm:$0xff] %v4521_v40   ;;  %v3020_v59 = vadd.f32 %v2979_v28, %v2706_v11 }
 0x2c5   : > { %v3056_v42 = vadd.f32 %v5157_v4, %v3020_v59 }
 0x2c6   : > { %v2353_v50 = vpop.f32.mrf.mxu2 }
 0x2c7   : > { %v2393_v9 = vadd.f32 %v2353_v50, %v2079_v16  ;;  %v2667_v51 = vpop.f32.mrf.mxu3  ;;  %v3088_v23 = vmax.f32 %v3056_v42, 0.0 }
 0x2c8   : > { %v2042_v32 = vpop.f32.mrf.mxu1 }
 0x2c9   : > { %v2707_v62 = vadd.f32 %v2667_v51, %v2393_v9  ;;  %v2080_v55 = vadd.f32 %v2042_v32, %v5133_v56 }
 0x2ca   : > { %v2984_v61 = vpop.f32.mrf.mxu0 }
 0x2cb   : > { %v3021_v60 = vadd.f32 %v2981_v13, %v2707_v62 }
 0x2cd   : > { %v3057_v17 = vadd.f32 %v5157_v4, %v3021_v60 }
 0x2ce   : > { %v2356_v29 = vpop.f32.mrf.mxu2 }
 0x2cf   : > { %v3089_v1 = vmax.f32 %v3057_v17, 0.0  ;;  %v2394_v35 = vadd.f32 %v2356_v29, %v2080_v55  ;;  %v2670_v58 = vpop.f32.mrf.mxu3 }
 0x2d0   : > { %v2044_v25 = vpop.f32.mrf.mxu1 }
 0x2d1   : > { %v4526_v22 = vpack.c.bf16 %v3089_v1, %v3088_v23  ;;  %v2708_v37 = vadd.f32 %v2670_v58, %v2394_v35  ;;  %v2081_v30 = vadd.f32 %v2044_v25, %v5140_v8 }
 0x2d2   : > { %v2986_v57 = vpop.f32.mrf.mxu0 }
 0x2d3   : > { %4550 = vst [vmem:[%s5170_s8 + $0x68] sm:$0xff] %v4526_v22   ;;  %v3022_v48 = vadd.f32 %v2984_v61, %v2708_v37 }
 0x2d5   : > { %v3058_v56 = vadd.f32 %v5157_v4, %v3022_v48 }
 0x2d6   : > { %v2358_v12 = vpop.f32.mrf.mxu2 }
 0x2d7   : > { %v2395_v2 = vadd.f32 %v2358_v12, %v2081_v30  ;;  %v2672_v33 = vpop.f32.mrf.mxu3  ;;  %v3090_v20 = vmax.f32 %v3058_v56, 0.0 }
 0x2d8   : > { %v2047_v5 = vpop.f32.mrf.mxu1 }
 0x2d9   : > { %v2709_v63 = vadd.f32 %v2672_v33, %v2395_v2  ;;  %v2082_v18 = vadd.f32 %v2047_v5, %v5143_v6 }
 0x2da   : > { %v2989_v21 = vpop.f32.mrf.mxu0 }
 0x2db   : > { %v3023_v14 = vadd.f32 %v2986_v57, %v2709_v63 }
 0x2dd   : > { %v3059_v15 = vadd.f32 %v5157_v4, %v3023_v14 }
 0x2de   : > { %v2361_v46 = vpop.f32.mrf.mxu2 }
 0x2df   : > { %v3091_v31 = vmax.f32 %v3059_v15, 0.0  ;;  %v2396_v0 = vadd.f32 %v2361_v46, %v2082_v18  ;;  %v2675_v8 = vpop.f32.mrf.mxu3 }
 0x2e0   : > { %v2049_v38 = vpop.f32.mrf.mxu1 }
 0x2e1   : > { %v4531_v39 = vpack.c.bf16 %v3091_v31, %v3090_v20  ;;  %v2710_v24 = vadd.f32 %v2675_v8, %v2396_v0  ;;  %v2083_v49 = vadd.f32 %v2049_v38, %v5150_v34 }
 0x2e2   : > { %v2991_v28 = vpop.f32.mrf.mxu0 }
 0x2e3   : > { %4551 = vst [vmem:[%s5170_s8 + $0x70] sm:$0xff] %v4531_v39   ;;  %v3024_v26 = vadd.f32 %v2989_v21, %v2710_v24 }
 0x2e5   : > { %v3060_v6 = vadd.f32 %v5157_v4, %v3024_v26 }
 0x2e6   : > { %v2363_v10 = vpop.f32.mrf.mxu2 }
 0x2e7   : > { %v2397_v27 = vadd.f32 %v2363_v10, %v2083_v49  ;;  %v2677_v54 = vpop.f32.mrf.mxu3  ;;  %v3092_v45 = vmax.f32 %v3060_v6, 0.0 }
 0x2e9   : > { %v2711_v43 = vadd.f32 %v2677_v54, %v2397_v27 }
 0x2eb   : > { %v3025_v52 = vadd.f32 %v2991_v28, %v2711_v43 }
 0x2ed   : > { %v3061_v19 = vadd.f32 %v5157_v4, %v3025_v52 }
 0x2ef   : > { %v3093_v47 = vmax.f32 %v3061_v19, 0.0 }
 0x2f1   : > { %v4536_v3 = vpack.c.bf16 %v3093_v47, %v3092_v45 }
 0x2f3   : > { %4552 = vst [vmem:[%s5170_s8 + $0x78] sm:$0xff] %v4536_v3  }
 0x2f4 PF: > { %s15_s18 = sadd.s32 1, %s4593_s18  }
 0x2f5   : > { %p12_p4 = scmp.ge.s32.totalorder %s15_s18, 6  }
 0x2f7   :  { %14 = sbr.rel (!%p12_p4) target bundleno = 1 (0x1), region = 84 }

// kernel: perceptual_loss.10
= control target key start
LH: loop header
LB: loop body
LE: loop exit
PB: predicated region body
PF: predicated region fallthrough
CT: control target
= control target key end

     0   :  { %s2337_s18 = smov 0   ;;  %s2678_s0 = inlined_call_operand.vmem [shape: bf16[4,80,128], index: 0, kind: input, shape index: {}]   ;;  %s2679_s1 = inlined_call_operand.vmem [shape: bf16[4,80,128], index: 1, kind: input, shape index: {}]   ;;  %s2680_s2 = inlined_call_operand.vmem [shape: bf16[4,80,128], index: 2, kind: input, shape index: {}]   ;;  %s2681_s3 = inlined_call_operand.vmem [shape: bf16[9,128,128], index: 3, kind: input, shape index: {}]   ;;  %s2682_s4 = inlined_call_operand.vmem [shape: f32[1,128], index: 4, kind: input, shape index: {}]   ;;  %s2683_s5 = inlined_call_operand.vmem [shape: bf16[4,64,128], index: 5, kind: output, shape index: {}]  }
   0x1 LB: > { %s1569_s19 = sadd.s32 4294967295, %s2305_s18   ;;  %p1573_p0 = scmp.ge.s32.totalorder %s2305_s18, 1  ;;  %s2305_s18 = sphi %s2337_s18, %s15_s18  }
   0x2   : > { %p207_p1 = scmp.lt.s32.totalorder %s2305_s18, 5 }
   0x4   : > { %p208_p2 = pnand %p1573_p0, %p207_p1 }
   0x5   : > { %p245_p3 = scmp.lt.s32.totalorder (!%p208_p2), %s1569_s19, 3 }
   0x6   : > { %211 = sbr.rel (%p208_p2) target bundleno = 336 (0x150), region = 40 }
   0xb   : > { %v2165_v0 = vld [vmem:[%s2681_s3 + $0x78] sm:$0xff]  ;;  %v2164_v2 = vld [vmem:[%s2681_s3 + $0x70] sm:$0xff]  ;;  %v2163_v6 = vld [vmem:[%s2681_s3 + $0x68] sm:$0xff]  ;;  %s2685_s19 = smov (!%p245_p3, %s1569_s19), 3 }
   0xc   : > { %v2177_v1 = vld [vmem:[%s2681_s3 + $0xb8] sm:$0xff]  ;;  %2273 = vmatpush.bf16.msra.mxu1 %v2165_v0  ;;  %386 = vmatpush.bf16.msra.mxu0 %v2165_v0  ;;  %v2176_v3 = vld [vmem:[%s2681_s3 + $0xb0] sm:$0xff]  ;;  %v2175_v7 = vld [vmem:[%s2681_s3 + $0xa8] sm:$0xff]  ;;  %s2289_s10 = smul.u32 40, %s2685_s19 }
   0xd   : > { %613 = vmatpush.bf16.msra.mxu2 %v2177_v1  ;;  %v2189_v4 = vld [vmem:[%s2681_s3 + $0xf8] sm:$0xff]  ;;  %v2188_v5 = vld [vmem:[%s2681_s3 + $0xf0] sm:$0xff]  ;;  %v2187_v8 = vld [vmem:[%s2681_s3 + $0xe8] sm:$0xff] }
   0xe   : > { %747 = vmatpush.bf16.msra.mxu3 %v2189_v4  ;;  %v2162_v9 = vld [vmem:[%s2681_s3 + $0x60] sm:$0xff]  ;;  %v2161_v12 = vld [vmem:[%s2681_s3 + $0x58] sm:$0xff]  ;;  %v2160_v15 = vld [vmem:[%s2681_s3 + $0x50] sm:$0xff]  ;;  %s2421_s21 = scalar_lea.vmem %s2679_s1, %s2289_s10  ;;  %s2432_s28 = scalar_lea.vmem %s2680_s2, %s2289_s10 }
   0xf   : > { %v2174_v10 = vld [vmem:[%s2681_s3 + $0xa0] sm:$0xff]  ;;  %v2173_v13 = vld [vmem:[%s2681_s3 + $0x98] sm:$0xff]  ;;  %v2172_v16 = vld [vmem:[%s2681_s3 + $0x90] sm:$0xff]  ;;  %s2449_s13 = scalar_lea.vmem %s2678_s0, %s2289_s10 }
  0x10   : > { %2274 = vmatpush.bf16.msra.mxu1 %v2164_v2  ;;  %387 = vmatpush.bf16.msra.mxu0 %v2164_v2  ;;  %v2186_v11 = vld [vmem:[%s2681_s3 + $0xe0] sm:$0xff]  ;;  %v2185_v14 = vld [vmem:[%s2681_s3 + $0xd8] sm:$0xff]  ;;  %v2184_v17 = vld [vmem:[%s2681_s3 + $0xd0] sm:$0xff] }
  0x11   : > { %614 = vmatpush.bf16.msra.mxu2 %v2176_v3  ;;  %v2159_v18 = vld [vmem:[%s2681_s3 + $0x48] sm:$0xff]  ;;  %v2158_v21 = vld [vmem:[%s2681_s3 + $0x40] sm:$0xff]  ;;  %v2153_v22 = vld [vmem:[%s2681_s3 + $0x38] sm:$0xff] }
  0x12   : > { %748 = vmatpush.bf16.msra.mxu3 %v2188_v5  ;;  %v2171_v19 = vld [vmem:[%s2681_s3 + $0x88] sm:$0xff]  ;;  %v2170_v23 = vld [vmem:[%s2681_s3 + $0x80] sm:$0xff]  ;;  %v2201_v24 = vld [vmem:[%s2681_s3 + $0x138] sm:$0xff] }
  0x13   : > { %v2183_v20 = vld [vmem:[%s2681_s3 + $0xc8] sm:$0xff]  ;;  %v2225_v25 = vld [vmem:[%s2681_s3 + $0x1b8] sm:$0xff]  ;;  %v2156_v26 = vld [vmem:[%s2421_s21 + $0x10] sm:$0xff] }
  0x14   : > { %2275 = vmatpush.bf16.msra.mxu1 %v2163_v6  ;;  %388 = vmatpush.bf16.msra.mxu0 %v2163_v6  ;;  %v2154_v27 = vld [vmem:[%s2421_s21] sm:$0xff]  ;;  %v2152_v30 = vld [vmem:[%s2681_s3 + $0x30] sm:$0xff]  ;;  %v2237_v31 = vld [vmem:[%s2681_s3 + $0x1f8] sm:$0xff] }
  0x15   : > { %615 = vmatpush.bf16.msra.mxu2 %v2175_v7  ;;  %v2166_v28 = vld [vmem:[%s2432_s28] sm:$0xff]  ;;  %v2200_v32 = vld [vmem:[%s2681_s3 + $0x130] sm:$0xff]  ;;  %v2151_v35 = vld [vmem:[%s2681_s3 + $0x28] sm:$0xff] }
  0x16   : > { %749 = vmatpush.bf16.msra.mxu3 %v2187_v8  ;;  %v2182_v29 = vld [vmem:[%s2681_s3 + $0xc0] sm:$0xff]  ;;  %v2224_v33 = vld [vmem:[%s2681_s3 + $0x1b0] sm:$0xff]  ;;  %v2199_v37 = vld [vmem:[%s2681_s3 + $0x128] sm:$0xff] }
  0x17   : > { %v2178_v34 = vld [vmem:[%s2449_s13 + $0x4] sm:$0xff]  ;;  %v2236_v36 = vld [vmem:[%s2681_s3 + $0x1f0] sm:$0xff]  ;;  %v2149_v43 = vld [vmem:[%s2681_s3 + $0x18] sm:$0xff] }
  0x18   : > { %2276 = vmatpush.bf16.msra.mxu1 %v2162_v9  ;;  %389 = vmatpush.bf16.msra.mxu0 %v2162_v9  ;;  %v2223_v38 = vld [vmem:[%s2681_s3 + $0x1a8] sm:$0xff]  ;;  %v2150_v39 = vld [vmem:[%s2681_s3 + $0x20] sm:$0xff]  ;;  %v2197_v44 = vld [vmem:[%s2681_s3 + $0x118] sm:$0xff] }
  0x19   : > { %616 = vmatpush.bf16.msra.mxu2 %v2174_v10  ;;  %v2235_v40 = vld [vmem:[%s2681_s3 + $0x1e8] sm:$0xff]  ;;  %v2198_v41 = vld [vmem:[%s2681_s3 + $0x120] sm:$0xff]  ;;  %v2157_v45 = vld [vmem:[%s2421_s21 + $0x18] sm:$0xff] }
  0x1a   : > { %750 = vmatpush.bf16.msra.mxu3 %v2186_v11  ;;  %v2222_v42 = vld [vmem:[%s2681_s3 + $0x1a0] sm:$0xff]  ;;  %v2155_v46 = vld [vmem:[%s2421_s21 + $0x8] sm:$0xff]  ;;  %v2148_v48 = vld [vmem:[%s2681_s3 + $0x10] sm:$0xff] }
  0x1b   : > { %v2167_v47 = vld [vmem:[%s2432_s28 + $0x8] sm:$0xff]  ;;  %v2196_v49 = vld [vmem:[%s2681_s3 + $0x110] sm:$0xff]  ;;  %v2221_v51 = vld [vmem:[%s2681_s3 + $0x198] sm:$0xff] }
  0x1c   : > { %2277 = vmatpush.bf16.msra.mxu1 %v2161_v12  ;;  %390 = vmatpush.bf16.msra.mxu0 %v2161_v12  ;;  %v2179_v50 = vld [vmem:[%s2449_s13 + $0xc] sm:$0xff]  ;;  %v2234_v52 = vld [vmem:[%s2681_s3 + $0x1e0] sm:$0xff]  ;;  %v2233_v56 = vld [vmem:[%s2681_s3 + $0x1d8] sm:$0xff] }
  0x1d   : > { %617 = vmatpush.bf16.msra.mxu2 %v2173_v13  ;;  %v2147_v53 = vld [vmem:[%s2681_s3 + $0x8] sm:$0xff]  ;;  %v2220_v54 = vld [vmem:[%s2681_s3 + $0x190] sm:$0xff]  ;;  %v2146_v57 = vld [vmem:[%s2681_s3] sm:$0xff] }
  0x1e   : > { %751 = vmatpush.bf16.msra.mxu3 %v2185_v14  ;;  %v2195_v55 = vld [vmem:[%s2681_s3 + $0x108] sm:$0xff]  ;;  %v2213_v58 = vld [vmem:[%s2681_s3 + $0x178] sm:$0xff]  ;;  %v2194_v59 = vld [vmem:[%s2681_s3 + $0x100] sm:$0xff] }
  0x1f   : > { %v2249_v60 = vld [vmem:[%s2681_s3 + $0x238] sm:$0xff]  ;;  %v2212_v61 = vld [vmem:[%s2681_s3 + $0x170] sm:$0xff]  ;;  %v2142_v62 = vld [vmem:[%s2449_s13] sm:$0xff] }
  0x20   : > { %2278 = vmatpush.bf16.msra.mxu1 %v2160_v15  ;;  %391 = vmatpush.bf16.msra.mxu0 %v2160_v15  ;;  %v2190_v63 = vld [vmem:[%s2421_s21 + $0x4] sm:$0xff]  ;;  %v2168_v0 = vld [vmem:[%s2432_s28 + $0x10] sm:$0xff]  ;;  %v2209_v11 = vld [vmem:[%s2681_s3 + $0x158] sm:$0xff] }
  0x21   : > { %618 = vmatpush.bf16.msra.mxu2 %v2172_v16  ;;  %v2248_v1 = vld [vmem:[%s2681_s3 + $0x230] sm:$0xff]  ;;  %v2211_v2 = vld [vmem:[%s2681_s3 + $0x168] sm:$0xff]  ;;  %v2218_v7 = vld [vmem:[%s2681_s3 + $0x180] sm:$0xff] }
  0x22   : > { %752 = vmatpush.bf16.msra.mxu3 %v2184_v17  ;;  %v2219_v3 = vld [vmem:[%s2681_s3 + $0x188] sm:$0xff]  ;;  %v2180_v4 = vld [vmem:[%s2449_s13 + $0x14] sm:$0xff]  ;;  %v2210_v8 = vld [vmem:[%s2681_s3 + $0x160] sm:$0xff] }
  0x23   : > { %v2232_v5 = vld [vmem:[%s2681_s3 + $0x1d0] sm:$0xff]  ;;  %v2247_v6 = vld [vmem:[%s2681_s3 + $0x228] sm:$0xff]  ;;  %v2246_v10 = vld [vmem:[%s2681_s3 + $0x220] sm:$0xff] }
  0x24   : > { %2279 = vmatpush.bf16.msra.mxu1 %v2159_v18  ;;  %392 = vmatpush.bf16.msra.mxu0 %v2159_v18  ;;  %v2231_v9 = vld [vmem:[%s2681_s3 + $0x1c8] sm:$0xff]  ;;  %v2208_v12 = vld [vmem:[%s2681_s3 + $0x150] sm:$0xff]  ;;  %v2169_v15 = vld [vmem:[%s2432_s28 + $0x18] sm:$0xff] }
  0x25   : > { %619 = vmatpush.bf16.msra.mxu2 %v2171_v19  ;;  %v2143_v13 = vld [vmem:[%s2449_s13 + $0x8] sm:$0xff]  ;;  %v2181_v16 = vld [vmem:[%s2449_s13 + $0x1c] sm:$0xff] }
  0x26   : > { %753 = vmatpush.bf16.msra.mxu3 %v2183_v20  ;;  %v2191_v14 = vld [vmem:[%s2421_s21 + $0xc] sm:$0xff]  ;;  %v2230_v18 = vld [vmem:[%s2681_s3 + $0x1c0] sm:$0xff]  ;;  %v2245_v19 = vld [vmem:[%s2681_s3 + $0x218] sm:$0xff] }
  0x27   : > { %v2207_v17 = vld [vmem:[%s2681_s3 + $0x148] sm:$0xff]  ;;  %v2206_v20 = vld [vmem:[%s2681_s3 + $0x140] sm:$0xff] }
  0x28   : > { %2280 = vmatpush.bf16.msra.mxu1 %v2158_v21  ;;  %393 = vmatpush.bf16.msra.mxu0 %v2158_v21  ;;  %v2244_v21 = vld [vmem:[%s2681_s3 + $0x210] sm:$0xff] }
  0x29   : > { %620 = vmatpush.bf16.msra.mxu2 %v2170_v23  ;;  %v2144_v23 = vld [vmem:[%s2449_s13 + $0x10] sm:$0xff] }
  0x2a   : > { %754 = vmatpush.bf16.msra.mxu3 %v2182_v29  ;;  %v2193_v29 = vld [vmem:[%s2421_s21 + $0x1c] sm:$0xff] }
  0x2b   : > { %404 = vmatmul.bf16.vlgmr.msra.gmra.mxu1 %v2156_v26  ;;  %394 = vmatmul.bf16.vlgmr.msra.gmra.mxu0 %v2154_v27  ;;  %v2226_v26 = vld [vmem:[%s2421_s21 + $0x8] sm:$0xff]  ;;  %v2242_v27 = vld [vmem:[%s2681_s3 + $0x200] sm:$0xff] }
  0x2c   : > { %487 = vmatpush.bf16.msrb.mxu1 %v2153_v22  ;;  %881 = vmatpush.bf16.msrb.mxu0 %v2201_v24  ;;  %v2243_v22 = vld [vmem:[%s2681_s3 + $0x208] sm:$0xff]  ;;  %v2192_v24 = vld [vmem:[%s2421_s21 + $0x14] sm:$0xff] }
  0x2d   : > { %1149 = vmatpush.bf16.msrb.mxu2 %v2225_v25  ;;  %755 = vmatmul.bf16.vlgmr.msra.gmra.mxu3 %v2178_v34  ;;  %v2214_v25 = vld [vmem:[%s2449_s13 + $0x8] sm:$0xff]  ;;  %v2216_v34 = vld [vmem:[%s2449_s13 + $0x18] sm:$0xff] }
  0x2e   : > { %621 = vmatmul.bf16.vlgmr.msra.gmra.mxu2 %v2166_v28  ;;  %1283 = vmatpush.bf16.msrb.mxu3 %v2237_v31  ;;  %v2145_v28 = vld [vmem:[%s2449_s13 + $0x18] sm:$0xff]  ;;  %v2227_v31 = vld [vmem:[%s2421_s21 + $0x10] sm:$0xff] }
  0x30   : > { %488 = vmatpush.bf16.msrb.mxu1 %v2152_v30  ;;  %882 = vmatpush.bf16.msrb.mxu0 %v2200_v32  ;;  %v2215_v30 = vld [vmem:[%s2449_s13 + $0x10] sm:$0xff]  ;;  %v2202_v32 = vld [vmem:[%s2432_s28 + $0x4] sm:$0xff] }
  0x31   : > { %1150 = vmatpush.bf16.msrb.mxu2 %v2224_v33  ;;  %v2238_v33 = vld [vmem:[%s2432_s28 + $0x8] sm:$0xff] }
  0x32   : > { %1284 = vmatpush.bf16.msrb.mxu3 %v2236_v36  ;;  %v2203_v36 = vld [vmem:[%s2432_s28 + $0xc] sm:$0xff] }
  0x34   : > { %489 = vmatpush.bf16.msrb.mxu1 %v2151_v35  ;;  %883 = vmatpush.bf16.msrb.mxu0 %v2199_v37  ;;  %v2228_v35 = vld [vmem:[%s2421_s21 + $0x18] sm:$0xff]  ;;  %v2239_v37 = vld [vmem:[%s2432_s28 + $0x10] sm:$0xff] }
  0x35   : > { %1151 = vmatpush.bf16.msrb.mxu2 %v2223_v38  ;;  %v2217_v38 = vld [vmem:[%s2449_s13 + $0x20] sm:$0xff]  ;;  %s2141_s13 = sshll.u32 %s2685_s19, 5 }
  0x36   : > { %1285 = vmatpush.bf16.msrb.mxu3 %v2235_v40  ;;  %v2204_v40 = vld [vmem:[%s2432_s28 + $0x14] sm:$0xff]  ;;  %s2654_s29 = scalar_lea.vmem %s2683_s5, %s2141_s13 }
  0x38   : > { %490 = vmatpush.bf16.msrb.mxu1 %v2150_v39  ;;  %884 = vmatpush.bf16.msrb.mxu0 %v2198_v41  ;;  %v2229_v39 = vld [vmem:[%s2421_s21 + $0x20] sm:$0xff]  ;;  %v2240_v41 = vld [vmem:[%s2432_s28 + $0x18] sm:$0xff] }
  0x39   : > { %1152 = vmatpush.bf16.msrb.mxu2 %v2222_v42 }
  0x3a   : > { %1286 = vmatpush.bf16.msrb.mxu3 %v2234_v52 }
  0x3b   : > { %409 = vmatmul.bf16.gmra.mxu1 %v2157_v45  ;;  %399 = vmatmul.bf16.gmra.mxu0 %v2155_v46 }
  0x3c   : > { %491 = vmatpush.bf16.msrb.mxu1 %v2149_v43  ;;  %885 = vmatpush.bf16.msrb.mxu0 %v2197_v44  ;;  %v2241_v44 = vld [vmem:[%s2432_s28 + $0x20] sm:$0xff] }
  0x3d   : > { %1153 = vmatpush.bf16.msrb.mxu2 %v2221_v51  ;;  %760 = vmatmul.bf16.gmra.mxu3 %v2179_v50 }
  0x3e   : > { %626 = vmatmul.bf16.gmra.mxu2 %v2167_v47  ;;  %1287 = vmatpush.bf16.msrb.mxu3 %v2233_v56 }
  0x40   : > { %492 = vmatpush.bf16.msrb.mxu1 %v2148_v48  ;;  %886 = vmatpush.bf16.msrb.mxu0 %v2196_v49  ;;  %v2205_v49 = vld [vmem:[%s2432_s28 + $0x1c] sm:$0xff] }
  0x41   : > { %1154 = vmatpush.bf16.msrb.mxu2 %v2220_v54 }
  0x42   : > { %1288 = vmatpush.bf16.msrb.mxu3 %v2232_v5 }
  0x44   : > { %493 = vmatpush.bf16.msrb.mxu1 %v2147_v53  ;;  %887 = vmatpush.bf16.msrb.mxu0 %v2195_v55 }
  0x45   : > { %1155 = vmatpush.bf16.msrb.mxu2 %v2219_v3 }
  0x46   : > { %1289 = vmatpush.bf16.msrb.mxu3 %v2231_v9 }
  0x48   : > { %494 = vmatpush.bf16.msrb.mxu1 %v2146_v57  ;;  %888 = vmatpush.bf16.msrb.mxu0 %v2194_v59 }
  0x49   : > { %1156 = vmatpush.bf16.msrb.mxu2 %v2218_v7 }
  0x4a   : > { %1290 = vmatpush.bf16.msrb.mxu3 %v2230_v18 }
  0x4b   : > { %495 = vmatmul.bf16.vlgmr.msrb.gmra.mxu1 %v2142_v62  ;;  %889 = vmatmul.bf16.vlgmr.msrb.gmra.mxu0 %v2190_v63 }
  0x4c   : > { %1015 = vmatpush.bf16.msra.mxu1 %v2213_v58  ;;  %1417 = vmatpush.bf16.msra.mxu0 %v2249_v60 }
  0x4d   : > { %765 = vmatmul.bf16.gmra.mxu3 %v2180_v4  ;;  %2281 = vmatpush.bf16.msra.mxu2 %v2249_v60 }
  0x4e   : > { %631 = vmatmul.bf16.gmra.mxu2 %v2168_v0 }
  0x50   : > { %1016 = vmatpush.bf16.msra.mxu1 %v2212_v61  ;;  %1418 = vmatpush.bf16.msra.mxu0 %v2248_v1 }
  0x51   : > { %2282 = vmatpush.bf16.msra.mxu2 %v2248_v1 }
  0x54   : > { %1017 = vmatpush.bf16.msra.mxu1 %v2211_v2  ;;  %1419 = vmatpush.bf16.msra.mxu0 %v2247_v6 }
  0x55   : > { %2283 = vmatpush.bf16.msra.mxu2 %v2247_v6 }
  0x58   : > { %1018 = vmatpush.bf16.msra.mxu1 %v2210_v8  ;;  %1420 = vmatpush.bf16.msra.mxu0 %v2246_v10 }
  0x59   : > { %2284 = vmatpush.bf16.msra.mxu2 %v2246_v10 }
  0x5b   : > { %500 = vmatmul.bf16.gmra.mxu1 %v2143_v13  ;;  %894 = vmatmul.bf16.gmra.mxu0 %v2191_v14 }
  0x5c   : > { %1019 = vmatpush.bf16.msra.mxu1 %v2209_v11  ;;  %1421 = vmatpush.bf16.msra.mxu0 %v2245_v19 }
  0x5d   : > { %770 = vmatmul.bf16.gmra.mxu3 %v2181_v16  ;;  %2285 = vmatpush.bf16.msra.mxu2 %v2245_v19 }
  0x5e   : > { %636 = vmatmul.bf16.gmra.mxu2 %v2169_v15 }
  0x60   : > { %1020 = vmatpush.bf16.msra.mxu1 %v2208_v12  ;;  %1422 = vmatpush.bf16.msra.mxu0 %v2244_v21 }
  0x61   : > { %2286 = vmatpush.bf16.msra.mxu2 %v2244_v21 }
  0x64   : > { %1021 = vmatpush.bf16.msra.mxu1 %v2207_v17  ;;  %1423 = vmatpush.bf16.msra.mxu0 %v2243_v22 }
  0x65   : > { %2287 = vmatpush.bf16.msra.mxu2 %v2243_v22 }
  0x68   : > { %1022 = vmatpush.bf16.msra.mxu1 %v2206_v20  ;;  %1424 = vmatpush.bf16.msra.mxu0 %v2242_v27 }
  0x69   : > { %2288 = vmatpush.bf16.msra.mxu2 %v2242_v27 }
  0x6b   : > { %505 = vmatmul.bf16.gmra.mxu1 %v2144_v23  ;;  %899 = vmatmul.bf16.gmra.mxu0 %v2192_v24 }
  0x6d   : > { %1291 = vmatmul.bf16.vlgmr.msrb.gmra.mxu3 %v2226_v26 }
  0x6e   : > { %1157 = vmatmul.bf16.vlgmr.msrb.gmra.mxu2 %v2214_v25 }
  0x7b   : > { %510 = vmatmul.bf16.gmra.mxu1 %v2145_v28  ;;  %904 = vmatmul.bf16.gmra.mxu0 %v2193_v29 }
  0x7d   : > { %1296 = vmatmul.bf16.gmra.mxu3 %v2227_v31 }
  0x7e   : > { %1162 = vmatmul.bf16.gmra.mxu2 %v2215_v30 }
  0x8b   : > { %1023 = vmatmul.bf16.vlgmr.msra.gmra.mxu1 %v2202_v32  ;;  %1425 = vmatmul.bf16.vlgmr.msra.gmra.mxu0 %v2238_v33 }
  0x8d   : > { %1301 = vmatmul.bf16.gmra.mxu3 %v2228_v35 }
  0x8e   : > { %1167 = vmatmul.bf16.gmra.mxu2 %v2216_v34 }
  0x9b   : > { %1028 = vmatmul.bf16.gmra.mxu1 %v2203_v36  ;;  %1430 = vmatmul.bf16.gmra.mxu0 %v2239_v37 }
  0x9d   : > { %1306 = vmatmul.bf16.gmra.mxu3 %v2229_v39 }
  0x9e   : > { %1172 = vmatmul.bf16.gmra.mxu2 %v2217_v38 }
  0xa8   : > { %v405_v42 = vpop.f32.mrf.mxu1  ;;  %v395_v43 = vpop.f32.mrf.mxu0 }
  0xab   : > { %1033 = vmatmul.bf16.gmra.mxu1 %v2204_v40  ;;  %1435 = vmatmul.bf16.gmra.mxu0 %v2240_v41 }
  0xae   : > { %1440 = vmatmul.bf16.vlgmr.msra.gmra.mxu2 %v2241_v44 }
  0xb0   : > { %v407_v46 = vpop.f32.mrf.mxu1  ;;  %v397_v47 = vpop.f32.mrf.mxu0 }
  0xb1   : > { %v622_v45 = vpop.f32.mrf.mxu2  ;;  %v756_v48 = vpop.f32.mrf.mxu3 }
  0xb8   : > { %v410_v51 = vpop.f32.mrf.mxu1  ;;  %v400_v52 = vpop.f32.mrf.mxu0 }
  0xb9   : > { %v624_v50 = vpop.f32.mrf.mxu2  ;;  %v2619_v53 = vpop.f32.mrf.mxu3 }
  0xbb   : > { %1038 = vmatmul.bf16.gmra.mxu1 %v2205_v49 }
  0xc0   : > { %v412_v55 = vpop.f32.mrf.mxu1  ;;  %v402_v56 = vpop.f32.mrf.mxu0 }
  0xc1   : > { %v627_v54 = vpop.f32.mrf.mxu2  ;;  %v761_v57 = vpop.f32.mrf.mxu3 }
  0xc8   : > { %v496_v59 = vpop.f32.mrf.mxu1  ;;  %v890_v60 = vpop.f32.mrf.mxu0 }
  0xc9   : > { %v629_v58 = vpop.f32.mrf.mxu2  ;;  %v497_v61 = vadd.f32 %v496_v59, %v395_v43  ;;  %v2621_v63 = vpop.f32.mrf.mxu3 }
  0xcb   : > { %v642_v62 = vadd.f32 %v622_v45, %v497_v61 }
  0xcd   : > { %v776_v0 = vadd.f32 %v756_v48, %v642_v62 }
  0xcf   : > { %v910_v1 = vadd.f32 %v890_v60, %v776_v0 }
  0xd0   : > { %v498_v3 = vpop.f32.mrf.mxu1  ;;  %v892_v4 = vpop.f32.mrf.mxu0 }
  0xd1   : > { %v632_v2 = vpop.f32.mrf.mxu2  ;;  %v499_v5 = vadd.f32 %v498_v3, %v397_v47  ;;  %v766_v7 = vpop.f32.mrf.mxu3 }
  0xd3   : > { %v643_v6 = vadd.f32 %v624_v50, %v499_v5 }
  0xd8   : > { %v501_v9 = vpop.f32.mrf.mxu1  ;;  %v895_v10 = vpop.f32.mrf.mxu0 }
  0xd9   : > { %v634_v8 = vpop.f32.mrf.mxu2  ;;  %v502_v11 = vadd.f32 %v501_v9, %v400_v52  ;;  %v2623_v16 = vpop.f32.mrf.mxu3 }
  0xdb   : > { %v644_v12 = vadd.f32 %v627_v54, %v502_v11 }
  0xdd   : > { %v778_v13 = vadd.f32 %v761_v57, %v644_v12 }
  0xdf   : > { %v912_v14 = vadd.f32 %v895_v10, %v778_v13 }
  0xe0   : > { %v503_v17 = vpop.f32.mrf.mxu1  ;;  %v2625_v18 = vpop.f32.mrf.mxu0 }
  0xe1   : > { %v637_v15 = vpop.f32.mrf.mxu2  ;;  %v504_v19 = vadd.f32 %v503_v17, %v402_v56  ;;  %v771_v25 = vpop.f32.mrf.mxu3  ;;  %v777_v56 = vadd.f32 %v2619_v53, %v643_v6 }
  0xe3   : > { %v645_v20 = vadd.f32 %v629_v58, %v504_v19  ;;  %v911_v57 = vadd.f32 %v892_v4, %v777_v56 }
  0xe5   : > { %v779_v9 = vadd.f32 %v2621_v63, %v645_v20 }
  0xe7   : > { %v913_v19 = vadd.f32 %v2625_v18, %v779_v9 }
  0xe8   : > { %v506_v22 = vpop.f32.mrf.mxu1  ;;  %v900_v23 = vpop.f32.mrf.mxu0 }
  0xe9   : > { %v639_v21 = vpop.f32.mrf.mxu2  ;;  %v507_v24 = vadd.f32 %v506_v22, %v405_v42  ;;  %v2633_v34 = vpop.f32.mrf.mxu3 }
  0xeb   : > { %v646_v26 = vadd.f32 %v632_v2, %v507_v24 }
  0xed   : > { %v780_v27 = vadd.f32 %v766_v7, %v646_v26 }
  0xef   : > { %v2627_v28 = vadd.f32 %v900_v23, %v780_v27 }
  0xf0   : > { %v508_v30 = vpop.f32.mrf.mxu1  ;;  %v2629_v31 = vpop.f32.mrf.mxu0 }
  0xf1   : > { %v1158_v29 = vpop.f32.mrf.mxu2  ;;  %v509_v32 = vadd.f32 %v508_v30, %v407_v46  ;;  %v1292_v41 = vpop.f32.mrf.mxu3 }
  0xf3   : > { %v2631_v33 = vadd.f32 %v634_v8, %v509_v32 }
  0xf8   : > { %v511_v36 = vpop.f32.mrf.mxu1  ;;  %v905_v37 = vpop.f32.mrf.mxu0 }
  0xf9   : > { %v1160_v35 = vpop.f32.mrf.mxu2  ;;  %v512_v38 = vadd.f32 %v511_v36, %v410_v51  ;;  %v1294_v46 = vpop.f32.mrf.mxu3  ;;  %v781_v36 = vadd.f32 %v2623_v16, %v2631_v33 }
  0xfb   : > { %v648_v39 = vadd.f32 %v637_v15, %v512_v38 }
  0xfd   : > { %v782_v40 = vadd.f32 %v771_v25, %v648_v39 }
  0xff   : > { %v2635_v42 = vadd.f32 %v905_v37, %v782_v40 }
 0x100   : > { %v513_v44 = vpop.f32.mrf.mxu1  ;;  %v2637_v45 = vpop.f32.mrf.mxu0 }
 0x101   : > { %v1163_v43 = vpop.f32.mrf.mxu2  ;;  %v514_v47 = vadd.f32 %v513_v44, %v412_v55  ;;  %v1297_v62 = vpop.f32.mrf.mxu3  ;;  %v2645_v55 = vld [vmem:[%s2682_s4] ss:$0 sm:$0xff] }
 0x103   : > { %v2639_v48 = vadd.f32 %v639_v21, %v514_v47 }
 0x108   : > { %v1024_v49 = vpop.f32.mrf.mxu1  ;;  %v1426_v50 = vpop.f32.mrf.mxu0 }
 0x109   : > { %v1044_v52 = vadd.f32 %v1024_v49, %v910_v1  ;;  %v1165_v54 = vpop.f32.mrf.mxu2  ;;  %v1299_v13 = vpop.f32.mrf.mxu3 }
 0x10b   : > { %v1178_v51 = vadd.f32 %v1158_v29, %v1044_v52 }
 0x10d   : > { %v1312_v58 = vadd.f32 %v1292_v41, %v1178_v51  ;;  %v915_v41 = vadd.f32 %v2629_v31, %v781_v36 }
 0x10f   : > { %v1446_v0 = vadd.f32 %v1426_v50, %v1312_v58  ;;  %v783_v58 = vadd.f32 %v2633_v34, %v2639_v48 }
 0x110   : > { %v1026_v59 = vpop.f32.mrf.mxu1  ;;  %v1428_v60 = vpop.f32.mrf.mxu0 }
 0x111   : > { %v1045_v61 = vadd.f32 %v1026_v59, %v911_v57  ;;  %v1168_v3 = vpop.f32.mrf.mxu2  ;;  %v1458_v5 = vadd.f32 %v2645_v55, %v1446_v0  ;;  %v1302_v25 = vpop.f32.mrf.mxu3 }
 0x113   : > { %v1179_v2 = vadd.f32 %v1160_v35, %v1045_v61  ;;  %v1466_v10 = vmax.f32 %v1458_v5, 0.0 }
 0x115   : > { %v1313_v1 = vadd.f32 %v1294_v46, %v1179_v2  ;;  %v917_v2 = vadd.f32 %v2637_v45, %v783_v58 }
 0x117   : > { %v1447_v53 = vadd.f32 %v1428_v60, %v1313_v1 }
 0x118   : > { %v1029_v6 = vpop.f32.mrf.mxu1  ;;  %v1431_v7 = vpop.f32.mrf.mxu0 }
 0x119   : > { %v1459_v4 = vadd.f32 %v2645_v55, %v1447_v53  ;;  %v1046_v8 = vadd.f32 %v1029_v6, %v912_v14  ;;  %v1170_v17 = vpop.f32.mrf.mxu2  ;;  %v1304_v44 = vpop.f32.mrf.mxu3 }
 0x11b   : > { %v1467_v11 = vmax.f32 %v1459_v4, 0.0  ;;  %v1180_v12 = vadd.f32 %v1163_v43, %v1046_v8 }
 0x11d   : > { %v2253_v15 = vpack.c.bf16 %v1467_v11, %v1466_v10  ;;  %v1314_v21 = vadd.f32 %v1297_v62, %v1180_v12 }
 0x11f   : > { %2254 = vst [vmem:[%s2654_s29] sm:$0xff] %v2253_v15   ;;  %v1448_v63 = vadd.f32 %v1431_v7, %v1314_v21 }
 0x120   : > { %v1031_v22 = vpop.f32.mrf.mxu1  ;;  %v1433_v14 = vpop.f32.mrf.mxu0 }
 0x121   : > { %v1047_v23 = vadd.f32 %v1031_v22, %v913_v19  ;;  %v1460_v26 = vadd.f32 %v2645_v55, %v1448_v63  ;;  %v1173_v29 = vpop.f32.mrf.mxu2  ;;  %v1307_v31 = vpop.f32.mrf.mxu3 }
 0x123   : > { %v1181_v20 = vadd.f32 %v1165_v54, %v1047_v23  ;;  %v1468_v37 = vmax.f32 %v1460_v26, 0.0 }
 0x125   : > { %v1315_v24 = vadd.f32 %v1299_v13, %v1181_v20 }
 0x127   : > { %v1449_v27 = vadd.f32 %v1433_v14, %v1315_v24 }
 0x128   : > { %v1034_v30 = vpop.f32.mrf.mxu1  ;;  %v1436_v18 = vpop.f32.mrf.mxu0 }
 0x129   : > { %v1461_v32 = vadd.f32 %v2645_v55, %v1449_v27  ;;  %v1048_v35 = vadd.f32 %v1034_v30, %v2627_v28  ;;  %v1175_v49 = vpop.f32.mrf.mxu2  ;;  %v1309_v7 = vpop.f32.mrf.mxu3 }
 0x12b   : > { %v1469_v38 = vmax.f32 %v1461_v32, 0.0  ;;  %v1182_v39 = vadd.f32 %v1168_v3, %v1048_v35 }
 0x12d   : > { %v2258_v40 = vpack.c.bf16 %v1469_v38, %v1468_v37  ;;  %v1316_v43 = vadd.f32 %v1302_v25, %v1182_v39 }
 0x12f   : > { %2270 = vst [vmem:[%s2654_s29 + $0x8] sm:$0xff] %v2258_v40   ;;  %v1450_v50 = vadd.f32 %v1436_v18, %v1316_v43 }
 0x130   : > { %v1036_v47 = vpop.f32.mrf.mxu1  ;;  %v1438_v28 = vpop.f32.mrf.mxu0 }
 0x131   : > { %v1049_v46 = vadd.f32 %v1036_v47, %v915_v41  ;;  %v1462_v56 = vadd.f32 %v2645_v55, %v1450_v50  ;;  %v1441_v62 = vpop.f32.mrf.mxu2 }
 0x133   : > { %v1183_v52 = vadd.f32 %v1170_v17, %v1049_v46  ;;  %v1470_v59 = vmax.f32 %v1462_v56, 0.0 }
 0x135   : > { %v1317_v54 = vadd.f32 %v1304_v44, %v1183_v52 }
 0x137   : > { %v1451_v16 = vadd.f32 %v1438_v28, %v1317_v54 }
 0x138   : > { %v1039_v33 = vpop.f32.mrf.mxu1 }
 0x139   : > { %v1463_v51 = vadd.f32 %v2645_v55, %v1451_v16  ;;  %v1050_v57 = vadd.f32 %v1039_v33, %v2635_v42  ;;  %v1443_v4 = vpop.f32.mrf.mxu2 }
 0x13b   : > { %v1471_v60 = vmax.f32 %v1463_v51, 0.0  ;;  %v1184_v61 = vadd.f32 %v1173_v29, %v1050_v57 }
 0x13d   : > { %v2263_v0 = vpack.c.bf16 %v1471_v60, %v1470_v59  ;;  %v1318_v3 = vadd.f32 %v1307_v31, %v1184_v61 }
 0x13f   : > { %2271 = vst [vmem:[%s2654_s29 + $0x10] sm:$0xff] %v2263_v0   ;;  %v1452_v53 = vadd.f32 %v1441_v62, %v1318_v3 }
 0x140   : > { %v1041_v1 = vpop.f32.mrf.mxu1 }
 0x141   : > { %v1051_v5 = vadd.f32 %v1041_v1, %v917_v2  ;;  %v1464_v8 = vadd.f32 %v2645_v55, %v1452_v53 }
 0x143   : > { %v1185_v6 = vadd.f32 %v1175_v49, %v1051_v5  ;;  %v1472_v9 = vmax.f32 %v1464_v8, 0.0 }
 0x145   : > { %v1319_v42 = vadd.f32 %v1309_v7, %v1185_v6 }
 0x147   : > { %v1453_v34 = vadd.f32 %v1443_v4, %v1319_v42 }
 0x149   : > { %v1465_v48 = vadd.f32 %v2645_v55, %v1453_v34 }
 0x14b   : > { %v1473_v10 = vmax.f32 %v1465_v48, 0.0 }
 0x14d   : > { %v2268_v11 = vpack.c.bf16 %v1473_v10, %v1472_v9 }
 0x14f   : > { %2272 = vst [vmem:[%s2654_s29 + $0x18] sm:$0xff] %v2268_v11  }
 0x150 PF: > { %s15_s18 = sadd.s32 1, %s2305_s18  }
 0x151   : > { %p12_p4 = scmp.ge.s32.totalorder %s15_s18, 6  }
 0x153   :  { %14 = sbr.rel (!%p12_p4) target bundleno = 1 (0x1), region = 84 }

// kernel: perceptual_loss.12
= control target key start
LH: loop header
LB: loop body
LE: loop exit
PB: predicated region body
PF: predicated region fallthrough
CT: control target
= control target key end

     0   :  { %s2532_s18 = smov 0   ;;  %s3474_s0 = inlined_call_operand.vmem [shape: bf16[4,24,128], index: 0, kind: input, shape index: {}]   ;;  %s3475_s1 = inlined_call_operand.vmem [shape: bf16[4,24,128], index: 1, kind: input, shape index: {}]   ;;  %s3476_s2 = inlined_call_operand.vmem [shape: bf16[4,24,128], index: 2, kind: input, shape index: {}]   ;;  %s3477_s3 = inlined_call_operand.vmem [shape: bf16[9,128,256], index: 3, kind: input, shape index: {}]   ;;  %s3478_s4 = inlined_call_operand.vmem [shape: f32[1,256], index: 4, kind: input, shape index: {}]   ;;  %s3479_s5 = inlined_call_operand.vmem [shape: bf16[4,16,256], index: 5, kind: output, shape index: {}]  }
   0x1 LB: > { %s1599_s19 = sadd.s32 4294967295, %s2500_s18   ;;  %p1603_p0 = scmp.ge.s32.totalorder %s2500_s18, 1  ;;  %s2500_s18 = sphi %s2532_s18, %s15_s18  }
   0x2   : > { %p207_p1 = scmp.lt.s32.totalorder %s2500_s18, 5 }
   0x4   : > { %p208_p2 = pnand %p1603_p0, %p207_p1 }
   0x5   : > { %p245_p3 = scmp.lt.s32.totalorder (!%p208_p2), %s1599_s19, 3 }
   0x6   : > { %211 = sbr.rel (%p208_p2) target bundleno = 317 (0x13d), region = 40 }
   0xb   : > { %v1687_v0 = vld [vmem:[%s3477_s3 + $0xf0] sm:$0xf]  ;;  %v2361_v1 = vld [vmem:[%s3477_s3 + $0xf4] sm:$0xf0]  ;;  %v2360_v2 = vld [vmem:[%s3477_s3 + $0xf4] sm:$0xf] }
   0xc   : > { %v1688_v3 = vor.u32 %v2361_v1, %v1687_v0  ;;  %v1689_v4 = vld [vmem:[%s3477_s3 + $0xf8] sm:$0xf0]  ;;  %v1755_v5 = vld [vmem:[%s3477_s3 + $0x70] sm:$0xf]  ;;  %v2344_v6 = vld [vmem:[%s3477_s3 + $0x74] sm:$0xf0] }
   0xd   : > { %v1692_v7 = vor.u32 %v2360_v2, %v1689_v4  ;;  %v1756_v8 = vor.u32 %v2344_v6, %v1755_v5  ;;  %v2343_v9 = vld [vmem:[%s3477_s3 + $0x74] sm:$0xf]  ;;  %v1757_v10 = vld [vmem:[%s3477_s3 + $0x78] sm:$0xf0]  ;;  %v1679_v11 = vld [vmem:[%s3477_s3 + $0xe0] sm:$0xf] }
   0xe   : > { %388 = vmatpush.bf16.msra.mxu0 %v1688_v3  ;;  %v1760_v12 = vor.u32 %v2343_v9, %v1757_v10  ;;  %v2359_v13 = vld [vmem:[%s3477_s3 + $0xe4] sm:$0xf0]  ;;  %v2358_v14 = vld [vmem:[%s3477_s3 + $0xe4] sm:$0xf]  ;;  %v1681_v15 = vld [vmem:[%s3477_s3 + $0xe8] sm:$0xf0] }
   0xf   : > { %402 = vmatpush.bf16.msra.mxu1 %v1692_v7  ;;  %502 = vmatpush.bf16.msra.mxu2 %v1756_v8  ;;  %v1680_v16 = vor.u32 %v2359_v13, %v1679_v11  ;;  %v1684_v17 = vor.u32 %v2358_v14, %v1681_v15  ;;  %v1747_v18 = vld [vmem:[%s3477_s3 + $0x60] sm:$0xf]  ;;  %v2342_v19 = vld [vmem:[%s3477_s3 + $0x64] sm:$0xf0]  ;;  %v2341_v20 = vld [vmem:[%s3477_s3 + $0x64] sm:$0xf] }
  0x10   : > { %516 = vmatpush.bf16.msra.mxu3 %v1760_v12  ;;  %v1748_v21 = vor.u32 %v2342_v19, %v1747_v18  ;;  %v1749_v22 = vld [vmem:[%s3477_s3 + $0x68] sm:$0xf0]  ;;  %v1671_v23 = vld [vmem:[%s3477_s3 + $0xd0] sm:$0xf]  ;;  %v2357_v24 = vld [vmem:[%s3477_s3 + $0xd4] sm:$0xf0] }
  0x11   : > { %v1752_v25 = vor.u32 %v2341_v20, %v1749_v22  ;;  %v2356_v26 = vld [vmem:[%s3477_s3 + $0xd4] sm:$0xf]  ;;  %v1673_v27 = vld [vmem:[%s3477_s3 + $0xd8] sm:$0xf0]  ;;  %v1739_v28 = vld [vmem:[%s3477_s3 + $0x50] sm:$0xf]  ;;  %v1672_v29 = vor.u32 %v2357_v24, %v1671_v23 }
  0x12   : > { %389 = vmatpush.bf16.msra.mxu0 %v1680_v16  ;;  %v2340_v30 = vld [vmem:[%s3477_s3 + $0x54] sm:$0xf0]  ;;  %v2339_v31 = vld [vmem:[%s3477_s3 + $0x54] sm:$0xf]  ;;  %v1741_v32 = vld [vmem:[%s3477_s3 + $0x58] sm:$0xf0]  ;;  %v1676_v33 = vor.u32 %v2356_v26, %v1673_v27 }
  0x13   : > { %403 = vmatpush.bf16.msra.mxu1 %v1684_v17  ;;  %503 = vmatpush.bf16.msra.mxu2 %v1748_v21  ;;  %v1740_v34 = vor.u32 %v2340_v30, %v1739_v28  ;;  %v1663_v35 = vld [vmem:[%s3477_s3 + $0xc0] sm:$0xf]  ;;  %v2355_v36 = vld [vmem:[%s3477_s3 + $0xc4] sm:$0xf0]  ;;  %v2354_v37 = vld [vmem:[%s3477_s3 + $0xc4] sm:$0xf]  ;;  %v1744_v38 = vor.u32 %v2339_v31, %v1741_v32 }
  0x14   : > { %517 = vmatpush.bf16.msra.mxu3 %v1752_v25  ;;  %v1665_v39 = vld [vmem:[%s3477_s3 + $0xc8] sm:$0xf0]  ;;  %v1731_v40 = vld [vmem:[%s3477_s3 + $0x40] sm:$0xf]  ;;  %v2338_v41 = vld [vmem:[%s3477_s3 + $0x44] sm:$0xf0]  ;;  %v1664_v44 = vor.u32 %v2355_v36, %v1663_v35 }
  0x15   : > { %v2337_v42 = vld [vmem:[%s3477_s3 + $0x44] sm:$0xf]  ;;  %v1733_v43 = vld [vmem:[%s3477_s3 + $0x48] sm:$0xf0]  ;;  %v1668_v45 = vor.u32 %v2354_v37, %v1665_v39  ;;  %v1732_v46 = vor.u32 %v2338_v41, %v1731_v40  ;;  %v1655_v47 = vld [vmem:[%s3477_s3 + $0xb0] sm:$0xf] }
  0x16   : > { %390 = vmatpush.bf16.msra.mxu0 %v1672_v29  ;;  %v2353_v48 = vld [vmem:[%s3477_s3 + $0xb4] sm:$0xf0]  ;;  %v2352_v49 = vld [vmem:[%s3477_s3 + $0xb4] sm:$0xf]  ;;  %v1736_v50 = vor.u32 %v2337_v42, %v1733_v43  ;;  %v1657_v51 = vld [vmem:[%s3477_s3 + $0xb8] sm:$0xf0] }
  0x17   : > { %404 = vmatpush.bf16.msra.mxu1 %v1676_v33  ;;  %504 = vmatpush.bf16.msra.mxu2 %v1740_v34  ;;  %v1723_v52 = vld [vmem:[%s3477_s3 + $0x30] sm:$0xf]  ;;  %v2336_v53 = vld [vmem:[%s3477_s3 + $0x34] sm:$0xf0]  ;;  %v2335_v54 = vld [vmem:[%s3477_s3 + $0x34] sm:$0xf]  ;;  %v1656_v56 = vor.u32 %v2353_v48, %v1655_v47  ;;  %v1660_v57 = vor.u32 %v2352_v49, %v1657_v51 }
  0x18   : > { %518 = vmatpush.bf16.msra.mxu3 %v1744_v38  ;;  %v1725_v55 = vld [vmem:[%s3477_s3 + $0x38] sm:$0xf0]  ;;  %v1724_v58 = vor.u32 %v2336_v53, %v1723_v52  ;;  %v1647_v59 = vld [vmem:[%s3477_s3 + $0xa0] sm:$0xf]  ;;  %v2351_v60 = vld [vmem:[%s3477_s3 + $0xa4] sm:$0xf0] }
  0x19   : > { %v2350_v61 = vld [vmem:[%s3477_s3 + $0xa4] sm:$0xf]  ;;  %v1728_v62 = vor.u32 %v2335_v54, %v1725_v55  ;;  %v1649_v63 = vld [vmem:[%s3477_s3 + $0xa8] sm:$0xf0]  ;;  %v1715_v0 = vld [vmem:[%s3477_s3 + $0x20] sm:$0xf]  ;;  %v1648_v4 = vor.u32 %v2351_v60, %v1647_v59 }
  0x1a   : > { %391 = vmatpush.bf16.msra.mxu0 %v1664_v44  ;;  %v2334_v1 = vld [vmem:[%s3477_s3 + $0x24] sm:$0xf0]  ;;  %v2333_v2 = vld [vmem:[%s3477_s3 + $0x24] sm:$0xf]  ;;  %v1717_v3 = vld [vmem:[%s3477_s3 + $0x28] sm:$0xf0]  ;;  %v1652_v5 = vor.u32 %v2350_v61, %v1649_v63 }
  0x1b   : > { %405 = vmatpush.bf16.msra.mxu1 %v1668_v45  ;;  %505 = vmatpush.bf16.msra.mxu2 %v1732_v46  ;;  %v1716_v6 = vor.u32 %v2334_v1, %v1715_v0  ;;  %v1639_v7 = vld [vmem:[%s3477_s3 + $0x90] sm:$0xf]  ;;  %v2349_v8 = vld [vmem:[%s3477_s3 + $0x94] sm:$0xf0]  ;;  %v2348_v9 = vld [vmem:[%s3477_s3 + $0x94] sm:$0xf]  ;;  %v1720_v10 = vor.u32 %v2333_v2, %v1717_v3 }
  0x1c   : > { %519 = vmatpush.bf16.msra.mxu3 %v1736_v50  ;;  %v1641_v11 = vld [vmem:[%s3477_s3 + $0x98] sm:$0xf0]  ;;  %v1707_v12 = vld [vmem:[%s3477_s3 + $0x10] sm:$0xf]  ;;  %v2332_v13 = vld [vmem:[%s3477_s3 + $0x14] sm:$0xf0]  ;;  %v1640_v16 = vor.u32 %v2349_v8, %v1639_v7 }
  0x1d   : > { %v2331_v14 = vld [vmem:[%s3477_s3 + $0x14] sm:$0xf]  ;;  %v1709_v15 = vld [vmem:[%s3477_s3 + $0x18] sm:$0xf0]  ;;  %v1631_v17 = vld [vmem:[%s3477_s3 + $0x80] sm:$0xf]  ;;  %v1644_v19 = vor.u32 %v2348_v9, %v1641_v11  ;;  %v1708_v20 = vor.u32 %v2332_v13, %v1707_v12 }
  0x1e   : > { %392 = vmatpush.bf16.msra.mxu0 %v1656_v56  ;;  %v2347_v18 = vld [vmem:[%s3477_s3 + $0x84] sm:$0xf0]  ;;  %v2346_v21 = vld [vmem:[%s3477_s3 + $0x84] sm:$0xf]  ;;  %v1633_v22 = vld [vmem:[%s3477_s3 + $0x88] sm:$0xf0]  ;;  %v1712_v24 = vor.u32 %v2331_v14, %v1709_v15 }
  0x1f   : > { %406 = vmatpush.bf16.msra.mxu1 %v1660_v57  ;;  %506 = vmatpush.bf16.msra.mxu2 %v1724_v58  ;;  %v1699_v23 = vld [vmem:[%s3477_s3] sm:$0xf]  ;;  %v2330_v25 = vld [vmem:[%s3477_s3 + $0x4] sm:$0xf0]  ;;  %v2329_v26 = vld [vmem:[%s3477_s3 + $0x4] sm:$0xf]  ;;  %v1632_v31 = vor.u32 %v2347_v18, %v1631_v17  ;;  %v1636_v35 = vor.u32 %v2346_v21, %v1633_v22 }
  0x20   : > { %520 = vmatpush.bf16.msra.mxu3 %v1728_v62  ;;  %v1701_v27 = vld [vmem:[%s3477_s3 + $0x8] sm:$0xf0]  ;;  %v1839_v28 = vld [vmem:[%s3477_s3 + $0x170] sm:$0xf]  ;;  %v2378_v29 = vld [vmem:[%s3477_s3 + $0x174] sm:$0xf0]  ;;  %v1700_v36 = vor.u32 %v2330_v25, %v1699_v23 }
  0x21   : > { %v2377_v30 = vld [vmem:[%s3477_s3 + $0x174] sm:$0xf]  ;;  %v1841_v32 = vld [vmem:[%s3477_s3 + $0x178] sm:$0xf0]  ;;  %v1919_v33 = vld [vmem:[%s3477_s3 + $0x1f0] sm:$0xf]  ;;  %v1704_v39 = vor.u32 %v2329_v26, %v1701_v27  ;;  %v1840_v40 = vor.u32 %v2378_v29, %v1839_v28 }
  0x22   : > { %393 = vmatpush.bf16.msra.mxu0 %v1648_v4  ;;  %v2394_v34 = vld [vmem:[%s3477_s3 + $0x1f4] sm:$0xf0]  ;;  %v2393_v37 = vld [vmem:[%s3477_s3 + $0x1f4] sm:$0xf]  ;;  %v1921_v38 = vld [vmem:[%s3477_s3 + $0x1f8] sm:$0xf0]  ;;  %v1844_v41 = vor.u32 %v2377_v30, %v1841_v32 }
  0x23   : > { %407 = vmatpush.bf16.msra.mxu1 %v1652_v5  ;;  %507 = vmatpush.bf16.msra.mxu2 %v1716_v6  ;;  %v1920_v42 = vor.u32 %v2394_v34, %v1919_v33  ;;  %v1831_v43 = vld [vmem:[%s3477_s3 + $0x160] sm:$0xf]  ;;  %v2376_v44 = vld [vmem:[%s3477_s3 + $0x164] sm:$0xf0]  ;;  %v2375_v45 = vld [vmem:[%s3477_s3 + $0x164] sm:$0xf]  ;;  %v1924_v46 = vor.u32 %v2393_v37, %v1921_v38 }
  0x24   : > { %521 = vmatpush.bf16.msra.mxu3 %v1720_v10  ;;  %v1833_v47 = vld [vmem:[%s3477_s3 + $0x168] sm:$0xf0]  ;;  %v1911_v48 = vld [vmem:[%s3477_s3 + $0x1e0] sm:$0xf]  ;;  %v2392_v49 = vld [vmem:[%s3477_s3 + $0x1e4] sm:$0xf0]  ;;  %v1832_v52 = vor.u32 %v2376_v44, %v1831_v43 }
  0x25   : > { %v2391_v50 = vld [vmem:[%s3477_s3 + $0x1e4] sm:$0xf]  ;;  %v1913_v51 = vld [vmem:[%s3477_s3 + $0x1e8] sm:$0xf0]  ;;  %v1823_v53 = vld [vmem:[%s3477_s3 + $0x150] sm:$0xf]  ;;  %v1836_v54 = vor.u32 %v2375_v45, %v1833_v47  ;;  %v1912_v55 = vor.u32 %v2392_v49, %v1911_v48 }
  0x26   : > { %394 = vmatpush.bf16.msra.mxu0 %v1640_v16  ;;  %v2374_v56 = vld [vmem:[%s3477_s3 + $0x154] sm:$0xf0]  ;;  %v2373_v57 = vld [vmem:[%s3477_s3 + $0x154] sm:$0xf]  ;;  %s3481_s19 = smov (!%p245_p3, %s1599_s19), 3  ;;  %v1916_v58 = vor.u32 %v2391_v50, %v1913_v51  ;;  %vm695_vm0 = vcmask 1045504  }
  0x27   : > { %408 = vmatpush.bf16.msra.mxu1 %v1644_v19  ;;  %508 = vmatpush.bf16.msra.mxu2 %v1708_v20  ;;  %v1825_v59 = vld [vmem:[%s3477_s3 + $0x158] sm:$0xf0]  ;;  %v1903_v60 = vld [vmem:[%s3477_s3 + $0x1d0] sm:$0xf]  ;;  %v2390_v61 = vld [vmem:[%s3477_s3 + $0x1d4] sm:$0xf0]  ;;  %v1824_v0 = vor.u32 %v2374_v56, %v1823_v53 }
  0x28   : > { %522 = vmatpush.bf16.msra.mxu3 %v1712_v24  ;;  %v2389_v62 = vld [vmem:[%s3477_s3 + $0x1d4] sm:$0xf]  ;;  %v1905_v63 = vld [vmem:[%s3477_s3 + $0x1d8] sm:$0xf0]  ;;  %s2811_s10 = smul.u32 12, %s3481_s19  ;;  %v1828_v2 = vor.u32 %v2373_v57, %v1825_v59  ;;  %v1904_v3 = vor.u32 %v2390_v61, %v1903_v60  ;;  %s2327_s15 = sshll.u32 %s3481_s19, 4 }
  0x29   : > { %v1815_v1 = vld [vmem:[%s3477_s3 + $0x140] sm:$0xf]  ;;  %v2372_v4 = vld [vmem:[%s3477_s3 + $0x144] sm:$0xf0]  ;;  %v2371_v5 = vld [vmem:[%s3477_s3 + $0x144] sm:$0xf]  ;;  %v1908_v7 = vor.u32 %v2389_v62, %v1905_v63  ;;  %s264_s17 = scalar_lea.vmem %s3479_s5, %s2327_s15 }
  0x2a   : > { %395 = vmatpush.bf16.msra.mxu0 %v1632_v31  ;;  %v1817_v6 = vld [vmem:[%s3477_s3 + $0x148] sm:$0xf0]  ;;  %s2829_s23 = scalar_lea.vmem %s3475_s1, %s2811_s10  ;;  %s2835_s26 = scalar_lea.vmem %s3474_s0, %s2811_s10  ;;  %v1895_v8 = vld [vmem:[%s3477_s3 + $0x1c0] sm:$0xf]  ;;  %v2388_v9 = vld [vmem:[%s3477_s3 + $0x1c4] sm:$0xf0]  ;;  %v1816_v14 = vor.u32 %v2372_v4, %v1815_v1 }
  0x2b   : > { %409 = vmatpush.bf16.msra.mxu1 %v1636_v35  ;;  %509 = vmatpush.bf16.msra.mxu2 %v1700_v36  ;;  %v2345_v10 = vld [vmem:[%s2829_s23] sm:$0xff]  ;;  %v1897_v12 = vld [vmem:[%s3477_s3 + $0x1c8] sm:$0xf0]  ;;  %v1820_v15 = vor.u32 %v2371_v5, %v1817_v6  ;;  %v1896_v16 = vor.u32 %v2388_v9, %v1895_v8  ;;  %v1807_v17 = vld [vmem:[%s3477_s3 + $0x130] sm:$0xf]  ;;  %s2968_s27 = scalar_lea.vmem %s3476_s2, %s2811_s10 }
  0x2c   : > { %523 = vmatpush.bf16.msra.mxu3 %v1704_v39  ;;  %v2387_v11 = vld [vmem:[%s3477_s3 + $0x1c4] sm:$0xf]  ;;  %v2370_v18 = vld [vmem:[%s3477_s3 + $0x134] sm:$0xf0]  ;;  %v2369_v19 = vld [vmem:[%s3477_s3 + $0x134] sm:$0xf] }
  0x2d   : > { %v2328_v13 = vld [vmem:[%s2835_s26] sm:$0xff]  ;;  %v1900_v20 = vor.u32 %v2387_v11, %v1897_v12  ;;  %396 = vmatmul.bf16.vlgmr.msra.gmra.mxu0 %v2345_v10  ;;  %v1809_v21 = vld [vmem:[%s3477_s3 + $0x138] sm:$0xf0]  ;;  %v1887_v22 = vld [vmem:[%s3477_s3 + $0x1b0] sm:$0xf]  ;;  %v1808_v26 = vor.u32 %v2370_v18, %v1807_v17 }
  0x2e   : > { %635 = vmatpush.bf16.msrb.mxu0 %v1840_v40  ;;  %410 = vmatmul.bf16.vlgmr.msra.gmra.mxu1 %v2345_v10  ;;  %v2386_v23 = vld [vmem:[%s3477_s3 + $0x1b4] sm:$0xf0]  ;;  %v2385_v24 = vld [vmem:[%s3477_s3 + $0x1b4] sm:$0xf]  ;;  %v1889_v25 = vld [vmem:[%s3477_s3 + $0x1b8] sm:$0xf0]  ;;  %v1812_v29 = vor.u32 %v2369_v19, %v1809_v21 }
  0x2f   : > { %649 = vmatpush.bf16.msrb.mxu1 %v1844_v41  ;;  %780 = vmatpush.bf16.msrb.mxu2 %v1920_v42  ;;  %v1799_v27 = vld [vmem:[%s3477_s3 + $0x120] sm:$0xf]  ;;  %v2368_v28 = vld [vmem:[%s3477_s3 + $0x124] sm:$0xf0]  ;;  %v1888_v30 = vor.u32 %v2386_v23, %v1887_v22  ;;  %v2367_v31 = vld [vmem:[%s3477_s3 + $0x124] sm:$0xf]  ;;  %v1892_v34 = vor.u32 %v2385_v24, %v1889_v25 }
  0x30   : > { %794 = vmatpush.bf16.msrb.mxu3 %v1924_v46  ;;  %510 = vmatmul.bf16.vlgmr.msra.gmra.mxu2 %v2328_v13  ;;  %v1801_v32 = vld [vmem:[%s3477_s3 + $0x128] sm:$0xf0]  ;;  %v1879_v33 = vld [vmem:[%s3477_s3 + $0x1a0] sm:$0xf]  ;;  %v2384_v35 = vld [vmem:[%s3477_s3 + $0x1a4] sm:$0xf0]  ;;  %v1800_v41 = vor.u32 %v2368_v28, %v1799_v27 }
  0x31   : > { %524 = vmatmul.bf16.vlgmr.msra.gmra.mxu3 %v2328_v13  ;;  %v2383_v36 = vld [vmem:[%s3477_s3 + $0x1a4] sm:$0xf]  ;;  %v1881_v37 = vld [vmem:[%s3477_s3 + $0x1a8] sm:$0xf0]  ;;  %v667_v38 = vld [vmem:[%s2835_s26] sm:$0xc]  ;;  %v1804_v42 = vor.u32 %v2367_v31, %v1801_v32  ;;  %v1880_v43 = vor.u32 %v2384_v35, %v1879_v33 }
  0x32   : > { %636 = vmatpush.bf16.msrb.mxu0 %v1832_v52  ;;  %v2901_v39 = vld [vmem:[%s2835_s26 + $0x4] sm:$0xf]  ;;  %v669_v40 = vld [vmem:[%s2835_s26 + $0x8] sm:$0x3]  ;;  %v1791_v44 = vld [vmem:[%s3477_s3 + $0x110] sm:$0xf]  ;;  %v1884_v47 = vor.u32 %v2383_v36, %v1881_v37  ;;  %v690_v51 = vunpack.c.l.b16 %v667_v38 }
  0x33   : > { %650 = vmatpush.bf16.msrb.mxu1 %v1836_v54  ;;  %781 = vmatpush.bf16.msrb.mxu2 %v1912_v55  ;;  %v2366_v45 = vld [vmem:[%s3477_s3 + $0x114] sm:$0xf0]  ;;  %v2365_v46 = vld [vmem:[%s3477_s3 + $0x114] sm:$0xf]  ;;  %v1793_v48 = vld [vmem:[%s3477_s3 + $0x118] sm:$0xf0]  ;;  %v691_v52 = vunpack.c.l.b16 %v2901_v39  ;;  %v692_v53 = vunpack.c.l.b16 %v669_v40 }
  0x34   : > { %795 = vmatpush.bf16.msrb.mxu3 %v1916_v58  ;;  %v1871_v49 = vld [vmem:[%s3477_s3 + $0x190] sm:$0xf]  ;;  %v2382_v50 = vld [vmem:[%s3477_s3 + $0x194] sm:$0xf0]  ;;  %v2381_v54 = vld [vmem:[%s3477_s3 + $0x194] sm:$0xf]  ;;  %v1792_v56 = vor.u32 %v2366_v45, %v1791_v44  ;;  %v1796_v59 = vor.u32 %v2365_v46, %v1793_v48 }
  0x35   : > { %v1873_v55 = vld [vmem:[%s3477_s3 + $0x198] sm:$0xf0]  ;;  %v1783_v57 = vld [vmem:[%s3477_s3 + $0x100] sm:$0xf]  ;;  %v2364_v58 = vld [vmem:[%s3477_s3 + $0x104] sm:$0xf0]  ;;  %v1872_v60 = vor.u32 %v2382_v50, %v1871_v49  ;;  %v693_v4 = vpack.c.b16 %v691_v52, %v690_v51  ;;  %v694_v5 = vpack.c.b16 %v692_v53, %v692_v53 }
  0x36   : > { %637 = vmatpush.bf16.msrb.mxu0 %v1824_v0  ;;  %v2363_v61 = vld [vmem:[%s3477_s3 + $0x104] sm:$0xf]  ;;  %v1785_v62 = vld [vmem:[%s3477_s3 + $0x108] sm:$0xf0]  ;;  %v1863_v63 = vld [vmem:[%s3477_s3 + $0x180] sm:$0xf]  ;;  %v1876_v0 = vor.u32 %v2381_v54, %v1873_v55  ;;  %v1784_v9 = vor.u32 %v2364_v58, %v1783_v57 }
  0x37   : > { %651 = vmatpush.bf16.msrb.mxu1 %v1828_v2  ;;  %782 = vmatpush.bf16.msrb.mxu2 %v1904_v3  ;;  %v2380_v1 = vld [vmem:[%s3477_s3 + $0x184] sm:$0xf0]  ;;  %v2379_v2 = vld [vmem:[%s3477_s3 + $0x184] sm:$0xf]  ;;  %v1865_v3 = vld [vmem:[%s3477_s3 + $0x188] sm:$0xf0]  ;;  %v1788_v13 = vor.u32 %v2363_v61, %v1785_v62 }
  0x38   : > { %796 = vmatpush.bf16.msrb.mxu3 %v1908_v7  ;;  %v1999_v6 = vld [vmem:[%s3477_s3 + $0x270] sm:$0xf]  ;;  %v2410_v7 = vld [vmem:[%s3477_s3 + $0x274] sm:$0xf0]  ;;  %v2409_v8 = vld [vmem:[%s3477_s3 + $0x274] sm:$0xf]  ;;  %v1868_v17 = vor.u32 %v2379_v2, %v1865_v3 }
  0x39   : > { %v2001_v10 = vld [vmem:[%s3477_s3 + $0x278] sm:$0xf0]  ;;  %v2079_v11 = vld [vmem:[%s3477_s3 + $0x2f0] sm:$0xf]  ;;  %v2426_v12 = vld [vmem:[%s3477_s3 + $0x2f4] sm:$0xf0]  ;;  %v2000_v18 = vor.u32 %v2410_v7, %v1999_v6 }
  0x3a   : > { %638 = vmatpush.bf16.msrb.mxu0 %v1816_v14  ;;  %v1864_v14 = vor.u32 %v2380_v1, %v1863_v63  ;;  %v2362_v19 = vld [vmem:[%s2968_s27] sm:$0xff]  ;;  %v697_v21 = vrot.slane %v694_v5, 2  ;;  %v2004_v22 = vor.u32 %v2409_v8, %v2001_v10  ;;  %v2080_v23 = vor.u32 %v2426_v12, %v2079_v11  ;;  %v2408_v25 = vld [vmem:[%s3477_s3 + $0x264] sm:$0xf0]  ;;  %v1993_v28 = vld [vmem:[%s3477_s3 + $0x268] sm:$0xf0] }
  0x3b   : > { %652 = vmatpush.bf16.msrb.mxu1 %v1820_v15  ;;  %783 = vmatpush.bf16.msrb.mxu2 %v1896_v16  ;;  %v2425_v15 = vld [vmem:[%s3477_s3 + $0x2f4] sm:$0xf]  ;;  %v2081_v16 = vld [vmem:[%s3477_s3 + $0x2f8] sm:$0xf0]  ;;  %v1991_v24 = vld [vmem:[%s3477_s3 + $0x260] sm:$0xf] }
  0x3c   : > { %797 = vmatpush.bf16.msrb.mxu3 %v1900_v20  ;;  %v696_v20 = vrot.slane %v693_v4, 2  ;;  %v2084_v27 = vor.u32 %v2425_v15, %v2081_v16  ;;  %v2423_v31 = vld [vmem:[%s3477_s3 + $0x2e4] sm:$0xf]  ;;  %v2073_v32 = vld [vmem:[%s3477_s3 + $0x2e8] sm:$0xf0] }
  0x3d   : > { %v1983_v37 = vld [vmem:[%s3477_s3 + $0x250] sm:$0xf]  ;;  %v2406_v38 = vld [vmem:[%s3477_s3 + $0x254] sm:$0xf0]  ;;  %v2405_v40 = vld [vmem:[%s3477_s3 + $0x254] sm:$0xf] }
  0x3e   : > { %639 = vmatpush.bf16.msrb.mxu0 %v1808_v26  ;;  %v2407_v26 = vld [vmem:[%s3477_s3 + $0x264] sm:$0xf]  ;;  %v698_v33 = vsel %vm695_vm0, %v696_v20, %v697_v21  ;;  %v2422_v44 = vld [vmem:[%s3477_s3 + $0x2d4] sm:$0xf0]  ;;  %v2421_v45 = vld [vmem:[%s3477_s3 + $0x2d4] sm:$0xf] }
  0x3f   : > { %653 = vmatpush.bf16.msrb.mxu1 %v1812_v29  ;;  %784 = vmatpush.bf16.msrb.mxu2 %v1888_v30  ;;  %v2071_v29 = vld [vmem:[%s3477_s3 + $0x2e0] sm:$0xf]  ;;  %v2424_v30 = vld [vmem:[%s3477_s3 + $0x2e4] sm:$0xf0]  ;;  %v1996_v35 = vor.u32 %v2407_v26, %v1993_v28  ;;  %v2065_v46 = vld [vmem:[%s3477_s3 + $0x2d8] sm:$0xf0] }
  0x40   : > { %798 = vmatpush.bf16.msrb.mxu3 %v1892_v34  ;;  %v1992_v34 = vor.u32 %v2408_v25, %v1991_v24  ;;  %v2072_v36 = vor.u32 %v2424_v30, %v2071_v29  ;;  %v1975_v50 = vld [vmem:[%s3477_s3 + $0x240] sm:$0xf]  ;;  %v2404_v51 = vld [vmem:[%s3477_s3 + $0x244] sm:$0xf0]  ;;  %v2403_v53 = vld [vmem:[%s3477_s3 + $0x244] sm:$0xf]  ;;  %v2068_v54 = vor.u32 %v2421_v45, %v2065_v46 }
  0x41   : > { %v1977_v55 = vld [vmem:[%s3477_s3 + $0x248] sm:$0xf0]  ;;  %v2420_v57 = vld [vmem:[%s3477_s3 + $0x2c4] sm:$0xf0]  ;;  %v2419_v58 = vld [vmem:[%s3477_s3 + $0x2c4] sm:$0xf] }
  0x42   : > { %640 = vmatpush.bf16.msrb.mxu0 %v1800_v41  ;;  %v2076_v41 = vor.u32 %v2423_v31, %v2073_v32  ;;  %v1967_v61 = vld [vmem:[%s3477_s3 + $0x230] sm:$0xf]  ;;  %v1980_v62 = vor.u32 %v2403_v53, %v1977_v55  ;;  %v2401_v1 = vld [vmem:[%s3477_s3 + $0x234] sm:$0xf]  ;;  %v1969_v2 = vld [vmem:[%s3477_s3 + $0x238] sm:$0xf0] }
  0x43   : > { %654 = vmatpush.bf16.msrb.mxu1 %v1804_v42  ;;  %785 = vmatpush.bf16.msrb.mxu2 %v1880_v43  ;;  %v1985_v42 = vld [vmem:[%s3477_s3 + $0x258] sm:$0xf0]  ;;  %v2063_v43 = vld [vmem:[%s3477_s3 + $0x2d0] sm:$0xf]  ;;  %v2418_v5 = vld [vmem:[%s3477_s3 + $0x2b4] sm:$0xf0] }
  0x44   : > { %799 = vmatpush.bf16.msrb.mxu3 %v1884_v47  ;;  %v1984_v47 = vor.u32 %v2406_v38, %v1983_v37  ;;  %v1988_v48 = vor.u32 %v2405_v40, %v1985_v42  ;;  %v2064_v49 = vor.u32 %v2422_v44, %v2063_v43  ;;  %v2047_v4 = vld [vmem:[%s3477_s3 + $0x2b0] sm:$0xf]  ;;  %v2417_v6 = vld [vmem:[%s3477_s3 + $0x2b4] sm:$0xf]  ;;  %v2049_v7 = vld [vmem:[%s3477_s3 + $0x2b8] sm:$0xf0] }
  0x45   : > { %v1959_v8 = vld [vmem:[%s3477_s3 + $0x220] sm:$0xf]  ;;  %v2399_v11 = vld [vmem:[%s3477_s3 + $0x224] sm:$0xf]  ;;  %v1961_v12 = vld [vmem:[%s3477_s3 + $0x228] sm:$0xf0]  ;;  %v2048_v15 = vor.u32 %v2418_v5, %v2047_v4 }
  0x46   : > { %641 = vmatpush.bf16.msrb.mxu0 %v1792_v56  ;;  %v2055_v56 = vld [vmem:[%s3477_s3 + $0x2c0] sm:$0xf]  ;;  %v2416_v16 = vld [vmem:[%s3477_s3 + $0x2a4] sm:$0xf0]  ;;  %v2497_v26 = vld [vmem:[%s2968_s27] sm:$0xf0]   ;;  %v1964_v29 = vor.u32 %v2399_v11, %v1961_v12 }
  0x47   : > { %655 = vmatpush.bf16.msrb.mxu1 %v1796_v59  ;;  %786 = vmatpush.bf16.msrb.mxu2 %v1872_v60  ;;  %v2057_v59 = vld [vmem:[%s3477_s3 + $0x2c8] sm:$0xf0]  ;;  %v1976_v60 = vor.u32 %v2404_v51, %v1975_v50  ;;  %v2056_v63 = vor.u32 %v2420_v57, %v2055_v56  ;;  %v2490_v20 = vld [vmem:[%s2829_s23] sm:$0xc]  ;;  %v3109_v21 = vld [vmem:[%s2829_s23 + $0x4] sm:$0xff]  }
  0x48   : > { %800 = vmatpush.bf16.msrb.mxu3 %v1876_v0  ;;  %v2402_v0 = vld [vmem:[%s3477_s3 + $0x234] sm:$0xf0]  ;;  %v2060_v3 = vor.u32 %v2419_v58, %v2057_v59  ;;  %v2494_v24 = vld [vmem:[%s2968_s27] sm:$0xc]  ;;  %v3115_v25 = vld [vmem:[%s2968_s27 + $0x4] sm:$0xff]  }
  0x49   : > { %v1968_v10 = vor.u32 %v2402_v0, %v1967_v61  ;;  %v1951_v30 = vld [vmem:[%s3477_s3 + $0x210] sm:$0xf]  ;;  %v2398_v32 = vld [vmem:[%s3477_s3 + $0x214] sm:$0xf0]  ;;  %v2033_v42 = vld [vmem:[%s3477_s3 + $0x298] sm:$0xf0]  ;;  %v2495_v58 = vor.u32 %v2497_v26, %v2494_v24 }
  0x4a   : > { %642 = vmatpush.bf16.msrb.mxu0 %v1784_v9  ;;  %v2400_v9 = vld [vmem:[%s3477_s3 + $0x224] sm:$0xf0]  ;;  %v2031_v37 = vld [vmem:[%s3477_s3 + $0x290] sm:$0xf]  ;;  %v2414_v38 = vld [vmem:[%s3477_s3 + $0x294] sm:$0xf0]  ;;  %v1952_v43 = vor.u32 %v2398_v32, %v1951_v30 }
  0x4b   : > { %656 = vmatpush.bf16.msrb.mxu1 %v1788_v13  ;;  %787 = vmatpush.bf16.msrb.mxu2 %v1864_v14  ;;  %v2039_v13 = vld [vmem:[%s3477_s3 + $0x2a0] sm:$0xf]  ;;  %v1972_v14 = vor.u32 %v2401_v1, %v1969_v2  ;;  %v1960_v28 = vor.u32 %v2400_v9, %v1959_v8  ;;  %v2396_v46 = vld [vmem:[%s3477_s3 + $0x204] sm:$0xf0]  ;;  %v2411_v56 = vld [vmem:[%s3477_s3 + $0x284] sm:$0xf] }
  0x4c   : > { %801 = vmatpush.bf16.msrb.mxu3 %v1868_v17  ;;  %v2415_v17 = vld [vmem:[%s3477_s3 + $0x2a4] sm:$0xf]  ;;  %v2040_v31 = vor.u32 %v2416_v16, %v2039_v13  ;;  %v1943_v45 = vld [vmem:[%s3477_s3 + $0x200] sm:$0xf]  ;;  %v2412_v55 = vld [vmem:[%s3477_s3 + $0x284] sm:$0xf0] }
  0x4d   : > { %643 = vmatmul.bf16.vlgmr.msrb.gmra.mxu0 %v2362_v19  ;;  %v2023_v50 = vld [vmem:[%s3477_s3 + $0x280] sm:$0xf]  ;;  %v2025_v57 = vld [vmem:[%s3477_s3 + $0x288] sm:$0xf0]  ;;  %v2442_v61 = vld [vmem:[%s3477_s3 + $0x374] sm:$0xf0] }
  0x4e   : > { %924 = vmatpush.bf16.msra.mxu0 %v2000_v18  ;;  %657 = vmatmul.bf16.vlgmr.msrb.gmra.mxu1 %v2362_v19  ;;  %v2041_v18 = vld [vmem:[%s3477_s3 + $0x2a8] sm:$0xf0]  ;;  %v2052_v19 = vor.u32 %v2417_v6, %v2049_v7  ;;  %v2161_v0 = vld [vmem:[%s3477_s3 + $0x378] sm:$0xf0]  ;;  %v2239_v1 = vld [vmem:[%s3477_s3 + $0x3f0] sm:$0xf]  ;;  %v2024_v4 = vor.u32 %v2412_v55, %v2023_v50  ;;  %v2028_v9 = vor.u32 %v2411_v56, %v2025_v57 }
  0x4f   : > { %938 = vmatpush.bf16.msra.mxu1 %v2004_v22  ;;  %1068 = vmatpush.bf16.msra.mxu2 %v2080_v23  ;;  %v2496_v22 = vld [vmem:[%s2829_s23] sm:$0xf0]   ;;  %v814_v23 = vld [vmem:[%s2829_s23 + $0x8] sm:$0x3]  ;;  %v2458_v2 = vld [vmem:[%s3477_s3 + $0x3f4] sm:$0xf0] }
  0x50   : > { %1082 = vmatpush.bf16.msra.mxu3 %v2084_v27  ;;  %788 = vmatmul.bf16.vlgmr.msrb.gmra.mxu2 %v698_v33  ;;  %v958_v27 = vld [vmem:[%s2968_s27 + $0x8] sm:$0x3]  ;;  %v2491_v51 = vor.u32 %v2496_v22, %v2490_v20  ;;  %v2457_v5 = vld [vmem:[%s3477_s3 + $0x3f4] sm:$0xf]  ;;  %v2241_v6 = vld [vmem:[%s3477_s3 + $0x3f8] sm:$0xf0] }
  0x51   : > { %802 = vmatmul.bf16.vlgmr.msrb.gmra.mxu3 %v698_v33  ;;  %v2397_v33 = vld [vmem:[%s3477_s3 + $0x214] sm:$0xf]  ;;  %v981_v40 = vunpack.c.l.b16 %v958_v27  ;;  %v984_v11 = vrot.slane %v2495_v58, 2  ;;  %v2440_v16 = vld [vmem:[%s3477_s3 + $0x364] sm:$0xf0] }
  0x52   : > { %925 = vmatpush.bf16.msra.mxu0 %v1992_v34  ;;  %v1953_v34 = vld [vmem:[%s3477_s3 + $0x218] sm:$0xf0]  ;;  %v840_v7 = vrot.slane %v2491_v51, 2  ;;  %v2231_v20 = vld [vmem:[%s3477_s3 + $0x3e0] sm:$0xf] }
  0x53   : > { %939 = vmatpush.bf16.msra.mxu1 %v1996_v35  ;;  %1069 = vmatpush.bf16.msra.mxu2 %v2072_v36  ;;  %v837_v35 = vunpack.c.l.b16 %v814_v23  ;;  %v2044_v36 = vor.u32 %v2415_v17, %v2041_v18  ;;  %v1956_v44 = vor.u32 %v2397_v33, %v1953_v34  ;;  %v983_v59 = vpack.c.b16 %v981_v40, %v981_v40  ;;  %v2439_v17 = vld [vmem:[%s3477_s3 + $0x364] sm:$0xf]  ;;  %v2456_v22 = vld [vmem:[%s3477_s3 + $0x3e4] sm:$0xf0]  ;;  %v2233_v26 = vld [vmem:[%s3477_s3 + $0x3e8] sm:$0xf0] }
  0x54   : > { %1083 = vmatpush.bf16.msra.mxu3 %v2076_v41  ;;  %v2413_v41 = vld [vmem:[%s3477_s3 + $0x294] sm:$0xf]  ;;  %v2244_v18 = vor.u32 %v2457_v5, %v2241_v6  ;;  %v2455_v24 = vld [vmem:[%s3477_s3 + $0x3e4] sm:$0xf]  ;;  %v2232_v30 = vor.u32 %v2456_v22, %v2231_v20  ;;  %v2438_v32 = vld [vmem:[%s3477_s3 + $0x354] sm:$0xf0] }
  0x55   : > { %v839_v53 = vpack.c.b16 %v837_v35, %v837_v35  ;;  %v985_v12 = vrot.slane %v983_v59, 2  ;;  %v2437_v33 = vld [vmem:[%s3477_s3 + $0x354] sm:$0xf]  ;;  %v2236_v34 = vor.u32 %v2455_v24, %v2233_v26  ;;  %v2145_v35 = vld [vmem:[%s3477_s3 + $0x358] sm:$0xf0] }
  0x56   : > { %926 = vmatpush.bf16.msra.mxu0 %v1984_v47  ;;  %v2032_v47 = vor.u32 %v2414_v38, %v2031_v37  ;;  %v2454_v37 = vld [vmem:[%s3477_s3 + $0x3d4] sm:$0xf0]  ;;  %v2453_v38 = vld [vmem:[%s3477_s3 + $0x3d4] sm:$0xf]  ;;  %v2225_v40 = vld [vmem:[%s3477_s3 + $0x3d8] sm:$0xf0] }
  0x57   : > { %940 = vmatpush.bf16.msra.mxu1 %v1988_v48  ;;  %1070 = vmatpush.bf16.msra.mxu2 %v2064_v49  ;;  %v2395_v48 = vld [vmem:[%s3477_s3 + $0x204] sm:$0xf]  ;;  %v1945_v49 = vld [vmem:[%s3477_s3 + $0x208] sm:$0xf0]  ;;  %v841_v8 = vrot.slane %v839_v53, 2  ;;  %v986_v27 = vsel %vm695_vm0, %v984_v11, %v985_v12 }
  0x58   : > { %1084 = vmatpush.bf16.msra.mxu3 %v2068_v54  ;;  %v2036_v54 = vor.u32 %v2413_v41, %v2033_v42  ;;  %v2148_v42 = vor.u32 %v2437_v33, %v2145_v35  ;;  %v2452_v50 = vld [vmem:[%s3477_s3 + $0x3c4] sm:$0xf0]  ;;  %v2451_v51 = vld [vmem:[%s3477_s3 + $0x3c4] sm:$0xf]  ;;  %v2217_v53 = vld [vmem:[%s3477_s3 + $0x3c8] sm:$0xf0] }
  0x59   : > { %v842_v23 = vsel %vm695_vm0, %v840_v7, %v841_v8  ;;  %v2127_v57 = vld [vmem:[%s3477_s3 + $0x330] sm:$0xf]  ;;  %v2434_v58 = vld [vmem:[%s3477_s3 + $0x334] sm:$0xf0]  ;;  %v2433_v59 = vld [vmem:[%s3477_s3 + $0x334] sm:$0xf] }
  0x5a   : > { %927 = vmatpush.bf16.msra.mxu0 %v1976_v60  ;;  %v2159_v60 = vld [vmem:[%s3477_s3 + $0x370] sm:$0xf]  ;;  %v2119_v5 = vld [vmem:[%s3477_s3 + $0x320] sm:$0xf]  ;;  %v2432_v6 = vld [vmem:[%s3477_s3 + $0x324] sm:$0xf0] }
  0x5b   : > { %941 = vmatpush.bf16.msra.mxu1 %v1980_v62  ;;  %1071 = vmatpush.bf16.msra.mxu2 %v2056_v63  ;;  %v2441_v62 = vld [vmem:[%s3477_s3 + $0x374] sm:$0xf]  ;;  %v1944_v63 = vor.u32 %v2396_v46, %v1943_v45  ;;  %v2436_v45 = vld [vmem:[%s3477_s3 + $0x344] sm:$0xf0]  ;;  %v2435_v46 = vld [vmem:[%s3477_s3 + $0x344] sm:$0xf] }
  0x5c   : > { %1085 = vmatpush.bf16.msra.mxu3 %v2060_v3  ;;  %v1948_v3 = vor.u32 %v2395_v48, %v1945_v49  ;;  %v2164_v13 = vor.u32 %v2441_v62, %v2161_v0  ;;  %v2137_v48 = vld [vmem:[%s3477_s3 + $0x348] sm:$0xf0]  ;;  %v2215_v49 = vld [vmem:[%s3477_s3 + $0x3c0] sm:$0xf]  ;;  %v2207_v62 = vld [vmem:[%s3477_s3 + $0x3b0] sm:$0xf] }
  0x5d   : > { %v2140_v55 = vor.u32 %v2435_v46, %v2137_v48  ;;  %v2216_v56 = vor.u32 %v2452_v50, %v2215_v49  ;;  %v2449_v0 = vld [vmem:[%s3477_s3 + $0x3b4] sm:$0xf]  ;;  %v2431_v7 = vld [vmem:[%s3477_s3 + $0x324] sm:$0xf]  ;;  %v2448_v11 = vld [vmem:[%s3477_s3 + $0x3a4] sm:$0xf0] }
  0x5e   : > { %928 = vmatpush.bf16.msra.mxu0 %v1968_v10  ;;  %v2160_v10 = vor.u32 %v2442_v61, %v2159_v60  ;;  %v2220_v60 = vor.u32 %v2451_v51, %v2217_v53  ;;  %v2129_v61 = vld [vmem:[%s3477_s3 + $0x338] sm:$0xf0]  ;;  %v2447_v12 = vld [vmem:[%s3477_s3 + $0x3a4] sm:$0xf]  ;;  %v2446_v24 = vld [vmem:[%s3477_s3 + $0x394] sm:$0xf0] }
  0x5f   : > { %942 = vmatpush.bf16.msra.mxu1 %v1972_v14  ;;  %1072 = vmatpush.bf16.msra.mxu2 %v2048_v15  ;;  %v2240_v14 = vor.u32 %v2458_v2, %v2239_v1  ;;  %v2151_v15 = vld [vmem:[%s3477_s3 + $0x360] sm:$0xf]  ;;  %v2209_v1 = vld [vmem:[%s3477_s3 + $0x3b8] sm:$0xf0]  ;;  %v2128_v2 = vor.u32 %v2434_v58, %v2127_v57  ;;  %v2445_v26 = vld [vmem:[%s3477_s3 + $0x394] sm:$0xf] }
  0x60   : > { %1086 = vmatpush.bf16.msra.mxu3 %v2052_v19  ;;  %v2153_v19 = vld [vmem:[%s3477_s3 + $0x368] sm:$0xf0]  ;;  %v2212_v8 = vor.u32 %v2449_v0, %v2209_v1  ;;  %v2113_v22 = vld [vmem:[%s3477_s3 + $0x318] sm:$0xf0]  ;;  %v2428_v33 = vld [vmem:[%s3477_s3 + $0x304] sm:$0xf0] }
  0x61   : > { %v2105_v35 = vld [vmem:[%s3477_s3 + $0x308] sm:$0xf0]  ;;  %v2473_v46 = vld [vmem:[%s3477_s3 + $0x474] sm:$0xf]  ;;  %v2471_v57 = vld [vmem:[%s3477_s3 + $0x464] sm:$0xf] }
  0x62   : > { %929 = vmatpush.bf16.msra.mxu0 %v1960_v28  ;;  %v2152_v28 = vor.u32 %v2440_v16, %v2151_v15  ;;  %v2313_v58 = vld [vmem:[%s3477_s3 + $0x468] sm:$0xf0]  ;;  %v2295_v1 = vld [vmem:[%s3477_s3 + $0x440] sm:$0xf] }
  0x63   : > { %943 = vmatpush.bf16.msra.mxu1 %v1964_v29  ;;  %1073 = vmatpush.bf16.msra.mxu2 %v2040_v31  ;;  %v2156_v29 = vor.u32 %v2439_v17, %v2153_v19  ;;  %v2143_v31 = vld [vmem:[%s3477_s3 + $0x350] sm:$0xf]  ;;  %v2429_v19 = vld [vmem:[%s3477_s3 + $0x314] sm:$0xf] }
  0x64   : > { %1087 = vmatpush.bf16.msra.mxu3 %v2044_v36  ;;  %v2223_v36 = vld [vmem:[%s3477_s3 + $0x3d0] sm:$0xf]  ;;  %v2144_v41 = vor.u32 %v2438_v32, %v2143_v31  ;;  %v2116_v31 = vor.u32 %v2429_v19, %v2113_v22  ;;  %v2462_v19 = vld [vmem:[%s3477_s3 + $0x414] sm:$0xf0]  ;;  %v2273_v22 = vld [vmem:[%s3477_s3 + $0x418] sm:$0xf0] }
  0x65   : > { %v2111_v17 = vld [vmem:[%s3477_s3 + $0x310] sm:$0xf] }
  0x66   : > { %930 = vmatpush.bf16.msra.mxu0 %v1952_v43  ;;  %v2224_v43 = vor.u32 %v2454_v37, %v2223_v36  ;;  %v2183_v37 = vld [vmem:[%s3477_s3 + $0x380] sm:$0xf] }
  0x67   : > { %944 = vmatpush.bf16.msra.mxu1 %v1956_v44  ;;  %1074 = vmatpush.bf16.msra.mxu2 %v2032_v47  ;;  %v2135_v44 = vld [vmem:[%s3477_s3 + $0x340] sm:$0xf]  ;;  %v2228_v47 = vor.u32 %v2453_v38, %v2225_v40  ;;  %v2444_v38 = vld [vmem:[%s3477_s3 + $0x384] sm:$0xf0]  ;;  %v2443_v40 = vld [vmem:[%s3477_s3 + $0x384] sm:$0xf] }
  0x68   : > { %1088 = vmatpush.bf16.msra.mxu3 %v2036_v54  ;;  %v2136_v54 = vor.u32 %v2436_v45, %v2135_v44  ;;  %v2184_v49 = vor.u32 %v2444_v38, %v2183_v37 }
  0x6a   : > { %931 = vmatpush.bf16.msra.mxu0 %v1944_v63  ;;  %v2450_v63 = vld [vmem:[%s3477_s3 + $0x3b4] sm:$0xf0] }
  0x6b   : > { %945 = vmatpush.bf16.msra.mxu1 %v1948_v3  ;;  %1075 = vmatpush.bf16.msra.mxu2 %v2024_v4  ;;  %v2132_v3 = vor.u32 %v2433_v59, %v2129_v61  ;;  %v2208_v4 = vor.u32 %v2450_v63, %v2207_v62  ;;  %v2303_v59 = vld [vmem:[%s3477_s3 + $0x450] sm:$0xf]  ;;  %v2469_v61 = vld [vmem:[%s3477_s3 + $0x454] sm:$0xf]  ;;  %v2305_v62 = vld [vmem:[%s3477_s3 + $0x458] sm:$0xf0] }
  0x6c   : > { %1089 = vmatpush.bf16.msra.mxu3 %v2028_v9  ;;  %v2121_v9 = vld [vmem:[%s3477_s3 + $0x328] sm:$0xf0]  ;;  %v2308_v0 = vor.u32 %v2469_v61, %v2305_v62 }
  0x6d   : > { %932 = vmatmul.bf16.vlgmr.msra.gmra.mxu0 %v842_v23  ;;  %v2124_v15 = vor.u32 %v2431_v7, %v2121_v9  ;;  %v2466_v7 = vld [vmem:[%s3477_s3 + $0x434] sm:$0xf0]  ;;  %v2289_v9 = vld [vmem:[%s3477_s3 + $0x438] sm:$0xf0] }
  0x6e   : > { %1202 = vmatpush.bf16.msrb.mxu0 %v2160_v10  ;;  %946 = vmatmul.bf16.vlgmr.msra.gmra.mxu1 %v842_v23  ;;  %v2199_v10 = vld [vmem:[%s3477_s3 + $0x3a0] sm:$0xf]  ;;  %v2191_v23 = vld [vmem:[%s3477_s3 + $0x390] sm:$0xf] }
  0x6f   : > { %1216 = vmatpush.bf16.msrb.mxu1 %v2164_v13  ;;  %1336 = vmatpush.bf16.msrb.mxu2 %v2240_v14  ;;  %v2201_v13 = vld [vmem:[%s3477_s3 + $0x3a8] sm:$0xf0]  ;;  %v2120_v14 = vor.u32 %v2432_v6, %v2119_v5  ;;  %v2200_v16 = vor.u32 %v2448_v11, %v2199_v10  ;;  %v2192_v32 = vor.u32 %v2446_v24, %v2191_v23  ;;  %v2287_v6 = vld [vmem:[%s3477_s3 + $0x430] sm:$0xf] }
  0x70   : > { %1350 = vmatpush.bf16.msrb.mxu3 %v2244_v18  ;;  %1076 = vmatmul.bf16.vlgmr.msra.gmra.mxu2 %v986_v27  ;;  %v2430_v18 = vld [vmem:[%s3477_s3 + $0x314] sm:$0xf0]  ;;  %v2204_v20 = vor.u32 %v2447_v12, %v2201_v13  ;;  %v2288_v10 = vor.u32 %v2466_v7, %v2287_v6  ;;  %v2279_v12 = vld [vmem:[%s3477_s3 + $0x420] sm:$0xf]  ;;  %v2464_v13 = vld [vmem:[%s3477_s3 + $0x424] sm:$0xf0] }
  0x71   : > { %1090 = vmatmul.bf16.vlgmr.msra.gmra.mxu3 %v986_v27  ;;  %v2193_v27 = vld [vmem:[%s3477_s3 + $0x398] sm:$0xf0] }
  0x72   : > { %1203 = vmatpush.bf16.msrb.mxu0 %v2152_v28  ;;  %v2112_v28 = vor.u32 %v2430_v18, %v2111_v17  ;;  %v2196_v36 = vor.u32 %v2445_v26, %v2193_v27  ;;  %v2271_v18 = vld [vmem:[%s3477_s3 + $0x410] sm:$0xf]  ;;  %v2263_v26 = vld [vmem:[%s3477_s3 + $0x400] sm:$0xf]  ;;  %v2460_v27 = vld [vmem:[%s3477_s3 + $0x404] sm:$0xf0] }
  0x73   : > { %1217 = vmatpush.bf16.msrb.mxu1 %v2156_v29  ;;  %1337 = vmatpush.bf16.msrb.mxu2 %v2232_v30  ;;  %v2103_v29 = vld [vmem:[%s3477_s3 + $0x300] sm:$0xf]  ;;  %v1100_v30 = vld [vmem:[%s2835_s26 + $0x8] sm:$0xf]  ;;  %v2272_v23 = vor.u32 %v2462_v19, %v2271_v18 }
  0x74   : > { %1351 = vmatpush.bf16.msrb.mxu3 %v2236_v34  ;;  %v2427_v34 = vld [vmem:[%s3477_s3 + $0x304] sm:$0xf]  ;;  %v1119_v44 = vunpack.c.l.b16 %v1100_v30  ;;  %v2104_v45 = vor.u32 %v2428_v33, %v2103_v29  ;;  %v2265_v29 = vld [vmem:[%s3477_s3 + $0x408] sm:$0xf0]  ;;  %v2264_v30 = vor.u32 %v2460_v27, %v2263_v26 }
  0x75   : > { %v2108_v48 = vor.u32 %v2427_v34, %v2105_v35 }
  0x76   : > { %1204 = vmatpush.bf16.msrb.mxu0 %v2144_v41  ;;  %v2185_v41 = vld [vmem:[%s3477_s3 + $0x388] sm:$0xf0] }
  0x77   : > { %1218 = vmatpush.bf16.msrb.mxu1 %v2148_v42  ;;  %1338 = vmatpush.bf16.msrb.mxu2 %v2224_v43  ;;  %v2319_v42 = vld [vmem:[%s3477_s3 + $0x470] sm:$0xf]  ;;  %v2474_v43 = vld [vmem:[%s3477_s3 + $0x474] sm:$0xf0]  ;;  %v2188_v50 = vor.u32 %v2443_v40, %v2185_v41 }
  0x78   : > { %1352 = vmatpush.bf16.msrb.mxu3 %v2228_v47  ;;  %v2321_v47 = vld [vmem:[%s3477_s3 + $0x478] sm:$0xf0]  ;;  %v2320_v51 = vor.u32 %v2474_v43, %v2319_v42 }
  0x79   : > { %v2324_v53 = vor.u32 %v2473_v46, %v2321_v47 }
  0x7a   : > { %1205 = vmatpush.bf16.msrb.mxu0 %v2136_v54  ;;  %v1120_v54 = vpack.c.b16 %v1119_v44, %v691_v52  ;;  %v2316_v52 = vor.u32 %v2471_v57, %v2313_v58 }
  0x7b   : > { %1219 = vmatpush.bf16.msrb.mxu1 %v2140_v55  ;;  %1339 = vmatpush.bf16.msrb.mxu2 %v2216_v56  ;;  %v2311_v55 = vld [vmem:[%s3477_s3 + $0x460] sm:$0xf]  ;;  %v2472_v56 = vld [vmem:[%s3477_s3 + $0x464] sm:$0xf0] }
  0x7c   : > { %1353 = vmatpush.bf16.msrb.mxu3 %v2220_v60  ;;  %v2312_v39 = vor.u32 %v2472_v56, %v2311_v55  ;;  %v2470_v60 = vld [vmem:[%s3477_s3 + $0x454] sm:$0xf0] }
  0x7d   : > { %v2304_v63 = vor.u32 %v2470_v60, %v2303_v59 }
  0x7e   : > { %1206 = vmatpush.bf16.msrb.mxu0 %v2128_v2  ;;  %v2468_v2 = vld [vmem:[%s3477_s3 + $0x444] sm:$0xf0] }
  0x7f   : > { %1220 = vmatpush.bf16.msrb.mxu1 %v2132_v3  ;;  %1340 = vmatpush.bf16.msrb.mxu2 %v2208_v4  ;;  %v2467_v3 = vld [vmem:[%s3477_s3 + $0x444] sm:$0xf]  ;;  %v2296_v4 = vor.u32 %v2468_v2, %v2295_v1 }
  0x80   : > { %1354 = vmatpush.bf16.msrb.mxu3 %v2212_v8  ;;  %v2465_v8 = vld [vmem:[%s3477_s3 + $0x434] sm:$0xf] }
  0x81   : > { %v2292_v11 = vor.u32 %v2465_v8, %v2289_v9  ;;  %v1502_v8 = vld [vmem:[%s3478_s4] sm:$0x3] }
  0x82   : > { %1207 = vmatpush.bf16.msrb.mxu0 %v2120_v14  ;;  %v2463_v14 = vld [vmem:[%s3477_s3 + $0x424] sm:$0xf]  ;;  %v1505_v19 = vperm.slane %v1502_v8, 1 }
  0x83   : > { %1221 = vmatpush.bf16.msrb.mxu1 %v2124_v15  ;;  %1341 = vmatpush.bf16.msrb.mxu2 %v2200_v16  ;;  %v2281_v15 = vld [vmem:[%s3477_s3 + $0x428] sm:$0xf0]  ;;  %v2280_v16 = vor.u32 %v2464_v13, %v2279_v12 }
  0x84   : > { %1355 = vmatpush.bf16.msrb.mxu3 %v2204_v20  ;;  %v2284_v17 = vor.u32 %v2463_v14, %v2281_v15  ;;  %v2461_v20 = vld [vmem:[%s3477_s3 + $0x414] sm:$0xf]  ;;  %v1504_v15 = vperm.slane %v1502_v8, 0 }
  0x85   : > { %v2276_v24 = vor.u32 %v2461_v20, %v2273_v22 }
  0x86   : > { %1208 = vmatpush.bf16.msrb.mxu0 %v2112_v28  ;;  %v2459_v28 = vld [vmem:[%s3477_s3 + $0x404] sm:$0xf] }
  0x87   : > { %1222 = vmatpush.bf16.msrb.mxu1 %v2116_v31  ;;  %1342 = vmatpush.bf16.msrb.mxu2 %v2192_v32  ;;  %v2268_v31 = vor.u32 %v2459_v28, %v2265_v29 }
  0x88   : > { %1356 = vmatpush.bf16.msrb.mxu3 %v2196_v36 }
  0x8a   : > { %1209 = vmatpush.bf16.msrb.mxu0 %v2104_v45 }
  0x8b   : > { %1223 = vmatpush.bf16.msrb.mxu1 %v2108_v48  ;;  %1343 = vmatpush.bf16.msrb.mxu2 %v2184_v49 }
  0x8c   : > { %1357 = vmatpush.bf16.msrb.mxu3 %v2188_v50 }
  0x8d   : > { %1210 = vmatmul.bf16.vlgmr.msrb.gmra.mxu0 %v1120_v54 }
  0x8e   : > { %1470 = vmatpush.bf16.msra.mxu0 %v2320_v51  ;;  %1224 = vmatmul.bf16.vlgmr.msrb.gmra.mxu1 %v1120_v54 }
  0x8f   : > { %1484 = vmatpush.bf16.msra.mxu1 %v2324_v53  ;;  %1344 = vmatmul.bf16.vlgmr.msrb.gmra.mxu2 %v3109_v21 }
  0x90   : > { %1358 = vmatmul.bf16.vlgmr.msrb.gmra.mxu3 %v3109_v21  ;;  %v2297_v21 = vld [vmem:[%s3477_s3 + $0x448] sm:$0xf0] }
  0x91   : > { %v2300_v5 = vor.u32 %v2467_v3, %v2297_v21 }
  0x92   : > { %1471 = vmatpush.bf16.msra.mxu0 %v2312_v39 }
  0x93   : > { %1485 = vmatpush.bf16.msra.mxu1 %v2316_v52 }
  0x96   : > { %1472 = vmatpush.bf16.msra.mxu0 %v2304_v63 }
  0x97   : > { %1486 = vmatpush.bf16.msra.mxu1 %v2308_v0 }
  0x9a   : > { %1473 = vmatpush.bf16.msra.mxu0 %v2296_v4 }
  0x9b   : > { %1487 = vmatpush.bf16.msra.mxu1 %v2300_v5 }
  0x9e   : > { %1474 = vmatpush.bf16.msra.mxu0 %v2288_v10 }
  0x9f   : > { %1488 = vmatpush.bf16.msra.mxu1 %v2292_v11 }
  0xa2   : > { %1475 = vmatpush.bf16.msra.mxu0 %v2280_v16 }
  0xa3   : > { %1489 = vmatpush.bf16.msra.mxu1 %v2284_v17 }
  0xa6   : > { %1476 = vmatpush.bf16.msra.mxu0 %v2272_v23 }
  0xa7   : > { %1490 = vmatpush.bf16.msra.mxu1 %v2276_v24 }
  0xaa   : > { %1477 = vmatpush.bf16.msra.mxu0 %v2264_v30  ;;  %v397_v32 = vpop.f32.mrf.mxu0 }
  0xab   : > { %1491 = vmatpush.bf16.msra.mxu1 %v2268_v31  ;;  %v411_v33 = vpop.f32.mrf.mxu1 }
  0xad   : > { %1478 = vmatmul.bf16.vlgmr.msra.gmra.mxu0 %v3115_v25 }
  0xae   : > { %1492 = vmatmul.bf16.vlgmr.msra.gmra.mxu1 %v3115_v25 }
  0xb2   : > { %v399_v34 = vpop.f32.mrf.mxu0 }
  0xb3   : > { %v413_v35 = vpop.f32.mrf.mxu1  ;;  %v511_v36 = vpop.f32.mrf.mxu2 }
  0xb4   : > { %v525_v37 = vpop.f32.mrf.mxu3  ;;  %v512_v57 = vadd.f32 %v511_v36, %v397_v32 }
  0xb5   : > { %v526_v58 = vadd.f32 %v525_v37, %v411_v33 }
  0xbb   : > { %v513_v41 = vpop.f32.mrf.mxu2 }
  0xbc   : > { %v527_v42 = vpop.f32.mrf.mxu3  ;;  %v514_v21 = vadd.f32 %v513_v41, %v399_v34 }
  0xbd   : > { %v528_v6 = vadd.f32 %v527_v42, %v413_v35 }
  0xca   : > { %v644_v38 = vpop.f32.mrf.mxu0 }
  0xcb   : > { %v658_v40 = vpop.f32.mrf.mxu1  ;;  %v663_v59 = vadd.f32 %v644_v38, %v512_v57 }
  0xcc   : > { %v664_v60 = vadd.f32 %v658_v40, %v526_v58 }
  0xd2   : > { %v646_v43 = vpop.f32.mrf.mxu0 }
  0xd3   : > { %v660_v44 = vpop.f32.mrf.mxu1  ;;  %v789_v45 = vpop.f32.mrf.mxu2  ;;  %v665_v9 = vadd.f32 %v646_v43, %v514_v21 }
  0xd4   : > { %v803_v46 = vpop.f32.mrf.mxu3  ;;  %v808_v61 = vadd.f32 %v789_v45, %v663_v59  ;;  %v666_v11 = vadd.f32 %v660_v44, %v528_v6 }
  0xd5   : > { %v809_v62 = vadd.f32 %v803_v46, %v664_v60 }
  0xdb   : > { %v791_v49 = vpop.f32.mrf.mxu2 }
  0xdc   : > { %v805_v50 = vpop.f32.mrf.mxu3  ;;  %v810_v13 = vadd.f32 %v791_v49, %v665_v9 }
  0xdd   : > { %v811_v16 = vadd.f32 %v805_v50, %v666_v11 }
  0xea   : > { %v933_v47 = vpop.f32.mrf.mxu0 }
  0xeb   : > { %v947_v48 = vpop.f32.mrf.mxu1  ;;  %v952_v0 = vadd.f32 %v933_v47, %v808_v61 }
  0xec   : > { %v953_v2 = vadd.f32 %v947_v48, %v809_v62 }
  0xf2   : > { %v935_v51 = vpop.f32.mrf.mxu0 }
  0xf3   : > { %v949_v25 = vpop.f32.mrf.mxu1  ;;  %v1077_v53 = vpop.f32.mrf.mxu2  ;;  %v954_v20 = vadd.f32 %v935_v51, %v810_v13 }
  0xf4   : > { %v1091_v54 = vpop.f32.mrf.mxu3  ;;  %v1096_v4 = vadd.f32 %v1077_v53, %v952_v0  ;;  %v955_v24 = vadd.f32 %v949_v25, %v811_v16 }
  0xf5   : > { %v1097_v7 = vadd.f32 %v1091_v54, %v953_v2 }
  0xfb   : > { %v1079_v39 = vpop.f32.mrf.mxu2 }
  0xfc   : > { %v1093_v52 = vpop.f32.mrf.mxu3  ;;  %v1098_v27 = vadd.f32 %v1079_v39, %v954_v20 }
  0xfd   : > { %v1099_v29 = vadd.f32 %v1093_v52, %v955_v24 }
 0x10a   : > { %v1211_v55 = vpop.f32.mrf.mxu0 }
 0x10b   : > { %v1225_v56 = vpop.f32.mrf.mxu1  ;;  %v1230_v10 = vadd.f32 %v1211_v55, %v1096_v4 }
 0x10c   : > { %v1231_v12 = vadd.f32 %v1225_v56, %v1097_v7 }
 0x112   : > { %v1213_v63 = vpop.f32.mrf.mxu0  ;;  %v1345_v3 = vpop.f32.mrf.mxu2 }
 0x113   : > { %v1227_v1 = vpop.f32.mrf.mxu1  ;;  %v1359_v5 = vpop.f32.mrf.mxu3  ;;  %v1364_v14 = vadd.f32 %v1345_v3, %v1230_v10  ;;  %v1232_v32 = vadd.f32 %v1213_v63, %v1098_v27 }
 0x114   : > { %v1365_v17 = vadd.f32 %v1359_v5, %v1231_v12  ;;  %v1233_v35 = vadd.f32 %v1227_v1, %v1099_v29 }
 0x11a   : > { %v1347_v30 = vpop.f32.mrf.mxu2 }
 0x11b   : > { %v1361_v33 = vpop.f32.mrf.mxu3  ;;  %v1366_v37 = vadd.f32 %v1347_v30, %v1232_v32 }
 0x11c   : > { %v1367_v38 = vadd.f32 %v1361_v33, %v1233_v35 }
 0x12a   : > { %v1479_v18 = vpop.f32.mrf.mxu0 }
 0x12b   : > { %v1498_v22 = vadd.f32 %v1479_v18, %v1364_v14  ;;  %v1493_v23 = vpop.f32.mrf.mxu1 }
 0x12c   : > { %v1499_v26 = vadd.f32 %v1493_v23, %v1365_v17 }
 0x12d   : > { %v1508_v28 = vadd.f32 %v1504_v15, %v1498_v22 }
 0x12e   : > { %v1509_v31 = vadd.f32 %v1505_v19, %v1499_v26 }
 0x12f   : > { %v1512_v34 = vmax.f32 %v1508_v28, 0.0 }
 0x130   : > { %v1513_v36 = vmax.f32 %v1509_v31, 0.0 }
 0x132   : > { %v1516_v40 = vpack.c.bf16 %v1513_v36, %v1512_v34  ;;  %v1481_v41 = vpop.f32.mrf.mxu0 }
 0x133   : > { %v1500_v42 = vadd.f32 %v1481_v41, %v1366_v37  ;;  %v1495_v43 = vpop.f32.mrf.mxu1 }
 0x134   : > { %1518 = vst [vmem:[%s264_s17] sm:$0xff] %v1516_v40  ;;  %v1501_v44 = vadd.f32 %v1495_v43, %v1367_v38 }
 0x135   : > { %v1510_v45 = vadd.f32 %v1504_v15, %v1500_v42 }
 0x136   : > { %v1511_v46 = vadd.f32 %v1505_v19, %v1501_v44 }
 0x137   : > { %v1514_v47 = vmax.f32 %v1510_v45, 0.0 }
 0x138   : > { %v1515_v48 = vmax.f32 %v1511_v46, 0.0 }
 0x13a   : > { %v1517_v49 = vpack.c.bf16 %v1515_v48, %v1514_v47 }
 0x13c   : > { %1519 = vst [vmem:[%s264_s17 + $0x8] sm:$0xff] %v1517_v49 }
 0x13d PF: > { %s15_s18 = sadd.s32 1, %s2500_s18  }
 0x13e   : > { %p12_p4 = scmp.ge.s32.totalorder %s15_s18, 6  }
 0x140   :  { %14 = sbr.rel (!%p12_p4) target bundleno = 1 (0x1), region = 84 }

// kernel: perceptual_loss.15
= control target key start
LH: loop header
LB: loop body
LE: loop exit
PB: predicated region body
PF: predicated region fallthrough
CT: control target
= control target key end

     0   :  { %s180_s0 = inlined_call_operand.vmem [shape: bf16[32,256], index: 0, kind: input, shape index: {}]   ;;  %s181_s1 = inlined_call_operand.vmem [shape: bf16[32,256], index: 1, kind: input, shape index: {}]   ;;  %s182_s2 = inlined_call_operand.hbm [shape: f32[1,1], index: 2, kind: output, shape index: {}]  }
   0x1   :  { %v18_v0 = vld [vmem:[%s180_s0] sm:$0xff]  ;;  %v20_v2 = vld [vmem:[%s180_s0 + $0x10] sm:$0xff]  ;;  %v19_v8 = vld [vmem:[%s180_s0 + $0x8] sm:$0xff] }
   0x2   :  { %v30_v1 = vld [vmem:[%s181_s1] sm:$0xff]  ;;  %v22_v3 = vunpack.c.l.bf16 %v18_v0  ;;  %v23_v4 = vunpack.c.h.bf16 %v18_v0  ;;  %v32_v7 = vld [vmem:[%s181_s1 + $0x10] sm:$0xff]  ;;  %v31_v9 = vld [vmem:[%s181_s1 + $0x8] sm:$0xff]  ;;  %v26_v10 = vunpack.c.l.bf16 %v20_v2  ;;  %v27_v11 = vunpack.c.h.bf16 %v20_v2 }
   0x3   :  { %v34_v5 = vunpack.c.l.bf16 %v30_v1  ;;  %v35_v6 = vunpack.c.h.bf16 %v30_v1  ;;  %v38_v12 = vunpack.c.l.bf16 %v32_v7  ;;  %v39_v13 = vunpack.c.h.bf16 %v32_v7  ;;  %v21_v14 = vld [vmem:[%s180_s0 + $0x18] sm:$0xff] }
   0x4   :  { %7 = vsyncpa [#allocation4], 0  ;;  %v24_v17 = vunpack.c.l.bf16 %v19_v8  ;;  %v25_v18 = vunpack.c.h.bf16 %v19_v8  ;;  %v36_v21 = vunpack.c.l.bf16 %v31_v9  ;;  %v37_v22 = vunpack.c.h.bf16 %v31_v9  ;;  %v33_v23 = vld [vmem:[%s181_s1 + $0x18] sm:$0xff]  ;;  %s134_s0 = smov [#allocation3]   ;;  %s96_s27 = sshll.u32 %s182_s2, 4  ;;  %s97_s27 = int_to_ptr.hbm [resolvable:$true] %s96_s27 }
   0x5   :  { %v42_v15 = vsub.f32 %v22_v3, %v34_v5  ;;  %v43_v16 = vsub.f32 %v23_v4, %v35_v6  ;;  %v46_v19 = vsub.f32 %v26_v10, %v38_v12  ;;  %v47_v20 = vsub.f32 %v27_v11, %v39_v13  ;;  %s94_s1 = sshll.u32 %s134_s0, 4  ;;  %s95_s1 = int_to_ptr.vmem [resolvable:$true] %s94_s1 }
   0x6   :  { %v28_v26 = vunpack.c.l.bf16 %v21_v14  ;;  %v29_v27 = vunpack.c.h.bf16 %v21_v14  ;;  %v44_v30 = vsub.f32 %v24_v17, %v36_v21  ;;  %v45_v31 = vsub.f32 %v25_v18, %v37_v22 }
   0x7   :  { %v50_v24 = vand.u32 2147483647, %v42_v15  ;;  %v51_v25 = vand.u32 2147483647, %v43_v16  ;;  %v54_v28 = vand.u32 2147483647, %v46_v19  ;;  %v40_v33 = vunpack.c.l.bf16 %v33_v23 }
   0x8   :  { %v55_v29 = vand.u32 2147483647, %v47_v20  ;;  %v41_v34 = vunpack.c.h.bf16 %v33_v23  ;;  %v52_v36 = vand.u32 2147483647, %v44_v30  ;;  %v53_v37 = vand.u32 2147483647, %v45_v31 }
   0x9   :  { %v58_v32 = vadd.f32 %v51_v25, %v50_v24  ;;  %v48_v38 = vsub.f32 %v28_v26, %v40_v33  ;;  %vm16_vm0 = vcmask 0   ;;  %v133_v44 = vmov 0.0  }
   0xa   :  { %v64_v35 = vadd.f32 %v55_v29, %v54_v28  ;;  %v49_v39 = vsub.f32 %v29_v27, %v41_v34  ;;  %v61_v42 = vadd.f32 %v53_v37, %v52_v36  ;;  %17 = vst.msk [vmem:[#allocation2] sm:$0x1] %vm16_vm0, %v133_v44 }
   0xb   :  { %59 = vadd.xlane.f32.xlu0 %v58_v32  ;;  %v56_v40 = vand.u32 2147483647, %v48_v38 }
   0xc   :  { %65 = vadd.xlane.f32.xlu1 %v64_v35  ;;  %v57_v41 = vand.u32 2147483647, %v49_v39 }
   0xe   :  { %v67_v43 = vadd.f32 %v57_v41, %v56_v40 }
  0x11   :  { %v79_v57 = vld [vmem:[#allocation2] sm:$0x1] }
  0x13   :  { %62 = vadd.xlane.f32.xlu0 %v61_v42 }
  0x14   :  { %68 = vadd.xlane.f32.xlu1 %v67_v43 }
  0x7e   :  { %v60_v45 = vpop.xlane.xlu0 %59 }
  0x7f   :  { %v66_v46 = vpop.xlane.xlu1 %65 }
  0x86   :  { %v63_v47 = vpop.xlane.xlu0 %62 }
  0x87   :  { %v70_v48 = vadd.f32 %v63_v47, %v60_v45  ;;  %v69_v49 = vpop.xlane.xlu1 %68 }
  0x89   :  { %v71_v50 = vadd.f32 %v70_v48, %v66_v46 }
  0x8b   :  { %v72_v51 = vadd.f32 %v71_v50, %v69_v49 }
  0x8d   :  { %v73_v52 = vrot.slane %v72_v51, 4 }
  0x8f   :  { %v74_v53 = vadd.f32 %v73_v52, %v72_v51 }
  0x91   :  { %v75_v54 = vrot.slane %v74_v53, 2 }
  0x93   :  { %v76_v55 = vadd.f32 %v75_v54, %v74_v53 }
  0x95   :  { %v77_v56 = vrot.slane %v76_v55, 1 }
  0x97   :  { %v78_v58 = vadd.f32 %v77_v56, %v76_v55 }
  0x99   :  { %v80_v59 = vadd.f32 %v79_v57, %v78_v58 }
  0x9b   :  { %82 = vst.msk [vmem:[#allocation2] sm:$0x1] %vm16_vm0, %v80_v59 }
  0xa2   :  { %v86_v60 = vld [vmem:[#allocation2] sm:$0x1] }
  0xa3   :  { %v87_v61 = vmul.f32 0.00012207031, %v86_v60 }
  0xa5   :  { %88 = vst.msk [vmem:[#allocation3] sm:$0x1] %vm16_vm0, %v87_v61 }
  0xa6   :  { %99 = dma.vmem_to_hbm [thread:$0]  %s95_s1, 16, %s97_s27, [#allocation4]  }
  0xa7   :  { %131 = dma.done.wait [#allocation4], 16  }
  0xa8   :  { %132 = vsyncadd [#allocation4], 4294967280 }
  0xa9   :  { %104 = vsyncpa [#allocation4], 1 }

// kernel: perceptual_loss.13
= control target key start
LH: loop header
LB: loop body
LE: loop exit
PB: predicated region body
PF: predicated region fallthrough
CT: control target
= control target key end

     0   :  { %s4549_s18 = smov 0   ;;  %s6436_s0 = inlined_call_operand.vmem [shape: bf16[4,24,256], index: 0, kind: input, shape index: {}]   ;;  %s6437_s1 = inlined_call_operand.vmem [shape: bf16[4,24,256], index: 1, kind: input, shape index: {}]   ;;  %s6438_s2 = inlined_call_operand.vmem [shape: bf16[4,24,256], index: 2, kind: input, shape index: {}]   ;;  %s6439_s3 = inlined_call_operand.vmem [shape: bf16[9,256,256], index: 3, kind: input, shape index: {}]   ;;  %s6440_s4 = inlined_call_operand.vmem [shape: f32[1,256], index: 4, kind: input, shape index: {}]   ;;  %s6441_s5 = inlined_call_operand.vmem [shape: bf16[4,16,256], index: 5, kind: output, shape index: {}]  }
   0x1 LB: > { %s2763_s19 = sadd.s32 4294967295, %s4517_s18   ;;  %p2767_p0 = scmp.ge.s32.totalorder %s4517_s18, 1  ;;  %s4517_s18 = sphi %s4549_s18, %s15_s18  }
   0x2   : > { %p207_p1 = scmp.lt.s32.totalorder %s4517_s18, 5 }
   0x4   : > { %p208_p2 = pnand %p2767_p0, %p207_p1 }
   0x5   : > { %p245_p3 = scmp.lt.s32.totalorder (!%p208_p2), %s2763_s19, 3 }
   0x6   : > { %211 = sbr.rel (%p208_p2) target bundleno = 454 (0x1c6), region = 40 }
   0xb   : > { %v2871_v0 = vld [vmem:[%s6439_s3 + $0x170] sm:$0xf]  ;;  %v4259_v1 = vld [vmem:[%s6439_s3 + $0x174] sm:$0xf0]  ;;  %v4258_v5 = vld [vmem:[%s6439_s3 + $0x174] sm:$0xf] }
   0xc   : > { %v2935_v2 = vld [vmem:[%s6439_s3 + $0x1f0] sm:$0xf]  ;;  %v2872_v3 = vor.u32 %v4259_v1, %v2871_v0  ;;  %v4275_v4 = vld [vmem:[%s6439_s3 + $0x1f4] sm:$0xf0]  ;;  %v2873_v6 = vld [vmem:[%s6439_s3 + $0x178] sm:$0xf0] }
   0xd   : > { %v2936_v7 = vor.u32 %v4275_v4, %v2935_v2  ;;  %v2876_v8 = vor.u32 %v4258_v5, %v2873_v6  ;;  %v4274_v9 = vld [vmem:[%s6439_s3 + $0x1f4] sm:$0xf]  ;;  %v2937_v10 = vld [vmem:[%s6439_s3 + $0x1f8] sm:$0xf0]  ;;  %v2863_v11 = vld [vmem:[%s6439_s3 + $0x160] sm:$0xf] }
   0xe   : > { %504 = vmatpush.bf16.msra.mxu0 %v2872_v3  ;;  %v2940_v12 = vor.u32 %v4274_v9, %v2937_v10  ;;  %v4257_v13 = vld [vmem:[%s6439_s3 + $0x164] sm:$0xf0]  ;;  %v2927_v14 = vld [vmem:[%s6439_s3 + $0x1e0] sm:$0xf]  ;;  %v4256_v18 = vld [vmem:[%s6439_s3 + $0x164] sm:$0xf] }
   0xf   : > { %v4273_v15 = vld [vmem:[%s6439_s3 + $0x1e4] sm:$0xf0]  ;;  %518 = vmatpush.bf16.msra.mxu1 %v2936_v7  ;;  %532 = vmatpush.bf16.msra.mxu2 %v2876_v8  ;;  %v2864_v16 = vor.u32 %v4257_v13, %v2863_v11  ;;  %v2865_v19 = vld [vmem:[%s6439_s3 + $0x168] sm:$0xf0]  ;;  %v4272_v20 = vld [vmem:[%s6439_s3 + $0x1e4] sm:$0xf] }
  0x10   : > { %v2928_v17 = vor.u32 %v4273_v15, %v2927_v14  ;;  %546 = vmatpush.bf16.msra.mxu3 %v2940_v12  ;;  %v2868_v21 = vor.u32 %v4256_v18, %v2865_v19  ;;  %v2929_v22 = vld [vmem:[%s6439_s3 + $0x1e8] sm:$0xf0]  ;;  %v2855_v23 = vld [vmem:[%s6439_s3 + $0x150] sm:$0xf]  ;;  %v4255_v24 = vld [vmem:[%s6439_s3 + $0x154] sm:$0xf0] }
  0x11   : > { %v2932_v25 = vor.u32 %v4272_v20, %v2929_v22  ;;  %v2919_v26 = vld [vmem:[%s6439_s3 + $0x1d0] sm:$0xf]  ;;  %v4271_v27 = vld [vmem:[%s6439_s3 + $0x1d4] sm:$0xf0]  ;;  %v4254_v28 = vld [vmem:[%s6439_s3 + $0x154] sm:$0xf]  ;;  %v2856_v29 = vor.u32 %v4255_v24, %v2855_v23 }
  0x12   : > { %505 = vmatpush.bf16.msra.mxu0 %v2864_v16  ;;  %v2857_v30 = vld [vmem:[%s6439_s3 + $0x158] sm:$0xf0]  ;;  %v4270_v31 = vld [vmem:[%s6439_s3 + $0x1d4] sm:$0xf]  ;;  %v2920_v33 = vor.u32 %v4271_v27, %v2919_v26  ;;  %v2847_v35 = vld [vmem:[%s6439_s3 + $0x140] sm:$0xf] }
  0x13   : > { %v2921_v32 = vld [vmem:[%s6439_s3 + $0x1d8] sm:$0xf0]  ;;  %519 = vmatpush.bf16.msra.mxu1 %v2928_v17  ;;  %533 = vmatpush.bf16.msra.mxu2 %v2868_v21  ;;  %v2860_v34 = vor.u32 %v4254_v28, %v2857_v30  ;;  %v4253_v36 = vld [vmem:[%s6439_s3 + $0x144] sm:$0xf0]  ;;  %v2911_v37 = vld [vmem:[%s6439_s3 + $0x1c0] sm:$0xf] }
  0x14   : > { %547 = vmatpush.bf16.msra.mxu3 %v2932_v25  ;;  %v2924_v38 = vor.u32 %v4270_v31, %v2921_v32  ;;  %v4269_v39 = vld [vmem:[%s6439_s3 + $0x1c4] sm:$0xf0]  ;;  %v4252_v40 = vld [vmem:[%s6439_s3 + $0x144] sm:$0xf]  ;;  %v2849_v41 = vld [vmem:[%s6439_s3 + $0x148] sm:$0xf0]  ;;  %v2848_v44 = vor.u32 %v4253_v36, %v2847_v35 }
  0x15   : > { %v4268_v42 = vld [vmem:[%s6439_s3 + $0x1c4] sm:$0xf]  ;;  %v2913_v43 = vld [vmem:[%s6439_s3 + $0x1c8] sm:$0xf0]  ;;  %v2912_v45 = vor.u32 %v4269_v39, %v2911_v37  ;;  %v2852_v46 = vor.u32 %v4252_v40, %v2849_v41  ;;  %v2839_v47 = vld [vmem:[%s6439_s3 + $0x130] sm:$0xf] }
  0x16   : > { %506 = vmatpush.bf16.msra.mxu0 %v2856_v29  ;;  %v4251_v48 = vld [vmem:[%s6439_s3 + $0x134] sm:$0xf0]  ;;  %v2903_v49 = vld [vmem:[%s6439_s3 + $0x1b0] sm:$0xf]  ;;  %v2916_v50 = vor.u32 %v4268_v42, %v2913_v43  ;;  %v4250_v52 = vld [vmem:[%s6439_s3 + $0x134] sm:$0xf] }
  0x17   : > { %520 = vmatpush.bf16.msra.mxu1 %v2920_v33  ;;  %534 = vmatpush.bf16.msra.mxu2 %v2860_v34  ;;  %v4267_v51 = vld [vmem:[%s6439_s3 + $0x1b4] sm:$0xf0]  ;;  %v2841_v53 = vld [vmem:[%s6439_s3 + $0x138] sm:$0xf0]  ;;  %v4266_v54 = vld [vmem:[%s6439_s3 + $0x1b4] sm:$0xf]  ;;  %v2840_v56 = vor.u32 %v4251_v48, %v2839_v47 }
  0x18   : > { %548 = vmatpush.bf16.msra.mxu3 %v2924_v38  ;;  %v2905_v55 = vld [vmem:[%s6439_s3 + $0x1b8] sm:$0xf0]  ;;  %v2904_v57 = vor.u32 %v4267_v51, %v2903_v49  ;;  %v2844_v58 = vor.u32 %v4250_v52, %v2841_v53  ;;  %v2831_v59 = vld [vmem:[%s6439_s3 + $0x120] sm:$0xf]  ;;  %v4249_v60 = vld [vmem:[%s6439_s3 + $0x124] sm:$0xf0] }
  0x19   : > { %v2895_v61 = vld [vmem:[%s6439_s3 + $0x1a0] sm:$0xf]  ;;  %v2908_v62 = vor.u32 %v4266_v54, %v2905_v55  ;;  %v4265_v63 = vld [vmem:[%s6439_s3 + $0x1a4] sm:$0xf0]  ;;  %v4248_v0 = vld [vmem:[%s6439_s3 + $0x124] sm:$0xf]  ;;  %v2832_v4 = vor.u32 %v4249_v60, %v2831_v59 }
  0x1a   : > { %507 = vmatpush.bf16.msra.mxu0 %v2848_v44  ;;  %v2833_v1 = vld [vmem:[%s6439_s3 + $0x128] sm:$0xf0]  ;;  %v4264_v2 = vld [vmem:[%s6439_s3 + $0x1a4] sm:$0xf]  ;;  %v2896_v5 = vor.u32 %v4265_v63, %v2895_v61  ;;  %v2823_v7 = vld [vmem:[%s6439_s3 + $0x110] sm:$0xf] }
  0x1b   : > { %521 = vmatpush.bf16.msra.mxu1 %v2912_v45  ;;  %535 = vmatpush.bf16.msra.mxu2 %v2852_v46  ;;  %v2897_v3 = vld [vmem:[%s6439_s3 + $0x1a8] sm:$0xf0]  ;;  %v2836_v6 = vor.u32 %v4248_v0, %v2833_v1  ;;  %v4247_v8 = vld [vmem:[%s6439_s3 + $0x114] sm:$0xf0]  ;;  %v2887_v9 = vld [vmem:[%s6439_s3 + $0x190] sm:$0xf] }
  0x1c   : > { %549 = vmatpush.bf16.msra.mxu3 %v2916_v50  ;;  %v2900_v10 = vor.u32 %v4264_v2, %v2897_v3  ;;  %v4263_v11 = vld [vmem:[%s6439_s3 + $0x194] sm:$0xf0]  ;;  %v4246_v12 = vld [vmem:[%s6439_s3 + $0x114] sm:$0xf]  ;;  %v2825_v13 = vld [vmem:[%s6439_s3 + $0x118] sm:$0xf0]  ;;  %v2824_v16 = vor.u32 %v4247_v8, %v2823_v7 }
  0x1d   : > { %v4262_v14 = vld [vmem:[%s6439_s3 + $0x194] sm:$0xf]  ;;  %v2889_v15 = vld [vmem:[%s6439_s3 + $0x198] sm:$0xf0]  ;;  %v2815_v17 = vld [vmem:[%s6439_s3 + $0x100] sm:$0xf]  ;;  %v2888_v19 = vor.u32 %v4263_v11, %v2887_v9  ;;  %v2828_v20 = vor.u32 %v4246_v12, %v2825_v13 }
  0x1e   : > { %508 = vmatpush.bf16.msra.mxu0 %v2840_v56  ;;  %v4245_v18 = vld [vmem:[%s6439_s3 + $0x104] sm:$0xf0]  ;;  %v2879_v21 = vld [vmem:[%s6439_s3 + $0x180] sm:$0xf]  ;;  %v4244_v23 = vld [vmem:[%s6439_s3 + $0x104] sm:$0xf]  ;;  %v2892_v24 = vor.u32 %v4262_v14, %v2889_v15 }
  0x1f   : > { %522 = vmatpush.bf16.msra.mxu1 %v2904_v57  ;;  %536 = vmatpush.bf16.msra.mxu2 %v2844_v58  ;;  %v4261_v22 = vld [vmem:[%s6439_s3 + $0x184] sm:$0xf0]  ;;  %v2817_v25 = vld [vmem:[%s6439_s3 + $0x108] sm:$0xf0]  ;;  %v4260_v26 = vld [vmem:[%s6439_s3 + $0x184] sm:$0xf]  ;;  %v2816_v31 = vor.u32 %v4245_v18, %v2815_v17 }
  0x20   : > { %550 = vmatpush.bf16.msra.mxu3 %v2908_v62  ;;  %v2881_v27 = vld [vmem:[%s6439_s3 + $0x188] sm:$0xf0]  ;;  %v3007_v28 = vld [vmem:[%s6439_s3 + $0x70] sm:$0xf]  ;;  %v4225_v29 = vld [vmem:[%s6439_s3 + $0x74] sm:$0xf0]  ;;  %v2880_v35 = vor.u32 %v4261_v22, %v2879_v21  ;;  %v2820_v36 = vor.u32 %v4244_v23, %v2817_v25 }
  0x21   : > { %v3071_v30 = vld [vmem:[%s6439_s3 + $0xf0] sm:$0xf]  ;;  %v4241_v32 = vld [vmem:[%s6439_s3 + $0xf4] sm:$0xf0]  ;;  %v4224_v33 = vld [vmem:[%s6439_s3 + $0x74] sm:$0xf]  ;;  %v2884_v39 = vor.u32 %v4260_v26, %v2881_v27  ;;  %v3008_v40 = vor.u32 %v4225_v29, %v3007_v28 }
  0x22   : > { %509 = vmatpush.bf16.msra.mxu0 %v2832_v4  ;;  %v3009_v34 = vld [vmem:[%s6439_s3 + $0x78] sm:$0xf0]  ;;  %v4240_v37 = vld [vmem:[%s6439_s3 + $0xf4] sm:$0xf]  ;;  %v3072_v41 = vor.u32 %v4241_v32, %v3071_v30  ;;  %v2999_v43 = vld [vmem:[%s6439_s3 + $0x60] sm:$0xf] }
  0x23   : > { %523 = vmatpush.bf16.msra.mxu1 %v2896_v5  ;;  %537 = vmatpush.bf16.msra.mxu2 %v2836_v6  ;;  %v3073_v38 = vld [vmem:[%s6439_s3 + $0xf8] sm:$0xf0]  ;;  %v3012_v42 = vor.u32 %v4224_v33, %v3009_v34  ;;  %v4223_v44 = vld [vmem:[%s6439_s3 + $0x64] sm:$0xf0]  ;;  %v3063_v45 = vld [vmem:[%s6439_s3 + $0xe0] sm:$0xf] }
  0x24   : > { %551 = vmatpush.bf16.msra.mxu3 %v2900_v10  ;;  %v3076_v46 = vor.u32 %v4240_v37, %v3073_v38  ;;  %v4239_v47 = vld [vmem:[%s6439_s3 + $0xe4] sm:$0xf0]  ;;  %v4222_v48 = vld [vmem:[%s6439_s3 + $0x64] sm:$0xf]  ;;  %v3001_v49 = vld [vmem:[%s6439_s3 + $0x68] sm:$0xf0]  ;;  %v3000_v52 = vor.u32 %v4223_v44, %v2999_v43 }
  0x25   : > { %v4238_v50 = vld [vmem:[%s6439_s3 + $0xe4] sm:$0xf]  ;;  %v3065_v51 = vld [vmem:[%s6439_s3 + $0xe8] sm:$0xf0]  ;;  %v2991_v53 = vld [vmem:[%s6439_s3 + $0x50] sm:$0xf]  ;;  %v3064_v54 = vor.u32 %v4239_v47, %v3063_v45  ;;  %v3004_v55 = vor.u32 %v4222_v48, %v3001_v49 }
  0x26   : > { %510 = vmatpush.bf16.msra.mxu0 %v2824_v16  ;;  %v4221_v56 = vld [vmem:[%s6439_s3 + $0x54] sm:$0xf0]  ;;  %v3055_v57 = vld [vmem:[%s6439_s3 + $0xd0] sm:$0xf]  ;;  %s6443_s19 = smov (!%p245_p3, %s2763_s19), 3  ;;  %v3068_v58 = vor.u32 %v4238_v50, %v3065_v51  ;;  %vm1100_vm0 = vcmask 1045504  }
  0x27   : > { %524 = vmatpush.bf16.msra.mxu1 %v2888_v19  ;;  %538 = vmatpush.bf16.msra.mxu2 %v2828_v20  ;;  %v4237_v59 = vld [vmem:[%s6439_s3 + $0xd4] sm:$0xf0]  ;;  %v4220_v60 = vld [vmem:[%s6439_s3 + $0x54] sm:$0xf]  ;;  %v2993_v61 = vld [vmem:[%s6439_s3 + $0x58] sm:$0xf0]  ;;  %v2992_v0 = vor.u32 %v4221_v56, %v2991_v53 }
  0x28   : > { %552 = vmatpush.bf16.msra.mxu3 %v2892_v24  ;;  %v4236_v62 = vld [vmem:[%s6439_s3 + $0xd4] sm:$0xf]  ;;  %v3057_v63 = vld [vmem:[%s6439_s3 + $0xd8] sm:$0xf0]  ;;  %s4828_s10 = smul.u32 24, %s6443_s19  ;;  %v3056_v4 = vor.u32 %v4237_v59, %v3055_v57  ;;  %v2996_v5 = vor.u32 %v4220_v60, %v2993_v61  ;;  %s4207_s12 = sshll.u32 %s6443_s19, 4 }
  0x29   : > { %v2983_v1 = vld [vmem:[%s6439_s3 + $0x40] sm:$0xf]  ;;  %v4219_v2 = vld [vmem:[%s6439_s3 + $0x44] sm:$0xf0]  ;;  %v4218_v7 = vld [vmem:[%s6439_s3 + $0x44] sm:$0xf]  ;;  %v3060_v9 = vor.u32 %v4236_v62, %v3057_v63  ;;  %s264_s15 = scalar_lea.vmem %s6441_s5, %s4207_s12 }
  0x2a   : > { %511 = vmatpush.bf16.msra.mxu0 %v2816_v31  ;;  %v3047_v3 = vld [vmem:[%s6439_s3 + $0xc0] sm:$0xf]  ;;  %v4235_v6 = vld [vmem:[%s6439_s3 + $0xc4] sm:$0xf0]  ;;  %v2985_v8 = vld [vmem:[%s6439_s3 + $0x48] sm:$0xf0]  ;;  %s4852_s27 = scalar_lea.vmem %s6437_s1, %s4828_s10  ;;  %v2984_v17 = vor.u32 %v4219_v2, %v2983_v1  ;;  %s4967_s13 = scalar_lea.vmem %s6436_s0, %s4828_s10 }
  0x2b   : > { %525 = vmatpush.bf16.msra.mxu1 %v2880_v35  ;;  %539 = vmatpush.bf16.msra.mxu2 %v2820_v36  ;;  %v2807_v10 = vld [vmem:[%s4852_s27] sm:$0xf]  ;;  %v4243_v11 = vld [vmem:[%s4852_s27 + $0x4] sm:$0xf0]  ;;  %v4242_v12 = vld [vmem:[%s4852_s27 + $0x4] sm:$0xf]  ;;  %v3048_v19 = vor.u32 %v4235_v6, %v3047_v3  ;;  %v2988_v20 = vor.u32 %v4218_v7, %v2985_v8  ;;  %s5169_s26 = scalar_lea.vmem %s6438_s2, %s4828_s10 }
  0x2c   : > { %553 = vmatpush.bf16.msra.mxu3 %v2884_v39  ;;  %v4234_v13 = vld [vmem:[%s6439_s3 + $0xc4] sm:$0xf]  ;;  %v3049_v14 = vld [vmem:[%s6439_s3 + $0xc8] sm:$0xf0]  ;;  %v2808_v15 = vor.u32 %v4243_v11, %v2807_v10  ;;  %v2975_v21 = vld [vmem:[%s6439_s3 + $0x30] sm:$0xf] }
  0x2d   : > { %v2809_v16 = vld [vmem:[%s4852_s27 + $0x8] sm:$0xf0]  ;;  %v4217_v22 = vld [vmem:[%s6439_s3 + $0x34] sm:$0xf0]  ;;  %v3039_v23 = vld [vmem:[%s6439_s3 + $0xb0] sm:$0xf]  ;;  %v3052_v24 = vor.u32 %v4234_v13, %v3049_v14 }
  0x2e   : > { %730 = vmatpush.bf16.msrb.mxu0 %v3008_v40  ;;  %v2812_v18 = vor.u32 %v4242_v12, %v2809_v16  ;;  %v4233_v25 = vld [vmem:[%s6439_s3 + $0xb4] sm:$0xf0]  ;;  %v4216_v26 = vld [vmem:[%s6439_s3 + $0x34] sm:$0xf]  ;;  %v2977_v27 = vld [vmem:[%s6439_s3 + $0x38] sm:$0xf0]  ;;  %540 = vmatmul.bf16.vlgmr.msra.gmra.mxu2 %v2808_v15  ;;  %v2976_v30 = vor.u32 %v4217_v22, %v2975_v21 }
  0x2f   : > { %744 = vmatpush.bf16.msrb.mxu1 %v3072_v41  ;;  %758 = vmatpush.bf16.msrb.mxu2 %v3012_v42  ;;  %v4232_v28 = vld [vmem:[%s6439_s3 + $0xb4] sm:$0xf]  ;;  %v3041_v29 = vld [vmem:[%s6439_s3 + $0xb8] sm:$0xf0]  ;;  %v3040_v31 = vor.u32 %v4233_v25, %v3039_v23  ;;  %v2980_v32 = vor.u32 %v4216_v26, %v2977_v27  ;;  %v2967_v33 = vld [vmem:[%s6439_s3 + $0x20] sm:$0xf] }
  0x30   : > { %772 = vmatpush.bf16.msrb.mxu3 %v3076_v46  ;;  %512 = vmatmul.bf16.vlgmr.msra.gmra.mxu0 %v2808_v15  ;;  %v4215_v34 = vld [vmem:[%s6439_s3 + $0x24] sm:$0xf0]  ;;  %v3031_v35 = vld [vmem:[%s6439_s3 + $0xa0] sm:$0xf]  ;;  %v3044_v36 = vor.u32 %v4232_v28, %v3041_v29  ;;  %v4214_v38 = vld [vmem:[%s6439_s3 + $0x24] sm:$0xf] }
  0x31   : > { %526 = vmatmul.bf16.vlgmr.msra.gmra.mxu1 %v2812_v18  ;;  %554 = vmatmul.bf16.vlgmr.msra.gmra.mxu3 %v2812_v18  ;;  %v4231_v37 = vld [vmem:[%s6439_s3 + $0xa4] sm:$0xf0]  ;;  %v2969_v39 = vld [vmem:[%s6439_s3 + $0x28] sm:$0xf0]  ;;  %v4230_v40 = vld [vmem:[%s6439_s3 + $0xa4] sm:$0xf]  ;;  %v2968_v42 = vor.u32 %v4215_v34, %v2967_v33 }
  0x32   : > { %731 = vmatpush.bf16.msrb.mxu0 %v3000_v52  ;;  %v3033_v41 = vld [vmem:[%s6439_s3 + $0xa8] sm:$0xf0]  ;;  %v3032_v43 = vor.u32 %v4231_v37, %v3031_v35  ;;  %v2972_v44 = vor.u32 %v4214_v38, %v2969_v39  ;;  %v2959_v45 = vld [vmem:[%s6439_s3 + $0x10] sm:$0xf]  ;;  %v4213_v46 = vld [vmem:[%s6439_s3 + $0x14] sm:$0xf0] }
  0x33   : > { %745 = vmatpush.bf16.msrb.mxu1 %v3064_v54  ;;  %759 = vmatpush.bf16.msrb.mxu2 %v3004_v55  ;;  %v3023_v47 = vld [vmem:[%s6439_s3 + $0x90] sm:$0xf]  ;;  %v3036_v48 = vor.u32 %v4230_v40, %v3033_v41  ;;  %v4229_v49 = vld [vmem:[%s6439_s3 + $0x94] sm:$0xf0]  ;;  %v4212_v50 = vld [vmem:[%s6439_s3 + $0x14] sm:$0xf]  ;;  %v2960_v54 = vor.u32 %v4213_v46, %v2959_v45 }
  0x34   : > { %773 = vmatpush.bf16.msrb.mxu3 %v3068_v58  ;;  %v2961_v51 = vld [vmem:[%s6439_s3 + $0x18] sm:$0xf0]  ;;  %v4228_v52 = vld [vmem:[%s6439_s3 + $0x94] sm:$0xf]  ;;  %v2951_v55 = vld [vmem:[%s6439_s3] sm:$0xf]  ;;  %v3024_v58 = vor.u32 %v4229_v49, %v3023_v47 }
  0x35   : > { %v3025_v53 = vld [vmem:[%s6439_s3 + $0x98] sm:$0xf0]  ;;  %v4211_v56 = vld [vmem:[%s6439_s3 + $0x4] sm:$0xf0]  ;;  %v3015_v57 = vld [vmem:[%s6439_s3 + $0x80] sm:$0xf]  ;;  %v2964_v59 = vor.u32 %v4212_v50, %v2961_v51 }
  0x36   : > { %732 = vmatpush.bf16.msrb.mxu0 %v2992_v0  ;;  %v4227_v60 = vld [vmem:[%s6439_s3 + $0x84] sm:$0xf0]  ;;  %v4210_v61 = vld [vmem:[%s6439_s3 + $0x4] sm:$0xf]  ;;  %v2953_v62 = vld [vmem:[%s6439_s3 + $0x8] sm:$0xf0]  ;;  %v3028_v63 = vor.u32 %v4228_v52, %v3025_v53  ;;  %v2952_v6 = vor.u32 %v4211_v56, %v2951_v55 }
  0x37   : > { %746 = vmatpush.bf16.msrb.mxu1 %v3056_v4  ;;  %760 = vmatpush.bf16.msrb.mxu2 %v2996_v5  ;;  %v4226_v0 = vld [vmem:[%s6439_s3 + $0x84] sm:$0xf]  ;;  %v3017_v1 = vld [vmem:[%s6439_s3 + $0x88] sm:$0xf0]  ;;  %v3175_v2 = vld [vmem:[%s6439_s3 + $0x270] sm:$0xf]  ;;  %v3016_v10 = vor.u32 %v4227_v60, %v3015_v57  ;;  %v2956_v11 = vor.u32 %v4210_v61, %v2953_v62 }
  0x38   : > { %774 = vmatpush.bf16.msrb.mxu3 %v3060_v9  ;;  %v4293_v3 = vld [vmem:[%s6439_s3 + $0x274] sm:$0xf0]  ;;  %v3239_v4 = vld [vmem:[%s6439_s3 + $0x2f0] sm:$0xf]  ;;  %v4292_v7 = vld [vmem:[%s6439_s3 + $0x274] sm:$0xf]  ;;  %v3020_v15 = vor.u32 %v4226_v0, %v3017_v1 }
  0x39   : > { %v4309_v5 = vld [vmem:[%s6439_s3 + $0x2f4] sm:$0xf0]  ;;  %v3177_v8 = vld [vmem:[%s6439_s3 + $0x278] sm:$0xf0]  ;;  %v4308_v9 = vld [vmem:[%s6439_s3 + $0x2f4] sm:$0xf]  ;;  %v3176_v16 = vor.u32 %v4293_v3, %v3175_v2 }
  0x3a   : > { %733 = vmatpush.bf16.msrb.mxu0 %v2984_v17  ;;  %v3241_v12 = vld [vmem:[%s6439_s3 + $0x2f8] sm:$0xf0]  ;;  %v2943_v13 = vld [vmem:[%s4967_s13] sm:$0xf]  ;;  %v4209_v14 = vld [vmem:[%s4967_s13 + $0x4] sm:$0xf0] }
  0x3b   : > { %747 = vmatpush.bf16.msrb.mxu1 %v3048_v19  ;;  %761 = vmatpush.bf16.msrb.mxu2 %v2988_v20  ;;  %v4208_v17 = vld [vmem:[%s4967_s13 + $0x4] sm:$0xf]  ;;  %v2945_v18 = vld [vmem:[%s4967_s13 + $0x8] sm:$0xf0]  ;;  %v3240_v19 = vor.u32 %v4309_v5, %v3239_v4  ;;  %v3180_v20 = vor.u32 %v4292_v7, %v3177_v8  ;;  %v3167_v21 = vld [vmem:[%s6439_s3 + $0x260] sm:$0xf]  ;;  %v2944_v25 = vor.u32 %v4209_v14, %v2943_v13 }
  0x3c   : > { %775 = vmatpush.bf16.msrb.mxu3 %v3052_v24  ;;  %v4291_v22 = vld [vmem:[%s6439_s3 + $0x264] sm:$0xf0]  ;;  %v3231_v23 = vld [vmem:[%s6439_s3 + $0x2e0] sm:$0xf]  ;;  %v3244_v24 = vor.u32 %v4308_v9, %v3241_v12  ;;  %v4290_v27 = vld [vmem:[%s6439_s3 + $0x264] sm:$0xf]  ;;  %v2948_v29 = vor.u32 %v4208_v17, %v2945_v18 }
  0x3d   : > { %v4307_v26 = vld [vmem:[%s6439_s3 + $0x2e4] sm:$0xf0]  ;;  %v3169_v28 = vld [vmem:[%s6439_s3 + $0x268] sm:$0xf0]  ;;  %v3159_v35 = vld [vmem:[%s6439_s3 + $0x250] sm:$0xf] }
  0x3e   : > { %734 = vmatpush.bf16.msrb.mxu0 %v2976_v30  ;;  %v4306_v30 = vld [vmem:[%s6439_s3 + $0x2e4] sm:$0xf]  ;;  %v3232_v33 = vor.u32 %v4307_v26, %v3231_v23  ;;  %v3172_v34 = vor.u32 %v4290_v27, %v3169_v28  ;;  %v3223_v37 = vld [vmem:[%s6439_s3 + $0x2d0] sm:$0xf]  ;;  %v4305_v39 = vld [vmem:[%s6439_s3 + $0x2d4] sm:$0xf0] }
  0x3f   : > { %748 = vmatpush.bf16.msrb.mxu1 %v3040_v31  ;;  %762 = vmatpush.bf16.msrb.mxu2 %v2980_v32  ;;  %v3233_v31 = vld [vmem:[%s6439_s3 + $0x2e8] sm:$0xf0]  ;;  %v3168_v32 = vor.u32 %v4291_v22, %v3167_v21  ;;  %v4288_v40 = vld [vmem:[%s6439_s3 + $0x254] sm:$0xf]  ;;  %v3161_v41 = vld [vmem:[%s6439_s3 + $0x258] sm:$0xf0]  ;;  %v3224_v45 = vor.u32 %v4305_v39, %v3223_v37 }
  0x40   : > { %776 = vmatpush.bf16.msrb.mxu3 %v3044_v36  ;;  %v4289_v36 = vld [vmem:[%s6439_s3 + $0x254] sm:$0xf0]  ;;  %v3236_v38 = vor.u32 %v4306_v30, %v3233_v31  ;;  %v3164_v46 = vor.u32 %v4288_v40, %v3161_v41  ;;  %v3151_v47 = vld [vmem:[%s6439_s3 + $0x240] sm:$0xf]  ;;  %v4303_v51 = vld [vmem:[%s6439_s3 + $0x2c4] sm:$0xf0] }
  0x41   : > { %v3215_v49 = vld [vmem:[%s6439_s3 + $0x2c0] sm:$0xf]  ;;  %v4286_v52 = vld [vmem:[%s6439_s3 + $0x244] sm:$0xf]  ;;  %v3153_v53 = vld [vmem:[%s6439_s3 + $0x248] sm:$0xf0] }
  0x42   : > { %735 = vmatpush.bf16.msrb.mxu0 %v2968_v42  ;;  %v4304_v42 = vld [vmem:[%s6439_s3 + $0x2d4] sm:$0xf]  ;;  %v3217_v55 = vld [vmem:[%s6439_s3 + $0x2c8] sm:$0xf0]  ;;  %v3216_v57 = vor.u32 %v4303_v51, %v3215_v49  ;;  %v4285_v60 = vld [vmem:[%s6439_s3 + $0x234] sm:$0xf0] }
  0x43   : > { %749 = vmatpush.bf16.msrb.mxu1 %v3032_v43  ;;  %763 = vmatpush.bf16.msrb.mxu2 %v2972_v44  ;;  %v3225_v43 = vld [vmem:[%s6439_s3 + $0x2d8] sm:$0xf0]  ;;  %v3160_v44 = vor.u32 %v4289_v36, %v3159_v35  ;;  %v3207_v61 = vld [vmem:[%s6439_s3 + $0x2b0] sm:$0xf]  ;;  %v4284_v0 = vld [vmem:[%s6439_s3 + $0x234] sm:$0xf] }
  0x44   : > { %777 = vmatpush.bf16.msrb.mxu3 %v3036_v48  ;;  %v4287_v48 = vld [vmem:[%s6439_s3 + $0x244] sm:$0xf0]  ;;  %v3228_v50 = vor.u32 %v4304_v42, %v3225_v43  ;;  %v3145_v1 = vld [vmem:[%s6439_s3 + $0x238] sm:$0xf0]  ;;  %v4300_v2 = vld [vmem:[%s6439_s3 + $0x2b4] sm:$0xf] }
  0x45   : > { %v3152_v56 = vor.u32 %v4287_v48, %v3151_v47  ;;  %v3209_v3 = vld [vmem:[%s6439_s3 + $0x2b8] sm:$0xf0]  ;;  %v3135_v7 = vld [vmem:[%s6439_s3 + $0x220] sm:$0xf]  ;;  %v4283_v8 = vld [vmem:[%s6439_s3 + $0x224] sm:$0xf0] }
  0x46   : > { %736 = vmatpush.bf16.msrb.mxu0 %v2960_v54  ;;  %v4302_v54 = vld [vmem:[%s6439_s3 + $0x2c4] sm:$0xf]  ;;  %v3199_v9 = vld [vmem:[%s6439_s3 + $0x2a0] sm:$0xf]  ;;  %v3137_v13 = vld [vmem:[%s6439_s3 + $0x228] sm:$0xf0] }
  0x47   : > { %750 = vmatpush.bf16.msrb.mxu1 %v3024_v58  ;;  %764 = vmatpush.bf16.msrb.mxu2 %v2964_v59  ;;  %v3156_v58 = vor.u32 %v4286_v52, %v3153_v53  ;;  %v3143_v59 = vld [vmem:[%s6439_s3 + $0x230] sm:$0xf]  ;;  %v3220_v62 = vor.u32 %v4302_v54, %v3217_v55  ;;  %v4282_v12 = vld [vmem:[%s6439_s3 + $0x224] sm:$0xf]  ;;  %v4297_v23 = vld [vmem:[%s6439_s3 + $0x294] sm:$0xf0] }
  0x48   : > { %778 = vmatpush.bf16.msrb.mxu3 %v3028_v63  ;;  %v4301_v63 = vld [vmem:[%s6439_s3 + $0x2b4] sm:$0xf0]  ;;  %v3144_v4 = vor.u32 %v4285_v60, %v3143_v59  ;;  %v4298_v14 = vld [vmem:[%s6439_s3 + $0x2a4] sm:$0xf]  ;;  %v3140_v18 = vor.u32 %v4282_v12, %v3137_v13  ;;  %v3191_v21 = vld [vmem:[%s6439_s3 + $0x290] sm:$0xf] }
  0x49   : > { %v3208_v5 = vor.u32 %v4301_v63, %v3207_v61  ;;  %v4296_v26 = vld [vmem:[%s6439_s3 + $0x294] sm:$0xf]  ;;  %v3193_v27 = vld [vmem:[%s6439_s3 + $0x298] sm:$0xf0]  ;;  %v4279_v30 = vld [vmem:[%s6439_s3 + $0x204] sm:$0xf0] }
  0x4a   : > { %737 = vmatpush.bf16.msrb.mxu0 %v2952_v6  ;;  %v3148_v6 = vor.u32 %v4284_v0, %v3145_v1  ;;  %v3183_v31 = vld [vmem:[%s6439_s3 + $0x280] sm:$0xf]  ;;  %v4278_v35 = vld [vmem:[%s6439_s3 + $0x204] sm:$0xf]  ;;  %v3121_v36 = vld [vmem:[%s6439_s3 + $0x208] sm:$0xf0]  ;;  %v3196_v37 = vor.u32 %v4296_v26, %v3193_v27 }
  0x4b   : > { %751 = vmatpush.bf16.msrb.mxu1 %v3016_v10  ;;  %765 = vmatpush.bf16.msrb.mxu2 %v2956_v11  ;;  %v3212_v10 = vor.u32 %v4300_v2, %v3209_v3  ;;  %v4299_v11 = vld [vmem:[%s6439_s3 + $0x2a4] sm:$0xf0]  ;;  %v3185_v39 = vld [vmem:[%s6439_s3 + $0x288] sm:$0xf0]  ;;  %v3335_v40 = vld [vmem:[%s6439_s3 + $0x370] sm:$0xf]  ;;  %v3124_v49 = vor.u32 %v4278_v35, %v3121_v36 }
  0x4c   : > { %779 = vmatpush.bf16.msrb.mxu3 %v3020_v15  ;;  %v3201_v15 = vld [vmem:[%s6439_s3 + $0x2a8] sm:$0xf0]  ;;  %v3200_v17 = vor.u32 %v4299_v11, %v3199_v9  ;;  %v4325_v41 = vld [vmem:[%s6439_s3 + $0x374] sm:$0xf0]  ;;  %v3399_v42 = vld [vmem:[%s6439_s3 + $0x3f0] sm:$0xf] }
  0x4d   : > { %738 = vmatmul.bf16.vlgmr.msrb.gmra.mxu0 %v2944_v25  ;;  %v3204_v22 = vor.u32 %v4298_v14, %v3201_v15  ;;  %v4341_v43 = vld [vmem:[%s6439_s3 + $0x3f4] sm:$0xf0]  ;;  %v4340_v47 = vld [vmem:[%s6439_s3 + $0x3f4] sm:$0xf]  ;;  %v3111_v51 = vld [vmem:[%s5169_s26] sm:$0xf]  ;;  %v3336_v54 = vor.u32 %v4325_v41, %v3335_v40 }
  0x4e   : > { %991 = vmatpush.bf16.msra.mxu0 %v3176_v16  ;;  %766 = vmatmul.bf16.vlgmr.msrb.gmra.mxu2 %v2944_v25  ;;  %v3136_v16 = vor.u32 %v4283_v8, %v3135_v7  ;;  %v3129_v25 = vld [vmem:[%s6439_s3 + $0x218] sm:$0xf0]  ;;  %v4277_v52 = vld [vmem:[%s5169_s26 + $0x4] sm:$0xf0]  ;;  %v4276_v55 = vld [vmem:[%s5169_s26 + $0x4] sm:$0xf] }
  0x4f   : > { %1005 = vmatpush.bf16.msra.mxu1 %v3240_v19  ;;  %1019 = vmatpush.bf16.msra.mxu2 %v3180_v20  ;;  %v3127_v19 = vld [vmem:[%s6439_s3 + $0x210] sm:$0xf]  ;;  %v4281_v20 = vld [vmem:[%s6439_s3 + $0x214] sm:$0xf0]  ;;  %v3327_v59 = vld [vmem:[%s6439_s3 + $0x360] sm:$0xf]  ;;  %v3112_v63 = vor.u32 %v4277_v52, %v3111_v51 }
  0x50   : > { %1033 = vmatpush.bf16.msra.mxu3 %v3244_v24  ;;  %752 = vmatmul.bf16.vlgmr.msrb.gmra.mxu1 %v2948_v29  ;;  %v4280_v24 = vld [vmem:[%s6439_s3 + $0x214] sm:$0xf]  ;;  %v3128_v28 = vor.u32 %v4281_v20, %v3127_v19  ;;  %v4323_v60 = vld [vmem:[%s6439_s3 + $0x364] sm:$0xf0]  ;;  %v3391_v61 = vld [vmem:[%s6439_s3 + $0x3e0] sm:$0xf] }
  0x51   : > { %780 = vmatmul.bf16.vlgmr.msrb.gmra.mxu3 %v2948_v29  ;;  %v3119_v29 = vld [vmem:[%s6439_s3 + $0x200] sm:$0xf]  ;;  %v4339_v0 = vld [vmem:[%s6439_s3 + $0x3e4] sm:$0xf0]  ;;  %v4322_v1 = vld [vmem:[%s6439_s3 + $0x364] sm:$0xf] }
  0x52   : > { %992 = vmatpush.bf16.msra.mxu0 %v3168_v32  ;;  %v3192_v32 = vor.u32 %v4297_v23, %v3191_v21  ;;  %v3329_v2 = vld [vmem:[%s6439_s3 + $0x368] sm:$0xf0]  ;;  %v3392_v7 = vor.u32 %v4339_v0, %v3391_v61  ;;  %v3319_v9 = vld [vmem:[%s6439_s3 + $0x350] sm:$0xf]  ;;  %v4337_v13 = vld [vmem:[%s6439_s3 + $0x3d4] sm:$0xf0] }
  0x53   : > { %1006 = vmatpush.bf16.msra.mxu1 %v3232_v33  ;;  %1020 = vmatpush.bf16.msra.mxu2 %v3172_v34  ;;  %v3132_v33 = vor.u32 %v4280_v24, %v3129_v25  ;;  %v4295_v34 = vld [vmem:[%s6439_s3 + $0x284] sm:$0xf0]  ;;  %v3332_v8 = vor.u32 %v4322_v1, %v3329_v2  ;;  %v3383_v11 = vld [vmem:[%s6439_s3 + $0x3d0] sm:$0xf]  ;;  %v4320_v14 = vld [vmem:[%s6439_s3 + $0x354] sm:$0xf] }
  0x54   : > { %1034 = vmatpush.bf16.msra.mxu3 %v3236_v38  ;;  %v4294_v38 = vld [vmem:[%s6439_s3 + $0x284] sm:$0xf]  ;;  %v3184_v48 = vor.u32 %v4295_v34, %v3183_v31  ;;  %v3321_v15 = vld [vmem:[%s6439_s3 + $0x358] sm:$0xf0]  ;;  %v3384_v19 = vor.u32 %v4337_v13, %v3383_v11  ;;  %v3311_v21 = vld [vmem:[%s6439_s3 + $0x340] sm:$0xf] }
  0x55   : > { %v3188_v53 = vor.u32 %v4294_v38, %v3185_v39  ;;  %v3324_v20 = vor.u32 %v4320_v14, %v3321_v15  ;;  %v3375_v23 = vld [vmem:[%s6439_s3 + $0x3c0] sm:$0xf]  ;;  %v4335_v25 = vld [vmem:[%s6439_s3 + $0x3c4] sm:$0xf0]  ;;  %v4318_v26 = vld [vmem:[%s6439_s3 + $0x344] sm:$0xf] }
  0x56   : > { %993 = vmatpush.bf16.msra.mxu0 %v3160_v44  ;;  %v3120_v44 = vor.u32 %v4279_v30, %v3119_v29  ;;  %v3313_v27 = vld [vmem:[%s6439_s3 + $0x348] sm:$0xf0]  ;;  %v3376_v31 = vor.u32 %v4335_v25, %v3375_v23  ;;  %v4317_v34 = vld [vmem:[%s6439_s3 + $0x334] sm:$0xf0]  ;;  %v3367_v35 = vld [vmem:[%s6439_s3 + $0x3b0] sm:$0xf] }
  0x57   : > { %1007 = vmatpush.bf16.msra.mxu1 %v3224_v45  ;;  %1021 = vmatpush.bf16.msra.mxu2 %v3164_v46  ;;  %v4324_v45 = vld [vmem:[%s6439_s3 + $0x374] sm:$0xf]  ;;  %v3337_v46 = vld [vmem:[%s6439_s3 + $0x378] sm:$0xf0]  ;;  %v3377_v29 = vld [vmem:[%s6439_s3 + $0x3c8] sm:$0xf0] }
  0x58   : > { %1035 = vmatpush.bf16.msra.mxu3 %v3228_v50  ;;  %v3401_v50 = vld [vmem:[%s6439_s3 + $0x3f8] sm:$0xf0]  ;;  %v4316_v38 = vld [vmem:[%s6439_s3 + $0x334] sm:$0xf]  ;;  %v1051_v52 = vld [vmem:[%s4967_s13] sm:$0xcc] }
  0x59   : > { %v3305_v39 = vld [vmem:[%s6439_s3 + $0x338] sm:$0xf0]  ;;  %v4332_v40 = vld [vmem:[%s6439_s3 + $0x3b4] sm:$0xf]  ;;  %v4313_v61 = vld [vmem:[%s6439_s3 + $0x314] sm:$0xf0]  ;;  %v1090_v0 = vunpack.c.l.b16 %v1051_v52 }
  0x5a   : > { %994 = vmatpush.bf16.msra.mxu0 %v3152_v56  ;;  %v3113_v56 = vld [vmem:[%s5169_s26 + $0x8] sm:$0xf0]  ;;  %v3369_v41 = vld [vmem:[%s6439_s3 + $0x3b8] sm:$0xf0]  ;;  %v3279_v13 = vld [vmem:[%s6439_s3 + $0x300] sm:$0xf] }
  0x5b   : > { %1008 = vmatpush.bf16.msra.mxu1 %v3216_v57  ;;  %1022 = vmatpush.bf16.msra.mxu2 %v3156_v58  ;;  %v3400_v57 = vor.u32 %v4341_v43, %v3399_v42  ;;  %v3340_v58 = vor.u32 %v4324_v45, %v3337_v46  ;;  %v3116_v3 = vor.u32 %v4276_v55, %v3113_v56  ;;  %v3295_v43 = vld [vmem:[%s6439_s3 + $0x320] sm:$0xf]  ;;  %v4330_v55 = vld [vmem:[%s6439_s3 + $0x3a4] sm:$0xf]  ;;  %v3361_v56 = vld [vmem:[%s6439_s3 + $0x3a8] sm:$0xf0] }
  0x5c   : > { %1036 = vmatpush.bf16.msra.mxu3 %v3220_v62  ;;  %v3404_v62 = vor.u32 %v4340_v47, %v3401_v50  ;;  %v3359_v45 = vld [vmem:[%s6439_s3 + $0x3a0] sm:$0xf]  ;;  %v3308_v47 = vor.u32 %v4316_v38, %v3305_v39  ;;  %v3297_v50 = vld [vmem:[%s6439_s3 + $0x328] sm:$0xf0]  ;;  %v3372_v51 = vor.u32 %v4332_v40, %v3369_v41  ;;  %v4311_v14 = vld [vmem:[%s6439_s3 + $0x304] sm:$0xf0] }
  0x5d   : > { %v4326_v23 = vld [vmem:[%s6439_s3 + $0x384] sm:$0xf]  ;;  %v3561_v38 = vld [vmem:[%s6439_s3 + $0x4f8] sm:$0xf0] }
  0x5e   : > { %995 = vmatpush.bf16.msra.mxu0 %v3144_v4  ;;  %v4338_v4 = vld [vmem:[%s6439_s3 + $0x3e4] sm:$0xf] }
  0x5f   : > { %1009 = vmatpush.bf16.msra.mxu1 %v3208_v5  ;;  %1023 = vmatpush.bf16.msra.mxu2 %v3148_v6  ;;  %v3393_v5 = vld [vmem:[%s6439_s3 + $0x3e8] sm:$0xf0]  ;;  %v3328_v6 = vor.u32 %v4323_v60, %v3327_v59  ;;  %v3287_v59 = vld [vmem:[%s6439_s3 + $0x310] sm:$0xf] }
  0x60   : > { %1037 = vmatpush.bf16.msra.mxu3 %v3212_v10  ;;  %v4321_v10 = vld [vmem:[%s6439_s3 + $0x354] sm:$0xf0]  ;;  %v3396_v12 = vor.u32 %v4338_v4, %v3393_v5  ;;  %v4312_v4 = vld [vmem:[%s6439_s3 + $0x314] sm:$0xf]  ;;  %v3289_v5 = vld [vmem:[%s6439_s3 + $0x318] sm:$0xf0]  ;;  %v3288_v11 = vor.u32 %v4313_v61, %v3287_v59 }
  0x61   : > { %v3292_v15 = vor.u32 %v4312_v4, %v3289_v5  ;;  %v3479_v61 = vld [vmem:[%s6439_s3 + $0x450] sm:$0xf]  ;;  %v3481_v4 = vld [vmem:[%s6439_s3 + $0x458] sm:$0xf0]  ;;  %v4368_v5 = vld [vmem:[%s6439_s3 + $0x4d4] sm:$0xf] }
  0x62   : > { %996 = vmatpush.bf16.msra.mxu0 %v3136_v16  ;;  %v4336_v16 = vld [vmem:[%s6439_s3 + $0x3d4] sm:$0xf] }
  0x63   : > { %1010 = vmatpush.bf16.msra.mxu1 %v3200_v17  ;;  %1024 = vmatpush.bf16.msra.mxu2 %v3140_v18  ;;  %v3385_v17 = vld [vmem:[%s6439_s3 + $0x3d8] sm:$0xf0]  ;;  %v3320_v18 = vor.u32 %v4321_v10, %v3319_v9  ;;  %v4328_v9 = vld [vmem:[%s6439_s3 + $0x394] sm:$0xf] }
  0x64   : > { %1038 = vmatpush.bf16.msra.mxu3 %v3204_v22  ;;  %v4319_v22 = vld [vmem:[%s6439_s3 + $0x344] sm:$0xf0]  ;;  %v3388_v24 = vor.u32 %v4336_v16, %v3385_v17  ;;  %v3353_v10 = vld [vmem:[%s6439_s3 + $0x398] sm:$0xf0]  ;;  %v3343_v16 = vld [vmem:[%s6439_s3 + $0x380] sm:$0xf] }
  0x65   : > { %v3312_v30 = vor.u32 %v4319_v22, %v3311_v21  ;;  %v4327_v17 = vld [vmem:[%s6439_s3 + $0x384] sm:$0xf0]  ;;  %v3356_v21 = vor.u32 %v4328_v9, %v3353_v10  ;;  %v3281_v22 = vld [vmem:[%s6439_s3 + $0x308] sm:$0xf0] }
  0x66   : > { %997 = vmatpush.bf16.msra.mxu0 %v3128_v28  ;;  %v4334_v28 = vld [vmem:[%s6439_s3 + $0x3c4] sm:$0xf] }
  0x67   : > { %1011 = vmatpush.bf16.msra.mxu1 %v3192_v32  ;;  %1025 = vmatpush.bf16.msra.mxu2 %v3132_v33  ;;  %v3316_v32 = vor.u32 %v4318_v26, %v3313_v27  ;;  %v3303_v33 = vld [vmem:[%s6439_s3 + $0x330] sm:$0xf]  ;;  %v3380_v36 = vor.u32 %v4334_v28, %v3377_v29  ;;  %v4357_v28 = vld [vmem:[%s6439_s3 + $0x474] sm:$0xf0] }
  0x68   : > { %1039 = vmatpush.bf16.msra.mxu3 %v3196_v37  ;;  %v4333_v37 = vld [vmem:[%s6439_s3 + $0x3b4] sm:$0xf0]  ;;  %v3304_v42 = vor.u32 %v4317_v34, %v3303_v33  ;;  %v3495_v27 = vld [vmem:[%s6439_s3 + $0x470] sm:$0xf]  ;;  %v4356_v33 = vld [vmem:[%s6439_s3 + $0x474] sm:$0xf] }
  0x69   : > { %v3368_v46 = vor.u32 %v4333_v37, %v3367_v35  ;;  %v3559_v29 = vld [vmem:[%s6439_s3 + $0x4f0] sm:$0xf]  ;;  %v3497_v34 = vld [vmem:[%s6439_s3 + $0x478] sm:$0xf0]  ;;  %v4372_v37 = vld [vmem:[%s6439_s3 + $0x4f4] sm:$0xf]  ;;  %v3496_v41 = vor.u32 %v4357_v28, %v3495_v27 }
  0x6a   : > { %998 = vmatpush.bf16.msra.mxu0 %v3120_v44  ;;  %v4315_v44 = vld [vmem:[%s6439_s3 + $0x324] sm:$0xf0]  ;;  %v4365_v27 = vld [vmem:[%s6439_s3 + $0x4b4] sm:$0xf0]  ;;  %v4348_v28 = vld [vmem:[%s6439_s3 + $0x434] sm:$0xf] }
  0x6b   : > { %1012 = vmatpush.bf16.msra.mxu1 %v3184_v48  ;;  %1026 = vmatpush.bf16.msra.mxu2 %v3124_v49  ;;  %v4331_v48 = vld [vmem:[%s6439_s3 + $0x3a4] sm:$0xf0]  ;;  %v4314_v49 = vld [vmem:[%s6439_s3 + $0x324] sm:$0xf] }
  0x6c   : > { %1040 = vmatpush.bf16.msra.mxu3 %v3188_v53  ;;  %v5312_v53 = vld [vmem:[%s4967_s13 + $0x8] sm:$0xff]  ;;  %v3300_v60 = vor.u32 %v4314_v49, %v3297_v50  ;;  %v3564_v49 = vor.u32 %v4372_v37, %v3561_v38 }
  0x6d   : > { %999 = vmatmul.bf16.vlgmr.msra.gmra.mxu0 %v3112_v63  ;;  %v1092_v1 = vunpack.c.l.b16 %v5312_v53  ;;  %v4371_v50 = vld [vmem:[%s6439_s3 + $0x4e4] sm:$0xf0] }
  0x6e   : > { %1269 = vmatpush.bf16.msrb.mxu0 %v3336_v54  ;;  %1013 = vmatmul.bf16.vlgmr.msra.gmra.mxu1 %v3116_v3  ;;  %v1053_v54 = vld [vmem:[%s4967_s13 + $0x10] sm:$0x33]  ;;  %v4363_v38 = vld [vmem:[%s6439_s3 + $0x4a4] sm:$0xf0] }
  0x6f   : > { %1283 = vmatpush.bf16.msrb.mxu1 %v3400_v57  ;;  %1297 = vmatpush.bf16.msrb.mxu2 %v3340_v58  ;;  %v3296_v57 = vor.u32 %v4315_v44, %v3295_v43  ;;  %v3360_v58 = vor.u32 %v4331_v48, %v3359_v45  ;;  %v1094_v2 = vunpack.c.l.b16 %v1053_v54  ;;  %v3500_v45 = vor.u32 %v4356_v33, %v3497_v34  ;;  %v3551_v48 = vld [vmem:[%s6439_s3 + $0x4e0] sm:$0xf]  ;;  %v4347_v34 = vld [vmem:[%s6439_s3 + $0x424] sm:$0xf0] }
  0x70   : > { %1311 = vmatpush.bf16.msrb.mxu3 %v3404_v62  ;;  %1027 = vmatmul.bf16.vlgmr.msra.gmra.mxu2 %v3112_v63  ;;  %v3351_v62 = vld [vmem:[%s6439_s3 + $0x390] sm:$0xf]  ;;  %v4329_v63 = vld [vmem:[%s6439_s3 + $0x394] sm:$0xf0]  ;;  %v3552_v59 = vor.u32 %v4371_v50, %v3551_v48  ;;  %v3455_v33 = vld [vmem:[%s6439_s3 + $0x420] sm:$0xf] }
  0x71   : > { %1041 = vmatmul.bf16.vlgmr.msra.gmra.mxu3 %v3116_v3  ;;  %v3364_v3 = vor.u32 %v4330_v55, %v3361_v56  ;;  %v4370_v55 = vld [vmem:[%s6439_s3 + $0x4e4] sm:$0xf]  ;;  %v3553_v56 = vld [vmem:[%s6439_s3 + $0x4e8] sm:$0xf0] }
  0x72   : > { %1270 = vmatpush.bf16.msrb.mxu0 %v3328_v6  ;;  %v1091_v6 = vunpack.c.h.b16 %v1051_v52  ;;  %v3489_v52 = vld [vmem:[%s6439_s3 + $0x468] sm:$0xf0] }
  0x73   : > { %1284 = vmatpush.bf16.msrb.mxu1 %v3392_v7  ;;  %1298 = vmatpush.bf16.msrb.mxu2 %v3332_v8  ;;  %v1093_v7 = vunpack.c.h.b16 %v5312_v53  ;;  %v1095_v8 = vunpack.c.h.b16 %v1053_v54  ;;  %v3959_v53 = vld [vmem:[%s6439_s3 + $0x750] sm:$0xf] }
  0x74   : > { %1312 = vmatpush.bf16.msrb.mxu3 %v3396_v12  ;;  %v3352_v12 = vor.u32 %v4329_v63, %v3351_v62  ;;  %v4353_v62 = vld [vmem:[%s6439_s3 + $0x454] sm:$0xf0]  ;;  %v3543_v63 = vld [vmem:[%s6439_s3 + $0x4d0] sm:$0xf] }
  0x75   : > { %v1097_v25 = vpack.c.b16 %v1093_v7, %v1091_v6  ;;  %v1099_v26 = vpack.c.b16 %v1095_v8, %v1095_v8  ;;  %v3545_v6 = vld [vmem:[%s6439_s3 + $0x4d8] sm:$0xf0]  ;;  %v3480_v8 = vor.u32 %v4353_v62, %v3479_v61 }
  0x76   : > { %1271 = vmatpush.bf16.msrb.mxu0 %v3320_v18  ;;  %v4310_v18 = vld [vmem:[%s6439_s3 + $0x304] sm:$0xf] }
  0x77   : > { %1285 = vmatpush.bf16.msrb.mxu1 %v3384_v19  ;;  %1299 = vmatpush.bf16.msrb.mxu2 %v3324_v20  ;;  %v1096_v19 = vpack.c.b16 %v1092_v1, %v1090_v0  ;;  %v1098_v20 = vpack.c.b16 %v1094_v2, %v1094_v2  ;;  %v3284_v35 = vor.u32 %v4310_v18, %v3281_v22  ;;  %v1105_v43 = vrot.slane %v1099_v26, 2  ;;  %v4369_v2 = vld [vmem:[%s6439_s3 + $0x4d4] sm:$0xf0]  ;;  %v4366_v18 = vld [vmem:[%s6439_s3 + $0x4c4] sm:$0xf] }
  0x78   : > { %1313 = vmatpush.bf16.msrb.mxu3 %v3388_v24  ;;  %v3345_v24 = vld [vmem:[%s6439_s3 + $0x388] sm:$0xf0]  ;;  %v3556_v0 = vor.u32 %v4370_v55, %v3553_v56  ;;  %v3544_v9 = vor.u32 %v4369_v2, %v3543_v63  ;;  %v3513_v2 = vld [vmem:[%s6439_s3 + $0x498] sm:$0xf0] }
  0x79   : > { %v1101_v39 = vrot.slane %v1096_v19, 2  ;;  %v1102_v40 = vrot.slane %v1098_v20, 2  ;;  %v3537_v19 = vld [vmem:[%s6439_s3 + $0x4c8] sm:$0xf0] }
  0x7a   : > { %1272 = vmatpush.bf16.msrb.mxu0 %v3312_v30  ;;  %v3280_v30 = vor.u32 %v4311_v14, %v3279_v13  ;;  %v3535_v13 = vld [vmem:[%s6439_s3 + $0x4c0] sm:$0xf]  ;;  %v3548_v14 = vor.u32 %v4368_v5, %v3545_v6  ;;  %v3540_v26 = vor.u32 %v4366_v18, %v3537_v19  ;;  %v4343_v6 = vld [vmem:[%s6439_s3 + $0x404] sm:$0xf0] }
  0x7b   : > { %1286 = vmatpush.bf16.msrb.mxu1 %v3376_v31  ;;  %1300 = vmatpush.bf16.msrb.mxu2 %v3316_v32  ;;  %v3344_v31 = vor.u32 %v4327_v17, %v3343_v16  ;;  %v4373_v32 = vld [vmem:[%s6439_s3 + $0x4f4] sm:$0xf0]  ;;  %v1103_v54 = vsel %vm1100_vm0, %v1101_v39, %v1102_v40  ;;  %v4350_v16 = vld [vmem:[%s6439_s3 + $0x444] sm:$0xf]  ;;  %v3473_v17 = vld [vmem:[%s6439_s3 + $0x448] sm:$0xf0] }
  0x7c   : > { %1314 = vmatpush.bf16.msrb.mxu3 %v3380_v36  ;;  %v3348_v36 = vor.u32 %v4326_v23, %v3345_v24  ;;  %v3560_v44 = vor.u32 %v4373_v32, %v3559_v29  ;;  %v3476_v22 = vor.u32 %v4350_v16, %v3473_v17  ;;  %v3463_v23 = vld [vmem:[%s6439_s3 + $0x430] sm:$0xf]  ;;  %v4349_v24 = vld [vmem:[%s6439_s3 + $0x434] sm:$0xf0]  ;;  %v3465_v29 = vld [vmem:[%s6439_s3 + $0x438] sm:$0xf0] }
  0x7d   : > { %v3464_v32 = vor.u32 %v4349_v24, %v3463_v23  ;;  %v3468_v37 = vor.u32 %v4348_v28, %v3465_v29  ;;  %v4346_v39 = vld [vmem:[%s6439_s3 + $0x424] sm:$0xf]  ;;  %v3457_v40 = vld [vmem:[%s6439_s3 + $0x428] sm:$0xf0]  ;;  %v3439_v5 = vld [vmem:[%s6439_s3 + $0x400] sm:$0xf] }
  0x7e   : > { %1273 = vmatpush.bf16.msrb.mxu0 %v3304_v42  ;;  %v1104_v42 = vrot.slane %v1097_v25, 2  ;;  %v3527_v25 = vld [vmem:[%s6439_s3 + $0x4b0] sm:$0xf]  ;;  %v3460_v50 = vor.u32 %v4346_v39, %v3457_v40  ;;  %v4358_v16 = vld [vmem:[%s6439_s3 + $0x484] sm:$0xf]  ;;  %v3440_v23 = vor.u32 %v4343_v6, %v3439_v5 }
  0x7f   : > { %1287 = vmatpush.bf16.msrb.mxu1 %v3368_v46  ;;  %1301 = vmatpush.bf16.msrb.mxu2 %v3308_v47  ;;  %v3487_v46 = vld [vmem:[%s6439_s3 + $0x460] sm:$0xf]  ;;  %v4355_v47 = vld [vmem:[%s6439_s3 + $0x464] sm:$0xf0]  ;;  %v3505_v17 = vld [vmem:[%s6439_s3 + $0x488] sm:$0xf0] }
  0x80   : > { %1315 = vmatpush.bf16.msrb.mxu3 %v3372_v51  ;;  %v4354_v51 = vld [vmem:[%s6439_s3 + $0x464] sm:$0xf]  ;;  %v4405_v24 = vld [vmem:[%s6439_s3 + $0x5f4] sm:$0xf0]  ;;  %v4404_v29 = vld [vmem:[%s6439_s3 + $0x5f4] sm:$0xf] }
  0x81   : > { %v3647_v39 = vld [vmem:[%s6439_s3 + $0x560] sm:$0xf]  ;;  %v4387_v40 = vld [vmem:[%s6439_s3 + $0x564] sm:$0xf0] }
  0x82   : > { %1274 = vmatpush.bf16.msrb.mxu0 %v3296_v57  ;;  %v1106_v57 = vsel %vm1100_vm0, %v1104_v42, %v1105_v43  ;;  %v1329_v42 = vld [vmem:[%s4852_s27] sm:$0xcc]  ;;  %v5517_v43 = vld [vmem:[%s4852_s27 + $0x8] sm:$0xff] }
  0x83   : > { %1288 = vmatpush.bf16.msrb.mxu1 %v3360_v58  ;;  %1302 = vmatpush.bf16.msrb.mxu2 %v3300_v60  ;;  %v3488_v58 = vor.u32 %v4355_v47, %v3487_v46  ;;  %v3492_v60 = vor.u32 %v4354_v51, %v3489_v52  ;;  %v3521_v46 = vld [vmem:[%s6439_s3 + $0x4a8] sm:$0xf0]  ;;  %v3456_v47 = vor.u32 %v4347_v34, %v3455_v33  ;;  %v4345_v51 = vld [vmem:[%s6439_s3 + $0x414] sm:$0xf0]  ;;  %v3511_v52 = vld [vmem:[%s6439_s3 + $0x490] sm:$0xf]  ;;  %v1368_v55 = vunpack.c.l.b16 %v1329_v42 }
  0x84   : > { %1316 = vmatpush.bf16.msrb.mxu3 %v3364_v3  ;;  %v4352_v3 = vld [vmem:[%s6439_s3 + $0x454] sm:$0xf]  ;;  %v1370_v56 = vunpack.c.l.b16 %v5517_v43  ;;  %v1369_v61 = vunpack.c.h.b16 %v1329_v42  ;;  %v1371_v62 = vunpack.c.h.b16 %v5517_v43  ;;  %v3508_v33 = vor.u32 %v4358_v16, %v3505_v17  ;;  %v3631_v6 = vld [vmem:[%s6439_s3 + $0x540] sm:$0xf]  ;;  %v4119_v43 = vld [vmem:[%s6439_s3 + $0x850] sm:$0xf] }
  0x85   : > { %v3484_v10 = vor.u32 %v4352_v3, %v3481_v4 }
  0x86   : > { %1275 = vmatpush.bf16.msrb.mxu0 %v3288_v11  ;;  %v3471_v11 = vld [vmem:[%s6439_s3 + $0x440] sm:$0xf]  ;;  %v1375_v18 = vpack.c.b16 %v1371_v62, %v1369_v61  ;;  %v4384_v61 = vld [vmem:[%s6439_s3 + $0x554] sm:$0xf] }
  0x87   : > { %1289 = vmatpush.bf16.msrb.mxu1 %v3352_v12  ;;  %1303 = vmatpush.bf16.msrb.mxu2 %v3292_v15  ;;  %v4351_v12 = vld [vmem:[%s6439_s3 + $0x444] sm:$0xf0] }
  0x88   : > { %1317 = vmatpush.bf16.msrb.mxu3 %v3356_v21  ;;  %v4367_v15 = vld [vmem:[%s6439_s3 + $0x4c4] sm:$0xf0]  ;;  %v3472_v20 = vor.u32 %v4351_v12, %v3471_v11  ;;  %v4342_v11 = vld [vmem:[%s6439_s3 + $0x404] sm:$0xf]  ;;  %v1374_v12 = vpack.c.b16 %v1370_v56, %v1368_v55  ;;  %v3639_v55 = vld [vmem:[%s6439_s3 + $0x550] sm:$0xf] }
  0x89   : > { %v3536_v21 = vor.u32 %v4367_v15, %v3535_v13  ;;  %v3441_v15 = vld [vmem:[%s6439_s3 + $0x408] sm:$0xf0] }
  0x8a   : > { %1276 = vmatpush.bf16.msrb.mxu0 %v3280_v30  ;;  %v4364_v30 = vld [vmem:[%s6439_s3 + $0x4b4] sm:$0xf]  ;;  %v3444_v28 = vor.u32 %v4342_v11, %v3441_v15  ;;  %v4399_v11 = vld [vmem:[%s6439_s3 + $0x5c4] sm:$0xf0]  ;;  %v3697_v15 = vld [vmem:[%s6439_s3 + $0x5c8] sm:$0xf0] }
  0x8b   : > { %1290 = vmatpush.bf16.msrb.mxu1 %v3344_v31  ;;  %1304 = vmatpush.bf16.msrb.mxu2 %v3284_v35  ;;  %v3529_v31 = vld [vmem:[%s6439_s3 + $0x4b8] sm:$0xf0]  ;;  %v3519_v35 = vld [vmem:[%s6439_s3 + $0x4a0] sm:$0xf] }
  0x8c   : > { %1318 = vmatpush.bf16.msrb.mxu3 %v3348_v36  ;;  %v3528_v36 = vor.u32 %v4365_v27, %v3527_v25  ;;  %v3520_v48 = vor.u32 %v4363_v38, %v3519_v35  ;;  %v4388_v25 = vld [vmem:[%s6439_s3 + $0x574] sm:$0xf]  ;;  %v1381_v35 = vrot.slane %v1375_v18, 2 }
  0x8d   : > { %1277 = vmatmul.bf16.vlgmr.msrb.gmra.mxu0 %v1103_v54 }
  0x8e   : > { %1546 = vmatpush.bf16.msra.mxu0 %v3496_v41  ;;  %1291 = vmatmul.bf16.vlgmr.msrb.gmra.mxu1 %v1106_v57  ;;  %v3532_v41 = vor.u32 %v4364_v30, %v3529_v31  ;;  %v3721_v30 = vld [vmem:[%s6439_s3 + $0x5f8] sm:$0xf0]  ;;  %v1378_v31 = vrot.slane %v1374_v12, 2  ;;  %v4382_v12 = vld [vmem:[%s6439_s3 + $0x544] sm:$0xf] }
  0x8f   : > { %1560 = vmatpush.bf16.msra.mxu1 %v3560_v44  ;;  %1574 = vmatpush.bf16.msra.mxu2 %v3500_v45  ;;  %v1331_v44 = vld [vmem:[%s4852_s27 + $0x10] sm:$0x33]  ;;  %v4362_v45 = vld [vmem:[%s6439_s3 + $0x4a4] sm:$0xf]  ;;  %v3724_v42 = vor.u32 %v4404_v29, %v3721_v30  ;;  %v3615_v29 = vld [vmem:[%s6439_s3 + $0x520] sm:$0xf] }
  0x90   : > { %1588 = vmatpush.bf16.msra.mxu3 %v3564_v49  ;;  %1305 = vmatmul.bf16.vlgmr.msrb.gmra.mxu2 %v1103_v54  ;;  %v3447_v49 = vld [vmem:[%s6439_s3 + $0x410] sm:$0xf]  ;;  %v4361_v54 = vld [vmem:[%s6439_s3 + $0x494] sm:$0xf0]  ;;  %v1373_v63 = vunpack.c.h.b16 %v1331_v44  ;;  %v4379_v30 = vld [vmem:[%s6439_s3 + $0x524] sm:$0xf0] }
  0x91   : > { %1319 = vmatmul.bf16.vlgmr.msrb.gmra.mxu3 %v1106_v57  ;;  %v1372_v57 = vunpack.c.l.b16 %v1331_v44  ;;  %v3448_v3 = vor.u32 %v4345_v51, %v3447_v49  ;;  %v3512_v4 = vor.u32 %v4361_v54, %v3511_v52  ;;  %v4403_v44 = vld [vmem:[%s6439_s3 + $0x5e4] sm:$0xf0]  ;;  %v3713_v49 = vld [vmem:[%s6439_s3 + $0x5e8] sm:$0xf0]  ;;  %v3648_v51 = vor.u32 %v4387_v40, %v3647_v39  ;;  %v1608_v40 = vld [vmem:[%s5169_s26 + $0x10] sm:$0x33] }
  0x92   : > { %1547 = vmatpush.bf16.msra.mxu0 %v3488_v58  ;;  %v3524_v58 = vor.u32 %v4362_v45, %v3521_v46  ;;  %v1377_v19 = vpack.c.b16 %v1373_v63, %v1373_v63  ;;  %v4386_v45 = vld [vmem:[%s6439_s3 + $0x564] sm:$0xf]  ;;  %v3649_v46 = vld [vmem:[%s6439_s3 + $0x568] sm:$0xf0]  ;;  %v3641_v63 = vld [vmem:[%s6439_s3 + $0x558] sm:$0xf0] }
  0x93   : > { %1561 = vmatpush.bf16.msra.mxu1 %v3552_v59  ;;  %1575 = vmatpush.bf16.msra.mxu2 %v3492_v60  ;;  %v4344_v59 = vld [vmem:[%s6439_s3 + $0x414] sm:$0xf]  ;;  %v3449_v60 = vld [vmem:[%s6439_s3 + $0x418] sm:$0xf0]  ;;  %v1376_v13 = vpack.c.b16 %v1372_v57, %v1372_v57  ;;  %v3652_v54 = vor.u32 %v4386_v45, %v3649_v46  ;;  %v4385_v57 = vld [vmem:[%s6439_s3 + $0x554] sm:$0xf0]  ;;  %v3644_v5 = vor.u32 %v4384_v61, %v3641_v63 }
  0x94   : > { %1589 = vmatpush.bf16.msra.mxu3 %v3556_v0  ;;  %v4360_v0 = vld [vmem:[%s6439_s3 + $0x494] sm:$0xf]  ;;  %v5722_v39 = vld [vmem:[%s5169_s26 + $0x8] sm:$0xff]  ;;  %v3616_v45 = vor.u32 %v4379_v30, %v3615_v29  ;;  %v3609_v61 = vld [vmem:[%s6439_s3 + $0x518] sm:$0xf0] }
  0x95   : > { %v4437_v29 = vld [vmem:[%s6439_s3 + $0x6f4] sm:$0xf0]  ;;  %v4420_v30 = vld [vmem:[%s6439_s3 + $0x674] sm:$0xf] }
  0x96   : > { %1548 = vmatpush.bf16.msra.mxu0 %v3480_v8  ;;  %v3452_v8 = vor.u32 %v4344_v59, %v3449_v60  ;;  %v4401_v60 = vld [vmem:[%s6439_s3 + $0x5d4] sm:$0xf0] }
  0x97   : > { %1562 = vmatpush.bf16.msra.mxu1 %v3544_v9  ;;  %1576 = vmatpush.bf16.msra.mxu2 %v3484_v10  ;;  %v3503_v9 = vld [vmem:[%s6439_s3 + $0x480] sm:$0xf]  ;;  %v4359_v10 = vld [vmem:[%s6439_s3 + $0x484] sm:$0xf0] }
  0x98   : > { %1590 = vmatpush.bf16.msra.mxu3 %v3548_v14  ;;  %v3516_v14 = vor.u32 %v4360_v0, %v3513_v2  ;;  %v3504_v27 = vor.u32 %v4359_v10, %v3503_v9  ;;  %v4400_v0 = vld [vmem:[%s6439_s3 + $0x5d4] sm:$0xf]  ;;  %v3705_v2 = vld [vmem:[%s6439_s3 + $0x5d8] sm:$0xf0]  ;;  %v3695_v9 = vld [vmem:[%s6439_s3 + $0x5c0] sm:$0xf] }
  0x99   : > { %v3708_v10 = vor.u32 %v4400_v0, %v3705_v2  ;;  %v3696_v17 = vor.u32 %v4399_v11, %v3695_v9  ;;  %v1648_v0 = vunpack.c.h.b16 %v5722_v39  ;;  %v1650_v2 = vunpack.c.h.b16 %v1608_v40  ;;  %v4375_v9 = vld [vmem:[%s6439_s3 + $0x504] sm:$0xf0]  ;;  %v3663_v11 = vld [vmem:[%s6439_s3 + $0x580] sm:$0xf] }
  0x9a   : > { %1549 = vmatpush.bf16.msra.mxu0 %v3472_v20  ;;  %v3655_v20 = vld [vmem:[%s6439_s3 + $0x570] sm:$0xf] }
  0x9b   : > { %1563 = vmatpush.bf16.msra.mxu1 %v3536_v21  ;;  %1577 = vmatpush.bf16.msra.mxu2 %v3476_v22  ;;  %v4389_v21 = vld [vmem:[%s6439_s3 + $0x574] sm:$0xf0]  ;;  %v3719_v22 = vld [vmem:[%s6439_s3 + $0x5f0] sm:$0xf] }
  0x9c   : > { %1591 = vmatpush.bf16.msra.mxu3 %v3540_v26  ;;  %v3657_v26 = vld [vmem:[%s6439_s3 + $0x578] sm:$0xf0]  ;;  %v3656_v34 = vor.u32 %v4389_v21, %v3655_v20  ;;  %v4381_v20 = vld [vmem:[%s6439_s3 + $0x534] sm:$0xf0]  ;;  %v3687_v21 = vld [vmem:[%s6439_s3 + $0x5b0] sm:$0xf] }
  0x9d   : > { %v3660_v38 = vor.u32 %v4388_v25, %v3657_v26  ;;  %v3625_v25 = vld [vmem:[%s6439_s3 + $0x538] sm:$0xf0]  ;;  %v4396_v26 = vld [vmem:[%s6439_s3 + $0x5b4] sm:$0xf] }
  0x9e   : > { %1550 = vmatpush.bf16.msra.mxu0 %v3464_v32  ;;  %v1379_v32 = vrot.slane %v1376_v13, 2  ;;  %v3633_v13 = vld [vmem:[%s6439_s3 + $0x548] sm:$0xf0] }
  0x9f   : > { %1564 = vmatpush.bf16.msra.mxu1 %v3528_v36  ;;  %1578 = vmatpush.bf16.msra.mxu2 %v3468_v37  ;;  %v1382_v36 = vrot.slane %v1377_v19, 2  ;;  %v3720_v37 = vor.u32 %v4405_v24, %v3719_v22  ;;  %v3636_v18 = vor.u32 %v4382_v12, %v3633_v13  ;;  %v3623_v19 = vld [vmem:[%s6439_s3 + $0x530] sm:$0xf]  ;;  %v4380_v24 = vld [vmem:[%s6439_s3 + $0x534] sm:$0xf] }
  0xa0   : > { %1592 = vmatpush.bf16.msra.mxu3 %v3532_v41  ;;  %v3711_v41 = vld [vmem:[%s6439_s3 + $0x5e0] sm:$0xf]  ;;  %v4391_v12 = vld [vmem:[%s6439_s3 + $0x584] sm:$0xf0]  ;;  %v4374_v13 = vld [vmem:[%s6439_s3 + $0x504] sm:$0xf] }
  0xa1   : > { %v3712_v52 = vor.u32 %v4403_v44, %v3711_v41  ;;  %v4394_v41 = vld [vmem:[%s6439_s3 + $0x5a4] sm:$0xf] }
  0xa2   : > { %1551 = vmatpush.bf16.msra.mxu0 %v3456_v47  ;;  %v1380_v47 = vsel %vm1100_vm0, %v1378_v31, %v1379_v32  ;;  %v3679_v31 = vld [vmem:[%s6439_s3 + $0x5a0] sm:$0xf] }
  0xa3   : > { %1565 = vmatpush.bf16.msra.mxu1 %v3520_v48  ;;  %1579 = vmatpush.bf16.msra.mxu2 %v3460_v50  ;;  %v4402_v48 = vld [vmem:[%s6439_s3 + $0x5e4] sm:$0xf]  ;;  %v1383_v50 = vsel %vm1100_vm0, %v1381_v35, %v1382_v36  ;;  %v3617_v36 = vld [vmem:[%s6439_s3 + $0x528] sm:$0xf0] }
  0xa4   : > { %1593 = vmatpush.bf16.msra.mxu3 %v3524_v58  ;;  %v3703_v58 = vld [vmem:[%s6439_s3 + $0x5d0] sm:$0xf]  ;;  %v3716_v59 = vor.u32 %v4402_v48, %v3713_v49  ;;  %v4378_v35 = vld [vmem:[%s6439_s3 + $0x524] sm:$0xf] }
  0xa5   : > { %v3607_v48 = vld [vmem:[%s6439_s3 + $0x510] sm:$0xf] }
  0xa6   : > { %1552 = vmatpush.bf16.msra.mxu0 %v3448_v3  ;;  %v3640_v3 = vor.u32 %v4385_v57, %v3639_v55  ;;  %v1647_v57 = vunpack.c.l.b16 %v5722_v39 }
  0xa7   : > { %1566 = vmatpush.bf16.msra.mxu1 %v3512_v4  ;;  %1580 = vmatpush.bf16.msra.mxu2 %v3452_v8  ;;  %v3704_v4 = vor.u32 %v4401_v60, %v3703_v58  ;;  %v4383_v8 = vld [vmem:[%s6439_s3 + $0x544] sm:$0xf0]  ;;  %v1649_v58 = vunpack.c.l.b16 %v1608_v40  ;;  %v4376_v60 = vld [vmem:[%s6439_s3 + $0x514] sm:$0xf] }
  0xa8   : > { %1594 = vmatpush.bf16.msra.mxu3 %v3516_v14  ;;  %v4398_v14 = vld [vmem:[%s6439_s3 + $0x5c4] sm:$0xf]  ;;  %v3632_v16 = vor.u32 %v4383_v8, %v3631_v6  ;;  %v3599_v8 = vld [vmem:[%s6439_s3 + $0x500] sm:$0xf] }
  0xa9   : > { %v3700_v22 = vor.u32 %v4398_v14, %v3697_v15  ;;  %v1653_v15 = vpack.c.b16 %v1649_v58, %v1649_v58  ;;  %v4418_v58 = vld [vmem:[%s6439_s3 + $0x664] sm:$0xf] }
  0xaa   : > { %1553 = vmatpush.bf16.msra.mxu0 %v3440_v23  ;;  %v4397_v23 = vld [vmem:[%s6439_s3 + $0x5b4] sm:$0xf0] }
  0xab   : > { %1567 = vmatpush.bf16.msra.mxu1 %v3504_v27  ;;  %1581 = vmatpush.bf16.msra.mxu2 %v3444_v28  ;;  %v3689_v27 = vld [vmem:[%s6439_s3 + $0x5b8] sm:$0xf0]  ;;  %v3624_v28 = vor.u32 %v4381_v20, %v3623_v19  ;;  %v3688_v32 = vor.u32 %v4397_v23, %v3687_v21  ;;  %v3665_v19 = vld [vmem:[%s6439_s3 + $0x588] sm:$0xf0]  ;;  %v3815_v23 = vld [vmem:[%s6439_s3 + $0x670] sm:$0xf] }
  0xac   : > { %1595 = vmatpush.bf16.msra.mxu3 %v3508_v33  ;;  %v3628_v33 = vor.u32 %v4380_v24, %v3625_v25  ;;  %v4421_v24 = vld [vmem:[%s6439_s3 + $0x674] sm:$0xf0]  ;;  %v3879_v25 = vld [vmem:[%s6439_s3 + $0x6f0] sm:$0xf]  ;;  %v1656_v40 = vrot.slane %v1653_v15, 2 }
  0xad   : > { %1554 = vmatmul.bf16.vlgmr.msra.gmra.mxu0 %v1380_v47  ;;  %v513_v44 = vpop.f32.mrf.mxu0  ;;  %v3801_v15 = vld [vmem:[%s6439_s3 + $0x658] sm:$0xf0] }
  0xae   : > { %1823 = vmatpush.bf16.msrb.mxu0 %v3656_v34  ;;  %1568 = vmatmul.bf16.vlgmr.msra.gmra.mxu1 %v1383_v50  ;;  %v4395_v34 = vld [vmem:[%s6439_s3 + $0x5a4] sm:$0xf0]  ;;  %v527_v49 = vpop.f32.mrf.mxu1 }
  0xaf   : > { %1837 = vmatpush.bf16.msrb.mxu1 %v3720_v37  ;;  %1851 = vmatpush.bf16.msrb.mxu2 %v3660_v38  ;;  %v3692_v37 = vor.u32 %v4396_v26, %v3689_v27  ;;  %v1606_v38 = vld [vmem:[%s5169_s26] sm:$0xcc]  ;;  %v3680_v46 = vor.u32 %v4395_v34, %v3679_v31  ;;  %v3600_v27 = vor.u32 %v4375_v9, %v3599_v8  ;;  %v3817_v31 = vld [vmem:[%s6439_s3 + $0x678] sm:$0xf0]  ;;  %v4417_v8 = vld [vmem:[%s6439_s3 + $0x654] sm:$0xf0] }
  0xb0   : > { %1865 = vmatpush.bf16.msrb.mxu3 %v3724_v42  ;;  %1582 = vmatmul.bf16.vlgmr.msra.gmra.mxu2 %v1380_v47  ;;  %v3681_v42 = vld [vmem:[%s6439_s3 + $0x5a8] sm:$0xf0]  ;;  %v3620_v47 = vor.u32 %v4378_v35, %v3617_v36  ;;  %v1645_v55 = vunpack.c.l.b16 %v1606_v38  ;;  %v1646_v63 = vunpack.c.h.b16 %v1606_v38  ;;  %v4436_v36 = vld [vmem:[%s6439_s3 + $0x6f4] sm:$0xf]  ;;  %v3863_v9 = vld [vmem:[%s6439_s3 + $0x6d0] sm:$0xf] }
  0xb1   : > { %1596 = vmatmul.bf16.vlgmr.msra.gmra.mxu3 %v1383_v50  ;;  %v4377_v50 = vld [vmem:[%s6439_s3 + $0x514] sm:$0xf0]  ;;  %v541_v20 = vpop.f32.mrf.mxu2 }
  0xb2   : > { %1824 = vmatpush.bf16.msrb.mxu0 %v3648_v51  ;;  %v3671_v51 = vld [vmem:[%s6439_s3 + $0x590] sm:$0xf]  ;;  %v1651_v14 = vpack.c.b16 %v1647_v57, %v1645_v55  ;;  %v1652_v21 = vpack.c.b16 %v1648_v0, %v1646_v63  ;;  %v4435_v55 = vld [vmem:[%s6439_s3 + $0x6e4] sm:$0xf0]  ;;  %v3873_v63 = vld [vmem:[%s6439_s3 + $0x6e8] sm:$0xf0] }
  0xb3   : > { %1838 = vmatpush.bf16.msrb.mxu1 %v3712_v52  ;;  %1852 = vmatpush.bf16.msrb.mxu2 %v3652_v54  ;;  %v4393_v52 = vld [vmem:[%s6439_s3 + $0x594] sm:$0xf0]  ;;  %v5743_v54 = vadd.f32 %v527_v49, %v513_v44  ;;  %v3816_v44 = vor.u32 %v4421_v24, %v3815_v23  ;;  %v3807_v49 = vld [vmem:[%s6439_s3 + $0x660] sm:$0xf]  ;;  %v4415_v23 = vld [vmem:[%s6439_s3 + $0x644] sm:$0xf0] }
  0xb4   : > { %1866 = vmatpush.bf16.msrb.mxu3 %v3716_v59  ;;  %v3684_v59 = vor.u32 %v4394_v41, %v3681_v42  ;;  %v3672_v6 = vor.u32 %v4393_v52, %v3671_v51  ;;  %v555_v26 = vpop.f32.mrf.mxu3  ;;  %v1655_v38 = vrot.slane %v1651_v14, 2  ;;  %v3871_v51 = vld [vmem:[%s6439_s3 + $0x6e0] sm:$0xf]  ;;  %v4416_v14 = vld [vmem:[%s6439_s3 + $0x654] sm:$0xf] }
  0xb5   : > { %v3855_v24 = vld [vmem:[%s6439_s3 + $0x6c0] sm:$0xf] }
  0xb6   : > { %1825 = vmatpush.bf16.msrb.mxu0 %v3640_v3  ;;  %v4392_v3 = vld [vmem:[%s6439_s3 + $0x594] sm:$0xf]  ;;  %v529_v34 = vpop.f32.mrf.mxu1 }
  0xb7   : > { %1839 = vmatpush.bf16.msrb.mxu1 %v3704_v4  ;;  %1853 = vmatpush.bf16.msrb.mxu2 %v3644_v5  ;;  %v3673_v4 = vld [vmem:[%s6439_s3 + $0x598] sm:$0xf0]  ;;  %v3608_v5 = vor.u32 %v4377_v50, %v3607_v48  ;;  %v3820_v48 = vor.u32 %v4420_v30, %v3817_v31  ;;  %v4419_v50 = vld [vmem:[%s6439_s3 + $0x664] sm:$0xf0]  ;;  %v4430_v30 = vld [vmem:[%s6439_s3 + $0x6c4] sm:$0xf] }
  0xb8   : > { %1867 = vmatpush.bf16.msrb.mxu3 %v3708_v10  ;;  %v3612_v10 = vor.u32 %v4376_v60, %v3609_v61  ;;  %v1657_v60 = vsel %vm1100_vm0, %v1655_v38, %v1656_v40  ;;  %v4434_v61 = vld [vmem:[%s6439_s3 + $0x6e4] sm:$0xf]  ;;  %v3857_v31 = vld [vmem:[%s6439_s3 + $0x6c8] sm:$0xf0]  ;;  %v3783_v38 = vld [vmem:[%s6439_s3 + $0x630] sm:$0xf] }
  0xb9   : > { %v4413_v40 = vld [vmem:[%s6439_s3 + $0x634] sm:$0xf0] }
  0xba   : > { %1826 = vmatpush.bf16.msrb.mxu0 %v3632_v16  ;;  %v3676_v16 = vor.u32 %v4392_v3, %v3673_v4  ;;  %v3808_v3 = vor.u32 %v4419_v50, %v3807_v49  ;;  %v3872_v4 = vor.u32 %v4435_v55, %v3871_v51  ;;  %v3849_v49 = vld [vmem:[%s6439_s3 + $0x6b8] sm:$0xf0]  ;;  %v3784_v50 = vor.u32 %v4413_v40, %v3783_v38  ;;  %v3775_v55 = vld [vmem:[%s6439_s3 + $0x620] sm:$0xf]  ;;  %v4422_v38 = vld [vmem:[%s6439_s3 + $0x684] sm:$0xf] }
  0xbb   : > { %1840 = vmatpush.bf16.msrb.mxu1 %v3696_v17  ;;  %1854 = vmatpush.bf16.msrb.mxu2 %v3636_v18  ;;  %v3601_v17 = vld [vmem:[%s6439_s3 + $0x508] sm:$0xf0]  ;;  %v4390_v18 = vld [vmem:[%s6439_s3 + $0x584] sm:$0xf] }
  0xbc   : > { %1868 = vmatpush.bf16.msrb.mxu3 %v3700_v22  ;;  %v1654_v22 = vpack.c.b16 %v1650_v2, %v1650_v2  ;;  %v3604_v35 = vor.u32 %v4374_v13, %v3601_v17  ;;  %v3668_v42 = vor.u32 %v4390_v18, %v3665_v19  ;;  %v4433_v13 = vld [vmem:[%s6439_s3 + $0x6d4] sm:$0xf0]  ;;  %v4432_v17 = vld [vmem:[%s6439_s3 + $0x6d4] sm:$0xf]  ;;  %v3865_v18 = vld [vmem:[%s6439_s3 + $0x6d8] sm:$0xf0] }
  0xbd   : > { %v3825_v40 = vld [vmem:[%s6439_s3 + $0x688] sm:$0xf0] }
  0xbe   : > { %1827 = vmatpush.bf16.msrb.mxu0 %v3624_v28  ;;  %v3664_v28 = vor.u32 %v4391_v12, %v3663_v11  ;;  %v557_v11 = vpop.f32.mrf.mxu3  ;;  %v3876_v12 = vor.u32 %v4434_v61, %v3873_v63  ;;  %v4427_v63 = vld [vmem:[%s6439_s3 + $0x6a4] sm:$0xf0] }
  0xbf   : > { %1841 = vmatpush.bf16.msrb.mxu1 %v3688_v32  ;;  %1855 = vmatpush.bf16.msrb.mxu2 %v3628_v33  ;;  %v515_v32 = vpop.f32.mrf.mxu0  ;;  %v5805_v33 = vadd.f32 %v555_v26, %v541_v20  ;;  %v3864_v20 = vor.u32 %v4433_v13, %v3863_v9  ;;  %v4431_v26 = vld [vmem:[%s6439_s3 + $0x6c4] sm:$0xf0]  ;;  %v3841_v9 = vld [vmem:[%s6439_s3 + $0x6a8] sm:$0xf0] }
  0xc0   : > { %1869 = vmatpush.bf16.msrb.mxu3 %v3692_v37  ;;  %v3881_v37 = vld [vmem:[%s6439_s3 + $0x6f8] sm:$0xf0]  ;;  %v5813_v41 = vadd.f32 %v529_v34, %v515_v32 }
  0xc1   : > { %v3884_v52 = vor.u32 %v4436_v36, %v3881_v37  ;;  %v3856_v36 = vor.u32 %v4431_v26, %v3855_v24  ;;  %v3833_v24 = vld [vmem:[%s6439_s3 + $0x698] sm:$0xf0]  ;;  %v3759_v26 = vld [vmem:[%s6439_s3 + $0x600] sm:$0xf] }
  0xc2   : > { %1828 = vmatpush.bf16.msrb.mxu0 %v3616_v45  ;;  %v1658_v45 = vrot.slane %v1652_v21, 2  ;;  %v3804_v21 = vor.u32 %v4416_v14, %v3801_v15  ;;  %v3767_v15 = vld [vmem:[%s6439_s3 + $0x610] sm:$0xf] }
  0xc3   : > { %1842 = vmatpush.bf16.msrb.mxu1 %v3680_v46  ;;  %1856 = vmatpush.bf16.msrb.mxu2 %v3620_v47  ;;  %v1659_v46 = vrot.slane %v1654_v22, 2  ;;  %v3880_v47 = vor.u32 %v4437_v29, %v3879_v25  ;;  %v3791_v22 = vld [vmem:[%s6439_s3 + $0x640] sm:$0xf]  ;;  %v3868_v25 = vor.u32 %v4432_v17, %v3865_v18  ;;  %v4409_v17 = vld [vmem:[%s6439_s3 + $0x614] sm:$0xf0] }
  0xc4   : > { %1870 = vmatpush.bf16.msrb.mxu3 %v3684_v59  ;;  %v3809_v59 = vld [vmem:[%s6439_s3 + $0x668] sm:$0xf0]  ;;  %v3792_v34 = vor.u32 %v4415_v23, %v3791_v22  ;;  %v3769_v22 = vld [vmem:[%s6439_s3 + $0x618] sm:$0xf0]  ;;  %v4424_v23 = vld [vmem:[%s6439_s3 + $0x694] sm:$0xf] }
  0xc5   : > { %v1660_v2 = vsel %vm1100_vm0, %v1658_v45, %v1659_v46  ;;  %v4429_v45 = vld [vmem:[%s6439_s3 + $0x6b4] sm:$0xf0]  ;;  %v4412_v46 = vld [vmem:[%s6439_s3 + $0x634] sm:$0xf] }
  0xc6   : > { %1829 = vmatpush.bf16.msrb.mxu0 %v3608_v5  ;;  %v3812_v5 = vor.u32 %v4418_v58, %v3809_v59  ;;  %v4411_v58 = vld [vmem:[%s6439_s3 + $0x624] sm:$0xf0]  ;;  %v3839_v59 = vld [vmem:[%s6439_s3 + $0x6a0] sm:$0xf] }
  0xc7   : > { %1843 = vmatpush.bf16.msrb.mxu1 %v3672_v6  ;;  %1857 = vmatpush.bf16.msrb.mxu2 %v3612_v10  ;;  %v3799_v6 = vld [vmem:[%s6439_s3 + $0x650] sm:$0xf]  ;;  %v543_v10 = vpop.f32.mrf.mxu2 }
  0xc8   : > { %1871 = vmatpush.bf16.msrb.mxu3 %v3676_v16  ;;  %v5859_v16 = vadd.f32 %v557_v11, %v543_v10  ;;  %v3800_v19 = vor.u32 %v4417_v8, %v3799_v6  ;;  %v4426_v8 = vld [vmem:[%s6439_s3 + $0x6a4] sm:$0xf]  ;;  %v3776_v11 = vor.u32 %v4411_v58, %v3775_v55 }
  0xc9   : > { %v3844_v18 = vor.u32 %v4426_v8, %v3841_v9  ;;  %v4031_v8 = vld [vmem:[%s6439_s3 + $0x7e0] sm:$0xf] }
  0xca   : > { %1830 = vmatpush.bf16.msrb.mxu0 %v3600_v27  ;;  %v4414_v27 = vld [vmem:[%s6439_s3 + $0x644] sm:$0xf]  ;;  %v739_v29 = vpop.f32.mrf.mxu0 }
  0xcb   : > { %1844 = vmatpush.bf16.msrb.mxu1 %v3664_v28  ;;  %1858 = vmatpush.bf16.msrb.mxu2 %v3604_v35  ;;  %v3793_v28 = vld [vmem:[%s6439_s3 + $0x648] sm:$0xf0]  ;;  %v740_v32 = vadd.f32 %v739_v29, %v5743_v54  ;;  %v3860_v54 = vor.u32 %v4430_v30, %v3857_v31  ;;  %v4423_v31 = vld [vmem:[%s6439_s3 + $0x684] sm:$0xf0] }
  0xcc   : > { %1872 = vmatpush.bf16.msrb.mxu3 %v3668_v42  ;;  %v3796_v37 = vor.u32 %v4414_v27, %v3793_v28  ;;  %v3847_v42 = vld [vmem:[%s6439_s3 + $0x6b0] sm:$0xf]  ;;  %v4407_v27 = vld [vmem:[%s6439_s3 + $0x604] sm:$0xf0]  ;;  %v3823_v28 = vld [vmem:[%s6439_s3 + $0x680] sm:$0xf] }
  0xcd   : > { %1831 = vmatmul.bf16.vlgmr.msrb.gmra.mxu0 %v1657_v60  ;;  %v753_v35 = vpop.f32.mrf.mxu1  ;;  %v3848_v51 = vor.u32 %v4429_v45, %v3847_v42  ;;  %v3975_v45 = vld [vmem:[%s6439_s3 + $0x770] sm:$0xf]  ;;  %v3824_v55 = vor.u32 %v4423_v31, %v3823_v28  ;;  %v4447_v31 = vld [vmem:[%s6439_s3 + $0x744] sm:$0xf0] }
  0xce   : > { %2084 = vmatpush.bf16.msra.mxu0 %v3816_v44  ;;  %1845 = vmatmul.bf16.vlgmr.msrb.gmra.mxu1 %v1660_v2  ;;  %v5901_v44 = vadd.f32 %v753_v35, %v740_v32  ;;  %v4406_v32 = vld [vmem:[%s6439_s3 + $0x604] sm:$0xf]  ;;  %v3836_v35 = vor.u32 %v4424_v23, %v3833_v24  ;;  %v4448_v23 = vld [vmem:[%s6439_s3 + $0x754] sm:$0xf]  ;;  %v3961_v24 = vld [vmem:[%s6439_s3 + $0x758] sm:$0xf0] }
  0xcf   : > { %2098 = vmatpush.bf16.msra.mxu1 %v3880_v47  ;;  %2112 = vmatpush.bf16.msra.mxu2 %v3820_v48  ;;  %v3785_v47 = vld [vmem:[%s6439_s3 + $0x638] sm:$0xf0]  ;;  %v4428_v48 = vld [vmem:[%s6439_s3 + $0x6b4] sm:$0xf] }
  0xd0   : > { %2126 = vmatpush.bf16.msra.mxu3 %v3884_v52  ;;  %1859 = vmatmul.bf16.vlgmr.msrb.gmra.mxu2 %v1657_v60  ;;  %v3788_v52 = vor.u32 %v4412_v46, %v3785_v47  ;;  %v3852_v60 = vor.u32 %v4428_v48, %v3849_v49  ;;  %v4453_v46 = vld [vmem:[%s6439_s3 + $0x774] sm:$0xf0]  ;;  %v4039_v47 = vld [vmem:[%s6439_s3 + $0x7f0] sm:$0xf]  ;;  %v3760_v48 = vor.u32 %v4407_v27, %v3759_v26  ;;  %v4025_v26 = vld [vmem:[%s6439_s3 + $0x7d8] sm:$0xf0] }
  0xd1   : > { %1873 = vmatmul.bf16.vlgmr.msrb.gmra.mxu3 %v1660_v2  ;;  %v767_v61 = vpop.f32.mrf.mxu2  ;;  %v4410_v2 = vld [vmem:[%s6439_s3 + $0x624] sm:$0xf]  ;;  %v4469_v49 = vld [vmem:[%s6439_s3 + $0x7f4] sm:$0xf0] }
  0xd2   : > { %2085 = vmatpush.bf16.msra.mxu0 %v3808_v3  ;;  %v3777_v3 = vld [vmem:[%s6439_s3 + $0x628] sm:$0xf0] }
  0xd3   : > { %2099 = vmatpush.bf16.msra.mxu1 %v3872_v4  ;;  %2113 = vmatpush.bf16.msra.mxu2 %v3812_v5  ;;  %v768_v4 = vadd.f32 %v767_v61, %v5805_v33  ;;  %v741_v5 = vpop.f32.mrf.mxu0  ;;  %v3840_v33 = vor.u32 %v4427_v63, %v3839_v59  ;;  %v3780_v14 = vor.u32 %v4410_v2, %v3777_v3  ;;  %v4468_v59 = vld [vmem:[%s6439_s3 + $0x7f4] sm:$0xf] }
  0xd4   : > { %2127 = vmatpush.bf16.msra.mxu3 %v3876_v12  ;;  %v781_v6 = vpop.f32.mrf.mxu3  ;;  %v742_v10 = vadd.f32 %v741_v5, %v5813_v41  ;;  %v3831_v41 = vld [vmem:[%s6439_s3 + $0x690] sm:$0xf]  ;;  %v3828_v63 = vor.u32 %v4422_v38, %v3825_v40  ;;  %v3976_v2 = vor.u32 %v4453_v46, %v3975_v45  ;;  %v4040_v3 = vor.u32 %v4469_v49, %v4039_v47  ;;  %v3967_v5 = vld [vmem:[%s6439_s3 + $0x760] sm:$0xf]  ;;  %v4462_v40 = vld [vmem:[%s6439_s3 + $0x7c4] sm:$0xf] }
  0xd5   : > { %v755_v12 = vpop.f32.mrf.mxu1  ;;  %v5944_v13 = vadd.f32 %v781_v6, %v768_v4  ;;  %v4451_v6 = vld [vmem:[%s6439_s3 + $0x764] sm:$0xf0]  ;;  %v3943_v49 = vld [vmem:[%s6439_s3 + $0x730] sm:$0xf] }
  0xd6   : > { %2086 = vmatpush.bf16.msra.mxu0 %v3800_v19  ;;  %v5955_v19 = vadd.f32 %v755_v12, %v742_v10  ;;  %v4450_v12 = vld [vmem:[%s6439_s3 + $0x764] sm:$0xf] }
  0xd7   : > { %2100 = vmatpush.bf16.msra.mxu1 %v3864_v20  ;;  %2114 = vmatpush.bf16.msra.mxu2 %v3804_v21  ;;  %v4425_v20 = vld [vmem:[%s6439_s3 + $0x694] sm:$0xf0]  ;;  %v4408_v21 = vld [vmem:[%s6439_s3 + $0x614] sm:$0xf] }
  0xd8   : > { %2128 = vmatpush.bf16.msra.mxu3 %v3868_v25  ;;  %v3768_v25 = vor.u32 %v4409_v17, %v3767_v15  ;;  %v3832_v29 = vor.u32 %v4425_v20, %v3831_v41  ;;  %v3772_v30 = vor.u32 %v4408_v21, %v3769_v22  ;;  %v4033_v15 = vld [vmem:[%s6439_s3 + $0x7e8] sm:$0xf0]  ;;  %v3968_v17 = vor.u32 %v4451_v6, %v3967_v5  ;;  %v4023_v20 = vld [vmem:[%s6439_s3 + $0x7d0] sm:$0xf]  ;;  %v4465_v22 = vld [vmem:[%s6439_s3 + $0x7d4] sm:$0xf0] }
  0xd9   : > { %v4024_v28 = vor.u32 %v4465_v22, %v4023_v20  ;;  %v3935_v5 = vld [vmem:[%s6439_s3 + $0x720] sm:$0xf]  ;;  %v4441_v22 = vld [vmem:[%s6439_s3 + $0x714] sm:$0xf0] }
  0xda   : > { %2087 = vmatpush.bf16.msra.mxu0 %v3792_v34  ;;  %v1883_v34 = vld [vmem:[%s4967_s13 + $0x10] sm:$0xff]  ;;  %v3999_v6 = vld [vmem:[%s6439_s3 + $0x7a0] sm:$0xf] }
  0xdb   : > { %2101 = vmatpush.bf16.msra.mxu1 %v3856_v36  ;;  %2115 = vmatpush.bf16.msra.mxu2 %v3796_v37  ;;  %v769_v36 = vpop.f32.mrf.mxu2  ;;  %v3761_v37 = vld [vmem:[%s6439_s3 + $0x608] sm:$0xf0]  ;;  %v1919_v61 = vunpack.c.h.b16 %v1883_v34 }
  0xdc   : > { %2129 = vmatpush.bf16.msra.mxu3 %v3860_v54  ;;  %v770_v42 = vadd.f32 %v769_v36, %v5859_v16  ;;  %v783_v54 = vpop.f32.mrf.mxu3  ;;  %v4452_v16 = vld [vmem:[%s6439_s3 + $0x774] sm:$0xf]  ;;  %v3764_v58 = vor.u32 %v4406_v32, %v3761_v37  ;;  %v4015_v32 = vld [vmem:[%s6439_s3 + $0x7c0] sm:$0xf]  ;;  %v4446_v36 = vld [vmem:[%s6439_s3 + $0x744] sm:$0xf] }
  0xdd   : > { %v3953_v37 = vld [vmem:[%s6439_s3 + $0x748] sm:$0xf0] }
  0xde   : > { %2088 = vmatpush.bf16.msra.mxu0 %v3784_v50  ;;  %v3977_v50 = vld [vmem:[%s6439_s3 + $0x778] sm:$0xf0] }
  0xdf   : > { %2102 = vmatpush.bf16.msra.mxu1 %v3848_v51  ;;  %2116 = vmatpush.bf16.msra.mxu2 %v3788_v52  ;;  %v1918_v51 = vunpack.c.l.b16 %v1883_v34  ;;  %v6016_v52 = vadd.f32 %v783_v54, %v770_v42  ;;  %v3980_v4 = vor.u32 %v4452_v16, %v3977_v50  ;;  %v4017_v42 = vld [vmem:[%s6439_s3 + $0x7c8] sm:$0xf0]  ;;  %v4445_v16 = vld [vmem:[%s6439_s3 + $0x734] sm:$0xf0]  ;;  %v4007_v50 = vld [vmem:[%s6439_s3 + $0x7b0] sm:$0xf] }
  0xe0   : > { %2130 = vmatpush.bf16.msra.mxu3 %v3852_v60  ;;  %v4041_v60 = vld [vmem:[%s6439_s3 + $0x7f8] sm:$0xf0] }
  0xe1   : > { %v4044_v9 = vor.u32 %v4468_v59, %v4041_v60  ;;  %v1920_v10 = vpack.c.b16 %v1918_v51, %v1092_v1  ;;  %v4466_v1 = vld [vmem:[%s6439_s3 + $0x7e4] sm:$0xf]  ;;  %v4020_v51 = vor.u32 %v4462_v40, %v4017_v42  ;;  %v3945_v59 = vld [vmem:[%s6439_s3 + $0x738] sm:$0xf0]  ;;  %v2144_v40 = vld [vmem:[%s4852_s27 + $0x10] sm:$0xff] }
  0xe2   : > { %2089 = vmatpush.bf16.msra.mxu0 %v3776_v11  ;;  %v4467_v11 = vld [vmem:[%s6439_s3 + $0x7e4] sm:$0xf0]  ;;  %v4036_v21 = vor.u32 %v4466_v1, %v4033_v15  ;;  %v4458_v1 = vld [vmem:[%s6439_s3 + $0x7a4] sm:$0xf]  ;;  %v4001_v15 = vld [vmem:[%s6439_s3 + $0x7a8] sm:$0xf0] }
  0xe3   : > { %2103 = vmatpush.bf16.msra.mxu1 %v3840_v33  ;;  %2117 = vmatpush.bf16.msra.mxu2 %v3780_v14  ;;  %v3969_v33 = vld [vmem:[%s6439_s3 + $0x768] sm:$0xf0]  ;;  %v1921_v14 = vpack.c.b16 %v1919_v61, %v1093_v7  ;;  %v4032_v41 = vor.u32 %v4467_v11, %v4031_v8  ;;  %v4449_v7 = vld [vmem:[%s6439_s3 + $0x754] sm:$0xf0]  ;;  %v4460_v61 = vld [vmem:[%s6439_s3 + $0x7b4] sm:$0xf] }
  0xe4   : > { %2131 = vmatpush.bf16.msra.mxu3 %v3844_v18  ;;  %v3972_v18 = vor.u32 %v4450_v12, %v3969_v33  ;;  %v3960_v27 = vor.u32 %v4449_v7, %v3959_v53  ;;  %v4442_v11 = vld [vmem:[%s6439_s3 + $0x724] sm:$0xf]  ;;  %v3937_v12 = vld [vmem:[%s6439_s3 + $0x728] sm:$0xf0] }
  0xe5   : > { %v3940_v20 = vor.u32 %v4442_v11, %v3937_v12  ;;  %v4127_v12 = vld [vmem:[%s6439_s3 + $0x860] sm:$0xf] }
  0xe6   : > { %2090 = vmatpush.bf16.msra.mxu0 %v3768_v25  ;;  %v4464_v25 = vld [vmem:[%s6439_s3 + $0x7d4] sm:$0xf] }
  0xe7   : > { %2104 = vmatpush.bf16.msra.mxu1 %v3832_v29  ;;  %2118 = vmatpush.bf16.msra.mxu2 %v3772_v30  ;;  %v3964_v29 = vor.u32 %v4448_v23, %v3961_v24  ;;  %v3951_v30 = vld [vmem:[%s6439_s3 + $0x740] sm:$0xf]  ;;  %v4028_v34 = vor.u32 %v4464_v25, %v4025_v26  ;;  %v3991_v23 = vld [vmem:[%s6439_s3 + $0x790] sm:$0xf]  ;;  %v4004_v25 = vor.u32 %v4458_v1, %v4001_v15  ;;  %v4457_v26 = vld [vmem:[%s6439_s3 + $0x794] sm:$0xf0] }
  0xe8   : > { %2132 = vmatpush.bf16.msra.mxu3 %v3836_v35  ;;  %v4463_v35 = vld [vmem:[%s6439_s3 + $0x7c4] sm:$0xf0]  ;;  %v3952_v45 = vor.u32 %v4447_v31, %v3951_v30  ;;  %v3993_v30 = vld [vmem:[%s6439_s3 + $0x798] sm:$0xf0] }
  0xe9   : > { %v4016_v47 = vor.u32 %v4463_v35, %v4015_v32  ;;  %v3919_v32 = vld [vmem:[%s6439_s3 + $0x700] sm:$0xf]  ;;  %v3992_v35 = vor.u32 %v4457_v26, %v3991_v23  ;;  %v4499_v15 = vld [vmem:[%s6439_s3 + $0x8e4] sm:$0xf0]  ;;  %v4480_v26 = vld [vmem:[%s6439_s3 + $0x854] sm:$0xf] }
  0xea   : > { %2091 = vmatpush.bf16.msra.mxu0 %v3760_v48  ;;  %v1000_v38 = vpop.f32.mrf.mxu0  ;;  %v3956_v48 = vor.u32 %v4446_v36, %v3953_v37  ;;  %v4455_v37 = vld [vmem:[%s6439_s3 + $0x784] sm:$0xf0] }
  0xeb   : > { %2105 = vmatpush.bf16.msra.mxu1 %v3824_v55  ;;  %2119 = vmatpush.bf16.msra.mxu2 %v3764_v58  ;;  %v1014_v54 = vpop.f32.mrf.mxu1  ;;  %v4461_v55 = vld [vmem:[%s6439_s3 + $0x7b4] sm:$0xf0]  ;;  %v4444_v58 = vld [vmem:[%s6439_s3 + $0x734] sm:$0xf] }
  0xec   : > { %2133 = vmatpush.bf16.msra.mxu3 %v3828_v63  ;;  %v1015_v46 = vadd.f32 %v1014_v54, %v1000_v38  ;;  %v4009_v63 = vld [vmem:[%s6439_s3 + $0x7b8] sm:$0xf0]  ;;  %v4438_v38 = vld [vmem:[%s6439_s3 + $0x704] sm:$0xf] }
  0xed   : > { %2092 = vmatmul.bf16.vlgmr.msra.gmra.mxu0 %v1920_v10  ;;  %v4012_v8 = vor.u32 %v4460_v61, %v4009_v63  ;;  %v4137_v61 = vld [vmem:[%s6439_s3 + $0x878] sm:$0xf0]  ;;  %v2179_v63 = vunpack.c.l.b16 %v2144_v40 }
  0xee   : > { %2345 = vmatpush.bf16.msrb.mxu0 %v3976_v2  ;;  %2106 = vmatmul.bf16.vlgmr.msra.gmra.mxu1 %v1921_v14  ;;  %v6119_v60 = vadd.f32 %v1015_v46, %v5901_v44  ;;  %v3944_v2 = vor.u32 %v4445_v16, %v3943_v49  ;;  %v4443_v44 = vld [vmem:[%s6439_s3 + $0x724] sm:$0xf0]  ;;  %v4454_v46 = vld [vmem:[%s6439_s3 + $0x784] sm:$0xf]  ;;  %v4135_v49 = vld [vmem:[%s6439_s3 + $0x870] sm:$0xf] }
  0xef   : > { %2359 = vmatpush.bf16.msrb.mxu1 %v4040_v3  ;;  %2373 = vmatpush.bf16.msrb.mxu2 %v3980_v4  ;;  %v4008_v3 = vor.u32 %v4461_v55, %v4007_v50  ;;  %v3948_v4 = vor.u32 %v4444_v58, %v3945_v59  ;;  %v4485_v16 = vld [vmem:[%s6439_s3 + $0x874] sm:$0xf0]  ;;  %v4199_v50 = vld [vmem:[%s6439_s3 + $0x8f0] sm:$0xf]  ;;  %v4484_v59 = vld [vmem:[%s6439_s3 + $0x874] sm:$0xf] }
  0xf0   : > { %2387 = vmatpush.bf16.msrb.mxu3 %v4044_v9  ;;  %2120 = vmatmul.bf16.vlgmr.msra.gmra.mxu2 %v1920_v10  ;;  %v4459_v10 = vld [vmem:[%s6439_s3 + $0x7a4] sm:$0xf0]  ;;  %v4501_v58 = vld [vmem:[%s6439_s3 + $0x8f4] sm:$0xf0]  ;;  %v4140_v11 = vor.u32 %v4484_v59, %v4137_v61  ;;  %v4476_v61 = vld [vmem:[%s6439_s3 + $0x834] sm:$0xf] }
  0xf1   : > { %2134 = vmatmul.bf16.vlgmr.msra.gmra.mxu3 %v1921_v14  ;;  %v4000_v7 = vor.u32 %v4459_v10, %v3999_v6  ;;  %v4200_v10 = vor.u32 %v4501_v58, %v4199_v50  ;;  %v4103_v50 = vld [vmem:[%s6439_s3 + $0x830] sm:$0xf]  ;;  %v4493_v59 = vld [vmem:[%s6439_s3 + $0x8b4] sm:$0xf0] }
  0xf2   : > { %2346 = vmatpush.bf16.msrb.mxu0 %v3968_v17  ;;  %v1002_v14 = vpop.f32.mrf.mxu0 }
  0xf3   : > { %2360 = vmatpush.bf16.msrb.mxu1 %v4032_v41  ;;  %2374 = vmatpush.bf16.msrb.mxu2 %v3972_v18  ;;  %v1028_v9 = vpop.f32.mrf.mxu2  ;;  %v1016_v41 = vpop.f32.mrf.mxu1  ;;  %v3936_v18 = vor.u32 %v4443_v44, %v3935_v5  ;;  %v4201_v5 = vld [vmem:[%s6439_s3 + $0x8f8] sm:$0xf0]  ;;  %v2180_v44 = vunpack.c.h.b16 %v2144_v40  ;;  %v4113_v40 = vld [vmem:[%s6439_s3 + $0x848] sm:$0xf0] }
  0xf4   : > { %2388 = vmatpush.bf16.msrb.mxu3 %v4036_v21  ;;  %v1042_v33 = vpop.f32.mrf.mxu3  ;;  %v1017_v53 = vadd.f32 %v1016_v41, %v1002_v14  ;;  %v3927_v21 = vld [vmem:[%s6439_s3 + $0x710] sm:$0xf]  ;;  %v4191_v14 = vld [vmem:[%s6439_s3 + $0x8e0] sm:$0xf]  ;;  %v4129_v41 = vld [vmem:[%s6439_s3 + $0x868] sm:$0xf0] }
  0xf5   : > { %v1043_v17 = vadd.f32 %v1042_v33, %v1028_v9  ;;  %v3928_v31 = vor.u32 %v4441_v22, %v3927_v21  ;;  %v4136_v9 = vor.u32 %v4485_v16, %v4135_v49  ;;  %v4483_v33 = vld [vmem:[%s6439_s3 + $0x864] sm:$0xf0]  ;;  %v4183_v22 = vld [vmem:[%s6439_s3 + $0x8d0] sm:$0xf] }
  0xf6   : > { %2347 = vmatpush.bf16.msrb.mxu0 %v3960_v27  ;;  %v4440_v27 = vld [vmem:[%s6439_s3 + $0x714] sm:$0xf] }
  0xf7   : > { %2361 = vmatpush.bf16.msrb.mxu1 %v4024_v28  ;;  %2375 = vmatpush.bf16.msrb.mxu2 %v3964_v29  ;;  %v6161_v24 = vadd.f32 %v1043_v17, %v5944_v13  ;;  %v3929_v28 = vld [vmem:[%s6439_s3 + $0x718] sm:$0xf0]  ;;  %v6173_v29 = vadd.f32 %v1017_v53, %v5955_v19  ;;  %v4456_v13 = vld [vmem:[%s6439_s3 + $0x794] sm:$0xf]  ;;  %v3983_v19 = vld [vmem:[%s6439_s3 + $0x780] sm:$0xf] }
  0xf8   : > { %2389 = vmatpush.bf16.msrb.mxu3 %v4028_v34  ;;  %v4439_v34 = vld [vmem:[%s6439_s3 + $0x704] sm:$0xf0]  ;;  %v3932_v36 = vor.u32 %v4440_v27, %v3929_v28  ;;  %v3996_v42 = vor.u32 %v4456_v13, %v3993_v30  ;;  %v4482_v17 = vld [vmem:[%s6439_s3 + $0x864] sm:$0xf]  ;;  %v4193_v53 = vld [vmem:[%s6439_s3 + $0x8e8] sm:$0xf0] }
  0xf9   : > { %v3920_v55 = vor.u32 %v4439_v34, %v3919_v32  ;;  %v4132_v21 = vor.u32 %v4482_v17, %v4129_v41  ;;  %v4121_v27 = vld [vmem:[%s6439_s3 + $0x858] sm:$0xf0]  ;;  %v4496_v28 = vld [vmem:[%s6439_s3 + $0x8d4] sm:$0xf]  ;;  %v4111_v34 = vld [vmem:[%s6439_s3 + $0x840] sm:$0xf] }
  0xfa   : > { %2348 = vmatpush.bf16.msrb.mxu0 %v3952_v45  ;;  %v3921_v45 = vld [vmem:[%s6439_s3 + $0x708] sm:$0xf0]  ;;  %v4185_v13 = vld [vmem:[%s6439_s3 + $0x8d8] sm:$0xf0]  ;;  %v4124_v32 = vor.u32 %v4480_v26, %v4121_v27  ;;  %v4490_v17 = vld [vmem:[%s6439_s3 + $0x8a4] sm:$0xf] }
  0xfb   : > { %2362 = vmatpush.bf16.msrb.mxu1 %v4016_v47  ;;  %2376 = vmatpush.bf16.msrb.mxu2 %v3956_v48  ;;  %v1030_v54 = vpop.f32.mrf.mxu2  ;;  %v3985_v47 = vld [vmem:[%s6439_s3 + $0x788] sm:$0xf0]  ;;  %v4489_v26 = vld [vmem:[%s6439_s3 + $0x894] sm:$0xf0]  ;;  %v4472_v27 = vld [vmem:[%s6439_s3 + $0x814] sm:$0xf] }
  0xfc   : > { %2390 = vmatpush.bf16.msrb.mxu3 %v4020_v51  ;;  %v1044_v48 = vpop.f32.mrf.mxu3  ;;  %v4161_v41 = vld [vmem:[%s6439_s3 + $0x8a8] sm:$0xf0] }
  0xfd   : > { %v1045_v51 = vadd.f32 %v1044_v48, %v1030_v54  ;;  %v4494_v54 = vld [vmem:[%s6439_s3 + $0x8c4] sm:$0xf] }
  0xfe   : > { %2349 = vmatpush.bf16.msrb.mxu0 %v3944_v2  ;;  %v3984_v2 = vor.u32 %v4455_v37, %v3983_v19  ;;  %v4479_v19 = vld [vmem:[%s6439_s3 + $0x844] sm:$0xf0] }
  0xff   : > { %2363 = vmatpush.bf16.msrb.mxu1 %v4008_v3  ;;  %2377 = vmatpush.bf16.msrb.mxu2 %v3948_v4  ;;  %v3924_v3 = vor.u32 %v4438_v38, %v3921_v45  ;;  %v4500_v4 = vld [vmem:[%s6439_s3 + $0x8f4] sm:$0xf]  ;;  %v6231_v6 = vadd.f32 %v1045_v51, %v6016_v52  ;;  %v2181_v52 = vpack.c.b16 %v2179_v63, %v1370_v56  ;;  %v4498_v56 = vld [vmem:[%s6439_s3 + $0x8e4] sm:$0xf]  ;;  %v4495_v37 = vld [vmem:[%s6439_s3 + $0x8c4] sm:$0xf0] }
 0x100   : > { %2391 = vmatpush.bf16.msrb.mxu3 %v4012_v8  ;;  %v3988_v8 = vor.u32 %v4454_v46, %v3985_v47  ;;  %v4204_v1 = vor.u32 %v4500_v4, %v4201_v5  ;;  %v4196_v23 = vor.u32 %v4498_v56, %v4193_v53  ;;  %v4478_v38 = vld [vmem:[%s6439_s3 + $0x844] sm:$0xf]  ;;  %v4177_v45 = vld [vmem:[%s6439_s3 + $0x8c8] sm:$0xf0]  ;;  %v4112_v47 = vor.u32 %v4479_v19, %v4111_v34  ;;  %v4477_v51 = vld [vmem:[%s6439_s3 + $0x834] sm:$0xf0] }
 0x101   : > { %v4116_v16 = vor.u32 %v4478_v38, %v4113_v40  ;;  %v4180_v58 = vor.u32 %v4494_v54, %v4177_v45  ;;  %v4105_v63 = vld [vmem:[%s6439_s3 + $0x838] sm:$0xf0]  ;;  %v4104_v5 = vor.u32 %v4477_v51, %v4103_v50  ;;  %v4487_v40 = vld [vmem:[%s6439_s3 + $0x884] sm:$0xf0]  ;;  %v4081_v54 = vld [vmem:[%s6439_s3 + $0x808] sm:$0xf0] }
 0x102   : > { %2350 = vmatpush.bf16.msrb.mxu0 %v3936_v18  ;;  %v2182_v18 = vpack.c.b16 %v2180_v44, %v1371_v62  ;;  %v4481_v62 = vld [vmem:[%s6439_s3 + $0x854] sm:$0xf0]  ;;  %v4169_v4 = vld [vmem:[%s6439_s3 + $0x8b8] sm:$0xf0] }
 0x103   : > { %2364 = vmatpush.bf16.msrb.mxu1 %v4000_v7  ;;  %2378 = vmatpush.bf16.msrb.mxu2 %v3940_v20  ;;  %v4128_v7 = vor.u32 %v4483_v33, %v4127_v12  ;;  %v4192_v20 = vor.u32 %v4499_v15, %v4191_v14  ;;  %v4120_v30 = vor.u32 %v4481_v62, %v4119_v43  ;;  %v4491_v33 = vld [vmem:[%s6439_s3 + $0x8a4] sm:$0xf0]  ;;  %v4474_v14 = vld [vmem:[%s6439_s3 + $0x824] sm:$0xf]  ;;  %v4087_v43 = vld [vmem:[%s6439_s3 + $0x810] sm:$0xf] }
 0x104   : > { %2392 = vmatpush.bf16.msrb.mxu3 %v4004_v25  ;;  %v4497_v25 = vld [vmem:[%s6439_s3 + $0x8d4] sm:$0xf0] }
 0x105   : > { %v4473_v62 = vld [vmem:[%s6439_s3 + $0x814] sm:$0xf0] }
 0x106   : > { %2351 = vmatpush.bf16.msrb.mxu0 %v3928_v31  ;;  %v4184_v31 = vor.u32 %v4497_v25, %v4183_v22  ;;  %v4151_v22 = vld [vmem:[%s6439_s3 + $0x890] sm:$0xf]  ;;  %v4164_v25 = vor.u32 %v4490_v17, %v4161_v41 }
 0x107   : > { %2365 = vmatpush.bf16.msrb.mxu1 %v3992_v35  ;;  %2379 = vmatpush.bf16.msrb.mxu2 %v3932_v36  ;;  %v4175_v35 = vld [vmem:[%s6439_s3 + $0x8c0] sm:$0xf]  ;;  %v4188_v36 = vor.u32 %v4496_v28, %v4185_v13  ;;  %v4089_v28 = vld [vmem:[%s6439_s3 + $0x818] sm:$0xf0]  ;;  %v4152_v34 = vor.u32 %v4489_v26, %v4151_v22 }
 0x108   : > { %2393 = vmatpush.bf16.msrb.mxu3 %v3996_v42  ;;  %v4176_v49 = vor.u32 %v4495_v37, %v4175_v35  ;;  %v4092_v19 = vor.u32 %v4472_v27, %v4089_v28  ;;  %v4471_v35 = vld [vmem:[%s6439_s3 + $0x804] sm:$0xf0] }
 0x10a   : > { %2352 = vmatpush.bf16.msrb.mxu0 %v3920_v55  ;;  %v1278_v42 = vpop.f32.mrf.mxu0  ;;  %v4167_v55 = vld [vmem:[%s6439_s3 + $0x8b0] sm:$0xf] }
 0x10b   : > { %2366 = vmatpush.bf16.msrb.mxu1 %v3984_v2  ;;  %2380 = vmatpush.bf16.msrb.mxu2 %v3924_v3  ;;  %v1292_v46 = vpop.f32.mrf.mxu1  ;;  %v4492_v3 = vld [vmem:[%s6439_s3 + $0x8b4] sm:$0xf]  ;;  %v4168_v44 = vor.u32 %v4493_v59, %v4167_v55 }
 0x10c   : > { %2394 = vmatpush.bf16.msrb.mxu3 %v3988_v8  ;;  %v1293_v48 = vadd.f32 %v1292_v46, %v1278_v42  ;;  %v4108_v8 = vor.u32 %v4476_v61, %v4105_v63  ;;  %v4470_v42 = vld [vmem:[%s6439_s3 + $0x804] sm:$0xf] }
 0x10d   : > { %2353 = vmatmul.bf16.vlgmr.msrb.gmra.mxu0 %v2181_v52  ;;  %v4486_v46 = vld [vmem:[%s6439_s3 + $0x884] sm:$0xf]  ;;  %v4084_v55 = vor.u32 %v4470_v42, %v4081_v54 }
 0x10e   : > { %2606 = vmatpush.bf16.msra.mxu0 %v4136_v9  ;;  %2367 = vmatmul.bf16.vlgmr.msrb.gmra.mxu1 %v2182_v18  ;;  %v6328_v2 = vadd.f32 %v1293_v48, %v6119_v60  ;;  %v4095_v9 = vld [vmem:[%s6439_s3 + $0x820] sm:$0xf]  ;;  %v4475_v60 = vld [vmem:[%s6439_s3 + $0x824] sm:$0xf0] }
 0x10f   : > { %2620 = vmatpush.bf16.msra.mxu1 %v4200_v10  ;;  %2634 = vmatpush.bf16.msra.mxu2 %v4140_v11  ;;  %v4159_v10 = vld [vmem:[%s6439_s3 + $0x8a0] sm:$0xf]  ;;  %v4172_v11 = vor.u32 %v4492_v3, %v4169_v4  ;;  %v4096_v53 = vor.u32 %v4475_v60, %v4095_v9 }
 0x110   : > { %2648 = vmatpush.bf16.msra.mxu3 %v4204_v1  ;;  %2381 = vmatmul.bf16.vlgmr.msrb.gmra.mxu2 %v2181_v52  ;;  %v4097_v1 = vld [vmem:[%s6439_s3 + $0x828] sm:$0xf0] }
 0x111   : > { %2395 = vmatmul.bf16.vlgmr.msrb.gmra.mxu3 %v2182_v18 }
 0x112   : > { %2607 = vmatpush.bf16.msra.mxu0 %v4128_v7  ;;  %v1280_v15 = vpop.f32.mrf.mxu0 }
 0x113   : > { %2621 = vmatpush.bf16.msra.mxu1 %v4192_v20  ;;  %2635 = vmatpush.bf16.msra.mxu2 %v4132_v21  ;;  %v1306_v12 = vpop.f32.mrf.mxu2  ;;  %v1294_v56 = vpop.f32.mrf.mxu1  ;;  %v4160_v20 = vor.u32 %v4491_v33, %v4159_v10  ;;  %v4100_v21 = vor.u32 %v4474_v14, %v4097_v1 }
 0x114   : > { %2649 = vmatpush.bf16.msra.mxu3 %v4196_v23  ;;  %v1320_v52 = vpop.f32.mrf.mxu3  ;;  %v1295_v7 = vadd.f32 %v1294_v56, %v1280_v15 }
 0x115   : > { %v1321_v18 = vadd.f32 %v1320_v52, %v1306_v12 }
 0x116   : > { %2608 = vmatpush.bf16.msra.mxu0 %v4120_v30  ;;  %v6382_v13 = vadd.f32 %v1295_v7, %v6173_v29  ;;  %v4153_v30 = vld [vmem:[%s6439_s3 + $0x898] sm:$0xf0]  ;;  %v4079_v29 = vld [vmem:[%s6439_s3 + $0x800] sm:$0xf] }
 0x117   : > { %2622 = vmatpush.bf16.msra.mxu1 %v4184_v31  ;;  %2636 = vmatpush.bf16.msra.mxu2 %v4124_v32  ;;  %v6370_v23 = vadd.f32 %v1321_v18, %v6161_v24  ;;  %v4488_v24 = vld [vmem:[%s6439_s3 + $0x894] sm:$0xf]  ;;  %v4088_v31 = vor.u32 %v4473_v62, %v4087_v43 }
 0x118   : > { %2650 = vmatpush.bf16.msra.mxu3 %v4188_v36  ;;  %v2405_v32 = vld [vmem:[%s5169_s26 + $0x10] sm:$0xff]  ;;  %v4143_v36 = vld [vmem:[%s6439_s3 + $0x880] sm:$0xf]  ;;  %v4156_v37 = vor.u32 %v4488_v24, %v4153_v30 }
 0x119   : > { %v2440_v48 = vunpack.c.l.b16 %v2405_v32  ;;  %v2441_v50 = vunpack.c.h.b16 %v2405_v32  ;;  %v4144_v51 = vor.u32 %v4487_v40, %v4143_v36 }
 0x11a   : > { %2609 = vmatpush.bf16.msra.mxu0 %v4112_v47  ;;  %v4145_v47 = vld [vmem:[%s6439_s3 + $0x888] sm:$0xf0] }
 0x11b   : > { %2623 = vmatpush.bf16.msra.mxu1 %v4176_v49  ;;  %2637 = vmatpush.bf16.msra.mxu2 %v4116_v16  ;;  %v1308_v38 = vpop.f32.mrf.mxu2  ;;  %v4080_v16 = vor.u32 %v4471_v35, %v4079_v29  ;;  %v4148_v59 = vor.u32 %v4486_v46, %v4145_v47  ;;  %v2442_v61 = vpack.c.b16 %v2440_v48, %v1647_v57 }
 0x11c   : > { %2651 = vmatpush.bf16.msra.mxu3 %v4180_v58  ;;  %v1322_v45 = vpop.f32.mrf.mxu3  ;;  %v2443_v63 = vpack.c.b16 %v2441_v50, %v1648_v0 }
 0x11d   : > { %v1323_v49 = vadd.f32 %v1322_v45, %v1308_v38 }
 0x11e   : > { %2610 = vmatpush.bf16.msra.mxu0 %v4104_v5 }
 0x11f   : > { %2624 = vmatpush.bf16.msra.mxu1 %v4168_v44  ;;  %2638 = vmatpush.bf16.msra.mxu2 %v4108_v8  ;;  %v6416_v58 = vadd.f32 %v1323_v49, %v6231_v6 }
 0x120   : > { %2652 = vmatpush.bf16.msra.mxu3 %v4172_v11 }
 0x122   : > { %2611 = vmatpush.bf16.msra.mxu0 %v4096_v53 }
 0x123   : > { %2625 = vmatpush.bf16.msra.mxu1 %v4160_v20  ;;  %2639 = vmatpush.bf16.msra.mxu2 %v4100_v21 }
 0x124   : > { %2653 = vmatpush.bf16.msra.mxu3 %v4164_v25 }
 0x126   : > { %2612 = vmatpush.bf16.msra.mxu0 %v4088_v31 }
 0x127   : > { %2626 = vmatpush.bf16.msra.mxu1 %v4152_v34  ;;  %2640 = vmatpush.bf16.msra.mxu2 %v4092_v19 }
 0x128   : > { %2654 = vmatpush.bf16.msra.mxu3 %v4156_v37 }
 0x12a   : > { %2613 = vmatpush.bf16.msra.mxu0 %v4080_v16  ;;  %v1555_v3 = vpop.f32.mrf.mxu0 }
 0x12b   : > { %2627 = vmatpush.bf16.msra.mxu1 %v4144_v51  ;;  %2641 = vmatpush.bf16.msra.mxu2 %v4084_v55  ;;  %v1569_v4 = vpop.f32.mrf.mxu1 }
 0x12c   : > { %2655 = vmatpush.bf16.msra.mxu3 %v4148_v59  ;;  %v1570_v25 = vadd.f32 %v1569_v4, %v1555_v3 }
 0x12d   : > { %2614 = vmatmul.bf16.vlgmr.msra.gmra.mxu0 %v2442_v61 }
 0x12e   : > { %2628 = vmatmul.bf16.vlgmr.msra.gmra.mxu1 %v2443_v63  ;;  %2642 = vmatmul.bf16.vlgmr.msra.gmra.mxu2 %v2442_v61  ;;  %v1602_v27 = vadd.f32 %v1570_v25, %v6328_v2  ;;  %v2666_v2 = vld [vmem:[%s6440_s4] sm:$0x3] }
 0x12f   : > { %2656 = vmatmul.bf16.vlgmr.msra.gmra.mxu3 %v2443_v63  ;;  %v2668_v55 = vperm.slane %v2666_v2, 0 }
 0x132   : > { %v1557_v44 = vpop.f32.mrf.mxu0 }
 0x133   : > { %v1583_v5 = vpop.f32.mrf.mxu2  ;;  %v1571_v8 = vpop.f32.mrf.mxu1 }
 0x134   : > { %v1597_v6 = vpop.f32.mrf.mxu3  ;;  %v1572_v36 = vadd.f32 %v1571_v8, %v1557_v44  ;;  %v2669_v44 = vperm.slane %v2666_v2, 1 }
 0x135   : > { %v1598_v28 = vadd.f32 %v1597_v6, %v1583_v5 }
 0x136   : > { %v1604_v48 = vadd.f32 %v1572_v36, %v6382_v13 }
 0x137   : > { %v1603_v37 = vadd.f32 %v1598_v28, %v6370_v23 }
 0x13b   : > { %v1585_v9 = vpop.f32.mrf.mxu2 }
 0x13c   : > { %v1599_v60 = vpop.f32.mrf.mxu3 }
 0x13d   : > { %v1600_v49 = vadd.f32 %v1599_v60, %v1585_v9 }
 0x14a   : > { %v1832_v57 = vpop.f32.mrf.mxu0 }
 0x14b   : > { %v1846_v10 = vpop.f32.mrf.mxu1 }
 0x14c   : > { %v1847_v26 = vadd.f32 %v1846_v10, %v1832_v57  ;;  %v1605_v57 = vadd.f32 %v1600_v49, %v6416_v58 }
 0x14e   : > { %v1879_v34 = vadd.f32 %v1847_v26, %v1602_v27 }
 0x152   : > { %v1834_v0 = vpop.f32.mrf.mxu0 }
 0x153   : > { %v1860_v11 = vpop.f32.mrf.mxu2  ;;  %v1848_v12 = vpop.f32.mrf.mxu1 }
 0x154   : > { %v1874_v39 = vpop.f32.mrf.mxu3  ;;  %v1849_v54 = vadd.f32 %v1848_v12, %v1834_v0 }
 0x155   : > { %v1875_v19 = vadd.f32 %v1874_v39, %v1860_v11 }
 0x156   : > { %v1881_v23 = vadd.f32 %v1849_v54, %v1604_v48 }
 0x157   : > { %v1880_v45 = vadd.f32 %v1875_v19, %v1603_v37 }
 0x15b   : > { %v1862_v33 = vpop.f32.mrf.mxu2 }
 0x15c   : > { %v1876_v14 = vpop.f32.mrf.mxu3 }
 0x15d   : > { %v1877_v61 = vadd.f32 %v1876_v14, %v1862_v33 }
 0x15f   : > { %v1882_v39 = vadd.f32 %v1877_v61, %v1605_v57 }
 0x16a   : > { %v2093_v1 = vpop.f32.mrf.mxu0 }
 0x16b   : > { %v2107_v52 = vpop.f32.mrf.mxu1 }
 0x16c   : > { %v2108_v24 = vadd.f32 %v2107_v52, %v2093_v1 }
 0x16e   : > { %v2140_v38 = vadd.f32 %v2108_v24, %v1879_v34 }
 0x172   : > { %v2095_v41 = vpop.f32.mrf.mxu0 }
 0x173   : > { %v2121_v15 = vpop.f32.mrf.mxu2  ;;  %v2109_v18 = vpop.f32.mrf.mxu1 }
 0x174   : > { %v2135_v17 = vpop.f32.mrf.mxu3  ;;  %v2110_v16 = vadd.f32 %v2109_v18, %v2095_v41 }
 0x175   : > { %v2136_v40 = vadd.f32 %v2135_v17, %v2121_v15 }
 0x176   : > { %v2142_v10 = vadd.f32 %v2110_v16, %v1881_v23 }
 0x177   : > { %v2141_v50 = vadd.f32 %v2136_v40, %v1880_v45 }
 0x17b   : > { %v2123_v56 = vpop.f32.mrf.mxu2 }
 0x17c   : > { %v2137_v53 = vpop.f32.mrf.mxu3 }
 0x17d   : > { %v2138_v13 = vadd.f32 %v2137_v53, %v2123_v56 }
 0x17f   : > { %v2143_v14 = vadd.f32 %v2138_v13, %v1882_v39 }
 0x18a   : > { %v2354_v7 = vpop.f32.mrf.mxu0 }
 0x18b   : > { %v2368_v20 = vpop.f32.mrf.mxu1 }
 0x18c   : > { %v2369_v29 = vadd.f32 %v2368_v20, %v2354_v7 }
 0x18e   : > { %v2401_v46 = vadd.f32 %v2369_v29, %v2140_v38 }
 0x192   : > { %v2356_v62 = vpop.f32.mrf.mxu0 }
 0x193   : > { %v2382_v21 = vpop.f32.mrf.mxu2  ;;  %v2370_v22 = vpop.f32.mrf.mxu1 }
 0x194   : > { %v2396_v43 = vpop.f32.mrf.mxu3  ;;  %v2371_v5 = vadd.f32 %v2370_v22, %v2356_v62 }
 0x195   : > { %v2397_v47 = vadd.f32 %v2396_v43, %v2382_v21 }
 0x196   : > { %v2403_v0 = vadd.f32 %v2371_v5, %v2142_v10 }
 0x197   : > { %v2402_v4 = vadd.f32 %v2397_v47, %v2141_v50 }
 0x19b   : > { %v2384_v30 = vpop.f32.mrf.mxu2 }
 0x19c   : > { %v2398_v31 = vpop.f32.mrf.mxu3 }
 0x19d   : > { %v2399_v12 = vadd.f32 %v2398_v31, %v2384_v30 }
 0x19f   : > { %v2404_v41 = vadd.f32 %v2399_v12, %v2143_v14 }
 0x1aa   : > { %v2615_v32 = vpop.f32.mrf.mxu0 }
 0x1ab   : > { %v2629_v35 = vpop.f32.mrf.mxu1 }
 0x1ac   : > { %v2630_v42 = vadd.f32 %v2629_v35, %v2615_v32 }
 0x1ae   : > { %v2662_v51 = vadd.f32 %v2630_v42, %v2401_v46 }
 0x1b0   : > { %v2672_v9 = vadd.f32 %v2668_v55, %v2662_v51 }
 0x1b1   : > { %v2643_v59 = vpop.f32.mrf.mxu2 }
 0x1b2   : > { %v2657_v63 = vpop.f32.mrf.mxu3  ;;  %v2617_v3 = vpop.f32.mrf.mxu0  ;;  %v2676_v1 = vmax.f32 %v2672_v9, 0.0 }
 0x1b3   : > { %v2658_v6 = vadd.f32 %v2657_v63, %v2643_v59  ;;  %v2631_v8 = vpop.f32.mrf.mxu1 }
 0x1b4   : > { %v2632_v11 = vadd.f32 %v2631_v8, %v2617_v3 }
 0x1b5   : > { %v2663_v60 = vadd.f32 %v2658_v6, %v2402_v4 }
 0x1b6   : > { %v2664_v15 = vadd.f32 %v2632_v11, %v2403_v0 }
 0x1b7   : > { %v2673_v33 = vadd.f32 %v2669_v44, %v2663_v60 }
 0x1b8   : > { %v2674_v53 = vadd.f32 %v2668_v55, %v2664_v15 }
 0x1b9   : > { %v2677_v52 = vmax.f32 %v2673_v33, 0.0  ;;  %v2645_v17 = vpop.f32.mrf.mxu2 }
 0x1ba   : > { %v2659_v58 = vpop.f32.mrf.mxu3  ;;  %v2678_v21 = vmax.f32 %v2674_v53, 0.0 }
 0x1bb   : > { %v2680_v18 = vpack.c.bf16 %v2677_v52, %v2676_v1  ;;  %v2660_v56 = vadd.f32 %v2659_v58, %v2645_v17 }
 0x1bd   : > { %2682 = vst [vmem:[%s264_s15] sm:$0xff] %v2680_v18  ;;  %v2665_v7 = vadd.f32 %v2660_v56, %v2404_v41 }
 0x1bf   : > { %v2675_v20 = vadd.f32 %v2669_v44, %v2665_v7 }
 0x1c1   : > { %v2679_v43 = vmax.f32 %v2675_v20, 0.0 }
 0x1c3   : > { %v2681_v62 = vpack.c.bf16 %v2679_v43, %v2678_v21 }
 0x1c5   : > { %2683 = vst [vmem:[%s264_s15 + $0x8] sm:$0xff] %v2681_v62 }
 0x1c6 PF: > { %s15_s18 = sadd.s32 1, %s4517_s18  }
 0x1c7   : > { %p12_p4 = scmp.ge.s32.totalorder %s15_s18, 6  }
 0x1c9   :  { %14 = sbr.rel (!%p12_p4) target bundleno = 1 (0x1), region = 84 }

</bundles_post_ra>
